<compile_context>
chip_gen: v7x
topology: tpu7x:2x2x1
jax: 0.10.0
libtpu: 0.0.40
codegen_flags: <defaults>
</compile_context>

<pallas_src>
import functools

import numpy as np
import jax
import jax.numpy as jnp
from jax import lax
from jax.experimental import pallas as pl
from jax.experimental.pallas import tpu as pltpu


# Geometry forced by the module (feat_shape = 32*8*8 -> 80x80 inputs):
#   conv1: 8x8 s4 p2 : 80 -> 20
#   conv2: 4x4 s2 p1 : 20 -> 10
#   conv3: 3x3 s1 p1 : 10 -> 10
#   conv4: 3x3 s1 p0 : 10 ->  8
_PG = 12                    # padded-grid pitch (10 valid + 1 zero border per side)
_PGA = _PG * _PG            # 144
_L10 = 9 * _PG + 10         # 118: wide-layout length for a 10x10 output
_L8 = 7 * _PG + 8           # 92 : wide-layout length for an  8x8  output
# stride-2 tap table: kernel index k (0..3) -> (row/col parity, offset in phase grid)
_PH2 = ((1, -1), (0, 0), (1, 0), (0, 1))


# ----------------------------------------------------------------------------
# Fused conv trunk: conv1..conv4 + bias + ReLU + GroupNorm, one sample / step.
# ----------------------------------------------------------------------------
def _trunk_kernel(p1_ref, w1_ref, b1_ref, gn1g_ref, gn1b_ref, pm1_ref, e1_ref,
                  w2_ref, b2_ref, gn2g_ref, gn2b_ref, pm2_ref,
                  w3_ref, b3_ref, gn3g_ref, gn3b_ref, pm3_ref,
                  w4_ref, b4_ref, gn4g_ref, gn4b_ref, pm4_ref,
                  mask10_ref, mask8_ref, e2_ref, e4c_ref,
                  out_ref, *, d1, d2, eps):
    f32 = jnp.float32

    def groupnorm(z, pm, gamma, beta, mask):
        # Lane-reduce first, combine groups on (C,1) columns; the scatter back
        # to channels is folded into the (C,C) one-hot/count matrix `pm`.
        zm = z if mask is None else z * mask
        mean = jnp.dot(pm, jnp.sum(zm, axis=1, keepdims=True),
                       preferred_element_type=f32)                   # (C, 1)
        xc = z - mean
        xm = xc if mask is None else xc * mask
        var = jnp.dot(pm, jnp.sum(xm * xm, axis=1, keepdims=True),
                      preferred_element_type=f32)                    # (C, 1)
        return xc * lax.rsqrt(var + eps) * gamma + beta

    # ---- conv1 (im2col'd on host, phase-major columns) + ReLU + GN ---------
    z1 = jnp.dot(w1_ref[...], p1_ref[0], preferred_element_type=f32)  # (d1,400)
    z1 = jnp.maximum(z1 + b1_ref[...], 0.0)
    a1 = groupnorm(z1, pm1_ref[...], gn1g_ref[...], gn1b_ref[...], None)
    # embed into four zero-bordered 12x12 phase grids -> (d1, 4*144)
    g1 = jnp.dot(a1, e1_ref[...], preferred_element_type=f32)

    # ---- conv2: 4x4, stride 2, pad 1 (phase-decomposed -> stride-1 taps) ---
    z2 = jnp.zeros((d1, _L10), f32)
    for kh in range(4):
        ph, di = _PH2[kh]
        for kw in range(4):
            qw, dj = _PH2[kw]
            off = (2 * ph + qw) * _PGA + (1 + di) * _PG + (1 + dj)
            wt = w2_ref[(kh * 4 + kw) * d1:(kh * 4 + kw + 1) * d1, :]
            z2 = z2 + jnp.dot(wt, g1[:, off:off + _L10],
                              preferred_element_type=f32)
    z2 = jnp.maximum(z2 + b2_ref[...], 0.0)
    mask10 = mask10_ref[...]
    a2 = groupnorm(z2, pm2_ref[...], gn2g_ref[...], gn2b_ref[...], mask10)
    g2 = jnp.dot(a2, e2_ref[...], preferred_element_type=f32)        # (d1,144)

    # ---- conv3: 3x3, stride 1, pad 1 ---------------------------------------
    z3 = jnp.zeros((d2, _L10), f32)
    for kh in range(3):
        for kw in range(3):
            off = kh * _PG + kw
            wt = w3_ref[(kh * 3 + kw) * d2:(kh * 3 + kw + 1) * d2, :]
            z3 = z3 + jnp.dot(wt, g2[:, off:off + _L10],
                              preferred_element_type=f32)
    z3 = jnp.maximum(z3 + b3_ref[...], 0.0)
    a3 = groupnorm(z3, pm3_ref[...], gn3g_ref[...], gn3b_ref[...], mask10)
    g3 = jnp.dot(a3, e2_ref[...], preferred_element_type=f32)        # (d2,144)

    # ---- conv4: 3x3, stride 1, pad 0 ---------------------------------------
    z4 = jnp.zeros((d2, _L8), f32)
    for kh in range(3):
        for kw in range(3):
            off = (kh + 1) * _PG + (kw + 1)
            wt = w4_ref[(kh * 3 + kw) * d2:(kh * 3 + kw + 1) * d2, :]
            z4 = z4 + jnp.dot(wt, g3[:, off:off + _L8],
                              preferred_element_type=f32)
    z4 = jnp.maximum(z4 + b4_ref[...], 0.0)
    a4 = groupnorm(z4, pm4_ref[...], gn4g_ref[...], gn4b_ref[...],
                   mask8_ref[...])
    # compact the valid 8x8 positions -> (d2, 64); row-major over (y, x), so
    # the channel-major flatten outside matches PyTorch's .reshape(-1, C*H*W).
    out_ref[0] = jnp.dot(a4, e4c_ref[...],
                         preferred_element_type=f32).astype(out_ref.dtype)


def trunk_forward(kp, patches, d1, d2):
    """patches: (N, Cin*64, 400) conv1 im2col (phase-major columns).
    Returns (N, d2, 64) = per-sample (channel, 8*8) features."""
    N, K1, _ = patches.shape

    def const_spec(shape):
        nd = len(shape)
        return pl.BlockSpec(shape, lambda n, _nd=nd: (0,) * _nd)

    kernel = functools.partial(_trunk_kernel, d1=d1, d2=d2, eps=1e-5)
    return pl.pallas_call(
        kernel,
        out_shape=jax.ShapeDtypeStruct((N, d2, 64), jnp.float32),
        grid=(N,),
        in_specs=[
            pl.BlockSpec((1, K1, 400), lambda n: (n, 0, 0)),
            const_spec((d1, K1)),
            const_spec((d1, 1)), const_spec((d1, 1)), const_spec((d1, 1)),
            const_spec((d1, d1)),
            const_spec((400, 4 * _PGA)),
            const_spec((16 * d1, d1)),
            const_spec((d1, 1)), const_spec((d1, 1)), const_spec((d1, 1)),
            const_spec((d1, d1)),
            const_spec((9 * d2, d1)),
            const_spec((d2, 1)), const_spec((d2, 1)), const_spec((d2, 1)),
            const_spec((d2, d2)),
            const_spec((9 * d2, d2)),
            const_spec((d2, 1)), const_spec((d2, 1)), const_spec((d2, 1)),
            const_spec((d2, d2)),
            const_spec((1, _L10)), const_spec((1, _L8)),
            const_spec((_L10, _PGA)), const_spec((_L8, 64)),
        ],
        out_specs=pl.BlockSpec((1, d2, 64), lambda n: (n, 0, 0)),
        compiler_params=pltpu.CompilerParams(
            dimension_semantics=("parallel",),
            vmem_limit_bytes=32 * 1024 * 1024),
    )(patches,
      kp['w1'], kp['b1'], kp['gn1_g'], kp['gn1_b'], kp['pm1'], kp['e1'],
      kp['w2'], kp['b2'], kp['gn2_g'], kp['gn2_b'], kp['pm2'],
      kp['w3'], kp['b3'], kp['gn3_g'], kp['gn3_b'], kp['pm3'],
      kp['w4'], kp['b4'], kp['gn4_g'], kp['gn4_b'], kp['pm4'],
      kp['mask10'], kp['mask8'], kp['e2'], kp['e4c'])


# ----------------------------------------------------------------------------
# Fused head: lin_track + GRU (input proj + recurrence) + value head
# ----------------------------------------------------------------------------
def _head_kernel(feats_ref, h0_ref, lw_ref, lb_ref, wih_ref, bih_ref,
                 whh_ref, bhh_ref, h1w_ref, h1b_ref, h2w_ref, h2b_ref,
                 ow_ref, ob_ref, v_ref, hT_ref, xg_ref, *, T, B, dr):
    f32 = jnp.float32
    # lin_track + GRU input projection for all T*B rows at once
    xl = jnp.dot(feats_ref[...], lw_ref[...], preferred_element_type=f32)
    xl = jnp.maximum(xl + lb_ref[...], 0.0)                       # (T*B, dl)
    gx = jnp.dot(xl, wih_ref[...], preferred_element_type=f32) + bih_ref[...]

    whh = whh_ref[...]
    bhh = bhh_ref[...]

    def sigmoid(v):                        # EUP tanh instead of a VPU divide
        return 0.5 * (jnp.tanh(0.5 * v) + 1.0)

    # Serial GRU recurrence, fully unrolled (T is small and static here).
    # TODO(synk): switch to lax.fori_loop + pl.ds row slices for large T.
    h = h0_ref[...]
    for t in range(T):
        gxt = gx[t * B:(t + 1) * B, :]
        gh = jnp.dot(h, whh, preferred_element_type=f32) + bhh
        r = sigmoid(gxt[:, 0:dr] + gh[:, 0:dr])
        z = sigmoid(gxt[:, dr:2 * dr] + gh[:, dr:2 * dr])
        n = jnp.tanh(gxt[:, 2 * dr:3 * dr] + r * gh[:, 2 * dr:3 * dr])
        h = (1.0 - z) * n + z * h
        xg_ref[t * B:(t + 1) * B, :] = h
    hT_ref[...] = h

    # value head on all timesteps at once (out_w zero-padded to 128 lanes for
    # a lane-dense store; the real column is sliced off outside).
    a = jnp.dot(xg_ref[...], h1w_ref[...], preferred_element_type=f32)
    a = jnp.maximum(a + h1b_ref[...], 0.0)
    a = jnp.dot(a, h2w_ref[...], preferred_element_type=f32)
    a = jnp.maximum(a + h2b_ref[...], 0.0)
    v = jnp.dot(a, ow_ref[...], preferred_element_type=f32) + ob_ref[...]
    v_ref[...] = v.astype(v_ref.dtype)


def head_forward(kp, feats, h0, T, B, dr):
    TB = feats.shape[0]
    vspec = pl.BlockSpec(memory_space=pltpu.MemorySpace.VMEM)
    kernel = functools.partial(_head_kernel, T=T, B=B, dr=dr)
    return pl.pallas_call(
        kernel,
        out_shape=(jax.ShapeDtypeStruct((TB, 128), jnp.float32),
                   jax.ShapeDtypeStruct((B, dr), jnp.float32)),
        in_specs=[vspec] * 14,
        out_specs=(vspec, vspec),
        scratch_shapes=[pltpu.VMEM((TB, dr), jnp.float32)],
        compiler_params=pltpu.CompilerParams(
            vmem_limit_bytes=32 * 1024 * 1024),
    )(feats, h0, kp['lin_w'], kp['lin_b'], kp['gru_wih'], kp['gru_bih'],
      kp['gru_whh'], kp['gru_bhh'], kp['h1_w'], kp['h1_b'],
      kp['h2_w'], kp['h2_b'], kp['out_w_pad'], kp['out_b_pad'])


# ----------------------------------------------------------------------------
# Host-side im2col for conv1 only (single fused XLA region, ~1.2 MB).
# ----------------------------------------------------------------------------
def conv1_patches_phase_major(x):
    """im2col for conv1 (8x8, stride 4, pad 2), columns in phase-major
    (p, q, i, j) order where output pixel (y, x) = (2i+p, 2j+q).
    x: (N, C, 80, 80) -> (N, C*64, 400).  K ordered (cin, kh, kw)."""
    N, C, H, W = x.shape
    xp = jnp.pad(x, ((0, 0), (0, 0), (2, 2), (2, 2)))
    OH = (H + 4 - 8) // 4 + 1          # 20
    cols = []
    for kh in range(8):
        for kw in range(8):
            cols.append(xp[:, :, kh:kh + 4 * OH:4, kw:kw + 4 * OH:4])
    pat = jnp.stack(cols, axis=2).reshape(N, C * 64, OH, OH)
    pat = pat.reshape(N, C * 64, OH // 2, 2, OH // 2, 2)       # (N,K,i,p,j,q)
    pat = pat.transpose(0, 1, 3, 5, 2, 4)                      # (N,K,p,q,i,j)
    return pat.reshape(N, C * 64, OH * OH)


# ----------------------------------------------------------------------------
# One-time parameter repack (PyTorch layouts -> kernel layouts + constants).
# ----------------------------------------------------------------------------
def prepare_params(params, settings):
    d1, d2, dl, dr = (settings['d1'], settings['d2'],
                      settings['dl'], settings['dr'])
    assert settings['width'] == 80 and settings['height'] == 80, \
        "feat_shape = 32*8*8 in the module implies 80x80 inputs"
    assert d2 * 64 == 32 * 8 * 8

    p = params
    kp = {}

    def tap_rows(w):                       # (Cout,Cin,KH,KW) -> (KH*KW*Cout, Cin)
        co, ci, kh, kw = w.shape
        return jnp.transpose(w, (2, 3, 0, 1)).reshape(kh * kw * co, ci)

    kp['w1'] = p['conv1_w'].reshape(d1, -1)
    kp['w2'] = tap_rows(p['conv2_w'])
    kp['w3'] = tap_rows(p['conv3_w'])
    kp['w4'] = tap_rows(p['conv4_w'])
    for i, c in enumerate((d1, d1, d2, d2), start=1):
        kp[f'b{i}'] = p[f'conv{i}_b'].reshape(c, 1)
        kp[f'gn{i}_g'] = p[f'gn{i}_g'].reshape(c, 1)
        kp[f'gn{i}_b'] = p[f'gn{i}_b'].reshape(c, 1)

    # GroupNorm group-mean matrices (C,C): one-hot group membership / count
    counts = (400, 100, 100, 64)
    chans = (d1, d1, d2, d2)
    groups = (d1 // 2, d1 // 2, d2 // 2, d2 // 2)
    for i, (c, g, cnt) in enumerate(zip(chans, groups, counts), start=1):
        cg = c // g
        gid = np.arange(c) // cg
        pm = (gid[:, None] == gid[None, :]).astype(np.float32) / float(cg * cnt)
        kp[f'pm{i}'] = jnp.asarray(pm)

    # conv1 output (phase-major 400) -> four zero-bordered 12x12 phase grids
    e1 = np.zeros((400, 4 * _PGA), np.float32)
    for ph in range(2):
        for q in range(2):
            for i in range(10):
                for j in range(10):
                    src = (2 * ph + q) * 100 + i * 10 + j
                    dst = (2 * ph + q) * _PGA + (i + 1) * _PG + (j + 1)
                    e1[src, dst] = 1.0
    kp['e1'] = jnp.asarray(e1)
    # wide 10x10 output -> zero-bordered 12x12 grid (drops garbage columns)
    e2 = np.zeros((_L10, _PGA), np.float32)
    for y in range(10):
        for x in range(10):
            e2[y * _PG + x, (y + 1) * _PG + (x + 1)] = 1.0
    kp['e2'] = jnp.asarray(e2)
    # wide 8x8 output -> compact row-major 64 features
    e4c = np.zeros((_L8, 64), np.float32)
    for y in range(8):
        for x in range(8):
            e4c[y * _PG + x, y * 8 + x] = 1.0
    kp['e4c'] = jnp.asarray(e4c)
    # validity masks for the wide layouts (garbage columns excluded from GN)
    pos10 = np.arange(_L10)
    kp['mask10'] = jnp.asarray(((pos10 % _PG) < 10).astype(np.float32)[None, :])
    pos8 = np.arange(_L8)
    kp['mask8'] = jnp.asarray(((pos8 % _PG) < 8).astype(np.float32)[None, :])

    # head / GRU params
    kp['lin_w'] = p['lin_w'];   kp['lin_b'] = p['lin_b'].reshape(1, -1)
    kp['gru_wih'] = p['gru_wih']; kp['gru_bih'] = p['gru_bih'].reshape(1, -1)
    kp['gru_whh'] = p['gru_whh']; kp['gru_bhh'] = p['gru_bhh'].reshape(1, -1)
    kp['h1_w'] = p['h1_w'];     kp['h1_b'] = p['h1_b'].reshape(1, -1)
    kp['h2_w'] = p['h2_w'];     kp['h2_b'] = p['h2_b'].reshape(1, -1)
    # zero-pad the 64->1 head to 128 output lanes (hoisted out of the forward)
    kp['out_w_pad'] = jnp.pad(p['out_w'],
                              ((0, 0), (0, 128 - p['out_w'].shape[1])))
    kp['out_b_pad'] = jnp.pad(p['out_b'].reshape(1, -1),
                              ((0, 0), (0, 128 - p['out_b'].shape[0])))
    return kp


# ----------------------------------------------------------------------------
# Full CriticIMPALA forward (2 pallas_calls total)
# ----------------------------------------------------------------------------
def pallas_forward(kp, settings, rgb, h_c):
    """rgb: (T, B, C, W, H) (first dim plays input_shape[0] in the PyTorch
    forward); h_c: (1, B, dr).  Returns (values, values, h_new, h_new)."""
    T, B = rgb.shape[0], rgb.shape[1]
    C = settings['channels']
    d1, d2, dl, dr = (settings['d1'], settings['d2'],
                      settings['dl'], settings['dr'])

    x = rgb.reshape(T * B, C, settings['width'], settings['height'])
    patches = conv1_patches_phase_major(x)             # (N, C*64, 400)
    feats = trunk_forward(kp, patches, d1, d2)         # (N, d2, 64)
    feats = feats.reshape(T * B, d2 * 64)              # channel-major flatten

    vpad, hT = head_forward(kp, feats, h_c[0], T, B, dr)
    values = vpad[:, :1].reshape(T, B, 1)
    h_new = hT[None]                                   # (1, B, dr)
    return values, values, h_new, h_new


# ----------------------------------------------------------------------------
# Pure-JAX reference (verification only)
# ----------------------------------------------------------------------------
def _groupnorm_ref(x, groups, gamma, beta, eps=1e-5):
    N, C, H, W = x.shape
    xg = x.reshape(N, groups, C // groups, H, W)
    mean = xg.mean(axis=(2, 3, 4), keepdims=True)
    var = xg.var(axis=(2, 3, 4), keepdims=True)
    xn = ((xg - mean) / jnp.sqrt(var + eps)).reshape(N, C, H, W)
    return xn * gamma[None, :, None, None] + beta[None, :, None, None]


def ref_forward(params, settings, rgb, h_c):
    p = params
    T = rgb.shape[0]
    C, Wd, Ht = settings['channels'], settings['width'], settings['height']
    d1, d2, dl, dr = (settings['d1'], settings['d2'],
                      settings['dl'], settings['dr'])

    def block(x, w, b, s, pad, gamma, beta, g):
        y = lax.conv_general_dilated(x, w, (s, s), [(pad, pad), (pad, pad)],
                                     dimension_numbers=('NCHW', 'OIHW', 'NCHW'))
        y = jnp.maximum(y + b[None, :, None, None], 0.0)
        return _groupnorm_ref(y, g, gamma, beta)

    x = rgb.reshape(-1, C, Wd, Ht)
    x = block(x, p['conv1_w'], p['conv1_b'], 4, 2, p['gn1_g'], p['gn1_b'], d1 // 2)
    x = block(x, p['conv2_w'], p['conv2_b'], 2, 1, p['gn2_g'], p['gn2_b'], d1 // 2)
    x = block(x, p['conv3_w'], p['conv3_b'], 1, 1, p['gn3_g'], p['gn3_b'], d2 // 2)
    x = block(x, p['conv4_w'], p['conv4_b'], 1, 0, p['gn4_g'], p['gn4_b'], d2 // 2)

    feats = x.reshape(x.shape[0], -1)
    xl = jnp.maximum(feats @ p['lin_w'] + p['lin_b'], 0.0)
    xs = xl.reshape(T, -1, dl)

    h = h_c[0]
    ys = []
    for t in range(T):
        gxt = xs[t] @ p['gru_wih'] + p['gru_bih']
        gh = h @ p['gru_whh'] + p['gru_bhh']
        r = jax.nn.sigmoid(gxt[:, 0:dr] + gh[:, 0:dr])
        z = jax.nn.sigmoid(gxt[:, dr:2 * dr] + gh[:, dr:2 * dr])
        n = jnp.tanh(gxt[:, 2 * dr:] + r * gh[:, 2 * dr:])
        h = (1.0 - z) * n + z * h
        ys.append(h)
    xgru = jnp.stack(ys, axis=0)

    a = jnp.maximum(xgru @ p['h1_w'] + p['h1_b'], 0.0)
    a = jnp.maximum(a @ p['h2_w'] + p['h2_b'], 0.0)
    values = a @ p['out_w'] + p['out_b']
    return values, values, h[None], h[None]


# ----------------------------------------------------------------------------
# Deterministic parameter init (PyTorch-style uniform(-1/sqrt(fan_in), +))
# ----------------------------------------------------------------------------
def init_params(key, s):
    keys = iter(jax.random.split(key, 40))

    def u(shape, fan_in):
        b = 1.0 / float(np.sqrt(fan_in))
        return jax.random.uniform(next(keys), shape, jnp.float32, -b, b)

    d1, d2, dl, dr = s['d1'], s['d2'], s['dl'], s['dr']
    C = s['channels']
    feat = d2 * 8 * 8                                   # = 2048 (feat_shape)
    p = {}
    p['conv1_w'] = u((d1, C, 8, 8), C * 64);   p['conv1_b'] = u((d1,), C * 64)
    p['gn1_g'] = 1.0 + 0.1 * u((d1,), 1.0);    p['gn1_b'] = 0.1 * u((d1,), 1.0)
    p['conv2_w'] = u((d1, d1, 4, 4), d1 * 16); p['conv2_b'] = u((d1,), d1 * 16)
    p['gn2_g'] = 1.0 + 0.1 * u((d1,), 1.0);    p['gn2_b'] = 0.1 * u((d1,), 1.0)
    p['conv3_w'] = u((d2, d1, 3, 3), d1 * 9);  p['conv3_b'] = u((d2,), d1 * 9)
    p['gn3_g'] = 1.0 + 0.1 * u((d2,), 1.0);    p['gn3_b'] = 0.1 * u((d2,), 1.0)
    p['conv4_w'] = u((d2, d2, 3, 3), d2 * 9);  p['conv4_b'] = u((d2,), d2 * 9)
    p['gn4_g'] = 1.0 + 0.1 * u((d2,), 1.0);    p['gn4_b'] = 0.1 * u((d2,), 1.0)
    p['lin_w'] = u((feat, dl), feat);          p['lin_b'] = u((dl,), feat)
    p['gru_wih'] = u((dl, 3 * dr), dr);        p['gru_whh'] = u((dr, 3 * dr), dr)
    p['gru_bih'] = u((3 * dr,), dr);           p['gru_bhh'] = u((3 * dr,), dr)
    p['h1_w'] = u((dr, 128), dr);              p['h1_b'] = u((128,), dr)
    p['h2_w'] = u((128, 64), 128);             p['h2_b'] = u((64,), 128)
    p['out_w'] = u((64, 1), 64);               p['out_b'] = u((1,), 64)
    return p


# ----------------------------------------------------------------------------
if __name__ == "__main__":
    # feat_shape = 32*8*8 in the module forces d2=32 and 80x80 inputs.
    settings = {'channels': 3, 'width': 80, 'height': 80,
                'd1': 16, 'd2': 32, 'd3': 64, 'dl': 128, 'dr': 128}
    T, B = 2, 2

    key = jax.random.PRNGKey(0)
    k_rgb, k_h, k_p = jax.random.split(key, 3)
    rgb = jax.random.normal(k_rgb, (T, B, settings['channels'],
                                    settings['width'], settings['height']),
                            jnp.float32)
    h_c = 0.1 * jax.random.normal(k_h, (1, B, settings['dr']), jnp.float32)
    params = init_params(k_p, settings)
    kparams = prepare_params(params, settings)          # one-time repack

    fwd = jax.jit(lambda kp, r, h: pallas_forward(kp, settings, r, h))
    values1, values2, h_new1, h_new2 = fwd(kparams, rgb, h_c)
    jax.block_until_ready((values1, values2, h_new1, h_new2))

    # Verify against a pure-JAX reference of the same math (all-f32 pipeline).
    rv1, rv2, rh1, rh2 = ref_forward(params, settings, rgb, h_c)
    np.testing.assert_allclose(np.asarray(values1), np.asarray(rv1),
                               rtol=1e-3, atol=1e-3)
    np.testing.assert_allclose(np.asarray(values2), np.asarray(rv2),
                               rtol=1e-3, atol=1e-3)
    np.testing.assert_allclose(np.asarray(h_new1), np.asarray(rh1),
                               rtol=1e-3, atol=1e-3)
    np.testing.assert_allclose(np.asarray(h_new2), np.asarray(rh2),
                               rtol=1e-3, atol=1e-3)

    assert values1.shape == (T, B, 1)
    assert values2.shape == (T, B, 1)
    assert h_new1.shape == (1, B, settings['dr'])
    assert h_new2.shape == (1, B, settings['dr'])
    print("KERNEL_OK")
</pallas_src>

<mosaic_0001>
module attributes {stable_mosaic.version = 11 : i64} {
  func.func @_trunk_kernel(%arg0: i32, %arg1: memref<1x192x400xf32, #tpu.memory_space<vmem>>, %arg2: memref<16x192xf32, #tpu.memory_space<vmem>>, %arg3: memref<16x1xf32, #tpu.memory_space<vmem>>, %arg4: memref<16x1xf32, #tpu.memory_space<vmem>>, %arg5: memref<16x1xf32, #tpu.memory_space<vmem>>, %arg6: memref<16x16xf32, #tpu.memory_space<vmem>>, %arg7: memref<400x576xf32, #tpu.memory_space<vmem>>, %arg8: memref<256x16xf32, #tpu.memory_space<vmem>>, %arg9: memref<16x1xf32, #tpu.memory_space<vmem>>, %arg10: memref<16x1xf32, #tpu.memory_space<vmem>>, %arg11: memref<16x1xf32, #tpu.memory_space<vmem>>, %arg12: memref<16x16xf32, #tpu.memory_space<vmem>>, %arg13: memref<288x16xf32, #tpu.memory_space<vmem>>, %arg14: memref<32x1xf32, #tpu.memory_space<vmem>>, %arg15: memref<32x1xf32, #tpu.memory_space<vmem>>, %arg16: memref<32x1xf32, #tpu.memory_space<vmem>>, %arg17: memref<32x32xf32, #tpu.memory_space<vmem>>, %arg18: memref<288x32xf32, #tpu.memory_space<vmem>>, %arg19: memref<32x1xf32, #tpu.memory_space<vmem>>, %arg20: memref<32x1xf32, #tpu.memory_space<vmem>>, %arg21: memref<32x1xf32, #tpu.memory_space<vmem>>, %arg22: memref<32x32xf32, #tpu.memory_space<vmem>>, %arg23: memref<1x118xf32, #tpu.memory_space<vmem>>, %arg24: memref<1x92xf32, #tpu.memory_space<vmem>>, %arg25: memref<118x144xf32, #tpu.memory_space<vmem>>, %arg26: memref<92x64xf32, #tpu.memory_space<vmem>>, %arg27: memref<1x32x64xf32, #tpu.memory_space<vmem>>) attributes {dimension_semantics = [#tpu.dimension_semantics<parallel>], iteration_bounds = array<i64: 4>, scalar_prefetch = 0 : i64, scratch_operands = 0 : i64, tpu.core_type = #tpu.core_type<tc>, window_params = [{transform_indices = @transform_0, window_bounds = array<i64: 1, 192, 400>}, {pipeline_mode = #tpu.pipeline_mode<synchronous>, transform_indices = @transform_1, window_bounds = array<i64: 16, 192>}, {pipeline_mode = #tpu.pipeline_mode<synchronous>, transform_indices = @transform_2, window_bounds = array<i64: 16, 1>}, {pipeline_mode = #tpu.pipeline_mode<synchronous>, transform_indices = @transform_3, window_bounds = array<i64: 16, 1>}, {pipeline_mode = #tpu.pipeline_mode<synchronous>, transform_indices = @transform_4, window_bounds = array<i64: 16, 1>}, {pipeline_mode = #tpu.pipeline_mode<synchronous>, transform_indices = @transform_5, window_bounds = array<i64: 16, 16>}, {pipeline_mode = #tpu.pipeline_mode<synchronous>, transform_indices = @transform_6, window_bounds = array<i64: 400, 576>}, {pipeline_mode = #tpu.pipeline_mode<synchronous>, transform_indices = @transform_7, window_bounds = array<i64: 256, 16>}, {pipeline_mode = #tpu.pipeline_mode<synchronous>, transform_indices = @transform_8, window_bounds = array<i64: 16, 1>}, {pipeline_mode = #tpu.pipeline_mode<synchronous>, transform_indices = @transform_9, window_bounds = array<i64: 16, 1>}, {pipeline_mode = #tpu.pipeline_mode<synchronous>, transform_indices = @transform_10, window_bounds = array<i64: 16, 1>}, {pipeline_mode = #tpu.pipeline_mode<synchronous>, transform_indices = @transform_11, window_bounds = array<i64: 16, 16>}, {pipeline_mode = #tpu.pipeline_mode<synchronous>, transform_indices = @transform_12, window_bounds = array<i64: 288, 16>}, {pipeline_mode = #tpu.pipeline_mode<synchronous>, transform_indices = @transform_13, window_bounds = array<i64: 32, 1>}, {pipeline_mode = #tpu.pipeline_mode<synchronous>, transform_indices = @transform_14, window_bounds = array<i64: 32, 1>}, {pipeline_mode = #tpu.pipeline_mode<synchronous>, transform_indices = @transform_15, window_bounds = array<i64: 32, 1>}, {pipeline_mode = #tpu.pipeline_mode<synchronous>, transform_indices = @transform_16, window_bounds = array<i64: 32, 32>}, {pipeline_mode = #tpu.pipeline_mode<synchronous>, transform_indices = @transform_17, window_bounds = array<i64: 288, 32>}, {pipeline_mode = #tpu.pipeline_mode<synchronous>, transform_indices = @transform_18, window_bounds = array<i64: 32, 1>}, {pipeline_mode = #tpu.pipeline_mode<synchronous>, transform_indices = @transform_19, window_bounds = array<i64: 32, 1>}, {pipeline_mode = #tpu.pipeline_mode<synchronous>, transform_indices = @transform_20, window_bounds = array<i64: 32, 1>}, {pipeline_mode = #tpu.pipeline_mode<synchronous>, transform_indices = @transform_21, window_bounds = array<i64: 32, 32>}, {pipeline_mode = #tpu.pipeline_mode<synchronous>, transform_indices = @transform_22, window_bounds = array<i64: 1, 118>}, {pipeline_mode = #tpu.pipeline_mode<synchronous>, transform_indices = @transform_23, window_bounds = array<i64: 1, 92>}, {pipeline_mode = #tpu.pipeline_mode<synchronous>, transform_indices = @transform_24, window_bounds = array<i64: 118, 144>}, {pipeline_mode = #tpu.pipeline_mode<synchronous>, transform_indices = @transform_25, window_bounds = array<i64: 92, 64>}, {transform_indices = @transform_26, window_bounds = array<i64: 1, 32, 64>}]} {
    %c0 = arith.constant 0 : index
    %c0_0 = arith.constant 0 : index
    %0 = vector.load %arg2[%c0, %c0_0] : memref<16x192xf32, #tpu.memory_space<vmem>>, vector<16x192xf32>
    %c0_1 = arith.constant 0 : index
    %c0_2 = arith.constant 0 : index
    %c0_3 = arith.constant 0 : index
    %1 = vector.load %arg1[%c0_1, %c0_2, %c0_3] : memref<1x192x400xf32, #tpu.memory_space<vmem>>, vector<1x192x400xf32>
    %2 = vector.shape_cast %1 : vector<1x192x400xf32> to vector<192x400xf32>
    %cst = arith.constant dense<0.000000e+00> : vector<16x400xf32>
    %3 = tpu.matmul %0, %2, %cst {dimension_numbers = #tpu.dot_dimension_numbers<[1], [0], [0], [1], [0, 0, 1, 1], [], []>} : vector<16x192xf32>, vector<192x400xf32>, vector<16x400xf32> -> vector<16x400xf32>
    %c0_4 = arith.constant 0 : index
    %c0_5 = arith.constant 0 : index
    %4 = vector.load %arg3[%c0_4, %c0_5] : memref<16x1xf32, #tpu.memory_space<vmem>>, vector<16x1xf32>
    %5 = vector.broadcast %4 : vector<16x1xf32> to vector<16x400xf32>
    %6 = arith.addf %3, %5 : vector<16x400xf32>
    %cst_6 = arith.constant 0.000000e+00 : f32
    %7 = vector.broadcast %cst_6 : f32 to vector<16x400xf32>
    %8 = arith.maximumf %6, %7 : vector<16x400xf32>
    %c0_7 = arith.constant 0 : index
    %c0_8 = arith.constant 0 : index
    %9 = vector.load %arg6[%c0_7, %c0_8] : memref<16x16xf32, #tpu.memory_space<vmem>>, vector<16x16xf32>
    %c0_9 = arith.constant 0 : index
    %c0_10 = arith.constant 0 : index
    %10 = vector.load %arg4[%c0_9, %c0_10] : memref<16x1xf32, #tpu.memory_space<vmem>>, vector<16x1xf32>
    %c0_11 = arith.constant 0 : index
    %c0_12 = arith.constant 0 : index
    %11 = vector.load %arg5[%c0_11, %c0_12] : memref<16x1xf32, #tpu.memory_space<vmem>>, vector<16x1xf32>
    %cst_13 = arith.constant dense<0.000000e+00> : vector<16xf32>
    %12 = vector.multi_reduction <add>, %8, %cst_13 [1] : vector<16x400xf32> to vector<16xf32>
    %13 = vector.shape_cast %12 : vector<16xf32> to vector<16x1xf32>
    %cst_14 = arith.constant dense<0.000000e+00> : vector<16x1xf32>
    %14 = tpu.matmul %9, %13, %cst_14 {dimension_numbers = #tpu.dot_dimension_numbers<[1], [0], [0], [1], [0, 0, 1, 1], [], []>} : vector<16x16xf32>, vector<16x1xf32>, vector<16x1xf32> -> vector<16x1xf32>
    %15 = vector.broadcast %14 : vector<16x1xf32> to vector<16x400xf32>
    %16 = arith.subf %8, %15 : vector<16x400xf32>
    %17 = arith.mulf %16, %16 : vector<16x400xf32>
    %cst_15 = arith.constant dense<0.000000e+00> : vector<16xf32>
    %18 = vector.multi_reduction <add>, %17, %cst_15 [1] : vector<16x400xf32> to vector<16xf32>
    %19 = vector.shape_cast %18 : vector<16xf32> to vector<16x1xf32>
    %cst_16 = arith.constant dense<0.000000e+00> : vector<16x1xf32>
    %20 = tpu.matmul %9, %19, %cst_16 {dimension_numbers = #tpu.dot_dimension_numbers<[1], [0], [0], [1], [0, 0, 1, 1], [], []>} : vector<16x16xf32>, vector<16x1xf32>, vector<16x1xf32> -> vector<16x1xf32>
    %cst_17 = arith.constant 9.99999974E-6 : f32
    %21 = vector.broadcast %cst_17 : f32 to vector<16x1xf32>
    %22 = arith.addf %20, %21 : vector<16x1xf32>
    %23 = math.rsqrt %22 : vector<16x1xf32>
    %24 = vector.broadcast %23 : vector<16x1xf32> to vector<16x400xf32>
    %25 = arith.mulf %16, %24 : vector<16x400xf32>
    %26 = vector.broadcast %10 : vector<16x1xf32> to vector<16x400xf32>
    %27 = arith.mulf %25, %26 : vector<16x400xf32>
    %28 = vector.broadcast %11 : vector<16x1xf32> to vector<16x400xf32>
    %29 = arith.addf %27, %28 : vector<16x400xf32>
    %c0_18 = arith.constant 0 : index
    %c0_19 = arith.constant 0 : index
    %30 = vector.load %arg7[%c0_18, %c0_19] : memref<400x576xf32, #tpu.memory_space<vmem>>, vector<400x576xf32>
    %cst_20 = arith.constant dense<0.000000e+00> : vector<16x576xf32>
    %31 = tpu.matmul %29, %30, %cst_20 {dimension_numbers = #tpu.dot_dimension_numbers<[1], [0], [0], [1], [0, 0, 1, 1], [], []>} : vector<16x400xf32>, vector<400x576xf32>, vector<16x576xf32> -> vector<16x576xf32>
    %cst_21 = arith.constant 0.000000e+00 : f32
    %32 = vector.broadcast %cst_21 : f32 to vector<16x118xf32>
    %c0_22 = arith.constant 0 : index
    %c0_23 = arith.constant 0 : index
    %33 = vector.load %arg8[%c0_22, %c0_23] : memref<256x16xf32, #tpu.memory_space<vmem>>, vector<16x16xf32>
    %34 = vector.extract_strided_slice %31 {offsets = [0, 432], sizes = [16, 118], strides = [1, 1]} : vector<16x576xf32> to vector<16x118xf32>
    %cst_24 = arith.constant dense<0.000000e+00> : vector<16x118xf32>
    %35 = tpu.matmul %33, %34, %cst_24 {dimension_numbers = #tpu.dot_dimension_numbers<[1], [0], [0], [1], [0, 0, 1, 1], [], []>} : vector<16x16xf32>, vector<16x118xf32>, vector<16x118xf32> -> vector<16x118xf32>
    %36 = arith.addf %32, %35 : vector<16x118xf32>
    %c16 = arith.constant 16 : index
    %c0_25 = arith.constant 0 : index
    %37 = vector.load %arg8[%c16, %c0_25] : memref<256x16xf32, #tpu.memory_space<vmem>>, vector<16x16xf32>
    %38 = vector.extract_strided_slice %31 {offsets = [0, 289], sizes = [16, 118], strides = [1, 1]} : vector<16x576xf32> to vector<16x118xf32>
    %cst_26 = arith.constant dense<0.000000e+00> : vector<16x118xf32>
    %39 = tpu.matmul %37, %38, %cst_26 {dimension_numbers = #tpu.dot_dimension_numbers<[1], [0], [0], [1], [0, 0, 1, 1], [], []>} : vector<16x16xf32>, vector<16x118xf32>, vector<16x118xf32> -> vector<16x118xf32>
    %40 = arith.addf %36, %39 : vector<16x118xf32>
    %c32 = arith.constant 32 : index
    %c0_27 = arith.constant 0 : index
    %41 = vector.load %arg8[%c32, %c0_27] : memref<256x16xf32, #tpu.memory_space<vmem>>, vector<16x16xf32>
    %42 = vector.extract_strided_slice %31 {offsets = [0, 433], sizes = [16, 118], strides = [1, 1]} : vector<16x576xf32> to vector<16x118xf32>
    %cst_28 = arith.constant dense<0.000000e+00> : vector<16x118xf32>
    %43 = tpu.matmul %41, %42, %cst_28 {dimension_numbers = #tpu.dot_dimension_numbers<[1], [0], [0], [1], [0, 0, 1, 1], [], []>} : vector<16x16xf32>, vector<16x118xf32>, vector<16x118xf32> -> vector<16x118xf32>
    %44 = arith.addf %40, %43 : vector<16x118xf32>
    %c48 = arith.constant 48 : index
    %c0_29 = arith.constant 0 : index
    %45 = vector.load %arg8[%c48, %c0_29] : memref<256x16xf32, #tpu.memory_space<vmem>>, vector<16x16xf32>
    %46 = vector.extract_strided_slice %31 {offsets = [0, 290], sizes = [16, 118], strides = [1, 1]} : vector<16x576xf32> to vector<16x118xf32>
    %cst_30 = arith.constant dense<0.000000e+00> : vector<16x118xf32>
    %47 = tpu.matmul %45, %46, %cst_30 {dimension_numbers = #tpu.dot_dimension_numbers<[1], [0], [0], [1], [0, 0, 1, 1], [], []>} : vector<16x16xf32>, vector<16x118xf32>, vector<16x118xf32> -> vector<16x118xf32>
    %48 = arith.addf %44, %47 : vector<16x118xf32>
    %c64 = arith.constant 64 : index
    %c0_31 = arith.constant 0 : index
    %49 = vector.load %arg8[%c64, %c0_31] : memref<256x16xf32, #tpu.memory_space<vmem>>, vector<16x16xf32>
    %50 = vector.extract_strided_slice %31 {offsets = [0, 156], sizes = [16, 118], strides = [1, 1]} : vector<16x576xf32> to vector<16x118xf32>
    %cst_32 = arith.constant dense<0.000000e+00> : vector<16x118xf32>
    %51 = tpu.matmul %49, %50, %cst_32 {dimension_numbers = #tpu.dot_dimension_numbers<[1], [0], [0], [1], [0, 0, 1, 1], [], []>} : vector<16x16xf32>, vector<16x118xf32>, vector<16x118xf32> -> vector<16x118xf32>
    %52 = arith.addf %48, %51 : vector<16x118xf32>
    %c80 = arith.constant 80 : index
    %c0_33 = arith.constant 0 : index
    %53 = vector.load %arg8[%c80, %c0_33] : memref<256x16xf32, #tpu.memory_space<vmem>>, vector<16x16xf32>
    %54 = vector.extract_strided_slice %31 {offsets = [0, 13], sizes = [16, 118], strides = [1, 1]} : vector<16x576xf32> to vector<16x118xf32>
    %cst_34 = arith.constant dense<0.000000e+00> : vector<16x118xf32>
    %55 = tpu.matmul %53, %54, %cst_34 {dimension_numbers = #tpu.dot_dimension_numbers<[1], [0], [0], [1], [0, 0, 1, 1], [], []>} : vector<16x16xf32>, vector<16x118xf32>, vector<16x118xf32> -> vector<16x118xf32>
    %56 = arith.addf %52, %55 : vector<16x118xf32>
    %c96 = arith.constant 96 : index
    %c0_35 = arith.constant 0 : index
    %57 = vector.load %arg8[%c96, %c0_35] : memref<256x16xf32, #tpu.memory_space<vmem>>, vector<16x16xf32>
    %58 = vector.extract_strided_slice %31 {offsets = [0, 157], sizes = [16, 118], strides = [1, 1]} : vector<16x576xf32> to vector<16x118xf32>
    %cst_36 = arith.constant dense<0.000000e+00> : vector<16x118xf32>
    %59 = tpu.matmul %57, %58, %cst_36 {dimension_numbers = #tpu.dot_dimension_numbers<[1], [0], [0], [1], [0, 0, 1, 1], [], []>} : vector<16x16xf32>, vector<16x118xf32>, vector<16x118xf32> -> vector<16x118xf32>
    %60 = arith.addf %56, %59 : vector<16x118xf32>
    %c112 = arith.constant 112 : index
    %c0_37 = arith.constant 0 : index
    %61 = vector.load %arg8[%c112, %c0_37] : memref<256x16xf32, #tpu.memory_space<vmem>>, vector<16x16xf32>
    %62 = vector.extract_strided_slice %31 {offsets = [0, 14], sizes = [16, 118], strides = [1, 1]} : vector<16x576xf32> to vector<16x118xf32>
    %cst_38 = arith.constant dense<0.000000e+00> : vector<16x118xf32>
    %63 = tpu.matmul %61, %62, %cst_38 {dimension_numbers = #tpu.dot_dimension_numbers<[1], [0], [0], [1], [0, 0, 1, 1], [], []>} : vector<16x16xf32>, vector<16x118xf32>, vector<16x118xf32> -> vector<16x118xf32>
    %64 = arith.addf %60, %63 : vector<16x118xf32>
    %c128 = arith.constant 128 : index
    %c0_39 = arith.constant 0 : index
    %65 = vector.load %arg8[%c128, %c0_39] : memref<256x16xf32, #tpu.memory_space<vmem>>, vector<16x16xf32>
    %66 = vector.extract_strided_slice %31 {offsets = [0, 444], sizes = [16, 118], strides = [1, 1]} : vector<16x576xf32> to vector<16x118xf32>
    %cst_40 = arith.constant dense<0.000000e+00> : vector<16x118xf32>
    %67 = tpu.matmul %65, %66, %cst_40 {dimension_numbers = #tpu.dot_dimension_numbers<[1], [0], [0], [1], [0, 0, 1, 1], [], []>} : vector<16x16xf32>, vector<16x118xf32>, vector<16x118xf32> -> vector<16x118xf32>
    %68 = arith.addf %64, %67 : vector<16x118xf32>
    %c144 = arith.constant 144 : index
    %c0_41 = arith.constant 0 : index
    %69 = vector.load %arg8[%c144, %c0_41] : memref<256x16xf32, #tpu.memory_space<vmem>>, vector<16x16xf32>
    %70 = vector.extract_strided_slice %31 {offsets = [0, 301], sizes = [16, 118], strides = [1, 1]} : vector<16x576xf32> to vector<16x118xf32>
    %cst_42 = arith.constant dense<0.000000e+00> : vector<16x118xf32>
    %71 = tpu.matmul %69, %70, %cst_42 {dimension_numbers = #tpu.dot_dimension_numbers<[1], [0], [0], [1], [0, 0, 1, 1], [], []>} : vector<16x16xf32>, vector<16x118xf32>, vector<16x118xf32> -> vector<16x118xf32>
    %72 = arith.addf %68, %71 : vector<16x118xf32>
    %c160 = arith.constant 160 : index
    %c0_43 = arith.constant 0 : index
    %73 = vector.load %arg8[%c160, %c0_43] : memref<256x16xf32, #tpu.memory_space<vmem>>, vector<16x16xf32>
    %74 = vector.extract_strided_slice %31 {offsets = [0, 445], sizes = [16, 118], strides = [1, 1]} : vector<16x576xf32> to vector<16x118xf32>
    %cst_44 = arith.constant dense<0.000000e+00> : vector<16x118xf32>
    %75 = tpu.matmul %73, %74, %cst_44 {dimension_numbers = #tpu.dot_dimension_numbers<[1], [0], [0], [1], [0, 0, 1, 1], [], []>} : vector<16x16xf32>, vector<16x118xf32>, vector<16x118xf32> -> vector<16x118xf32>
    %76 = arith.addf %72, %75 : vector<16x118xf32>
    %c176 = arith.constant 176 : index
    %c0_45 = arith.constant 0 : index
    %77 = vector.load %arg8[%c176, %c0_45] : memref<256x16xf32, #tpu.memory_space<vmem>>, vector<16x16xf32>
    %78 = vector.extract_strided_slice %31 {offsets = [0, 302], sizes = [16, 118], strides = [1, 1]} : vector<16x576xf32> to vector<16x118xf32>
    %cst_46 = arith.constant dense<0.000000e+00> : vector<16x118xf32>
    %79 = tpu.matmul %77, %78, %cst_46 {dimension_numbers = #tpu.dot_dimension_numbers<[1], [0], [0], [1], [0, 0, 1, 1], [], []>} : vector<16x16xf32>, vector<16x118xf32>, vector<16x118xf32> -> vector<16x118xf32>
    %80 = arith.addf %76, %79 : vector<16x118xf32>
    %c192 = arith.constant 192 : index
    %c0_47 = arith.constant 0 : index
    %81 = vector.load %arg8[%c192, %c0_47] : memref<256x16xf32, #tpu.memory_space<vmem>>, vector<16x16xf32>
    %82 = vector.extract_strided_slice %31 {offsets = [0, 168], sizes = [16, 118], strides = [1, 1]} : vector<16x576xf32> to vector<16x118xf32>
    %cst_48 = arith.constant dense<0.000000e+00> : vector<16x118xf32>
    %83 = tpu.matmul %81, %82, %cst_48 {dimension_numbers = #tpu.dot_dimension_numbers<[1], [0], [0], [1], [0, 0, 1, 1], [], []>} : vector<16x16xf32>, vector<16x118xf32>, vector<16x118xf32> -> vector<16x118xf32>
    %84 = arith.addf %80, %83 : vector<16x118xf32>
    %c208 = arith.constant 208 : index
    %c0_49 = arith.constant 0 : index
    %85 = vector.load %arg8[%c208, %c0_49] : memref<256x16xf32, #tpu.memory_space<vmem>>, vector<16x16xf32>
    %86 = vector.extract_strided_slice %31 {offsets = [0, 25], sizes = [16, 118], strides = [1, 1]} : vector<16x576xf32> to vector<16x118xf32>
    %cst_50 = arith.constant dense<0.000000e+00> : vector<16x118xf32>
    %87 = tpu.matmul %85, %86, %cst_50 {dimension_numbers = #tpu.dot_dimension_numbers<[1], [0], [0], [1], [0, 0, 1, 1], [], []>} : vector<16x16xf32>, vector<16x118xf32>, vector<16x118xf32> -> vector<16x118xf32>
    %88 = arith.addf %84, %87 : vector<16x118xf32>
    %c224 = arith.constant 224 : index
    %c0_51 = arith.constant 0 : index
    %89 = vector.load %arg8[%c224, %c0_51] : memref<256x16xf32, #tpu.memory_space<vmem>>, vector<16x16xf32>
    %90 = vector.extract_strided_slice %31 {offsets = [0, 169], sizes = [16, 118], strides = [1, 1]} : vector<16x576xf32> to vector<16x118xf32>
    %cst_52 = arith.constant dense<0.000000e+00> : vector<16x118xf32>
    %91 = tpu.matmul %89, %90, %cst_52 {dimension_numbers = #tpu.dot_dimension_numbers<[1], [0], [0], [1], [0, 0, 1, 1], [], []>} : vector<16x16xf32>, vector<16x118xf32>, vector<16x118xf32> -> vector<16x118xf32>
    %92 = arith.addf %88, %91 : vector<16x118xf32>
    %c240 = arith.constant 240 : index
    %c0_53 = arith.constant 0 : index
    %93 = vector.load %arg8[%c240, %c0_53] : memref<256x16xf32, #tpu.memory_space<vmem>>, vector<16x16xf32>
    %94 = vector.extract_strided_slice %31 {offsets = [0, 26], sizes = [16, 118], strides = [1, 1]} : vector<16x576xf32> to vector<16x118xf32>
    %cst_54 = arith.constant dense<0.000000e+00> : vector<16x118xf32>
    %95 = tpu.matmul %93, %94, %cst_54 {dimension_numbers = #tpu.dot_dimension_numbers<[1], [0], [0], [1], [0, 0, 1, 1], [], []>} : vector<16x16xf32>, vector<16x118xf32>, vector<16x118xf32> -> vector<16x118xf32>
    %96 = arith.addf %92, %95 : vector<16x118xf32>
    %c0_55 = arith.constant 0 : index
    %c0_56 = arith.constant 0 : index
    %97 = vector.load %arg9[%c0_55, %c0_56] : memref<16x1xf32, #tpu.memory_space<vmem>>, vector<16x1xf32>
    %98 = vector.broadcast %97 : vector<16x1xf32> to vector<16x118xf32>
    %99 = arith.addf %96, %98 : vector<16x118xf32>
    %cst_57 = arith.constant 0.000000e+00 : f32
    %100 = vector.broadcast %cst_57 : f32 to vector<16x118xf32>
    %101 = arith.maximumf %99, %100 : vector<16x118xf32>
    %c0_58 = arith.constant 0 : index
    %c0_59 = arith.constant 0 : index
    %102 = vector.load %arg23[%c0_58, %c0_59] : memref<1x118xf32, #tpu.memory_space<vmem>>, vector<1x118xf32>
    %c0_60 = arith.constant 0 : index
    %c0_61 = arith.constant 0 : index
    %103 = vector.load %arg12[%c0_60, %c0_61] : memref<16x16xf32, #tpu.memory_space<vmem>>, vector<16x16xf32>
    %c0_62 = arith.constant 0 : index
    %c0_63 = arith.constant 0 : index
    %104 = vector.load %arg10[%c0_62, %c0_63] : memref<16x1xf32, #tpu.memory_space<vmem>>, vector<16x1xf32>
    %c0_64 = arith.constant 0 : index
    %c0_65 = arith.constant 0 : index
    %105 = vector.load %arg11[%c0_64, %c0_65] : memref<16x1xf32, #tpu.memory_space<vmem>>, vector<16x1xf32>
    %106 = vector.broadcast %102 : vector<1x118xf32> to vector<16x118xf32>
    %107 = arith.mulf %101, %106 : vector<16x118xf32>
    %cst_66 = arith.constant dense<0.000000e+00> : vector<16xf32>
    %108 = vector.multi_reduction <add>, %107, %cst_66 [1] : vector<16x118xf32> to vector<16xf32>
    %109 = vector.shape_cast %108 : vector<16xf32> to vector<16x1xf32>
    %cst_67 = arith.constant dense<0.000000e+00> : vector<16x1xf32>
    %110 = tpu.matmul %103, %109, %cst_67 {dimension_numbers = #tpu.dot_dimension_numbers<[1], [0], [0], [1], [0, 0, 1, 1], [], []>} : vector<16x16xf32>, vector<16x1xf32>, vector<16x1xf32> -> vector<16x1xf32>
    %111 = vector.broadcast %110 : vector<16x1xf32> to vector<16x118xf32>
    %112 = arith.subf %101, %111 : vector<16x118xf32>
    %113 = vector.broadcast %102 : vector<1x118xf32> to vector<16x118xf32>
    %114 = arith.mulf %112, %113 : vector<16x118xf32>
    %115 = arith.mulf %114, %114 : vector<16x118xf32>
    %cst_68 = arith.constant dense<0.000000e+00> : vector<16xf32>
    %116 = vector.multi_reduction <add>, %115, %cst_68 [1] : vector<16x118xf32> to vector<16xf32>
    %117 = vector.shape_cast %116 : vector<16xf32> to vector<16x1xf32>
    %cst_69 = arith.constant dense<0.000000e+00> : vector<16x1xf32>
    %118 = tpu.matmul %103, %117, %cst_69 {dimension_numbers = #tpu.dot_dimension_numbers<[1], [0], [0], [1], [0, 0, 1, 1], [], []>} : vector<16x16xf32>, vector<16x1xf32>, vector<16x1xf32> -> vector<16x1xf32>
    %cst_70 = arith.constant 9.99999974E-6 : f32
    %119 = vector.broadcast %cst_70 : f32 to vector<16x1xf32>
    %120 = arith.addf %118, %119 : vector<16x1xf32>
    %121 = math.rsqrt %120 : vector<16x1xf32>
    %122 = vector.broadcast %121 : vector<16x1xf32> to vector<16x118xf32>
    %123 = arith.mulf %112, %122 : vector<16x118xf32>
    %124 = vector.broadcast %104 : vector<16x1xf32> to vector<16x118xf32>
    %125 = arith.mulf %123, %124 : vector<16x118xf32>
    %126 = vector.broadcast %105 : vector<16x1xf32> to vector<16x118xf32>
    %127 = arith.addf %125, %126 : vector<16x118xf32>
    %c0_71 = arith.constant 0 : index
    %c0_72 = arith.constant 0 : index
    %128 = vector.load %arg25[%c0_71, %c0_72] : memref<118x144xf32, #tpu.memory_space<vmem>>, vector<118x144xf32>
    %cst_73 = arith.constant dense<0.000000e+00> : vector<16x144xf32>
    %129 = tpu.matmul %127, %128, %cst_73 {dimension_numbers = #tpu.dot_dimension_numbers<[1], [0], [0], [1], [0, 0, 1, 1], [], []>} : vector<16x118xf32>, vector<118x144xf32>, vector<16x144xf32> -> vector<16x144xf32>
    %cst_74 = arith.constant 0.000000e+00 : f32
    %130 = vector.broadcast %cst_74 : f32 to vector<32x118xf32>
    %c0_75 = arith.constant 0 : index
    %c0_76 = arith.constant 0 : index
    %131 = vector.load %arg13[%c0_75, %c0_76] : memref<288x16xf32, #tpu.memory_space<vmem>>, vector<32x16xf32>
    %132 = vector.extract_strided_slice %129 {offsets = [0, 0], sizes = [16, 118], strides = [1, 1]} : vector<16x144xf32> to vector<16x118xf32>
    %cst_77 = arith.constant dense<0.000000e+00> : vector<32x118xf32>
    %133 = tpu.matmul %131, %132, %cst_77 {dimension_numbers = #tpu.dot_dimension_numbers<[1], [0], [0], [1], [0, 0, 1, 1], [], []>} : vector<32x16xf32>, vector<16x118xf32>, vector<32x118xf32> -> vector<32x118xf32>
    %134 = arith.addf %130, %133 : vector<32x118xf32>
    %c32_78 = arith.constant 32 : index
    %c0_79 = arith.constant 0 : index
    %135 = vector.load %arg13[%c32_78, %c0_79] : memref<288x16xf32, #tpu.memory_space<vmem>>, vector<32x16xf32>
    %136 = vector.extract_strided_slice %129 {offsets = [0, 1], sizes = [16, 118], strides = [1, 1]} : vector<16x144xf32> to vector<16x118xf32>
    %cst_80 = arith.constant dense<0.000000e+00> : vector<32x118xf32>
    %137 = tpu.matmul %135, %136, %cst_80 {dimension_numbers = #tpu.dot_dimension_numbers<[1], [0], [0], [1], [0, 0, 1, 1], [], []>} : vector<32x16xf32>, vector<16x118xf32>, vector<32x118xf32> -> vector<32x118xf32>
    %138 = arith.addf %134, %137 : vector<32x118xf32>
    %c64_81 = arith.constant 64 : index
    %c0_82 = arith.constant 0 : index
    %139 = vector.load %arg13[%c64_81, %c0_82] : memref<288x16xf32, #tpu.memory_space<vmem>>, vector<32x16xf32>
    %140 = vector.extract_strided_slice %129 {offsets = [0, 2], sizes = [16, 118], strides = [1, 1]} : vector<16x144xf32> to vector<16x118xf32>
    %cst_83 = arith.constant dense<0.000000e+00> : vector<32x118xf32>
    %141 = tpu.matmul %139, %140, %cst_83 {dimension_numbers = #tpu.dot_dimension_numbers<[1], [0], [0], [1], [0, 0, 1, 1], [], []>} : vector<32x16xf32>, vector<16x118xf32>, vector<32x118xf32> -> vector<32x118xf32>
    %142 = arith.addf %138, %141 : vector<32x118xf32>
    %c96_84 = arith.constant 96 : index
    %c0_85 = arith.constant 0 : index
    %143 = vector.load %arg13[%c96_84, %c0_85] : memref<288x16xf32, #tpu.memory_space<vmem>>, vector<32x16xf32>
    %144 = vector.extract_strided_slice %129 {offsets = [0, 12], sizes = [16, 118], strides = [1, 1]} : vector<16x144xf32> to vector<16x118xf32>
    %cst_86 = arith.constant dense<0.000000e+00> : vector<32x118xf32>
    %145 = tpu.matmul %143, %144, %cst_86 {dimension_numbers = #tpu.dot_dimension_numbers<[1], [0], [0], [1], [0, 0, 1, 1], [], []>} : vector<32x16xf32>, vector<16x118xf32>, vector<32x118xf32> -> vector<32x118xf32>
    %146 = arith.addf %142, %145 : vector<32x118xf32>
    %c128_87 = arith.constant 128 : index
    %c0_88 = arith.constant 0 : index
    %147 = vector.load %arg13[%c128_87, %c0_88] : memref<288x16xf32, #tpu.memory_space<vmem>>, vector<32x16xf32>
    %148 = vector.extract_strided_slice %129 {offsets = [0, 13], sizes = [16, 118], strides = [1, 1]} : vector<16x144xf32> to vector<16x118xf32>
    %cst_89 = arith.constant dense<0.000000e+00> : vector<32x118xf32>
    %149 = tpu.matmul %147, %148, %cst_89 {dimension_numbers = #tpu.dot_dimension_numbers<[1], [0], [0], [1], [0, 0, 1, 1], [], []>} : vector<32x16xf32>, vector<16x118xf32>, vector<32x118xf32> -> vector<32x118xf32>
    %150 = arith.addf %146, %149 : vector<32x118xf32>
    %c160_90 = arith.constant 160 : index
    %c0_91 = arith.constant 0 : index
    %151 = vector.load %arg13[%c160_90, %c0_91] : memref<288x16xf32, #tpu.memory_space<vmem>>, vector<32x16xf32>
    %152 = vector.extract_strided_slice %129 {offsets = [0, 14], sizes = [16, 118], strides = [1, 1]} : vector<16x144xf32> to vector<16x118xf32>
    %cst_92 = arith.constant dense<0.000000e+00> : vector<32x118xf32>
    %153 = tpu.matmul %151, %152, %cst_92 {dimension_numbers = #tpu.dot_dimension_numbers<[1], [0], [0], [1], [0, 0, 1, 1], [], []>} : vector<32x16xf32>, vector<16x118xf32>, vector<32x118xf32> -> vector<32x118xf32>
    %154 = arith.addf %150, %153 : vector<32x118xf32>
    %c192_93 = arith.constant 192 : index
    %c0_94 = arith.constant 0 : index
    %155 = vector.load %arg13[%c192_93, %c0_94] : memref<288x16xf32, #tpu.memory_space<vmem>>, vector<32x16xf32>
    %156 = vector.extract_strided_slice %129 {offsets = [0, 24], sizes = [16, 118], strides = [1, 1]} : vector<16x144xf32> to vector<16x118xf32>
    %cst_95 = arith.constant dense<0.000000e+00> : vector<32x118xf32>
    %157 = tpu.matmul %155, %156, %cst_95 {dimension_numbers = #tpu.dot_dimension_numbers<[1], [0], [0], [1], [0, 0, 1, 1], [], []>} : vector<32x16xf32>, vector<16x118xf32>, vector<32x118xf32> -> vector<32x118xf32>
    %158 = arith.addf %154, %157 : vector<32x118xf32>
    %c224_96 = arith.constant 224 : index
    %c0_97 = arith.constant 0 : index
    %159 = vector.load %arg13[%c224_96, %c0_97] : memref<288x16xf32, #tpu.memory_space<vmem>>, vector<32x16xf32>
    %160 = vector.extract_strided_slice %129 {offsets = [0, 25], sizes = [16, 118], strides = [1, 1]} : vector<16x144xf32> to vector<16x118xf32>
    %cst_98 = arith.constant dense<0.000000e+00> : vector<32x118xf32>
    %161 = tpu.matmul %159, %160, %cst_98 {dimension_numbers = #tpu.dot_dimension_numbers<[1], [0], [0], [1], [0, 0, 1, 1], [], []>} : vector<32x16xf32>, vector<16x118xf32>, vector<32x118xf32> -> vector<32x118xf32>
    %162 = arith.addf %158, %161 : vector<32x118xf32>
    %c256 = arith.constant 256 : index
    %c0_99 = arith.constant 0 : index
    %163 = vector.load %arg13[%c256, %c0_99] : memref<288x16xf32, #tpu.memory_space<vmem>>, vector<32x16xf32>
    %164 = vector.extract_strided_slice %129 {offsets = [0, 26], sizes = [16, 118], strides = [1, 1]} : vector<16x144xf32> to vector<16x118xf32>
    %cst_100 = arith.constant dense<0.000000e+00> : vector<32x118xf32>
    %165 = tpu.matmul %163, %164, %cst_100 {dimension_numbers = #tpu.dot_dimension_numbers<[1], [0], [0], [1], [0, 0, 1, 1], [], []>} : vector<32x16xf32>, vector<16x118xf32>, vector<32x118xf32> -> vector<32x118xf32>
    %166 = arith.addf %162, %165 : vector<32x118xf32>
    %c0_101 = arith.constant 0 : index
    %c0_102 = arith.constant 0 : index
    %167 = vector.load %arg14[%c0_101, %c0_102] : memref<32x1xf32, #tpu.memory_space<vmem>>, vector<32x1xf32>
    %168 = vector.broadcast %167 : vector<32x1xf32> to vector<32x118xf32>
    %169 = arith.addf %166, %168 : vector<32x118xf32>
    %cst_103 = arith.constant 0.000000e+00 : f32
    %170 = vector.broadcast %cst_103 : f32 to vector<32x118xf32>
    %171 = arith.maximumf %169, %170 : vector<32x118xf32>
    %c0_104 = arith.constant 0 : index
    %c0_105 = arith.constant 0 : index
    %172 = vector.load %arg17[%c0_104, %c0_105] : memref<32x32xf32, #tpu.memory_space<vmem>>, vector<32x32xf32>
    %c0_106 = arith.constant 0 : index
    %c0_107 = arith.constant 0 : index
    %173 = vector.load %arg15[%c0_106, %c0_107] : memref<32x1xf32, #tpu.memory_space<vmem>>, vector<32x1xf32>
    %c0_108 = arith.constant 0 : index
    %c0_109 = arith.constant 0 : index
    %174 = vector.load %arg16[%c0_108, %c0_109] : memref<32x1xf32, #tpu.memory_space<vmem>>, vector<32x1xf32>
    %175 = vector.broadcast %102 : vector<1x118xf32> to vector<32x118xf32>
    %176 = arith.mulf %171, %175 : vector<32x118xf32>
    %cst_110 = arith.constant dense<0.000000e+00> : vector<32xf32>
    %177 = vector.multi_reduction <add>, %176, %cst_110 [1] : vector<32x118xf32> to vector<32xf32>
    %178 = vector.shape_cast %177 : vector<32xf32> to vector<32x1xf32>
    %cst_111 = arith.constant dense<0.000000e+00> : vector<32x1xf32>
    %179 = tpu.matmul %172, %178, %cst_111 {dimension_numbers = #tpu.dot_dimension_numbers<[1], [0], [0], [1], [0, 0, 1, 1], [], []>} : vector<32x32xf32>, vector<32x1xf32>, vector<32x1xf32> -> vector<32x1xf32>
    %180 = vector.broadcast %179 : vector<32x1xf32> to vector<32x118xf32>
    %181 = arith.subf %171, %180 : vector<32x118xf32>
    %182 = vector.broadcast %102 : vector<1x118xf32> to vector<32x118xf32>
    %183 = arith.mulf %181, %182 : vector<32x118xf32>
    %184 = arith.mulf %183, %183 : vector<32x118xf32>
    %cst_112 = arith.constant dense<0.000000e+00> : vector<32xf32>
    %185 = vector.multi_reduction <add>, %184, %cst_112 [1] : vector<32x118xf32> to vector<32xf32>
    %186 = vector.shape_cast %185 : vector<32xf32> to vector<32x1xf32>
    %cst_113 = arith.constant dense<0.000000e+00> : vector<32x1xf32>
    %187 = tpu.matmul %172, %186, %cst_113 {dimension_numbers = #tpu.dot_dimension_numbers<[1], [0], [0], [1], [0, 0, 1, 1], [], []>} : vector<32x32xf32>, vector<32x1xf32>, vector<32x1xf32> -> vector<32x1xf32>
    %cst_114 = arith.constant 9.99999974E-6 : f32
    %188 = vector.broadcast %cst_114 : f32 to vector<32x1xf32>
    %189 = arith.addf %187, %188 : vector<32x1xf32>
    %190 = math.rsqrt %189 : vector<32x1xf32>
    %191 = vector.broadcast %190 : vector<32x1xf32> to vector<32x118xf32>
    %192 = arith.mulf %181, %191 : vector<32x118xf32>
    %193 = vector.broadcast %173 : vector<32x1xf32> to vector<32x118xf32>
    %194 = arith.mulf %192, %193 : vector<32x118xf32>
    %195 = vector.broadcast %174 : vector<32x1xf32> to vector<32x118xf32>
    %196 = arith.addf %194, %195 : vector<32x118xf32>
    %c0_115 = arith.constant 0 : index
    %c0_116 = arith.constant 0 : index
    %197 = vector.load %arg25[%c0_115, %c0_116] : memref<118x144xf32, #tpu.memory_space<vmem>>, vector<118x144xf32>
    %cst_117 = arith.constant dense<0.000000e+00> : vector<32x144xf32>
    %198 = tpu.matmul %196, %197, %cst_117 {dimension_numbers = #tpu.dot_dimension_numbers<[1], [0], [0], [1], [0, 0, 1, 1], [], []>} : vector<32x118xf32>, vector<118x144xf32>, vector<32x144xf32> -> vector<32x144xf32>
    %cst_118 = arith.constant 0.000000e+00 : f32
    %199 = vector.broadcast %cst_118 : f32 to vector<32x92xf32>
    %c0_119 = arith.constant 0 : index
    %c0_120 = arith.constant 0 : index
    %200 = vector.load %arg18[%c0_119, %c0_120] : memref<288x32xf32, #tpu.memory_space<vmem>>, vector<32x32xf32>
    %201 = vector.extract_strided_slice %198 {offsets = [0, 13], sizes = [32, 92], strides = [1, 1]} : vector<32x144xf32> to vector<32x92xf32>
    %cst_121 = arith.constant dense<0.000000e+00> : vector<32x92xf32>
    %202 = tpu.matmul %200, %201, %cst_121 {dimension_numbers = #tpu.dot_dimension_numbers<[1], [0], [0], [1], [0, 0, 1, 1], [], []>} : vector<32x32xf32>, vector<32x92xf32>, vector<32x92xf32> -> vector<32x92xf32>
    %203 = arith.addf %199, %202 : vector<32x92xf32>
    %c32_122 = arith.constant 32 : index
    %c0_123 = arith.constant 0 : index
    %204 = vector.load %arg18[%c32_122, %c0_123] : memref<288x32xf32, #tpu.memory_space<vmem>>, vector<32x32xf32>
    %205 = vector.extract_strided_slice %198 {offsets = [0, 14], sizes = [32, 92], strides = [1, 1]} : vector<32x144xf32> to vector<32x92xf32>
    %cst_124 = arith.constant dense<0.000000e+00> : vector<32x92xf32>
    %206 = tpu.matmul %204, %205, %cst_124 {dimension_numbers = #tpu.dot_dimension_numbers<[1], [0], [0], [1], [0, 0, 1, 1], [], []>} : vector<32x32xf32>, vector<32x92xf32>, vector<32x92xf32> -> vector<32x92xf32>
    %207 = arith.addf %203, %206 : vector<32x92xf32>
    %c64_125 = arith.constant 64 : index
    %c0_126 = arith.constant 0 : index
    %208 = vector.load %arg18[%c64_125, %c0_126] : memref<288x32xf32, #tpu.memory_space<vmem>>, vector<32x32xf32>
    %209 = vector.extract_strided_slice %198 {offsets = [0, 15], sizes = [32, 92], strides = [1, 1]} : vector<32x144xf32> to vector<32x92xf32>
    %cst_127 = arith.constant dense<0.000000e+00> : vector<32x92xf32>
    %210 = tpu.matmul %208, %209, %cst_127 {dimension_numbers = #tpu.dot_dimension_numbers<[1], [0], [0], [1], [0, 0, 1, 1], [], []>} : vector<32x32xf32>, vector<32x92xf32>, vector<32x92xf32> -> vector<32x92xf32>
    %211 = arith.addf %207, %210 : vector<32x92xf32>
    %c96_128 = arith.constant 96 : index
    %c0_129 = arith.constant 0 : index
    %212 = vector.load %arg18[%c96_128, %c0_129] : memref<288x32xf32, #tpu.memory_space<vmem>>, vector<32x32xf32>
    %213 = vector.extract_strided_slice %198 {offsets = [0, 25], sizes = [32, 92], strides = [1, 1]} : vector<32x144xf32> to vector<32x92xf32>
    %cst_130 = arith.constant dense<0.000000e+00> : vector<32x92xf32>
    %214 = tpu.matmul %212, %213, %cst_130 {dimension_numbers = #tpu.dot_dimension_numbers<[1], [0], [0], [1], [0, 0, 1, 1], [], []>} : vector<32x32xf32>, vector<32x92xf32>, vector<32x92xf32> -> vector<32x92xf32>
    %215 = arith.addf %211, %214 : vector<32x92xf32>
    %c128_131 = arith.constant 128 : index
    %c0_132 = arith.constant 0 : index
    %216 = vector.load %arg18[%c128_131, %c0_132] : memref<288x32xf32, #tpu.memory_space<vmem>>, vector<32x32xf32>
    %217 = vector.extract_strided_slice %198 {offsets = [0, 26], sizes = [32, 92], strides = [1, 1]} : vector<32x144xf32> to vector<32x92xf32>
    %cst_133 = arith.constant dense<0.000000e+00> : vector<32x92xf32>
    %218 = tpu.matmul %216, %217, %cst_133 {dimension_numbers = #tpu.dot_dimension_numbers<[1], [0], [0], [1], [0, 0, 1, 1], [], []>} : vector<32x32xf32>, vector<32x92xf32>, vector<32x92xf32> -> vector<32x92xf32>
    %219 = arith.addf %215, %218 : vector<32x92xf32>
    %c160_134 = arith.constant 160 : index
    %c0_135 = arith.constant 0 : index
    %220 = vector.load %arg18[%c160_134, %c0_135] : memref<288x32xf32, #tpu.memory_space<vmem>>, vector<32x32xf32>
    %221 = vector.extract_strided_slice %198 {offsets = [0, 27], sizes = [32, 92], strides = [1, 1]} : vector<32x144xf32> to vector<32x92xf32>
    %cst_136 = arith.constant dense<0.000000e+00> : vector<32x92xf32>
    %222 = tpu.matmul %220, %221, %cst_136 {dimension_numbers = #tpu.dot_dimension_numbers<[1], [0], [0], [1], [0, 0, 1, 1], [], []>} : vector<32x32xf32>, vector<32x92xf32>, vector<32x92xf32> -> vector<32x92xf32>
    %223 = arith.addf %219, %222 : vector<32x92xf32>
    %c192_137 = arith.constant 192 : index
    %c0_138 = arith.constant 0 : index
    %224 = vector.load %arg18[%c192_137, %c0_138] : memref<288x32xf32, #tpu.memory_space<vmem>>, vector<32x32xf32>
    %225 = vector.extract_strided_slice %198 {offsets = [0, 37], sizes = [32, 92], strides = [1, 1]} : vector<32x144xf32> to vector<32x92xf32>
    %cst_139 = arith.constant dense<0.000000e+00> : vector<32x92xf32>
    %226 = tpu.matmul %224, %225, %cst_139 {dimension_numbers = #tpu.dot_dimension_numbers<[1], [0], [0], [1], [0, 0, 1, 1], [], []>} : vector<32x32xf32>, vector<32x92xf32>, vector<32x92xf32> -> vector<32x92xf32>
    %227 = arith.addf %223, %226 : vector<32x92xf32>
    %c224_140 = arith.constant 224 : index
    %c0_141 = arith.constant 0 : index
    %228 = vector.load %arg18[%c224_140, %c0_141] : memref<288x32xf32, #tpu.memory_space<vmem>>, vector<32x32xf32>
    %229 = vector.extract_strided_slice %198 {offsets = [0, 38], sizes = [32, 92], strides = [1, 1]} : vector<32x144xf32> to vector<32x92xf32>
    %cst_142 = arith.constant dense<0.000000e+00> : vector<32x92xf32>
    %230 = tpu.matmul %228, %229, %cst_142 {dimension_numbers = #tpu.dot_dimension_numbers<[1], [0], [0], [1], [0, 0, 1, 1], [], []>} : vector<32x32xf32>, vector<32x92xf32>, vector<32x92xf32> -> vector<32x92xf32>
    %231 = arith.addf %227, %230 : vector<32x92xf32>
    %c256_143 = arith.constant 256 : index
    %c0_144 = arith.constant 0 : index
    %232 = vector.load %arg18[%c256_143, %c0_144] : memref<288x32xf32, #tpu.memory_space<vmem>>, vector<32x32xf32>
    %233 = vector.extract_strided_slice %198 {offsets = [0, 39], sizes = [32, 92], strides = [1, 1]} : vector<32x144xf32> to vector<32x92xf32>
    %cst_145 = arith.constant dense<0.000000e+00> : vector<32x92xf32>
    %234 = tpu.matmul %232, %233, %cst_145 {dimension_numbers = #tpu.dot_dimension_numbers<[1], [0], [0], [1], [0, 0, 1, 1], [], []>} : vector<32x32xf32>, vector<32x92xf32>, vector<32x92xf32> -> vector<32x92xf32>
    %235 = arith.addf %231, %234 : vector<32x92xf32>
    %c0_146 = arith.constant 0 : index
    %c0_147 = arith.constant 0 : index
    %236 = vector.load %arg19[%c0_146, %c0_147] : memref<32x1xf32, #tpu.memory_space<vmem>>, vector<32x1xf32>
    %237 = vector.broadcast %236 : vector<32x1xf32> to vector<32x92xf32>
    %238 = arith.addf %235, %237 : vector<32x92xf32>
    %cst_148 = arith.constant 0.000000e+00 : f32
    %239 = vector.broadcast %cst_148 : f32 to vector<32x92xf32>
    %240 = arith.maximumf %238, %239 : vector<32x92xf32>
    %c0_149 = arith.constant 0 : index
    %c0_150 = arith.constant 0 : index
    %241 = vector.load %arg22[%c0_149, %c0_150] : memref<32x32xf32, #tpu.memory_space<vmem>>, vector<32x32xf32>
    %c0_151 = arith.constant 0 : index
    %c0_152 = arith.constant 0 : index
    %242 = vector.load %arg20[%c0_151, %c0_152] : memref<32x1xf32, #tpu.memory_space<vmem>>, vector<32x1xf32>
    %c0_153 = arith.constant 0 : index
    %c0_154 = arith.constant 0 : index
    %243 = vector.load %arg21[%c0_153, %c0_154] : memref<32x1xf32, #tpu.memory_space<vmem>>, vector<32x1xf32>
    %c0_155 = arith.constant 0 : index
    %c0_156 = arith.constant 0 : index
    %244 = vector.load %arg24[%c0_155, %c0_156] : memref<1x92xf32, #tpu.memory_space<vmem>>, vector<1x92xf32>
    %245 = vector.broadcast %244 : vector<1x92xf32> to vector<32x92xf32>
    %246 = arith.mulf %240, %245 : vector<32x92xf32>
    %cst_157 = arith.constant dense<0.000000e+00> : vector<32xf32>
    %247 = vector.multi_reduction <add>, %246, %cst_157 [1] : vector<32x92xf32> to vector<32xf32>
    %248 = vector.shape_cast %247 : vector<32xf32> to vector<32x1xf32>
    %cst_158 = arith.constant dense<0.000000e+00> : vector<32x1xf32>
    %249 = tpu.matmul %241, %248, %cst_158 {dimension_numbers = #tpu.dot_dimension_numbers<[1], [0], [0], [1], [0, 0, 1, 1], [], []>} : vector<32x32xf32>, vector<32x1xf32>, vector<32x1xf32> -> vector<32x1xf32>
    %250 = vector.broadcast %249 : vector<32x1xf32> to vector<32x92xf32>
    %251 = arith.subf %240, %250 : vector<32x92xf32>
    %252 = vector.broadcast %244 : vector<1x92xf32> to vector<32x92xf32>
    %253 = arith.mulf %251, %252 : vector<32x92xf32>
    %254 = arith.mulf %253, %253 : vector<32x92xf32>
    %cst_159 = arith.constant dense<0.000000e+00> : vector<32xf32>
    %255 = vector.multi_reduction <add>, %254, %cst_159 [1] : vector<32x92xf32> to vector<32xf32>
    %256 = vector.shape_cast %255 : vector<32xf32> to vector<32x1xf32>
    %cst_160 = arith.constant dense<0.000000e+00> : vector<32x1xf32>
    %257 = tpu.matmul %241, %256, %cst_160 {dimension_numbers = #tpu.dot_dimension_numbers<[1], [0], [0], [1], [0, 0, 1, 1], [], []>} : vector<32x32xf32>, vector<32x1xf32>, vector<32x1xf32> -> vector<32x1xf32>
    %cst_161 = arith.constant 9.99999974E-6 : f32
    %258 = vector.broadcast %cst_161 : f32 to vector<32x1xf32>
    %259 = arith.addf %257, %258 : vector<32x1xf32>
    %260 = math.rsqrt %259 : vector<32x1xf32>
    %261 = vector.broadcast %260 : vector<32x1xf32> to vector<32x92xf32>
    %262 = arith.mulf %251, %261 : vector<32x92xf32>
    %263 = vector.broadcast %242 : vector<32x1xf32> to vector<32x92xf32>
    %264 = arith.mulf %262, %263 : vector<32x92xf32>
    %265 = vector.broadcast %243 : vector<32x1xf32> to vector<32x92xf32>
    %266 = arith.addf %264, %265 : vector<32x92xf32>
    %c0_162 = arith.constant 0 : index
    %c0_163 = arith.constant 0 : index
    %267 = vector.load %arg26[%c0_162, %c0_163] : memref<92x64xf32, #tpu.memory_space<vmem>>, vector<92x64xf32>
    %cst_164 = arith.constant dense<0.000000e+00> : vector<32x64xf32>
    %268 = tpu.matmul %266, %267, %cst_164 {dimension_numbers = #tpu.dot_dimension_numbers<[1], [0], [0], [1], [0, 0, 1, 1], [], []>} : vector<32x92xf32>, vector<92x64xf32>, vector<32x64xf32> -> vector<32x64xf32>
    %c0_165 = arith.constant 0 : index
    %c0_166 = arith.constant 0 : index
    %c0_167 = arith.constant 0 : index
    %269 = vector.load %arg27[%c0_165, %c0_166, %c0_167] : memref<1x32x64xf32, #tpu.memory_space<vmem>>, vector<1x32x64xf32>
    %270 = vector.shape_cast %269 : vector<1x32x64xf32> to vector<32x64xf32>
    %271 = vector.shape_cast %268 : vector<32x64xf32> to vector<1x32x64xf32>
    tpu.vector_store %arg27[%c0_165, %c0_166, %c0_167], %271 {strides = array<i32>} : memref<1x32x64xf32, #tpu.memory_space<vmem>>, vector<1x32x64xf32>,
    return
  }
  func.func @transform_0(%arg0: i32) -> (i32, i32, i32) {
    %c0_i32 = arith.constant 0 : i32
    %c0_i32_0 = arith.constant 0 : i32
    %c0_i32_1 = arith.constant 0 : i32
    return %arg0, %c0_i32, %c0_i32_0 : i32, i32, i32
  }
  func.func @transform_1(%arg0: i32) -> (i32, i32) {
    %c0_i32 = arith.constant 0 : i32
    %c0_i32_0 = arith.constant 0 : i32
    %c0_i32_1 = arith.constant 0 : i32
    return %c0_i32, %c0_i32_0 : i32, i32
  }
  func.func @transform_2(%arg0: i32) -> (i32, i32) {
    %c0_i32 = arith.constant 0 : i32
    %c0_i32_0 = arith.constant 0 : i32
    %c0_i32_1 = arith.constant 0 : i32
    return %c0_i32, %c0_i32_0 : i32, i32
  }
  func.func @transform_3(%arg0: i32) -> (i32, i32) {
    %c0_i32 = arith.constant 0 : i32
    %c0_i32_0 = arith.constant 0 : i32
    %c0_i32_1 = arith.constant 0 : i32
    return %c0_i32, %c0_i32_0 : i32, i32
  }
  func.func @transform_4(%arg0: i32) -> (i32, i32) {
    %c0_i32 = arith.constant 0 : i32
    %c0_i32_0 = arith.constant 0 : i32
    %c0_i32_1 = arith.constant 0 : i32
    return %c0_i32, %c0_i32_0 : i32, i32
  }
  func.func @transform_5(%arg0: i32) -> (i32, i32) {
    %c0_i32 = arith.constant 0 : i32
    %c0_i32_0 = arith.constant 0 : i32
    %c0_i32_1 = arith.constant 0 : i32
    return %c0_i32, %c0_i32_0 : i32, i32
  }
  func.func @transform_6(%arg0: i32) -> (i32, i32) {
    %c0_i32 = arith.constant 0 : i32
    %c0_i32_0 = arith.constant 0 : i32
    %c0_i32_1 = arith.constant 0 : i32
    return %c0_i32, %c0_i32_0 : i32, i32
  }
  func.func @transform_7(%arg0: i32) -> (i32, i32) {
    %c0_i32 = arith.constant 0 : i32
    %c0_i32_0 = arith.constant 0 : i32
    %c0_i32_1 = arith.constant 0 : i32
    return %c0_i32, %c0_i32_0 : i32, i32
  }
  func.func @transform_8(%arg0: i32) -> (i32, i32) {
    %c0_i32 = arith.constant 0 : i32
    %c0_i32_0 = arith.constant 0 : i32
    %c0_i32_1 = arith.constant 0 : i32
    return %c0_i32, %c0_i32_0 : i32, i32
  }
  func.func @transform_9(%arg0: i32) -> (i32, i32) {
    %c0_i32 = arith.constant 0 : i32
    %c0_i32_0 = arith.constant 0 : i32
    %c0_i32_1 = arith.constant 0 : i32
    return %c0_i32, %c0_i32_0 : i32, i32
  }
  func.func @transform_10(%arg0: i32) -> (i32, i32) {
    %c0_i32 = arith.constant 0 : i32
    %c0_i32_0 = arith.constant 0 : i32
    %c0_i32_1 = arith.constant 0 : i32
    return %c0_i32, %c0_i32_0 : i32, i32
  }
  func.func @transform_11(%arg0: i32) -> (i32, i32) {
    %c0_i32 = arith.constant 0 : i32
    %c0_i32_0 = arith.constant 0 : i32
    %c0_i32_1 = arith.constant 0 : i32
    return %c0_i32, %c0_i32_0 : i32, i32
  }
  func.func @transform_12(%arg0: i32) -> (i32, i32) {
    %c0_i32 = arith.constant 0 : i32
    %c0_i32_0 = arith.constant 0 : i32
    %c0_i32_1 = arith.constant 0 : i32
    return %c0_i32, %c0_i32_0 : i32, i32
  }
  func.func @transform_13(%arg0: i32) -> (i32, i32) {
    %c0_i32 = arith.constant 0 : i32
    %c0_i32_0 = arith.constant 0 : i32
    %c0_i32_1 = arith.constant 0 : i32
    return %c0_i32, %c0_i32_0 : i32, i32
  }
  func.func @transform_14(%arg0: i32) -> (i32, i32) {
    %c0_i32 = arith.constant 0 : i32
    %c0_i32_0 = arith.constant 0 : i32
    %c0_i32_1 = arith.constant 0 : i32
    return %c0_i32, %c0_i32_0 : i32, i32
  }
  func.func @transform_15(%arg0: i32) -> (i32, i32) {
    %c0_i32 = arith.constant 0 : i32
    %c0_i32_0 = arith.constant 0 : i32
    %c0_i32_1 = arith.constant 0 : i32
    return %c0_i32, %c0_i32_0 : i32, i32
  }
  func.func @transform_16(%arg0: i32) -> (i32, i32) {
    %c0_i32 = arith.constant 0 : i32
    %c0_i32_0 = arith.constant 0 : i32
    %c0_i32_1 = arith.constant 0 : i32
    return %c0_i32, %c0_i32_0 : i32, i32
  }
  func.func @transform_17(%arg0: i32) -> (i32, i32) {
    %c0_i32 = arith.constant 0 : i32
    %c0_i32_0 = arith.constant 0 : i32
    %c0_i32_1 = arith.constant 0 : i32
    return %c0_i32, %c0_i32_0 : i32, i32
  }
  func.func @transform_18(%arg0: i32) -> (i32, i32) {
    %c0_i32 = arith.constant 0 : i32
    %c0_i32_0 = arith.constant 0 : i32
    %c0_i32_1 = arith.constant 0 : i32
    return %c0_i32, %c0_i32_0 : i32, i32
  }
  func.func @transform_19(%arg0: i32) -> (i32, i32) {
    %c0_i32 = arith.constant 0 : i32
    %c0_i32_0 = arith.constant 0 : i32
    %c0_i32_1 = arith.constant 0 : i32
    return %c0_i32, %c0_i32_0 : i32, i32
  }
  func.func @transform_20(%arg0: i32) -> (i32, i32) {
    %c0_i32 = arith.constant 0 : i32
    %c0_i32_0 = arith.constant 0 : i32
    %c0_i32_1 = arith.constant 0 : i32
    return %c0_i32, %c0_i32_0 : i32, i32
  }
  func.func @transform_21(%arg0: i32) -> (i32, i32) {
    %c0_i32 = arith.constant 0 : i32
    %c0_i32_0 = arith.constant 0 : i32
    %c0_i32_1 = arith.constant 0 : i32
    return %c0_i32, %c0_i32_0 : i32, i32
  }
  func.func @transform_22(%arg0: i32) -> (i32, i32) {
    %c0_i32 = arith.constant 0 : i32
    %c0_i32_0 = arith.constant 0 : i32
    %c0_i32_1 = arith.constant 0 : i32
    return %c0_i32, %c0_i32_0 : i32, i32
  }
  func.func @transform_23(%arg0: i32) -> (i32, i32) {
    %c0_i32 = arith.constant 0 : i32
    %c0_i32_0 = arith.constant 0 : i32
    %c0_i32_1 = arith.constant 0 : i32
    return %c0_i32, %c0_i32_0 : i32, i32
  }
  func.func @transform_24(%arg0: i32) -> (i32, i32) {
    %c0_i32 = arith.constant 0 : i32
    %c0_i32_0 = arith.constant 0 : i32
    %c0_i32_1 = arith.constant 0 : i32
    return %c0_i32, %c0_i32_0 : i32, i32
  }
  func.func @transform_25(%arg0: i32) -> (i32, i32) {
    %c0_i32 = arith.constant 0 : i32
    %c0_i32_0 = arith.constant 0 : i32
    %c0_i32_1 = arith.constant 0 : i32
    return %c0_i32, %c0_i32_0 : i32, i32
  }
  func.func @transform_26(%arg0: i32) -> (i32, i32, i32) {
    %c0_i32 = arith.constant 0 : i32
    %c0_i32_0 = arith.constant 0 : i32
    %c0_i32_1 = arith.constant 0 : i32
    return %arg0, %c0_i32, %c0_i32_0 : i32, i32, i32
  }
}

module attributes {stable_mosaic.version = 11 : i64} {
  func.func @_head_kernel(%arg0: memref<4x2048xf32, #tpu.memory_space<vmem>>, %arg1: memref<2x128xf32, #tpu.memory_space<vmem>>, %arg2: memref<2048x128xf32, #tpu.memory_space<vmem>>, %arg3: memref<1x128xf32, #tpu.memory_space<vmem>>, %arg4: memref<128x384xf32, #tpu.memory_space<vmem>>, %arg5: memref<1x384xf32, #tpu.memory_space<vmem>>, %arg6: memref<128x384xf32, #tpu.memory_space<vmem>>, %arg7: memref<1x384xf32, #tpu.memory_space<vmem>>, %arg8: memref<128x128xf32, #tpu.memory_space<vmem>>, %arg9: memref<1x128xf32, #tpu.memory_space<vmem>>, %arg10: memref<128x64xf32, #tpu.memory_space<vmem>>, %arg11: memref<1x64xf32, #tpu.memory_space<vmem>>, %arg12: memref<64x128xf32, #tpu.memory_space<vmem>>, %arg13: memref<1x128xf32, #tpu.memory_space<vmem>>, %arg14: memref<4x128xf32, #tpu.memory_space<vmem>>, %arg15: memref<2x128xf32, #tpu.memory_space<vmem>>, %arg16: memref<4x128xf32, #tpu.memory_space<vmem>>) attributes {dimension_semantics = [], scalar_prefetch = 0 : i64, scratch_operands = 1 : i64, tpu.core_type = #tpu.core_type<tc>} {
    %c0 = arith.constant 0 : index
    %c0_0 = arith.constant 0 : index
    %0 = vector.load %arg0[%c0, %c0_0] : memref<4x2048xf32, #tpu.memory_space<vmem>>, vector<4x2048xf32>
    %c0_1 = arith.constant 0 : index
    %c0_2 = arith.constant 0 : index
    %1 = vector.load %arg2[%c0_1, %c0_2] : memref<2048x128xf32, #tpu.memory_space<vmem>>, vector<2048x128xf32>
    %cst = arith.constant dense<0.000000e+00> : vector<4x128xf32>
    %2 = tpu.matmul %0, %1, %cst {dimension_numbers = #tpu.dot_dimension_numbers<[1], [0], [0], [1], [0, 0, 1, 1], [], []>} : vector<4x2048xf32>, vector<2048x128xf32>, vector<4x128xf32> -> vector<4x128xf32>
    %c0_3 = arith.constant 0 : index
    %c0_4 = arith.constant 0 : index
    %3 = vector.load %arg3[%c0_3, %c0_4] : memref<1x128xf32, #tpu.memory_space<vmem>>, vector<1x128xf32>
    %4 = vector.broadcast %3 : vector<1x128xf32> to vector<4x128xf32>
    %5 = arith.addf %2, %4 : vector<4x128xf32>
    %cst_5 = arith.constant 0.000000e+00 : f32
    %6 = vector.broadcast %cst_5 : f32 to vector<4x128xf32>
    %7 = arith.maximumf %5, %6 : vector<4x128xf32>
    %c0_6 = arith.constant 0 : index
    %c0_7 = arith.constant 0 : index
    %8 = vector.load %arg4[%c0_6, %c0_7] : memref<128x384xf32, #tpu.memory_space<vmem>>, vector<128x384xf32>
    %cst_8 = arith.constant dense<0.000000e+00> : vector<4x384xf32>
    %9 = tpu.matmul %7, %8, %cst_8 {dimension_numbers = #tpu.dot_dimension_numbers<[1], [0], [0], [1], [0, 0, 1, 1], [], []>} : vector<4x128xf32>, vector<128x384xf32>, vector<4x384xf32> -> vector<4x384xf32>
    %c0_9 = arith.constant 0 : index
    %c0_10 = arith.constant 0 : index
    %10 = vector.load %arg5[%c0_9, %c0_10] : memref<1x384xf32, #tpu.memory_space<vmem>>, vector<1x384xf32>
    %11 = vector.broadcast %10 : vector<1x384xf32> to vector<4x384xf32>
    %12 = arith.addf %9, %11 : vector<4x384xf32>
    %c0_11 = arith.constant 0 : index
    %c0_12 = arith.constant 0 : index
    %13 = vector.load %arg6[%c0_11, %c0_12] : memref<128x384xf32, #tpu.memory_space<vmem>>, vector<128x384xf32>
    %c0_13 = arith.constant 0 : index
    %c0_14 = arith.constant 0 : index
    %14 = vector.load %arg7[%c0_13, %c0_14] : memref<1x384xf32, #tpu.memory_space<vmem>>, vector<1x384xf32>
    %c0_15 = arith.constant 0 : index
    %c0_16 = arith.constant 0 : index
    %15 = vector.load %arg1[%c0_15, %c0_16] : memref<2x128xf32, #tpu.memory_space<vmem>>, vector<2x128xf32>
    %16 = vector.extract_strided_slice %12 {offsets = [0, 0], sizes = [2, 384], strides = [1, 1]} : vector<4x384xf32> to vector<2x384xf32>
    %cst_17 = arith.constant dense<0.000000e+00> : vector<2x384xf32>
    %17 = tpu.matmul %15, %13, %cst_17 {dimension_numbers = #tpu.dot_dimension_numbers<[1], [0], [0], [1], [0, 0, 1, 1], [], []>} : vector<2x128xf32>, vector<128x384xf32>, vector<2x384xf32> -> vector<2x384xf32>
    %18 = vector.broadcast %14 : vector<1x384xf32> to vector<2x384xf32>
    %19 = arith.addf %17, %18 : vector<2x384xf32>
    %20 = vector.extract_strided_slice %16 {offsets = [0, 0], sizes = [2, 128], strides = [1, 1]} : vector<2x384xf32> to vector<2x128xf32>
    %21 = vector.extract_strided_slice %19 {offsets = [0, 0], sizes = [2, 128], strides = [1, 1]} : vector<2x384xf32> to vector<2x128xf32>
    %22 = arith.addf %20, %21 : vector<2x128xf32>
    %cst_18 = arith.constant 5.000000e-01 : f32
    %23 = vector.broadcast %cst_18 : f32 to vector<2x128xf32>
    %24 = arith.mulf %23, %22 : vector<2x128xf32>
    %25 = math.tanh %24 : vector<2x128xf32>
    %cst_19 = arith.constant 1.000000e+00 : f32
    %26 = vector.broadcast %cst_19 : f32 to vector<2x128xf32>
    %27 = arith.addf %25, %26 : vector<2x128xf32>
    %cst_20 = arith.constant 5.000000e-01 : f32
    %28 = vector.broadcast %cst_20 : f32 to vector<2x128xf32>
    %29 = arith.mulf %28, %27 : vector<2x128xf32>
    %30 = vector.extract_strided_slice %16 {offsets = [0, 128], sizes = [2, 128], strides = [1, 1]} : vector<2x384xf32> to vector<2x128xf32>
    %31 = vector.extract_strided_slice %19 {offsets = [0, 128], sizes = [2, 128], strides = [1, 1]} : vector<2x384xf32> to vector<2x128xf32>
    %32 = arith.addf %30, %31 : vector<2x128xf32>
    %cst_21 = arith.constant 5.000000e-01 : f32
    %33 = vector.broadcast %cst_21 : f32 to vector<2x128xf32>
    %34 = arith.mulf %33, %32 : vector<2x128xf32>
    %35 = math.tanh %34 : vector<2x128xf32>
    %cst_22 = arith.constant 1.000000e+00 : f32
    %36 = vector.broadcast %cst_22 : f32 to vector<2x128xf32>
    %37 = arith.addf %35, %36 : vector<2x128xf32>
    %cst_23 = arith.constant 5.000000e-01 : f32
    %38 = vector.broadcast %cst_23 : f32 to vector<2x128xf32>
    %39 = arith.mulf %38, %37 : vector<2x128xf32>
    %40 = vector.extract_strided_slice %16 {offsets = [0, 256], sizes = [2, 128], strides = [1, 1]} : vector<2x384xf32> to vector<2x128xf32>
    %41 = vector.extract_strided_slice %19 {offsets = [0, 256], sizes = [2, 128], strides = [1, 1]} : vector<2x384xf32> to vector<2x128xf32>
    %42 = arith.mulf %29, %41 : vector<2x128xf32>
    %43 = arith.addf %40, %42 : vector<2x128xf32>
    %44 = math.tanh %43 : vector<2x128xf32>
    %cst_24 = arith.constant 1.000000e+00 : f32
    %45 = vector.broadcast %cst_24 : f32 to vector<2x128xf32>
    %46 = arith.subf %45, %39 : vector<2x128xf32>
    %47 = arith.mulf %46, %44 : vector<2x128xf32>
    %48 = arith.mulf %39, %15 : vector<2x128xf32>
    %49 = arith.addf %47, %48 : vector<2x128xf32>
    %c0_25 = arith.constant 0 : index
    %c0_26 = arith.constant 0 : index
    %50 = vector.load %arg16[%c0_25, %c0_26] : memref<4x128xf32, #tpu.memory_space<vmem>>, vector<2x128xf32>
    tpu.vector_store %arg16[%c0_25, %c0_26], %49 {strides = array<i32>} : memref<4x128xf32, #tpu.memory_space<vmem>>, vector<2x128xf32>,
    %51 = vector.extract_strided_slice %12 {offsets = [2, 0], sizes = [2, 384], strides = [1, 1]} : vector<4x384xf32> to vector<2x384xf32>
    %cst_27 = arith.constant dense<0.000000e+00> : vector<2x384xf32>
    %52 = tpu.matmul %49, %13, %cst_27 {dimension_numbers = #tpu.dot_dimension_numbers<[1], [0], [0], [1], [0, 0, 1, 1], [], []>} : vector<2x128xf32>, vector<128x384xf32>, vector<2x384xf32> -> vector<2x384xf32>
    %53 = vector.broadcast %14 : vector<1x384xf32> to vector<2x384xf32>
    %54 = arith.addf %52, %53 : vector<2x384xf32>
    %55 = vector.extract_strided_slice %51 {offsets = [0, 0], sizes = [2, 128], strides = [1, 1]} : vector<2x384xf32> to vector<2x128xf32>
    %56 = vector.extract_strided_slice %54 {offsets = [0, 0], sizes = [2, 128], strides = [1, 1]} : vector<2x384xf32> to vector<2x128xf32>
    %57 = arith.addf %55, %56 : vector<2x128xf32>
    %cst_28 = arith.constant 5.000000e-01 : f32
    %58 = vector.broadcast %cst_28 : f32 to vector<2x128xf32>
    %59 = arith.mulf %58, %57 : vector<2x128xf32>
    %60 = math.tanh %59 : vector<2x128xf32>
    %cst_29 = arith.constant 1.000000e+00 : f32
    %61 = vector.broadcast %cst_29 : f32 to vector<2x128xf32>
    %62 = arith.addf %60, %61 : vector<2x128xf32>
    %cst_30 = arith.constant 5.000000e-01 : f32
    %63 = vector.broadcast %cst_30 : f32 to vector<2x128xf32>
    %64 = arith.mulf %63, %62 : vector<2x128xf32>
    %65 = vector.extract_strided_slice %51 {offsets = [0, 128], sizes = [2, 128], strides = [1, 1]} : vector<2x384xf32> to vector<2x128xf32>
    %66 = vector.extract_strided_slice %54 {offsets = [0, 128], sizes = [2, 128], strides = [1, 1]} : vector<2x384xf32> to vector<2x128xf32>
    %67 = arith.addf %65, %66 : vector<2x128xf32>
    %cst_31 = arith.constant 5.000000e-01 : f32
    %68 = vector.broadcast %cst_31 : f32 to vector<2x128xf32>
    %69 = arith.mulf %68, %67 : vector<2x128xf32>
    %70 = math.tanh %69 : vector<2x128xf32>
    %cst_32 = arith.constant 1.000000e+00 : f32
    %71 = vector.broadcast %cst_32 : f32 to vector<2x128xf32>
    %72 = arith.addf %70, %71 : vector<2x128xf32>
    %cst_33 = arith.constant 5.000000e-01 : f32
    %73 = vector.broadcast %cst_33 : f32 to vector<2x128xf32>
    %74 = arith.mulf %73, %72 : vector<2x128xf32>
    %75 = vector.extract_strided_slice %51 {offsets = [0, 256], sizes = [2, 128], strides = [1, 1]} : vector<2x384xf32> to vector<2x128xf32>
    %76 = vector.extract_strided_slice %54 {offsets = [0, 256], sizes = [2, 128], strides = [1, 1]} : vector<2x384xf32> to vector<2x128xf32>
    %77 = arith.mulf %64, %76 : vector<2x128xf32>
    %78 = arith.addf %75, %77 : vector<2x128xf32>
    %79 = math.tanh %78 : vector<2x128xf32>
    %cst_34 = arith.constant 1.000000e+00 : f32
    %80 = vector.broadcast %cst_34 : f32 to vector<2x128xf32>
    %81 = arith.subf %80, %74 : vector<2x128xf32>
    %82 = arith.mulf %81, %79 : vector<2x128xf32>
    %83 = arith.mulf %74, %49 : vector<2x128xf32>
    %84 = arith.addf %82, %83 : vector<2x128xf32>
    %c2 = arith.constant 2 : index
    %c0_35 = arith.constant 0 : index
    %85 = vector.load %arg16[%c2, %c0_35] : memref<4x128xf32, #tpu.memory_space<vmem>>, vector<2x128xf32>
    tpu.vector_store %arg16[%c2, %c0_35], %84 {strides = array<i32>} : memref<4x128xf32, #tpu.memory_space<vmem>>, vector<2x128xf32>,
    %c0_36 = arith.constant 0 : index
    %c0_37 = arith.constant 0 : index
    %86 = vector.load %arg15[%c0_36, %c0_37] : memref<2x128xf32, #tpu.memory_space<vmem>>, vector<2x128xf32>
    tpu.vector_store %arg15[%c0_36, %c0_37], %84 {strides = array<i32>} : memref<2x128xf32, #tpu.memory_space<vmem>>, vector<2x128xf32>,
    %c0_38 = arith.constant 0 : index
    %c0_39 = arith.constant 0 : index
    %87 = vector.load %arg16[%c0_38, %c0_39] : memref<4x128xf32, #tpu.memory_space<vmem>>, vector<4x128xf32>
    %c0_40 = arith.constant 0 : index
    %c0_41 = arith.constant 0 : index
    %88 = vector.load %arg8[%c0_40, %c0_41] : memref<128x128xf32, #tpu.memory_space<vmem>>, vector<128x128xf32>
    %cst_42 = arith.constant dense<0.000000e+00> : vector<4x128xf32>
    %89 = tpu.matmul %87, %88, %cst_42 {dimension_numbers = #tpu.dot_dimension_numbers<[1], [0], [0], [1], [0, 0, 1, 1], [], []>} : vector<4x128xf32>, vector<128x128xf32>, vector<4x128xf32> -> vector<4x128xf32>
    %c0_43 = arith.constant 0 : index
    %c0_44 = arith.constant 0 : index
    %90 = vector.load %arg9[%c0_43, %c0_44] : memref<1x128xf32, #tpu.memory_space<vmem>>, vector<1x128xf32>
    %91 = vector.broadcast %90 : vector<1x128xf32> to vector<4x128xf32>
    %92 = arith.addf %89, %91 : vector<4x128xf32>
    %cst_45 = arith.constant 0.000000e+00 : f32
    %93 = vector.broadcast %cst_45 : f32 to vector<4x128xf32>
    %94 = arith.maximumf %92, %93 : vector<4x128xf32>
    %c0_46 = arith.constant 0 : index
    %c0_47 = arith.constant 0 : index
    %95 = vector.load %arg10[%c0_46, %c0_47] : memref<128x64xf32, #tpu.memory_space<vmem>>, vector<128x64xf32>
    %cst_48 = arith.constant dense<0.000000e+00> : vector<4x64xf32>
    %96 = tpu.matmul %94, %95, %cst_48 {dimension_numbers = #tpu.dot_dimension_numbers<[1], [0], [0], [1], [0, 0, 1, 1], [], []>} : vector<4x128xf32>, vector<128x64xf32>, vector<4x64xf32> -> vector<4x64xf32>
    %c0_49 = arith.constant 0 : index
    %c0_50 = arith.constant 0 : index
    %97 = vector.load %arg11[%c0_49, %c0_50] : memref<1x64xf32, #tpu.memory_space<vmem>>, vector<1x64xf32>
    %98 = vector.broadcast %97 : vector<1x64xf32> to vector<4x64xf32>
    %99 = arith.addf %96, %98 : vector<4x64xf32>
    %cst_51 = arith.constant 0.000000e+00 : f32
    %100 = vector.broadcast %cst_51 : f32 to vector<4x64xf32>
    %101 = arith.maximumf %99, %100 : vector<4x64xf32>
    %c0_52 = arith.constant 0 : index
    %c0_53 = arith.constant 0 : index
    %102 = vector.load %arg12[%c0_52, %c0_53] : memref<64x128xf32, #tpu.memory_space<vmem>>, vector<64x128xf32>
    %cst_54 = arith.constant dense<0.000000e+00> : vector<4x128xf32>
    %103 = tpu.matmul %101, %102, %cst_54 {dimension_numbers = #tpu.dot_dimension_numbers<[1], [0], [0], [1], [0, 0, 1, 1], [], []>} : vector<4x64xf32>, vector<64x128xf32>, vector<4x128xf32> -> vector<4x128xf32>
    %c0_55 = arith.constant 0 : index
    %c0_56 = arith.constant 0 : index
    %104 = vector.load %arg13[%c0_55, %c0_56] : memref<1x128xf32, #tpu.memory_space<vmem>>, vector<1x128xf32>
    %105 = vector.broadcast %104 : vector<1x128xf32> to vector<4x128xf32>
    %106 = arith.addf %103, %105 : vector<4x128xf32>
    %c0_57 = arith.constant 0 : index
    %c0_58 = arith.constant 0 : index
    %107 = vector.load %arg14[%c0_57, %c0_58] : memref<4x128xf32, #tpu.memory_space<vmem>>, vector<4x128xf32>
    tpu.vector_store %arg14[%c0_57, %c0_58], %106 {strides = array<i32>} : memref<4x128xf32, #tpu.memory_space<vmem>>, vector<4x128xf32>,
    return
  }
}

</mosaic_0001>

<bundles_post_ra>
// kernel: _lambda_.3
= control target key start
LH: loop header
LB: loop body
LE: loop exit
PB: predicated region body
PF: predicated region fallthrough
CT: control target
= control target key end

     0   :  { %vm2877_vm0 = vmmov 0   ;;  %vm1712_vm1 = vcmask 523264   ;;  %s4373_s2 = inlined_call_operand.vmem [shape: f32[2048,128], index: 2, kind: input, shape index: {}]   ;;  %s4374_s0 = inlined_call_operand.vmem [shape: f32[4,2048], index: 0, kind: input, shape index: {}]   ;;  %s4375_s4 = inlined_call_operand.vmem [shape: f32[128,384], index: 4, kind: input, shape index: {}]   ;;  %s4376_s6 = inlined_call_operand.vmem [shape: f32[128,384], index: 6, kind: input, shape index: {}]   ;;  %s4377_s3 = inlined_call_operand.vmem [shape: f32[1,128], index: 3, kind: input, shape index: {}]   ;;  %s4378_s1 = inlined_call_operand.vmem [shape: f32[2,128], index: 1, kind: input, shape index: {}]   ;;  %s4379_s5 = inlined_call_operand.vmem [shape: f32[1,384], index: 5, kind: input, shape index: {}]   ;;  %s4380_s7 = inlined_call_operand.vmem [shape: f32[1,384], index: 7, kind: input, shape index: {}]   ;;  %s4381_s8 = inlined_call_operand.vmem [shape: f32[128,128], index: 8, kind: input, shape index: {}]   ;;  %s4382_s10 = inlined_call_operand.vmem [shape: f32[128,64], index: 10, kind: input, shape index: {}]   ;;  %s4383_s15 = inlined_call_operand.vmem [shape: f32[2,128], index: 15, kind: output, shape index: {1}]   ;;  %s4384_s12 = inlined_call_operand.vmem [shape: f32[64,128], index: 12, kind: input, shape index: {}]   ;;  %s4385_s9 = inlined_call_operand.vmem [shape: f32[1,128], index: 9, kind: input, shape index: {}]   ;;  %s4386_s11 = inlined_call_operand.vmem [shape: f32[1,64], index: 11, kind: input, shape index: {}]   ;;  %s4387_s13 = inlined_call_operand.vmem [shape: f32[1,128], index: 13, kind: input, shape index: {}]   ;;  %s4388_s14 = inlined_call_operand.vmem [shape: f32[4,128], index: 14, kind: output, shape index: {0}]  }
   0x1   :  { %v73_v0 = vld [vmem:[%s4373_s2 + $0x80] sm:$0xff]  ;;  %v74_v1 = vld [vmem:[%s4373_s2 + $0x88] sm:$0xff]  ;;  %v75_v11 = vld [vmem:[%s4373_s2 + $0x90] sm:$0xff] }
   0x2   :  { %v57_v2 = vld [vmem:[%s4373_s2] sm:$0xff]  ;;  %v2368_v3 = vpack.c.bf16 %v74_v1, %v73_v0  ;;  %v58_v4 = vld [vmem:[%s4373_s2 + $0x8] sm:$0xff]  ;;  %v76_v13 = vld [vmem:[%s4373_s2 + $0x98] sm:$0xff] }
   0x3   :  { %v105_v5 = vld [vmem:[%s4373_s2 + $0x180] sm:$0xff]  ;;  %v106_v6 = vld [vmem:[%s4373_s2 + $0x188] sm:$0xff]  ;;  %v2370_v7 = vpack.c.bf16 %v58_v4, %v57_v2  ;;  %v59_v14 = vld [vmem:[%s4373_s2 + $0x10] sm:$0xff]  ;;  %v2372_v16 = vpack.c.bf16 %v76_v13, %v75_v11 }
   0x4   :  { %v2400_v8 = vpack.c.bf16 %v106_v6, %v105_v5  ;;  %v89_v9 = vld [vmem:[%s4373_s2 + $0x100] sm:$0xff]  ;;  %v90_v10 = vld [vmem:[%s4373_s2 + $0x108] sm:$0xff]  ;;  %2369 = vmatprep.subr.bf16.mxu0 %v2368_v3  ;;  %v60_v15 = vld [vmem:[%s4373_s2 + $0x18] sm:$0xff] }
   0x5   :  { %v2402_v12 = vpack.c.bf16 %v90_v10, %v89_v9  ;;  %2371 = vmatpush3.bf16.msra.mxu0 %v2370_v7  ;;  %v2374_v17 = vpack.c.bf16 %v60_v15, %v59_v14  ;;  %v107_v18 = vld [vmem:[%s4373_s2 + $0x190] sm:$0xff]  ;;  %v108_v19 = vld [vmem:[%s4373_s2 + $0x198] sm:$0xff]  ;;  %v77_v23 = vld [vmem:[%s4373_s2 + $0xa0] sm:$0xff] }
   0x6   :  { %2401 = vmatprep.subr.bf16.mxu1 %v2400_v8  ;;  %v91_v20 = vld [vmem:[%s4373_s2 + $0x110] sm:$0xff]  ;;  %v2404_v21 = vpack.c.bf16 %v108_v19, %v107_v18  ;;  %v92_v22 = vld [vmem:[%s4373_s2 + $0x118] sm:$0xff]  ;;  %v78_v24 = vld [vmem:[%s4373_s2 + $0xa8] sm:$0xff]  ;;  %2373 = vmatprep.subr.bf16.mxu0 %v2372_v16 }
   0x7   :  { %2403 = vmatpush3.bf16.msra.mxu1 %v2402_v12  ;;  %v2406_v25 = vpack.c.bf16 %v92_v22, %v91_v20  ;;  %v2376_v26 = vpack.c.bf16 %v78_v24, %v77_v23  ;;  %v61_v27 = vld [vmem:[%s4373_s2 + $0x20] sm:$0xff]  ;;  %v62_v28 = vld [vmem:[%s4373_s2 + $0x28] sm:$0xff]  ;;  %v79_v35 = vld [vmem:[%s4373_s2 + $0xb0] sm:$0xff] }
   0x8   :  { %v109_v29 = vld [vmem:[%s4373_s2 + $0x1a0] sm:$0xff]  ;;  %2405 = vmatprep.subr.bf16.mxu1 %v2404_v21  ;;  %v110_v30 = vld [vmem:[%s4373_s2 + $0x1a8] sm:$0xff]  ;;  %v2378_v33 = vpack.c.bf16 %v62_v28, %v61_v27  ;;  %v80_v36 = vld [vmem:[%s4373_s2 + $0xb8] sm:$0xff] }
   0x9   :  { %v93_v31 = vld [vmem:[%s4373_s2 + $0x120] sm:$0xff]  ;;  %v94_v32 = vld [vmem:[%s4373_s2 + $0x128] sm:$0xff]  ;;  %2375 = vmatpush3.bf16.msra.mxu0 %v2374_v17  ;;  %v2408_v34 = vpack.c.bf16 %v110_v30, %v109_v29  ;;  %v63_v37 = vld [vmem:[%s4373_s2 + $0x30] sm:$0xff]  ;;  %v2380_v39 = vpack.c.bf16 %v80_v36, %v79_v35 }
   0xa   :  { %2377 = vmatprep.subr.bf16.mxu0 %v2376_v26  ;;  %v2410_v38 = vpack.c.bf16 %v94_v32, %v93_v31  ;;  %v64_v40 = vld [vmem:[%s4373_s2 + $0x38] sm:$0xff]  ;;  %v111_v41 = vld [vmem:[%s4373_s2 + $0x1b0] sm:$0xff]  ;;  %v81_v46 = vld [vmem:[%s4373_s2 + $0xc0] sm:$0xff] }
   0xb   :  { %2407 = vmatpush3.bf16.msra.mxu1 %v2406_v25  ;;  %v112_v42 = vld [vmem:[%s4373_s2 + $0x1b8] sm:$0xff]  ;;  %v95_v44 = vld [vmem:[%s4373_s2 + $0x130] sm:$0xff]  ;;  %v82_v47 = vld [vmem:[%s4373_s2 + $0xc8] sm:$0xff]  ;;  %v2382_v48 = vpack.c.bf16 %v64_v40, %v63_v37 }
   0xc   :  { %2409 = vmatprep.subr.bf16.mxu1 %v2408_v34  ;;  %v2412_v43 = vpack.c.bf16 %v112_v42, %v111_v41  ;;  %v96_v45 = vld [vmem:[%s4373_s2 + $0x138] sm:$0xff]  ;;  %v113_v49 = vld [vmem:[%s4373_s2 + $0x1c0] sm:$0xff]  ;;  %v114_v50 = vld [vmem:[%s4373_s2 + $0x1c8] sm:$0xff]  ;;  %v2384_v52 = vpack.c.bf16 %v82_v47, %v81_v46 }
   0xd   :  { %2379 = vmatpush3.bf16.msra.mxu0 %v2378_v33  ;;  %v2414_v51 = vpack.c.bf16 %v96_v45, %v95_v44  ;;  %v65_v53 = vld [vmem:[%s4373_s2 + $0x40] sm:$0xff]  ;;  %v66_v54 = vld [vmem:[%s4373_s2 + $0x48] sm:$0xff]  ;;  %v2416_v56 = vpack.c.bf16 %v114_v50, %v113_v49  ;;  %v83_v58 = vld [vmem:[%s4373_s2 + $0xd0] sm:$0xff] }
   0xe   :  { %2381 = vmatprep.subr.bf16.mxu0 %v2380_v39  ;;  %v97_v55 = vld [vmem:[%s4373_s2 + $0x140] sm:$0xff]  ;;  %v98_v57 = vld [vmem:[%s4373_s2 + $0x148] sm:$0xff]  ;;  %v84_v59 = vld [vmem:[%s4373_s2 + $0xd8] sm:$0xff]  ;;  %v2386_v62 = vpack.c.bf16 %v66_v54, %v65_v53 }
   0xf   :  { %2411 = vmatpush3.bf16.msra.mxu1 %v2410_v38  ;;  %v115_v60 = vld [vmem:[%s4373_s2 + $0x1d0] sm:$0xff]  ;;  %v116_v61 = vld [vmem:[%s4373_s2 + $0x1d8] sm:$0xff]  ;;  %v2418_v63 = vpack.c.bf16 %v98_v57, %v97_v55  ;;  %v2388_v0 = vpack.c.bf16 %v84_v59, %v83_v58  ;;  %v85_v6 = vld [vmem:[%s4373_s2 + $0xe0] sm:$0xff] }
  0x10   :  { %2413 = vmatprep.subr.bf16.mxu1 %v2412_v43  ;;  %v67_v1 = vld [vmem:[%s4373_s2 + $0x50] sm:$0xff]  ;;  %v68_v2 = vld [vmem:[%s4373_s2 + $0x58] sm:$0xff]  ;;  %v2420_v4 = vpack.c.bf16 %v116_v61, %v115_v60  ;;  %v86_v7 = vld [vmem:[%s4373_s2 + $0xe8] sm:$0xff] }
  0x11   :  { %2383 = vmatpush3.bf16.msra.mxu0 %v2382_v48  ;;  %v99_v3 = vld [vmem:[%s4373_s2 + $0x150] sm:$0xff]  ;;  %v100_v5 = vld [vmem:[%s4373_s2 + $0x158] sm:$0xff]  ;;  %v117_v8 = vld [vmem:[%s4373_s2 + $0x1e0] sm:$0xff]  ;;  %v2390_v10 = vpack.c.bf16 %v68_v2, %v67_v1  ;;  %v2392_v14 = vpack.c.bf16 %v86_v7, %v85_v6 }
  0x12   :  { %2385 = vmatprep.subr.bf16.mxu0 %v2384_v52  ;;  %v118_v9 = vld [vmem:[%s4373_s2 + $0x1e8] sm:$0xff]  ;;  %v69_v11 = vld [vmem:[%s4373_s2 + $0x60] sm:$0xff]  ;;  %v2422_v13 = vpack.c.bf16 %v100_v5, %v99_v3  ;;  %v87_v19 = vld [vmem:[%s4373_s2 + $0xf0] sm:$0xff] }
  0x13   :  { %2415 = vmatpush3.bf16.msra.mxu1 %v2414_v51  ;;  %v70_v12 = vld [vmem:[%s4373_s2 + $0x68] sm:$0xff]  ;;  %v101_v15 = vld [vmem:[%s4373_s2 + $0x160] sm:$0xff]  ;;  %v2424_v18 = vpack.c.bf16 %v118_v9, %v117_v8  ;;  %v88_v20 = vld [vmem:[%s4373_s2 + $0xf8] sm:$0xff] }
  0x14   :  { %2417 = vmatprep.subr.bf16.mxu1 %v2416_v56  ;;  %v102_v16 = vld [vmem:[%s4373_s2 + $0x168] sm:$0xff]  ;;  %v49_v17 = vld [vmem:[%s4374_s0] sm:$0xff]  ;;  %v119_v23 = vld [vmem:[%s4373_s2 + $0x1f0] sm:$0xff]  ;;  %v2394_v26 = vpack.c.bf16 %v70_v12, %v69_v11  ;;  %v2396_v28 = vpack.c.bf16 %v88_v20, %v87_v19 }
  0x15   :  { %2387 = vmatpush3.bf16.msra.mxu0 %v2386_v62  ;;  %v328_v21 = vcombine.high %v49_v17, %v49_v17  ;;  %v50_v22 = vld [vmem:[%s4374_s0 + $0x8] sm:$0xff]  ;;  %v120_v24 = vld [vmem:[%s4373_s2 + $0x1f8] sm:$0xff]  ;;  %v2426_v27 = vpack.c.bf16 %v102_v16, %v101_v15  ;;  %v71_v29 = vld [vmem:[%s4373_s2 + $0x70] sm:$0xff] }
  0x16   :  { %2389 = vmatprep.subr.bf16.mxu0 %v2388_v0  ;;  %v329_v25 = vcombine.high %v50_v22, %v50_v22  ;;  %v72_v30 = vld [vmem:[%s4373_s2 + $0x78] sm:$0xff]  ;;  %v103_v31 = vld [vmem:[%s4373_s2 + $0x170] sm:$0xff]  ;;  %v2428_v32 = vpack.c.bf16 %v120_v24, %v119_v23  ;;  %v137_v34 = vld [vmem:[%s4373_s2 + $0x280] sm:$0xff] }
  0x17   :  { %2419 = vmatpush3.bf16.msra.mxu1 %v2418_v63  ;;  %408 = vmatprep.mubr.f32.mxu0 %v328_v21  ;;  %v104_v33 = vld [vmem:[%s4373_s2 + $0x178] sm:$0xff]  ;;  %v138_v35 = vld [vmem:[%s4373_s2 + $0x288] sm:$0xff]  ;;  %v169_v36 = vld [vmem:[%s4373_s2 + $0x380] sm:$0xff]  ;;  %v2398_v38 = vpack.c.bf16 %v72_v30, %v71_v29 }
  0x18   :  { %2421 = vmatprep.subr.bf16.mxu1 %v2420_v4  ;;  %478 = vmatprep.mubr.f32.mxu1 %v329_v25  ;;  %v170_v37 = vld [vmem:[%s4373_s2 + $0x388] sm:$0xff]  ;;  %v2430_v39 = vpack.c.bf16 %v104_v33, %v103_v31  ;;  %v2432_v40 = vpack.c.bf16 %v138_v35, %v137_v34  ;;  %v121_v41 = vld [vmem:[%s4373_s2 + $0x200] sm:$0xff]  ;;  %v139_v46 = vld [vmem:[%s4373_s2 + $0x290] sm:$0xff] }
  0x19   :  { %2391 = vmatpush3.bf16.msra.mxu0 %v2390_v10  ;;  %v122_v42 = vld [vmem:[%s4373_s2 + $0x208] sm:$0xff]  ;;  %v153_v43 = vld [vmem:[%s4373_s2 + $0x300] sm:$0xff]  ;;  %v2464_v44 = vpack.c.bf16 %v170_v37, %v169_v36  ;;  %v140_v47 = vld [vmem:[%s4373_s2 + $0x298] sm:$0xff] }
  0x1a   :  { %2393 = vmatprep.subr.bf16.mxu0 %v2392_v14  ;;  %v154_v45 = vld [vmem:[%s4373_s2 + $0x308] sm:$0xff]  ;;  %v171_v48 = vld [vmem:[%s4373_s2 + $0x390] sm:$0xff]  ;;  %v172_v49 = vld [vmem:[%s4373_s2 + $0x398] sm:$0xff]  ;;  %v2434_v50 = vpack.c.bf16 %v122_v42, %v121_v41  ;;  %v2436_v52 = vpack.c.bf16 %v140_v47, %v139_v46 }
  0x1b   :  { %2423 = vmatpush3.bf16.msra.mxu1 %v2422_v13  ;;  %v2466_v51 = vpack.c.bf16 %v154_v45, %v153_v43  ;;  %v123_v53 = vld [vmem:[%s4373_s2 + $0x210] sm:$0xff]  ;;  %v124_v54 = vld [vmem:[%s4373_s2 + $0x218] sm:$0xff]  ;;  %v2468_v56 = vpack.c.bf16 %v172_v49, %v171_v48  ;;  %v141_v58 = vld [vmem:[%s4373_s2 + $0x2a0] sm:$0xff] }
  0x1c   :  { %2425 = vmatprep.subr.bf16.mxu1 %v2424_v18  ;;  %v155_v55 = vld [vmem:[%s4373_s2 + $0x310] sm:$0xff]  ;;  %v156_v57 = vld [vmem:[%s4373_s2 + $0x318] sm:$0xff]  ;;  %v142_v59 = vld [vmem:[%s4373_s2 + $0x2a8] sm:$0xff]  ;;  %v2438_v62 = vpack.c.bf16 %v124_v54, %v123_v53 }
  0x1d   :  { %2395 = vmatpush3.bf16.msra.mxu0 %v2394_v26  ;;  %v173_v60 = vld [vmem:[%s4373_s2 + $0x3a0] sm:$0xff]  ;;  %v174_v61 = vld [vmem:[%s4373_s2 + $0x3a8] sm:$0xff]  ;;  %v2470_v63 = vpack.c.bf16 %v156_v57, %v155_v55  ;;  %v2440_v0 = vpack.c.bf16 %v142_v59, %v141_v58  ;;  %v143_v6 = vld [vmem:[%s4373_s2 + $0x2b0] sm:$0xff] }
  0x1e   :  { %2397 = vmatprep.subr.bf16.mxu0 %v2396_v28  ;;  %v125_v1 = vld [vmem:[%s4373_s2 + $0x220] sm:$0xff]  ;;  %v126_v2 = vld [vmem:[%s4373_s2 + $0x228] sm:$0xff]  ;;  %v2472_v4 = vpack.c.bf16 %v174_v61, %v173_v60  ;;  %v144_v7 = vld [vmem:[%s4373_s2 + $0x2b8] sm:$0xff] }
  0x1f   :  { %2427 = vmatpush3.bf16.msra.mxu1 %v2426_v27  ;;  %v157_v3 = vld [vmem:[%s4373_s2 + $0x320] sm:$0xff]  ;;  %v158_v5 = vld [vmem:[%s4373_s2 + $0x328] sm:$0xff]  ;;  %v175_v8 = vld [vmem:[%s4373_s2 + $0x3b0] sm:$0xff]  ;;  %v2442_v10 = vpack.c.bf16 %v126_v2, %v125_v1  ;;  %v2444_v12 = vpack.c.bf16 %v144_v7, %v143_v6 }
  0x20   :  { %2429 = vmatprep.subr.bf16.mxu1 %v2428_v32  ;;  %v176_v9 = vld [vmem:[%s4373_s2 + $0x3b8] sm:$0xff]  ;;  %v2474_v11 = vpack.c.bf16 %v158_v5, %v157_v3  ;;  %v127_v13 = vld [vmem:[%s4373_s2 + $0x230] sm:$0xff]  ;;  %v145_v18 = vld [vmem:[%s4373_s2 + $0x2c0] sm:$0xff] }
  0x21   :  { %2399 = vmatpush3.bf16.msra.mxu0 %v2398_v38  ;;  %v128_v14 = vld [vmem:[%s4373_s2 + $0x238] sm:$0xff]  ;;  %v159_v15 = vld [vmem:[%s4373_s2 + $0x330] sm:$0xff]  ;;  %v2476_v16 = vpack.c.bf16 %v176_v9, %v175_v8  ;;  %v146_v19 = vld [vmem:[%s4373_s2 + $0x2c8] sm:$0xff] }
  0x22   :  { %2433 = vmatprep.subr.bf16.mxu0 %v2432_v40  ;;  %v177_v20 = vld [vmem:[%s4373_s2 + $0x3c0] sm:$0xff]  ;;  %v178_v21 = vld [vmem:[%s4373_s2 + $0x3c8] sm:$0xff]  ;;  %v2446_v23 = vpack.c.bf16 %v128_v14, %v127_v13  ;;  %v3274_v25 = vld [vmem:[%s4374_s0 + $0x18] sm:$0xff]  ;;  %v2448_v27 = vpack.c.bf16 %v146_v19, %v145_v18 }
  0x23   :  { %2431 = vmatpush3.bf16.msra.mxu1 %v2430_v39  ;;  %v129_v28 = vld [vmem:[%s4373_s2 + $0x240] sm:$0xff]  ;;  %v130_v29 = vld [vmem:[%s4373_s2 + $0x248] sm:$0xff]  ;;  %v331_v31 = vcombine.high %v3274_v25, %v3274_v25  ;;  %v2480_v32 = vpack.c.bf16 %v178_v21, %v177_v20  ;;  %v147_v34 = vld [vmem:[%s4373_s2 + $0x2d0] sm:$0xff] }
  0x24   :  { %2465 = vmatprep.subr.bf16.mxu1 %v2464_v44  ;;  %409 = vmatmul.mubr.f32.vlgmr.msra.gmra.mrb[0].mxu0 %v49_v17  ;;  %v160_v17 = vld [vmem:[%s4373_s2 + $0x338] sm:$0xff]  ;;  %v161_v30 = vld [vmem:[%s4373_s2 + $0x340] sm:$0xff]  ;;  %v162_v33 = vld [vmem:[%s4373_s2 + $0x348] sm:$0xff]  ;;  %v2450_v38 = vpack.c.bf16 %v130_v29, %v129_v28 }
  0x25   :  { %2435 = vmatpush3.bf16.msra.mxu0 %v2434_v50  ;;  %v2478_v26 = vpack.c.bf16 %v160_v17, %v159_v15  ;;  %v148_v35 = vld [vmem:[%s4373_s2 + $0x2d8] sm:$0xff]  ;;  %v179_v36 = vld [vmem:[%s4373_s2 + $0x3d0] sm:$0xff]  ;;  %v2482_v39 = vpack.c.bf16 %v162_v33, %v161_v30  ;;  %v149_v46 = vld [vmem:[%s4373_s2 + $0x2e0] sm:$0xff] }
  0x26   :  { %479 = vmatmul.mubr.f32.vlgmr.msra.gmra.mrb[0].mxu1 %v50_v22  ;;  %2437 = vmatprep.subr.bf16.mxu0 %v2436_v52  ;;  %v3267_v22 = vld [vmem:[%s4374_s0 + $0x10] sm:$0xff]  ;;  %v180_v37 = vld [vmem:[%s4373_s2 + $0x3d8] sm:$0xff]  ;;  %v2452_v40 = vpack.c.bf16 %v148_v35, %v147_v34  ;;  %v150_v47 = vld [vmem:[%s4373_s2 + $0x2e8] sm:$0xff] }
  0x27   :  { %2467 = vmatpush3.bf16.msra.mxu1 %v2466_v51  ;;  %v330_v24 = vcombine.high %v3267_v22, %v3267_v22  ;;  %618 = vmatprep.mubr.f32.mxu1 %v331_v31  ;;  %v131_v41 = vld [vmem:[%s4373_s2 + $0x250] sm:$0xff]  ;;  %v132_v42 = vld [vmem:[%s4373_s2 + $0x258] sm:$0xff]  ;;  %v2484_v44 = vpack.c.bf16 %v180_v37, %v179_v36  ;;  %v181_v48 = vld [vmem:[%s4373_s2 + $0x3e0] sm:$0xff]  ;;  %v2456_v52 = vpack.c.bf16 %v150_v47, %v149_v46 }
  0x28   :  { %2469 = vmatprep.subr.bf16.mxu1 %v2468_v56  ;;  %v163_v43 = vld [vmem:[%s4373_s2 + $0x350] sm:$0xff]  ;;  %v164_v45 = vld [vmem:[%s4373_s2 + $0x358] sm:$0xff]  ;;  %v182_v49 = vld [vmem:[%s4373_s2 + $0x3e8] sm:$0xff]  ;;  %v2454_v50 = vpack.c.bf16 %v132_v42, %v131_v41 }
  0x29   :  { %2439 = vmatpush3.bf16.msra.mxu0 %v2438_v62  ;;  %548 = vmatprep.mubr.f32.mxu0 %v330_v24  ;;  %v2486_v51 = vpack.c.bf16 %v164_v45, %v163_v43  ;;  %v133_v53 = vld [vmem:[%s4373_s2 + $0x260] sm:$0xff]  ;;  %v134_v54 = vld [vmem:[%s4373_s2 + $0x268] sm:$0xff]  ;;  %v2488_v56 = vpack.c.bf16 %v182_v49, %v181_v48  ;;  %v151_v58 = vld [vmem:[%s4373_s2 + $0x2f0] sm:$0xff] }
  0x2a   :  { %2441 = vmatprep.subr.bf16.mxu0 %v2440_v0  ;;  %v165_v55 = vld [vmem:[%s4373_s2 + $0x360] sm:$0xff]  ;;  %v166_v57 = vld [vmem:[%s4373_s2 + $0x368] sm:$0xff]  ;;  %v152_v59 = vld [vmem:[%s4373_s2 + $0x2f8] sm:$0xff]  ;;  %v2458_v62 = vpack.c.bf16 %v134_v54, %v133_v53 }
  0x2b   :  { %2471 = vmatpush3.bf16.msra.mxu1 %v2470_v63  ;;  %v183_v60 = vld [vmem:[%s4373_s2 + $0x3f0] sm:$0xff]  ;;  %v184_v61 = vld [vmem:[%s4373_s2 + $0x3f8] sm:$0xff]  ;;  %v2490_v63 = vpack.c.bf16 %v166_v57, %v165_v55  ;;  %v2460_v0 = vpack.c.bf16 %v152_v59, %v151_v58  ;;  %v201_v6 = vld [vmem:[%s4373_s2 + $0x480] sm:$0xff] }
  0x2c   :  { %2473 = vmatprep.subr.bf16.mxu1 %v2472_v4  ;;  %v135_v1 = vld [vmem:[%s4373_s2 + $0x270] sm:$0xff]  ;;  %v136_v2 = vld [vmem:[%s4373_s2 + $0x278] sm:$0xff]  ;;  %v2492_v4 = vpack.c.bf16 %v184_v61, %v183_v60  ;;  %v202_v7 = vld [vmem:[%s4373_s2 + $0x488] sm:$0xff] }
  0x2d   :  { %2443 = vmatpush3.bf16.msra.mxu0 %v2442_v10  ;;  %v167_v3 = vld [vmem:[%s4373_s2 + $0x370] sm:$0xff]  ;;  %v168_v5 = vld [vmem:[%s4373_s2 + $0x378] sm:$0xff]  ;;  %v233_v8 = vld [vmem:[%s4373_s2 + $0x580] sm:$0xff]  ;;  %v2462_v10 = vpack.c.bf16 %v136_v2, %v135_v1 }
  0x2e   :  { %2445 = vmatprep.subr.bf16.mxu0 %v2444_v12  ;;  %v234_v9 = vld [vmem:[%s4373_s2 + $0x588] sm:$0xff]  ;;  %v2496_v12 = vpack.c.bf16 %v202_v7, %v201_v6  ;;  %v185_v13 = vld [vmem:[%s4373_s2 + $0x400] sm:$0xff]  ;;  %v203_v18 = vld [vmem:[%s4373_s2 + $0x490] sm:$0xff] }
  0x2f   :  { %2475 = vmatpush3.bf16.msra.mxu1 %v2474_v11  ;;  %v2494_v11 = vpack.c.bf16 %v168_v5, %v167_v3  ;;  %v186_v14 = vld [vmem:[%s4373_s2 + $0x408] sm:$0xff]  ;;  %v217_v15 = vld [vmem:[%s4373_s2 + $0x500] sm:$0xff]  ;;  %v204_v19 = vld [vmem:[%s4373_s2 + $0x498] sm:$0xff] }
  0x30   :  { %2477 = vmatprep.subr.bf16.mxu1 %v2476_v16  ;;  %v2528_v16 = vpack.c.bf16 %v234_v9, %v233_v8  ;;  %v218_v17 = vld [vmem:[%s4373_s2 + $0x508] sm:$0xff]  ;;  %v235_v20 = vld [vmem:[%s4373_s2 + $0x590] sm:$0xff]  ;;  %v236_v21 = vld [vmem:[%s4373_s2 + $0x598] sm:$0xff]  ;;  %v2500_v28 = vpack.c.bf16 %v204_v19, %v203_v18 }
  0x31   :  { %2447 = vmatpush3.bf16.msra.mxu0 %v2446_v23  ;;  %v2498_v23 = vpack.c.bf16 %v186_v14, %v185_v13  ;;  %v187_v24 = vld [vmem:[%s4373_s2 + $0x410] sm:$0xff]  ;;  %v220_v30 = vld [vmem:[%s4373_s2 + $0x518] sm:$0xff]  ;;  %v3413_v31 = vld [vmem:[%s4374_s0 + $0x20] sm:$0xff] }
  0x32   :  { %2449 = vmatprep.subr.bf16.mxu0 %v2448_v27  ;;  %v2530_v27 = vpack.c.bf16 %v218_v17, %v217_v15  ;;  %v219_v29 = vld [vmem:[%s4373_s2 + $0x510] sm:$0xff]  ;;  %v205_v33 = vld [vmem:[%s4373_s2 + $0x4a0] sm:$0xff]  ;;  %v206_v34 = vld [vmem:[%s4373_s2 + $0x4a8] sm:$0xff]  ;;  %v332_v35 = vcombine.high %v3413_v31, %v3413_v31 }
  0x33   :  { %2479 = vmatpush3.bf16.msra.mxu1 %v2478_v26  ;;  %v188_v26 = vld [vmem:[%s4373_s2 + $0x418] sm:$0xff]  ;;  %v3426_v36 = vld [vmem:[%s4374_s0 + $0x28] sm:$0xff]  ;;  %v237_v37 = vld [vmem:[%s4373_s2 + $0x5a0] sm:$0xff]  ;;  %v2534_v41 = vpack.c.bf16 %v220_v30, %v219_v29  ;;  %v2504_v42 = vpack.c.bf16 %v206_v34, %v205_v33 }
  0x34   :  { %2481 = vmatprep.subr.bf16.mxu1 %v2480_v32  ;;  %v2532_v32 = vpack.c.bf16 %v236_v21, %v235_v20  ;;  %v190_v43 = vld [vmem:[%s4373_s2 + $0x428] sm:$0xff]  ;;  %v207_v46 = vld [vmem:[%s4373_s2 + $0x4b0] sm:$0xff]  ;;  %v208_v47 = vld [vmem:[%s4373_s2 + $0x4b8] sm:$0xff] }
  0x35   :  { %2451 = vmatpush3.bf16.msra.mxu0 %v2450_v38  ;;  %v238_v38 = vld [vmem:[%s4373_s2 + $0x5a8] sm:$0xff]  ;;  %v239_v48 = vld [vmem:[%s4373_s2 + $0x5b0] sm:$0xff]  ;;  %v240_v49 = vld [vmem:[%s4373_s2 + $0x5b8] sm:$0xff] }
  0x36   :  { %2453 = vmatprep.subr.bf16.mxu0 %v2452_v40  ;;  %v2502_v40 = vpack.c.bf16 %v188_v26, %v187_v24  ;;  %v2536_v45 = vpack.c.bf16 %v238_v38, %v237_v37  ;;  %v191_v53 = vld [vmem:[%s4373_s2 + $0x430] sm:$0xff]  ;;  %v192_v54 = vld [vmem:[%s4373_s2 + $0x438] sm:$0xff]  ;;  %v209_v58 = vld [vmem:[%s4373_s2 + $0x4c0] sm:$0xff] }
  0x37   :  { %2483 = vmatpush3.bf16.msra.mxu1 %v2482_v39  ;;  %v333_v39 = vcombine.high %v3426_v36, %v3426_v36  ;;  %v223_v55 = vld [vmem:[%s4373_s2 + $0x530] sm:$0xff]  ;;  %v224_v57 = vld [vmem:[%s4373_s2 + $0x538] sm:$0xff]  ;;  %v210_v59 = vld [vmem:[%s4373_s2 + $0x4c8] sm:$0xff] }
  0x38   :  { %2485 = vmatprep.subr.bf16.mxu1 %v2484_v44  ;;  %v221_v44 = vld [vmem:[%s4373_s2 + $0x520] sm:$0xff]  ;;  %v242_v61 = vld [vmem:[%s4373_s2 + $0x5c8] sm:$0xff]  ;;  %v211_v6 = vld [vmem:[%s4373_s2 + $0x4d0] sm:$0xff] }
  0x39   :  { %2455 = vmatpush3.bf16.msra.mxu0 %v2454_v50  ;;  %v241_v60 = vld [vmem:[%s4373_s2 + $0x5c0] sm:$0xff]  ;;  %v194_v2 = vld [vmem:[%s4373_s2 + $0x448] sm:$0xff]  ;;  %v212_v7 = vld [vmem:[%s4373_s2 + $0x4d8] sm:$0xff] }
  0x3a   :  { %2457 = vmatprep.subr.bf16.mxu0 %v2456_v52  ;;  %v2508_v52 = vpack.c.bf16 %v208_v47, %v207_v46  ;;  %v193_v1 = vld [vmem:[%s4373_s2 + $0x440] sm:$0xff]  ;;  %v226_v5 = vld [vmem:[%s4373_s2 + $0x548] sm:$0xff]  ;;  %v243_v8 = vld [vmem:[%s4373_s2 + $0x5d0] sm:$0xff] }
  0x3b   :  { %2487 = vmatpush3.bf16.msra.mxu1 %v2486_v51  ;;  %v225_v3 = vld [vmem:[%s4373_s2 + $0x540] sm:$0xff]  ;;  %v244_v9 = vld [vmem:[%s4373_s2 + $0x5d8] sm:$0xff]  ;;  %v195_v13 = vld [vmem:[%s4373_s2 + $0x450] sm:$0xff] }
  0x3c   :  { %2489 = vmatprep.subr.bf16.mxu1 %v2488_v56  ;;  %v2540_v56 = vpack.c.bf16 %v240_v49, %v239_v48  ;;  %v196_v14 = vld [vmem:[%s4373_s2 + $0x458] sm:$0xff]  ;;  %v227_v15 = vld [vmem:[%s4373_s2 + $0x550] sm:$0xff]  ;;  %v213_v18 = vld [vmem:[%s4373_s2 + $0x4e0] sm:$0xff] }
  0x3d   :  { %2459 = vmatpush3.bf16.msra.mxu0 %v2458_v62  ;;  %v2510_v62 = vpack.c.bf16 %v192_v54, %v191_v53  ;;  %v228_v17 = vld [vmem:[%s4373_s2 + $0x558] sm:$0xff]  ;;  %v214_v19 = vld [vmem:[%s4373_s2 + $0x4e8] sm:$0xff]  ;;  %v245_v20 = vld [vmem:[%s4373_s2 + $0x5e0] sm:$0xff] }
  0x3e   :  { %2461 = vmatprep.subr.bf16.mxu0 %v2460_v0  ;;  %v2512_v0 = vpack.c.bf16 %v210_v59, %v209_v58  ;;  %v246_v21 = vld [vmem:[%s4373_s2 + $0x5e8] sm:$0xff]  ;;  %v2550_v24 = vpack.c.bf16 %v228_v17, %v227_v15  ;;  %v2520_v26 = vpack.c.bf16 %v214_v19, %v213_v18  ;;  %v229_v29 = vld [vmem:[%s4373_s2 + $0x560] sm:$0xff]  ;;  %v215_v33 = vld [vmem:[%s4373_s2 + $0x4f0] sm:$0xff] }
  0x3f   :  { %2491 = vmatpush3.bf16.msra.mxu1 %v2490_v63  ;;  %v2542_v63 = vpack.c.bf16 %v224_v57, %v223_v55  ;;  %v2552_v30 = vpack.c.bf16 %v246_v21, %v245_v20  ;;  %v216_v34 = vld [vmem:[%s4373_s2 + $0x4f8] sm:$0xff]  ;;  %v297_v46 = vld [vmem:[%s4373_s2 + $0x780] sm:$0xff]  ;;  %v298_v47 = vld [vmem:[%s4373_s2 + $0x788] sm:$0xff] }
  0x40   :  { %2493 = vmatprep.subr.bf16.mxu1 %v2492_v4  ;;  %v2544_v4 = vpack.c.bf16 %v242_v61, %v241_v60  ;;  %v248_v37 = vld [vmem:[%s4373_s2 + $0x5f8] sm:$0xff]  ;;  %v281_v53 = vld [vmem:[%s4373_s2 + $0x700] sm:$0xff]  ;;  %v2592_v54 = vpack.c.bf16 %v298_v47, %v297_v46  ;;  %v282_v55 = vld [vmem:[%s4373_s2 + $0x708] sm:$0xff] }
  0x41   :  { %2463 = vmatpush3.bf16.msra.mxu0 %v2462_v10  ;;  %v2514_v10 = vpack.c.bf16 %v194_v2, %v193_v1  ;;  %v268_v57 = vld [vmem:[%s4373_s2 + $0x698] sm:$0xff]  ;;  %v299_v58 = vld [vmem:[%s4373_s2 + $0x790] sm:$0xff]  ;;  %v254_v15 = vld [vmem:[%s4373_s2 + $0x628] sm:$0xff] }
  0x42   :  { %2497 = vmatprep.subr.bf16.mxu0 %v2496_v12  ;;  %v2516_v12 = vpack.c.bf16 %v212_v7, %v211_v6  ;;  %v300_v59 = vld [vmem:[%s4373_s2 + $0x798] sm:$0xff]  ;;  %v3609_v60 = vld [vmem:[%s4374_s0 + $0x30] sm:$0xff]  ;;  %v269_v6 = vld [vmem:[%s4373_s2 + $0x6a0] sm:$0xff] }
  0x43   :  { %2495 = vmatpush3.bf16.msra.mxu1 %v2494_v11  ;;  %v2546_v11 = vpack.c.bf16 %v226_v5, %v225_v3  ;;  %v251_v1 = vld [vmem:[%s4373_s2 + $0x610] sm:$0xff]  ;;  %v252_v2 = vld [vmem:[%s4373_s2 + $0x618] sm:$0xff]  ;;  %v270_v7 = vld [vmem:[%s4373_s2 + $0x6a8] sm:$0xff] }
  0x44   :  { %2529 = vmatprep.subr.bf16.mxu1 %v2528_v16  ;;  %549 = vmatmul.mubr.f32.vlgmr.msra.gmra.mrb[2].mxu0 %v3267_v22  ;;  %v189_v22 = vld [vmem:[%s4373_s2 + $0x420] sm:$0xff]  ;;  %v2548_v16 = vpack.c.bf16 %v244_v9, %v243_v8  ;;  %v283_v3 = vld [vmem:[%s4373_s2 + $0x710] sm:$0xff]  ;;  %v284_v5 = vld [vmem:[%s4373_s2 + $0x718] sm:$0xff]  ;;  %v334_v8 = vcombine.high %v3609_v60, %v3609_v60 }
  0x45   :  { %2499 = vmatpush3.bf16.msra.mxu0 %v2498_v23  ;;  %688 = vmatprep.mubr.f32.mxu0 %v332_v35  ;;  %v2506_v50 = vpack.c.bf16 %v190_v43, %v189_v22  ;;  %v2518_v23 = vpack.c.bf16 %v196_v14, %v195_v13  ;;  %v247_v35 = vld [vmem:[%s4373_s2 + $0x5f0] sm:$0xff]  ;;  %v301_v9 = vld [vmem:[%s4373_s2 + $0x7a0] sm:$0xff]  ;;  %v2598_v13 = vpack.c.bf16 %v284_v5, %v283_v3  ;;  %v272_v19 = vld [vmem:[%s4373_s2 + $0x6b8] sm:$0xff] }
  0x46   :  { %619 = vmatmul.mubr.f32.vlgmr.msra.gmra.mrb[2].mxu1 %v3274_v25  ;;  %2501 = vmatprep.subr.bf16.mxu0 %v2500_v28  ;;  %v222_v25 = vld [vmem:[%s4373_s2 + $0x528] sm:$0xff]  ;;  %v231_v22 = vld [vmem:[%s4373_s2 + $0x570] sm:$0xff]  ;;  %v2556_v43 = vpack.c.bf16 %v248_v37, %v247_v35  ;;  %v2568_v14 = vpack.c.bf16 %v270_v7, %v269_v6  ;;  %v304_v21 = vld [vmem:[%s4373_s2 + $0x7b8] sm:$0xff] }
  0x47   :  { %2531 = vmatpush3.bf16.msra.mxu1 %v2530_v27  ;;  %758 = vmatprep.mubr.f32.mxu1 %v333_v39  ;;  %v2538_v51 = vpack.c.bf16 %v222_v25, %v221_v44  ;;  %v197_v27 = vld [vmem:[%s4373_s2 + $0x460] sm:$0xff]  ;;  %v198_v28 = vld [vmem:[%s4373_s2 + $0x468] sm:$0xff]  ;;  %v232_v44 = vld [vmem:[%s4373_s2 + $0x578] sm:$0xff] }
  0x48   :  { %2533 = vmatprep.subr.bf16.mxu1 %v2532_v32  ;;  %v230_v32 = vld [vmem:[%s4373_s2 + $0x568] sm:$0xff]  ;;  %v2522_v38 = vpack.c.bf16 %v198_v28, %v197_v27  ;;  %v2558_v49 = vpack.c.bf16 %v232_v44, %v231_v22  ;;  %v271_v18 = vld [vmem:[%s4373_s2 + $0x6b0] sm:$0xff]  ;;  %v256_v28 = vld [vmem:[%s4373_s2 + $0x638] sm:$0xff] }
  0x49   :  { %2503 = vmatpush3.bf16.msra.mxu0 %v2502_v40  ;;  %v2554_v39 = vpack.c.bf16 %v230_v32, %v229_v29  ;;  %v2524_v40 = vpack.c.bf16 %v216_v34, %v215_v33  ;;  %v266_v25 = vld [vmem:[%s4373_s2 + $0x688] sm:$0xff]  ;;  %v303_v20 = vld [vmem:[%s4373_s2 + $0x7b0] sm:$0xff]  ;;  %v288_v32 = vld [vmem:[%s4373_s2 + $0x738] sm:$0xff] }
  0x4a   :  { %2505 = vmatprep.subr.bf16.mxu0 %v2504_v42  ;;  %v200_v42 = vld [vmem:[%s4373_s2 + $0x478] sm:$0xff]  ;;  %v255_v27 = vld [vmem:[%s4373_s2 + $0x630] sm:$0xff]  ;;  %v273_v33 = vld [vmem:[%s4373_s2 + $0x6c0] sm:$0xff] }
  0x4b   :  { %2535 = vmatpush3.bf16.msra.mxu1 %v2534_v41  ;;  %v199_v41 = vld [vmem:[%s4373_s2 + $0x470] sm:$0xff]  ;;  %v274_v34 = vld [vmem:[%s4373_s2 + $0x6c8] sm:$0xff]  ;;  %v305_v35 = vld [vmem:[%s4373_s2 + $0x7c0] sm:$0xff] }
  0x4c   :  { %2537 = vmatprep.subr.bf16.mxu1 %v2536_v45  ;;  %v265_v45 = vld [vmem:[%s4373_s2 + $0x680] sm:$0xff]  ;;  %v2526_v48 = vpack.c.bf16 %v200_v42, %v199_v41  ;;  %v287_v29 = vld [vmem:[%s4373_s2 + $0x730] sm:$0xff]  ;;  %v306_v37 = vld [vmem:[%s4373_s2 + $0x7c8] sm:$0xff] }
  0x4d   :  { %2507 = vmatpush3.bf16.msra.mxu0 %v2506_v50  ;;  %v2560_v50 = vpack.c.bf16 %v266_v25, %v265_v45  ;;  %v257_v41 = vld [vmem:[%s4373_s2 + $0x640] sm:$0xff]  ;;  %v258_v42 = vld [vmem:[%s4373_s2 + $0x648] sm:$0xff]  ;;  %v275_v45 = vld [vmem:[%s4373_s2 + $0x6d0] sm:$0xff] }
  0x4e   :  { %2509 = vmatprep.subr.bf16.mxu0 %v2508_v52  ;;  %v250_v52 = vld [vmem:[%s4373_s2 + $0x608] sm:$0xff]  ;;  %v289_v22 = vld [vmem:[%s4373_s2 + $0x740] sm:$0xff]  ;;  %v276_v25 = vld [vmem:[%s4373_s2 + $0x6d8] sm:$0xff] }
  0x4f   :  { %2539 = vmatpush3.bf16.msra.mxu1 %v2538_v51  ;;  %v249_v51 = vld [vmem:[%s4373_s2 + $0x600] sm:$0xff]  ;;  %v290_v44 = vld [vmem:[%s4373_s2 + $0x748] sm:$0xff]  ;;  %v307_v46 = vld [vmem:[%s4373_s2 + $0x7d0] sm:$0xff] }
  0x50   :  { %2541 = vmatprep.subr.bf16.mxu1 %v2540_v56  ;;  %v267_v56 = vld [vmem:[%s4373_s2 + $0x690] sm:$0xff]  ;;  %v2562_v61 = vpack.c.bf16 %v250_v52, %v249_v51  ;;  %v308_v47 = vld [vmem:[%s4373_s2 + $0x7d8] sm:$0xff]  ;;  %v293_v3 = vld [vmem:[%s4373_s2 + $0x760] sm:$0xff] }
  0x51   :  { %2511 = vmatpush3.bf16.msra.mxu0 %v2510_v62  ;;  %v3614_v62 = vld [vmem:[%s4374_s0 + $0x38] sm:$0xff]  ;;  %v259_v51 = vld [vmem:[%s4373_s2 + $0x650] sm:$0xff]  ;;  %v294_v5 = vld [vmem:[%s4373_s2 + $0x768] sm:$0xff] }
  0x52   :  { %2513 = vmatprep.subr.bf16.mxu0 %v2512_v0  ;;  %v2564_v0 = vpack.c.bf16 %v268_v57, %v267_v56  ;;  %v260_v52 = vld [vmem:[%s4373_s2 + $0x658] sm:$0xff]  ;;  %v277_v56 = vld [vmem:[%s4373_s2 + $0x6e0] sm:$0xff]  ;;  %v278_v57 = vld [vmem:[%s4373_s2 + $0x6e8] sm:$0xff] }
  0x53   :  { %2543 = vmatpush3.bf16.msra.mxu1 %v2542_v63  ;;  %v2594_v63 = vpack.c.bf16 %v282_v55, %v281_v53  ;;  %v291_v53 = vld [vmem:[%s4373_s2 + $0x750] sm:$0xff]  ;;  %v292_v55 = vld [vmem:[%s4373_s2 + $0x758] sm:$0xff] }
  0x54   :  { %2545 = vmatprep.subr.bf16.mxu1 %v2544_v4  ;;  %v2596_v4 = vpack.c.bf16 %v300_v59, %v299_v58  ;;  %v309_v58 = vld [vmem:[%s4373_s2 + $0x7e0] sm:$0xff]  ;;  %v310_v59 = vld [vmem:[%s4373_s2 + $0x7e8] sm:$0xff]  ;;  %v279_v6 = vld [vmem:[%s4373_s2 + $0x6f0] sm:$0xff] }
  0x55   :  { %2515 = vmatpush3.bf16.msra.mxu0 %v2514_v10  ;;  %v302_v10 = vld [vmem:[%s4373_s2 + $0x7a8] sm:$0xff]  ;;  %v280_v7 = vld [vmem:[%s4373_s2 + $0x6f8] sm:$0xff] }
  0x56   :  { %2517 = vmatprep.subr.bf16.mxu0 %v2516_v12  ;;  %v2566_v12 = vpack.c.bf16 %v252_v2, %v251_v1  ;;  %v2600_v17 = vpack.c.bf16 %v302_v10, %v301_v9  ;;  %v261_v1 = vld [vmem:[%s4373_s2 + $0x660] sm:$0xff]  ;;  %v262_v2 = vld [vmem:[%s4373_s2 + $0x668] sm:$0xff]  ;;  %v312_v9 = vld [vmem:[%s4373_s2 + $0x7f8] sm:$0xff] }
  0x57   :  { %2547 = vmatpush3.bf16.msra.mxu1 %v2546_v11  ;;  %v335_v11 = vcombine.high %v3614_v62, %v3614_v62  ;;  %v2586_v10 = vpack.c.bf16 %v262_v2, %v261_v1  ;;  %v939_v1 = vld [vmem:[%s4375_s4 + $0x110] sm:$0xff] }
  0x58   :  { %2549 = vmatprep.subr.bf16.mxu1 %v2548_v16  ;;  %v285_v16 = vld [vmem:[%s4373_s2 + $0x720] sm:$0xff] }
  0x59   :  { %2519 = vmatpush3.bf16.msra.mxu0 %v2518_v23 }
  0x5a   :  { %2521 = vmatprep.subr.bf16.mxu0 %v2520_v26  ;;  %v2572_v26 = vpack.c.bf16 %v272_v19, %v271_v18  ;;  %v906_v18 = vld [vmem:[%s4375_s4 + $0x8] sm:$0xff]  ;;  %v909_v19 = vld [vmem:[%s4375_s4 + $0x20] sm:$0xff] }
  0x5b   :  { %2551 = vmatpush3.bf16.msra.mxu1 %v2550_v24 }
  0x5c   :  { %2553 = vmatprep.subr.bf16.mxu1 %v2552_v30  ;;  %v2604_v30 = vpack.c.bf16 %v304_v21, %v303_v20  ;;  %v905_v20 = vld [vmem:[%s4375_s4] sm:$0xff]  ;;  %v2624_v21 = vpack.c.bf16 %v909_v19, %v906_v18  ;;  %v948_v18 = vld [vmem:[%s4375_s4 + $0x158] sm:$0xff]  ;;  %v951_v19 = vld [vmem:[%s4375_s4 + $0x170] sm:$0xff] }
  0x5d   :  { %2523 = vmatpush3.bf16.msra.mxu0 %v2522_v38  ;;  %v2574_v38 = vpack.c.bf16 %v256_v28, %v255_v27  ;;  %v912_v28 = vld [vmem:[%s4375_s4 + $0x38] sm:$0xff] }
  0x5e   :  { %2525 = vmatprep.subr.bf16.mxu0 %v2524_v40  ;;  %v2576_v40 = vpack.c.bf16 %v274_v34, %v273_v33  ;;  %v914_v33 = vld [vmem:[%s4375_s4 + $0x48] sm:$0xff]  ;;  %v913_v34 = vld [vmem:[%s4375_s4 + $0x40] sm:$0xff] }
  0x5f   :  { %2555 = vmatpush3.bf16.msra.mxu1 %v2554_v39  ;;  %v2606_v39 = vpack.c.bf16 %v288_v32, %v287_v29  ;;  %v915_v29 = vld [vmem:[%s4375_s4 + $0x50] sm:$0xff] }
  0x60   :  { %2557 = vmatprep.subr.bf16.mxu1 %v2556_v43  ;;  %v2608_v43 = vpack.c.bf16 %v306_v37, %v305_v35  ;;  %v2628_v32 = vpack.c.bf16 %v915_v29, %v912_v28  ;;  %v916_v35 = vld [vmem:[%s4375_s4 + $0x58] sm:$0xff]  ;;  %v1112_v28 = vld [vmem:[%s4376_s6 + $0x8] sm:$0xff]  ;;  %v1115_v29 = vld [vmem:[%s4376_s6 + $0x20] sm:$0xff] }
  0x61   :  { %2527 = vmatpush3.bf16.msra.mxu0 %v2526_v48  ;;  %v2578_v48 = vpack.c.bf16 %v258_v42, %v257_v41  ;;  %v917_v41 = vld [vmem:[%s4375_s4 + $0x60] sm:$0xff] }
  0x62   :  { %2561 = vmatprep.subr.bf16.mxu0 %v2560_v50  ;;  %v2580_v50 = vpack.c.bf16 %v276_v25, %v275_v45  ;;  %v924_v45 = vld [vmem:[%s4375_s4 + $0x98] sm:$0xff]  ;;  %v927_v25 = vld [vmem:[%s4375_s4 + $0xb0] sm:$0xff] }
  0x63   :  { %2559 = vmatpush3.bf16.msra.mxu1 %v2558_v49  ;;  %v2610_v49 = vpack.c.bf16 %v290_v44, %v289_v22  ;;  %v920_v22 = vld [vmem:[%s4375_s4 + $0x78] sm:$0xff]  ;;  %v922_v44 = vld [vmem:[%s4375_s4 + $0x88] sm:$0xff] }
  0x64   :  { %2593 = vmatprep.subr.bf16.mxu1 %v2592_v54  ;;  %689 = vmatmul.mubr.f32.vlgmr.msra.gmra.mrb[4].mxu0 %v3413_v31  ;;  %v253_v31 = vld [vmem:[%s4373_s2 + $0x620] sm:$0xff]  ;;  %v2612_v54 = vpack.c.bf16 %v308_v47, %v307_v46  ;;  %v2634_v46 = vpack.c.bf16 %v920_v22, %v917_v41 }
  0x65   :  { %2563 = vmatpush3.bf16.msra.mxu0 %v2562_v61  ;;  %828 = vmatprep.mubr.f32.mxu0 %v334_v8  ;;  %v2570_v23 = vpack.c.bf16 %v254_v15, %v253_v31  ;;  %v2582_v61 = vpack.c.bf16 %v260_v52, %v259_v51  ;;  %v311_v8 = vld [vmem:[%s4373_s2 + $0x7f0] sm:$0xff]  ;;  %v925_v51 = vld [vmem:[%s4375_s4 + $0xa0] sm:$0xff]  ;;  %v928_v52 = vld [vmem:[%s4375_s4 + $0xb8] sm:$0xff] }
  0x66   :  { %759 = vmatmul.mubr.f32.vlgmr.msra.gmra.mrb[4].mxu1 %v3426_v36  ;;  %2565 = vmatprep.subr.bf16.mxu0 %v2564_v0  ;;  %v286_v36 = vld [vmem:[%s4373_s2 + $0x728] sm:$0xff]  ;;  %v2584_v0 = vpack.c.bf16 %v278_v57, %v277_v56  ;;  %v2620_v31 = vpack.c.bf16 %v312_v9, %v311_v8  ;;  %v295_v15 = vld [vmem:[%s4373_s2 + $0x770] sm:$0xff]  ;;  %v2666_v56 = vpack.c.bf16 %v928_v52, %v925_v51  ;;  %v929_v57 = vld [vmem:[%s4375_s4 + $0xc0] sm:$0xff] }
  0x67   :  { %2595 = vmatpush3.bf16.msra.mxu1 %v2594_v63  ;;  %898 = vmatprep.mubr.f32.mxu1 %v335_v11  ;;  %v2602_v24 = vpack.c.bf16 %v286_v36, %v285_v16  ;;  %v2614_v63 = vpack.c.bf16 %v292_v55, %v291_v53  ;;  %v2618_v11 = vpack.c.bf16 %v294_v5, %v293_v3  ;;  %v296_v16 = vld [vmem:[%s4373_s2 + $0x778] sm:$0xff]  ;;  %v930_v53 = vld [vmem:[%s4375_s4 + $0xc8] sm:$0xff] }
  0x68   :  { %2597 = vmatprep.subr.bf16.mxu1 %v2596_v4  ;;  %v2616_v4 = vpack.c.bf16 %v310_v59, %v309_v58  ;;  %v2622_v36 = vpack.c.bf16 %v296_v16, %v295_v15  ;;  %v932_v59 = vld [vmem:[%s4375_s4 + $0xd8] sm:$0xff]  ;;  %v943_v16 = vld [vmem:[%s4375_s4 + $0x130] sm:$0xff] }
  0x69   :  { %2567 = vmatpush3.bf16.msra.mxu0 %v2566_v12  ;;  %v2588_v12 = vpack.c.bf16 %v280_v7, %v279_v6  ;;  %v2642_v2 = vpack.c.bf16 %v932_v59, %v929_v57  ;;  %v938_v6 = vld [vmem:[%s4375_s4 + $0x108] sm:$0xff]  ;;  %v937_v7 = vld [vmem:[%s4375_s4 + $0x100] sm:$0xff]  ;;  %v940_v8 = vld [vmem:[%s4375_s4 + $0x118] sm:$0xff] }
  0x6a   :  { %2569 = vmatprep.subr.bf16.mxu0 %v2568_v14  ;;  %v264_v14 = vld [vmem:[%s4373_s2 + $0x678] sm:$0xff] }
  0x6b   :  { %2599 = vmatpush3.bf16.msra.mxu1 %v2598_v13  ;;  %v263_v13 = vld [vmem:[%s4373_s2 + $0x670] sm:$0xff] }
  0x6c   :  { %2601 = vmatprep.subr.bf16.mxu1 %v2600_v17  ;;  %v2590_v17 = vpack.c.bf16 %v264_v14, %v263_v13  ;;  %v941_v14 = vld [vmem:[%s4375_s4 + $0x120] sm:$0xff] }
  0x6d   :  { %2571 = vmatpush3.bf16.msra.mxu0 %v2570_v23  ;;  %v908_v23 = vld [vmem:[%s4375_s4 + $0x18] sm:$0xff] }
  0x6e   :  { %2573 = vmatprep.subr.bf16.mxu0 %v2572_v26  ;;  %v2626_v26 = vpack.c.bf16 %v908_v23, %v905_v20  ;;  %v2652_v20 = vpack.c.bf16 %v951_v19, %v948_v18  ;;  %v950_v23 = vld [vmem:[%s4375_s4 + $0x168] sm:$0xff]  ;;  %v1123_v18 = vld [vmem:[%s4376_s6 + $0x60] sm:$0xff] }
  0x6f   :  { %2603 = vmatpush3.bf16.msra.mxu1 %v2602_v24  ;;  %v910_v24 = vld [vmem:[%s4375_s4 + $0x28] sm:$0xff] }
  0x70   :  { %2605 = vmatprep.subr.bf16.mxu1 %v2604_v30  ;;  %v911_v30 = vld [vmem:[%s4375_s4 + $0x30] sm:$0xff] }
  0x71   :  { %2575 = vmatpush3.bf16.msra.mxu0 %v2574_v38  ;;  %v2630_v37 = vpack.c.bf16 %v914_v33, %v911_v30  ;;  %v2660_v38 = vpack.c.bf16 %v916_v35, %v913_v34  ;;  %v3938_v30 = vpack.c.bf16 %v1115_v29, %v1112_v28  ;;  %v1795_v34 = vld [vmem:[%s4377_s3] ss:$0 sm:$0xff]  ;;  %v1129_v28 = vld [vmem:[%s4376_s6 + $0x90] sm:$0xff] }
  0x72   :  { %2577 = vmatprep.subr.bf16.mxu0 %v2576_v40  ;;  %v921_v40 = vld [vmem:[%s4375_s4 + $0x80] sm:$0xff] }
  0x73   :  { %2607 = vmatpush3.bf16.msra.mxu1 %v2606_v39  ;;  %v918_v39 = vld [vmem:[%s4375_s4 + $0x68] sm:$0xff] }
  0x74   :  { %2609 = vmatprep.subr.bf16.mxu1 %v2608_v43  ;;  %v2632_v42 = vpack.c.bf16 %v921_v40, %v918_v39  ;;  %v919_v43 = vld [vmem:[%s4375_s4 + $0x70] sm:$0xff] }
  0x75   :  { %2579 = vmatpush3.bf16.msra.mxu0 %v2578_v48  ;;  %v2663_v47 = vpack.c.bf16 %v922_v44, %v919_v43  ;;  %v923_v48 = vld [vmem:[%s4375_s4 + $0x90] sm:$0xff] }
  0x76   :  { %2581 = vmatprep.subr.bf16.mxu0 %v2580_v50  ;;  %v926_v50 = vld [vmem:[%s4375_s4 + $0xa8] sm:$0xff] }
  0x77   :  { %2611 = vmatpush3.bf16.msra.mxu1 %v2610_v49  ;;  %v2636_v49 = vpack.c.bf16 %v927_v25, %v924_v45  ;;  %v2638_v55 = vpack.c.bf16 %v926_v50, %v923_v48 }
  0x78   :  { %2613 = vmatprep.subr.bf16.mxu1 %v2612_v54  ;;  %v933_v54 = vld [vmem:[%s4375_s4 + $0xe0] sm:$0xff] }
  0x79   :  { %2583 = vmatpush3.bf16.msra.mxu0 %v2582_v61  ;;  %v2640_v58 = vpack.c.bf16 %v933_v54, %v930_v53  ;;  %v931_v61 = vld [vmem:[%s4375_s4 + $0xd0] sm:$0xff] }
  0x7a   :  { %2585 = vmatprep.subr.bf16.mxu0 %v2584_v0  ;;  %v936_v0 = vld [vmem:[%s4375_s4 + $0xf8] sm:$0xff] }
  0x7b   :  { %2615 = vmatpush3.bf16.msra.mxu1 %v2614_v63  ;;  %v934_v63 = vld [vmem:[%s4375_s4 + $0xe8] sm:$0xff]  ;;  %v2644_v5 = vpack.c.bf16 %v939_v1, %v936_v0  ;;  %v1111_v1 = vld [vmem:[%s4376_s6] sm:$0xff] }
  0x7c   :  { %2617 = vmatprep.subr.bf16.mxu1 %v2616_v4  ;;  %v2669_v3 = vpack.c.bf16 %v934_v63, %v931_v61  ;;  %v935_v4 = vld [vmem:[%s4375_s4 + $0xf0] sm:$0xff] }
  0x7d   :  { %2587 = vmatpush3.bf16.msra.mxu0 %v2586_v10  ;;  %v2646_v9 = vpack.c.bf16 %v938_v6, %v935_v4  ;;  %v2672_v10 = vpack.c.bf16 %v940_v8, %v937_v7  ;;  %v1113_v4 = vld [vmem:[%s4376_s6 + $0x10] sm:$0xff]  ;;  %v1118_v6 = vld [vmem:[%s4376_s6 + $0x38] sm:$0xff] }
  0x7e   :  { %2589 = vmatprep.subr.bf16.mxu0 %v2588_v12  ;;  %v945_v12 = vld [vmem:[%s4375_s4 + $0x140] sm:$0xff]  ;;  %v1121_v7 = vld [vmem:[%s4376_s6 + $0x50] sm:$0xff] }
  0x7f   :  { %2619 = vmatpush3.bf16.msra.mxu1 %v2618_v11  ;;  %v942_v11 = vld [vmem:[%s4375_s4 + $0x128] sm:$0xff] }
  0x80   :  { %2621 = vmatprep.subr.bf16.mxu1 %v2620_v31  ;;  %v2648_v13 = vpack.c.bf16 %v945_v12, %v942_v11  ;;  %v944_v31 = vld [vmem:[%s4375_s4 + $0x138] sm:$0xff] }
  0x81   :  { %2591 = vmatpush3.bf16.msra.mxu0 %v2590_v17  ;;  %v2650_v15 = vpack.c.bf16 %v944_v31, %v941_v14  ;;  %v946_v17 = vld [vmem:[%s4375_s4 + $0x148] sm:$0xff]  ;;  %v1119_v31 = vld [vmem:[%s4376_s6 + $0x40] sm:$0xff] }
  0x82   :  { %2625 = vmatprep.subr.bf16.mxu0 %v2624_v21  ;;  %v947_v21 = vld [vmem:[%s4375_s4 + $0x150] sm:$0xff]  ;;  %v1120_v14 = vld [vmem:[%s4376_s6 + $0x48] sm:$0xff] }
  0x83   :  { %2623 = vmatpush3.bf16.msra.mxu1 %v2622_v36  ;;  %v2675_v36 = vpack.c.bf16 %v946_v17, %v943_v16  ;;  %v1124_v16 = vld [vmem:[%s4376_s6 + $0x68] sm:$0xff]  ;;  %v1127_v17 = vld [vmem:[%s4376_s6 + $0x80] sm:$0xff] }
  0x84   :  { %829 = vmatmul.mubr.f32.vlgmr.msra.gmra.mrb[6].mxu0 %v3609_v60  ;;  %v2875_v60 = vmov 0.0|0.0  }
  0x85   :  { %2656 = vmatprep.subr.bf16.mxu1 %v2875_v60  ;;  %2627 = vmatpush1.bf16.msra.mxu0 %v2626_v26  ;;  %v952_v26 = vld [vmem:[%s4375_s4 + $0x178] sm:$0xff] }
  0x86   :  { %899 = vmatmul.mubr.f32.vlgmr.msra.gmra.mrb[6].mxu1 %v3614_v62  ;;  %v907_v62 = vld [vmem:[%s4375_s4 + $0x10] sm:$0xff]  ;;  %2629 = vmatprep.subr.bf16.mxu0 %v2628_v32  ;;  %v2876_v32 = vmov 0.0  }
  0x87   :  { %v2657_v27 = vpack.c.bf16 %v910_v24, %v907_v62  ;;  %v2654_v62 = vpack.c.bf16 %v950_v23, %v947_v21  ;;  %v949_v24 = vld [vmem:[%s4375_s4 + $0x160] sm:$0xff]  ;;  %1034 = vmatprep.mubr.f32.mxu0 %v2876_v32  ;;  %2206 = vmatprep.mubr.msk.f32.mxu1 %vm2877_vm0, %v2876_v32  ;;  %v1126_v21 = vld [vmem:[%s4376_s6 + $0x78] sm:$0xff]  ;;  %v1125_v23 = vld [vmem:[%s4376_s6 + $0x70] sm:$0xff] }
  0x89   :  { %2658 = vmatpush3.bf16.msra.mxu1 %v2657_v27  ;;  %2631 = vmatpush1.bf16.msra.mxu0 %v2630_v37  ;;  %v2678_v27 = vpack.c.bf16 %v952_v26, %v949_v24  ;;  %v1130_v24 = vld [vmem:[%s4376_s6 + $0x98] sm:$0xff]  ;;  %v1133_v26 = vld [vmem:[%s4376_s6 + $0xb0] sm:$0xff] }
  0x8a   :  { %2659 = vmatprep.subr.bf16.mxu1 %v2875_v60  ;;  %2633 = vmatprep.subr.bf16.mxu0 %v2632_v42 }
  0x8d   :  { %2661 = vmatpush3.bf16.msra.mxu1 %v2660_v38  ;;  %2635 = vmatpush1.bf16.msra.mxu0 %v2634_v46 }
  0x8e   :  { %2662 = vmatprep.subr.bf16.mxu1 %v2875_v60  ;;  %2637 = vmatprep.subr.bf16.mxu0 %v2636_v49 }
  0x91   :  { %2664 = vmatpush3.bf16.msra.mxu1 %v2663_v47  ;;  %2639 = vmatpush1.bf16.msra.mxu0 %v2638_v55 }
  0x92   :  { %2665 = vmatprep.subr.bf16.mxu1 %v2875_v60  ;;  %2641 = vmatprep.subr.bf16.mxu0 %v2640_v58 }
  0x95   :  { %2667 = vmatpush3.bf16.msra.mxu1 %v2666_v56  ;;  %2643 = vmatpush1.bf16.msra.mxu0 %v2642_v2 }
  0x96   :  { %2668 = vmatprep.subr.bf16.mxu1 %v2875_v60  ;;  %2645 = vmatprep.subr.bf16.mxu0 %v2644_v5  ;;  %v1116_v5 = vld [vmem:[%s4376_s6 + $0x28] sm:$0xff] }
  0x97   :  { %v3971_v11 = vpack.c.bf16 %v1116_v5, %v1113_v4  ;;  %v1153_v4 = vld [vmem:[%s4376_s6 + $0x150] sm:$0xff] }
  0x99   :  { %2670 = vmatpush3.bf16.msra.mxu1 %v2669_v3  ;;  %2647 = vmatpush1.bf16.msra.mxu0 %v2646_v9  ;;  %v1114_v3 = vld [vmem:[%s4376_s6 + $0x18] sm:$0xff] }
  0x9a   :  { %2671 = vmatprep.subr.bf16.mxu1 %v2875_v60  ;;  %2649 = vmatprep.subr.bf16.mxu0 %v2648_v13  ;;  %v3966_v9 = vpack.c.bf16 %v1114_v3, %v1111_v1  ;;  %v3973_v13 = vpack.c.bf16 %v1121_v7, %v1118_v6  ;;  %v1154_v1 = vld [vmem:[%s4376_s6 + $0x158] sm:$0xff]  ;;  %v1156_v7 = vld [vmem:[%s4376_s6 + $0x168] sm:$0xff] }
  0x9d   :  { %2673 = vmatpush3.bf16.msra.mxu1 %v2672_v10  ;;  %2651 = vmatpush1.bf16.msra.mxu0 %v2650_v15  ;;  %v1117_v10 = vld [vmem:[%s4376_s6 + $0x30] sm:$0xff]  ;;  %v1122_v15 = vld [vmem:[%s4376_s6 + $0x58] sm:$0xff] }
  0x9e   :  { %2674 = vmatprep.subr.bf16.mxu1 %v2875_v60  ;;  %2653 = vmatprep.subr.bf16.mxu0 %v2652_v20  ;;  %v3997_v19 = vpack.c.bf16 %v1122_v15, %v1119_v31  ;;  %v4000_v20 = vpack.c.bf16 %v1127_v17, %v1124_v16  ;;  %v4144_v31 = vld [vmem:[%s4378_s1] sm:$0x3]  ;;  %v955_v15 = vlaneseq }
  0xa0   :  { %v956_v16 = vshrl.u32 %v955_v15, 7  ;;  %v1524_v15 = vld [vmem:[%s4381_s8 + $0x78] sm:$0xff] }
  0xa1   :  { %2676 = vmatpush3.bf16.msra.mxu1 %v2675_v36  ;;  %2655 = vmatpush1.bf16.msra.mxu0 %v2654_v62  ;;  %v3991_v36 = vpack.c.bf16 %v1120_v14, %v1117_v10  ;;  %v1128_v62 = vld [vmem:[%s4376_s6 + $0x88] sm:$0xff]  ;;  %v1158_v10 = vld [vmem:[%s4376_s6 + $0x178] sm:$0xff] }
  0xa2   :  { %2677 = vmatprep.subr.bf16.mxu1 %v2875_v60  ;;  %2681 = vmatprep.subr.bf16.mxu0 %v3938_v30  ;;  %v4028_v29 = vpack.c.bf16 %v1128_v62, %v1125_v23  ;;  %v957_v17 = vsub.s32 0, %v956_v16 }
  0xa5   :  { %2679 = vmatpush3.bf16.msra.mxu1 %v2678_v27  ;;  %v4022_v27 = vpack.c.bf16 %v1126_v21, %v1123_v18  ;;  %v1159_v18 = vld [vmem:[%s4380_s7] sm:$0x7] }
  0xa6   :  { %2712 = vmatprep.subr.bf16.mxu1 %v2875_v60  ;;  %v4183_v21 = vrot.slane %v1159_v18, %v957_v17 }
  0xf7   :  { %v1832_v33 = vpop.f32.mrb[0].mxu0 }
  0xf8   :  { %v1833_v35 = vpop.f32.mrb[1].mxu0 }
  0xf9   :  { %v1867_v37 = vpop.f32.mrb[0].mxu1  ;;  %v1834_v38 = vadd.f32 %v1833_v35, %v1832_v33  ;;  %v4031_v33 = vpack.c.bf16 %v1133_v26, %v1130_v24  ;;  %v1131_v35 = vld [vmem:[%s4376_s6 + $0xa0] sm:$0xff] }
  0xfa   :  { %v1868_v39 = vpop.f32.mrb[1].mxu1 }
  0xfb   :  { %v1869_v40 = vadd.f32 %v1868_v39, %v1867_v37  ;;  %v411_v41 = vadd.f32 %v1834_v38, %v1795_v34  ;;  %v1132_v34 = vld [vmem:[%s4376_s6 + $0xa8] sm:$0xff]  ;;  %v1134_v37 = vld [vmem:[%s4376_s6 + $0xb8] sm:$0xff]  ;;  %v1139_v39 = vld [vmem:[%s4376_s6 + $0xe0] sm:$0xff] }
  0xfc   :  { %v1136_v38 = vld [vmem:[%s4376_s6 + $0xc8] sm:$0xff] }
  0xfd   :  { %v481_v42 = vadd.f32 %v1869_v40, %v411_v41  ;;  %v4050_v40 = vpack.c.bf16 %v1132_v34, %v1129_v28  ;;  %v1135_v41 = vld [vmem:[%s4376_s6 + $0xc0] sm:$0xff] }
 0x117   :  { %v1902_v22 = vpop.f32.mrb[2].mxu0 }
 0x118   :  { %v1903_v43 = vpop.f32.mrb[3].mxu0 }
 0x119   :  { %v1937_v44 = vpop.f32.mrb[2].mxu1  ;;  %v1904_v45 = vadd.f32 %v1903_v43, %v1902_v22  ;;  %v4059_v22 = vpack.c.bf16 %v1139_v39, %v1136_v38  ;;  %v1138_v43 = vld [vmem:[%s4376_s6 + $0xd8] sm:$0xff] }
 0x11a   :  { %v1938_v25 = vpop.f32.mrb[3].mxu1 }
 0x11b   :  { %v1939_v46 = vadd.f32 %v1938_v25, %v1937_v44  ;;  %v551_v47 = vadd.f32 %v1904_v45, %v481_v42  ;;  %v4056_v42 = vpack.c.bf16 %v1134_v37, %v1131_v35  ;;  %v1137_v44 = vld [vmem:[%s4376_s6 + $0xd0] sm:$0xff]  ;;  %v1140_v45 = vld [vmem:[%s4376_s6 + $0xe8] sm:$0xff]  ;;  %v1142_v25 = vld [vmem:[%s4376_s6 + $0xf8] sm:$0xff] }
 0x11d   :  { %v621_v48 = vadd.f32 %v1939_v46, %v551_v47  ;;  %v1145_v46 = vld [vmem:[%s4376_s6 + $0x110] sm:$0xff]  ;;  %v4078_v47 = vpack.c.bf16 %v1138_v43, %v1135_v41  ;;  %v965_v41 = vsub.s32 2, %v956_v16 }
 0x137   :  { %v1972_v49 = vpop.f32.mrb[4].mxu0 }
 0x138   :  { %v1973_v50 = vpop.f32.mrb[5].mxu0 }
 0x139   :  { %v2007_v51 = vpop.f32.mrb[4].mxu1  ;;  %v1974_v52 = vadd.f32 %v1973_v50, %v1972_v49  ;;  %v4084_v49 = vpack.c.bf16 %v1140_v45, %v1137_v44  ;;  %v4087_v50 = vpack.c.bf16 %v1145_v46, %v1142_v25 }
 0x13a   :  { %v2008_v53 = vpop.f32.mrb[5].mxu1 }
 0x13b   :  { %v2009_v54 = vadd.f32 %v2008_v53, %v2007_v51  ;;  %v691_v55 = vadd.f32 %v1974_v52, %v621_v48  ;;  %v1141_v48 = vld [vmem:[%s4376_s6 + $0xf0] sm:$0xff]  ;;  %v1144_v51 = vld [vmem:[%s4376_s6 + $0x108] sm:$0xff]  ;;  %v1143_v52 = vld [vmem:[%s4376_s6 + $0x100] sm:$0xff] }
 0x13c   :  { %v1146_v53 = vld [vmem:[%s4376_s6 + $0x118] sm:$0xff] }
 0x13d   :  { %v761_v56 = vadd.f32 %v2009_v54, %v691_v55  ;;  %v1148_v54 = vld [vmem:[%s4376_s6 + $0x128] sm:$0xff]  ;;  %v1151_v55 = vld [vmem:[%s4376_s6 + $0x140] sm:$0xff] }
 0x157   :  { %v2042_v57 = vpop.f32.mrb[6].mxu0 }
 0x158   :  { %v2043_v58 = vpop.f32.mrb[7].mxu0 }
 0x159   :  { %v2077_v59 = vpop.f32.mrb[6].mxu1  ;;  %v2044_v61 = vadd.f32 %v2043_v58, %v2042_v57  ;;  %v1147_v57 = vld [vmem:[%s4376_s6 + $0x120] sm:$0xff]  ;;  %v2728_v58 = vpack.c.bf16 %v1146_v53, %v1143_v52 }
 0x15a   :  { %v2078_v63 = vpop.f32.mrb[7].mxu1 }
 0x15b   :  { %v2079_v0 = vadd.f32 %v2078_v63, %v2077_v59  ;;  %v831_v2 = vadd.f32 %v2044_v61, %v761_v56  ;;  %v2702_v56 = vpack.c.bf16 %v1144_v51, %v1141_v48  ;;  %v2704_v59 = vpack.c.bf16 %v1151_v55, %v1148_v54  ;;  %v1150_v61 = vld [vmem:[%s4376_s6 + $0x138] sm:$0xff]  ;;  %v1149_v63 = vld [vmem:[%s4376_s6 + $0x130] sm:$0xff] }
 0x15c   :  { %v2706_v3 = vpack.c.bf16 %v1150_v61, %v1147_v57  ;;  %v1509_v57 = vld [vmem:[%s4381_s8] sm:$0xff]  ;;  %v1511_v61 = vld [vmem:[%s4381_s8 + $0x10] sm:$0xff] }
 0x15d   :  { %v901_v8 = vadd.f32 %v2079_v0, %v831_v2  ;;  %v1152_v0 = vld [vmem:[%s4376_s6 + $0x148] sm:$0xff]  ;;  %v1157_v2 = vld [vmem:[%s4376_s6 + $0x170] sm:$0xff] }
 0x15e   :  { %v2731_v5 = vpack.c.bf16 %v1152_v0, %v1149_v63  ;;  %v2708_v6 = vpack.c.bf16 %v1157_v2, %v1154_v1  ;;  %v1512_v63 = vld [vmem:[%s4381_s8 + $0x18] sm:$0xff]  ;;  %v1513_v1 = vld [vmem:[%s4381_s8 + $0x20] sm:$0xff]  ;;  %v1514_v2 = vld [vmem:[%s4381_s8 + $0x28] sm:$0xff] }
 0x15f   :  { %v904_v12 = vmax.f32 %v901_v8, 0.0  ;;  %v1155_v8 = vld [vmem:[%s4376_s6 + $0x160] sm:$0xff]  ;;  %v2796_v0 = vpack.c.bf16 %v1512_v63, %v1511_v61 }
 0x160   :  { %v2734_v14 = vpack.c.bf16 %v1158_v10, %v1155_v8  ;;  %v1518_v8 = vld [vmem:[%s4381_s8 + $0x48] sm:$0xff] }
 0x161   :  { %1035 = vmatmul.mubr.f32.vlgmr.msra.gmra.mrb[8].mxu0 %v904_v12  ;;  %2207 = vmatmul.mubr.f32.vlgmr.msra.gmra.mrb[8].mxu1 %v904_v12  ;;  %v2710_v12 = vpack.c.bf16 %v1156_v7, %v1153_v4  ;;  %v1515_v4 = vld [vmem:[%s4381_s8 + $0x30] sm:$0xff]  ;;  %v1517_v7 = vld [vmem:[%s4381_s8 + $0x40] sm:$0xff] }
 0x162   :  { %2683 = vmatpush1.bf16.msra.mxu0 %v3966_v9  ;;  %2714 = vmatpush3.bf16.msra.mxu1 %v3971_v11  ;;  %v2805_v10 = vpack.c.bf16 %v1518_v8, %v1517_v7 }
 0x163   :  { %2685 = vmatprep.subr.bf16.mxu0 %v3973_v13  ;;  %2715 = vmatprep.subr.bf16.mxu1 %v2875_v60 }
 0x164   :  { %1241 = vmatprep.mubr.f32.mxu0 %v2876_v32  ;;  %2241 = vmatprep.mubr.msk.f32.mxu1 %vm2877_vm0, %v2876_v32 }
 0x166   :  { %2687 = vmatpush1.bf16.msra.mxu0 %v3991_v36  ;;  %2717 = vmatpush3.bf16.msra.mxu1 %v3997_v19 }
 0x167   :  { %2689 = vmatprep.subr.bf16.mxu0 %v4000_v20  ;;  %2718 = vmatprep.subr.bf16.mxu1 %v2875_v60 }
 0x16a   :  { %2691 = vmatpush1.bf16.msra.mxu0 %v4022_v27  ;;  %2720 = vmatpush3.bf16.msra.mxu1 %v4028_v29 }
 0x16b   :  { %2693 = vmatprep.subr.bf16.mxu0 %v4031_v33  ;;  %2721 = vmatprep.subr.bf16.mxu1 %v2875_v60 }
 0x16e   :  { %2695 = vmatpush1.bf16.msra.mxu0 %v4050_v40  ;;  %2723 = vmatpush3.bf16.msra.mxu1 %v4056_v42 }
 0x16f   :  { %2697 = vmatprep.subr.bf16.mxu0 %v4059_v22  ;;  %2724 = vmatprep.subr.bf16.mxu1 %v2875_v60 }
 0x172   :  { %2699 = vmatpush1.bf16.msra.mxu0 %v4078_v47  ;;  %2726 = vmatpush3.bf16.msra.mxu1 %v4084_v49 }
 0x173   :  { %2701 = vmatprep.subr.bf16.mxu0 %v4087_v50  ;;  %2727 = vmatprep.subr.bf16.mxu1 %v2875_v60 }
 0x176   :  { %2703 = vmatpush1.bf16.msra.mxu0 %v2702_v56  ;;  %2729 = vmatpush3.bf16.msra.mxu1 %v2728_v58 }
 0x177   :  { %2705 = vmatprep.subr.bf16.mxu0 %v2704_v59  ;;  %2730 = vmatprep.subr.bf16.mxu1 %v2875_v60 }
 0x17a   :  { %2707 = vmatpush1.bf16.msra.mxu0 %v2706_v3  ;;  %2732 = vmatpush3.bf16.msra.mxu1 %v2731_v5 }
 0x17b   :  { %2709 = vmatprep.subr.bf16.mxu0 %v2708_v6  ;;  %2733 = vmatprep.subr.bf16.mxu1 %v2875_v60 }
 0x17e   :  { %2711 = vmatpush1.bf16.msra.mxu0 %v2710_v12  ;;  %2735 = vmatpush3.bf16.msra.mxu1 %v2734_v14 }
 0x17f   :  { %2737 = vmatprep.subr.bf16.mxu0 %v3938_v30  ;;  %2768 = vmatprep.subr.bf16.mxu1 %v2875_v60 }
 0x181   :  { %1242 = vmatmul.mubr.f32.vlgmr.msra.gmra.mrb[10].mxu0 %v4144_v31  ;;  %2242 = vmatmul.mubr.f32.vlgmr.msra.gmra.mrb[10].mxu1 %v4144_v31 }
 0x182   :  { %2739 = vmatpush1.bf16.msra.mxu0 %v3966_v9  ;;  %2770 = vmatpush3.bf16.msra.mxu1 %v3971_v11 }
 0x183   :  { %2741 = vmatprep.subr.bf16.mxu0 %v3973_v13  ;;  %2771 = vmatprep.subr.bf16.mxu1 %v2875_v60 }
 0x184   :  { %1400 = vmatprep.mubr.f32.mxu0 %v2876_v32  ;;  %2276 = vmatprep.mubr.msk.f32.mxu1 %vm2877_vm0, %v2876_v32 }
 0x186   :  { %2743 = vmatpush1.bf16.msra.mxu0 %v3991_v36  ;;  %2773 = vmatpush3.bf16.msra.mxu1 %v3997_v19  ;;  %v953_v36 = vld [vmem:[%s4379_s5] sm:$0x7]  ;;  %v961_v19 = vsub.s32 1, %v956_v16 }
 0x187   :  { %2745 = vmatprep.subr.bf16.mxu0 %v4000_v20  ;;  %2774 = vmatprep.subr.bf16.mxu1 %v2875_v60  ;;  %v958_v20 = vrot.slane %v953_v36, %v957_v17  ;;  %v966_v43 = vrot.slane %v953_v36, %v965_v41  ;;  %v1603_v17 = vld [vmem:[%s4382_s10] sm:$0xff] }
 0x188   :  { %v4185_v23 = vrot.slane %v1159_v18, %v961_v19  ;;  %v962_v62 = vrot.slane %v953_v36, %v961_v19  ;;  %v1604_v36 = vld [vmem:[%s4382_s10 + $0x8] sm:$0xff] }
 0x189   :  { %v2817_v19 = vpack.c.bf16 %v1604_v36, %v1603_v17 }
 0x18a   :  { %2747 = vmatpush1.bf16.msra.mxu0 %v4022_v27  ;;  %2776 = vmatpush3.bf16.msra.mxu1 %v4028_v29 }
 0x18b   :  { %2749 = vmatprep.subr.bf16.mxu0 %v4031_v33  ;;  %2777 = vmatprep.subr.bf16.mxu1 %v2875_v60 }
 0x18e   :  { %2751 = vmatpush1.bf16.msra.mxu0 %v4050_v40  ;;  %2779 = vmatpush3.bf16.msra.mxu1 %v4056_v42  ;;  %v4195_v42 = vrot.slane %v1159_v18, %v965_v41  ;;  %v1605_v18 = vld [vmem:[%s4382_s10 + $0x10] sm:$0xff]  ;;  %v1614_v41 = vld [vmem:[%s4382_s10 + $0x58] sm:$0xff] }
 0x18f   :  { %2753 = vmatprep.subr.bf16.mxu0 %v4059_v22  ;;  %2780 = vmatprep.subr.bf16.mxu1 %v2875_v60 }
 0x192   :  { %2755 = vmatpush1.bf16.msra.mxu0 %v4078_v47  ;;  %2782 = vmatpush3.bf16.msra.mxu1 %v4084_v49 }
 0x193   :  { %2757 = vmatprep.subr.bf16.mxu0 %v4087_v50  ;;  %2783 = vmatprep.subr.bf16.mxu1 %v2875_v60 }
 0x196   :  { %2759 = vmatpush1.bf16.msra.mxu0 %v2702_v56  ;;  %2785 = vmatpush3.bf16.msra.mxu1 %v2728_v58  ;;  %v1510_v58 = vld [vmem:[%s4381_s8 + $0x8] sm:$0xff] }
 0x197   :  { %2761 = vmatprep.subr.bf16.mxu0 %v2704_v59  ;;  %2786 = vmatprep.subr.bf16.mxu1 %v2875_v60  ;;  %v2793_v59 = vpack.c.bf16 %v1510_v58, %v1509_v57 }
 0x19a   :  { %2763 = vmatpush1.bf16.msra.mxu0 %v2706_v3  ;;  %2788 = vmatpush3.bf16.msra.mxu1 %v2731_v5  ;;  %v2799_v3 = vpack.c.bf16 %v1514_v2, %v1513_v1  ;;  %v1516_v5 = vld [vmem:[%s4381_s8 + $0x38] sm:$0xff] }
 0x19b   :  { %2765 = vmatprep.subr.bf16.mxu0 %v2708_v6  ;;  %2789 = vmatprep.subr.bf16.mxu1 %v2875_v60  ;;  %v2802_v6 = vpack.c.bf16 %v1516_v5, %v1515_v4 }
 0x19e   :  { %2767 = vmatpush1.bf16.msra.mxu0 %v2710_v12  ;;  %2791 = vmatpush3.bf16.msra.mxu1 %v2734_v14  ;;  %v1519_v12 = vld [vmem:[%s4381_s8 + $0x50] sm:$0xff]  ;;  %v1520_v14 = vld [vmem:[%s4381_s8 + $0x58] sm:$0xff] }
 0x19f   :  { %2792 = vmatprep.subr.bf16.mxu0 %v2875_v60  ;;  %2816 = vmatprep.subr.bf16.mxu1 %v2875_v60 }
 0x234   :  { %v1036_v30 = vpop.f32.mrb[8].mxu0  ;;  %v1107_v9 = vpop.f32.mrb[8].mxu1 }
 0x235   :  { %v1038_v11 = vpop.f32.mrb[9].mxu0  ;;  %v2208_v13 = vpop.f32.mrb[9].mxu1  ;;  %v4187_v27 = vadd.f32 %v1036_v30, %v958_v20  ;;  %v4198_v46 = vadd.f32 %v1107_v9, %v966_v43  ;;  %v1521_v30 = vld [vmem:[%s4381_s8 + $0x60] sm:$0xff]  ;;  %v1522_v9 = vld [vmem:[%s4381_s8 + $0x68] sm:$0xff]  ;;  %v1606_v20 = vld [vmem:[%s4382_s10 + $0x18] sm:$0xff] }
 0x236   :  { %v4192_v37 = vadd.f32 %v1038_v11, %v962_v62  ;;  %v2811_v11 = vpack.c.bf16 %v1522_v9, %v1521_v30  ;;  %v1523_v13 = vld [vmem:[%s4381_s8 + $0x70] sm:$0xff]  ;;  %v2820_v62 = vpack.c.bf16 %v1606_v20, %v1605_v18  ;;  %v1615_v43 = vld [vmem:[%s4382_s10 + $0x60] sm:$0xff]  ;;  %v1700_v30 = vld [vmem:[%s4384_s12 + $0x18] sm:$0xff] }
 0x237   :  { %v2814_v16 = vpack.c.bf16 %v1524_v15, %v1523_v13  ;;  %v1702_v13 = vld [vmem:[%s4384_s12 + $0x28] sm:$0xff]  ;;  %v1703_v20 = vld [vmem:[%s4384_s12 + $0x30] sm:$0xff] }
 0x254   :  { %v1243_v24 = vpop.f32.mrb[10].mxu0  ;;  %v1314_v26 = vpop.f32.mrb[10].mxu1 }
 0x255   :  { %v1244_v28 = vadd.f32 %v1243_v24, %v4183_v21  ;;  %v1245_v29 = vpop.f32.mrb[11].mxu0  ;;  %v2243_v33 = vpop.f32.mrb[11].mxu1  ;;  %v1315_v44 = vadd.f32 %v1314_v26, %v4195_v42  ;;  %v1607_v24 = vld [vmem:[%s4382_s10 + $0x20] sm:$0xff]  ;;  %v1608_v26 = vld [vmem:[%s4382_s10 + $0x28] sm:$0xff] }
 0x256   :  { %v1246_v34 = vadd.f32 %v1245_v29, %v4185_v23  ;;  %v1609_v29 = vld [vmem:[%s4382_s10 + $0x30] sm:$0xff]  ;;  %v1610_v33 = vld [vmem:[%s4382_s10 + $0x38] sm:$0xff] }
 0x257   :  { %v1318_v35 = vadd.f32 %v1244_v28, %v4187_v27  ;;  %v2823_v28 = vpack.c.bf16 %v1608_v26, %v1607_v24 }
 0x258   :  { %v1323_v39 = vadd.f32 %v1246_v34, %v4192_v37  ;;  %v2826_v34 = vpack.c.bf16 %v1610_v33, %v1609_v29 }
 0x259   :  { %v1319_v38 = vmul.f32 0.5, %v1318_v35  ;;  %v1611_v35 = vld [vmem:[%s4382_s10 + $0x40] sm:$0xff] }
 0x25a   :  { %v1324_v40 = vmul.f32 0.5, %v1323_v39 }
 0x25b   :  { %2863 = vtanh.f32 %v1319_v38  ;;  %v1612_v38 = vld [vmem:[%s4382_s10 + $0x48] sm:$0xff] }
 0x25c   :  { %2865 = vtanh.f32 %v1324_v40  ;;  %v2829_v39 = vpack.c.bf16 %v1612_v38, %v1611_v35  ;;  %v1613_v40 = vld [vmem:[%s4382_s10 + $0x50] sm:$0xff] }
 0x265   :  { %v2864_v22 = vpop.eup %2863 }
 0x266   :  { %v1321_v45 = vadd.f32 1.0, %v2864_v22  ;;  %v2866_v48 = vpop.eup %2865  ;;  %v2832_v22 = vpack.c.bf16 %v1614_v41, %v1613_v40 }
 0x267   :  { %v1326_v50 = vadd.f32 1.0, %v2866_v48 }
 0x268   :  { %v1322_v25 = vmul.f32 0.5, %v1321_v45 }
 0x269   :  { %v1327_v51 = vmul.f32 0.5, %v1326_v50 }
 0x26a   :  { %v1328_v47 = vmul.f32 %v1322_v25, %v1315_v44  ;;  %v1616_v44 = vld [vmem:[%s4382_s10 + $0x68] sm:$0xff] }
 0x26b   :  { %v1331_v52 = vsub.f32 1.0, %v1327_v51  ;;  %v1333_v54 = vmul.f32 %v1327_v51, %v4144_v31  ;;  %v2808_v31 = vpack.c.bf16 %v1520_v14, %v1519_v12  ;;  %v2835_v45 = vpack.c.bf16 %v1616_v44, %v1615_v43  ;;  %v1697_v12 = vld [vmem:[%s4384_s12] sm:$0xff]  ;;  %v1698_v14 = vld [vmem:[%s4384_s12 + $0x8] sm:$0xff] }
 0x26c   :  { %v1329_v49 = vadd.f32 %v1328_v47, %v4198_v46 }
 0x26e   :  { %2867 = vtanh.f32 %v1329_v49 }
 0x278   :  { %v2868_v53 = vpop.eup %2867 }
 0x279   :  { %v1332_v55 = vmul.f32 %v2868_v53, %v1331_v52 }
 0x27b   :  { %v4202_v56 = vadd.f32 %v1333_v54, %v1332_v55 }
 0x27d   :  { %1335 = vst [vmem:[#allocation2] sm:$0x3] %v4202_v56  ;;  %1401 = vmatmul.mubr.f32.vlgmr.msra.gmra.mrb[12].mxu0 %v4202_v56  ;;  %2277 = vmatmul.mubr.f32.vlgmr.msra.gmra.mrb[12].mxu1 %v4202_v56 }
 0x27e   :  { %2311 = vmatprep.mubr.msk.f32.mxu0 %vm2877_vm0, %v2876_v32  ;;  %2346 = vmatprep.mubr.msk.f32.mxu1 %vm2877_vm0, %v2876_v32 }
 0x27f   :  { %2794 = vmatpush3.bf16.msra.mxu0 %v2793_v59  ;;  %2818 = vmatpush3.bf16.msra.mxu1 %v2817_v19 }
 0x280   :  { %2795 = vmatprep.subr.bf16.mxu0 %v2875_v60  ;;  %2819 = vmatprep.subr.bf16.mxu1 %v2875_v60 }
 0x283   :  { %2797 = vmatpush3.bf16.msra.mxu0 %v2796_v0  ;;  %2821 = vmatpush3.bf16.msra.mxu1 %v2820_v62  ;;  %v1704_v62 = vld [vmem:[%s4384_s12 + $0x38] sm:$0xff] }
 0x284   :  { %2798 = vmatprep.subr.bf16.mxu0 %v2875_v60  ;;  %2822 = vmatprep.subr.bf16.mxu1 %v2875_v60  ;;  %v2850_v24 = vpack.c.bf16 %v1704_v62, %v1703_v20 }
 0x287   :  { %2800 = vmatpush3.bf16.msra.mxu0 %v2799_v3  ;;  %2824 = vmatpush3.bf16.msra.mxu1 %v2823_v28 }
 0x288   :  { %2801 = vmatprep.subr.bf16.mxu0 %v2875_v60  ;;  %2825 = vmatprep.subr.bf16.mxu1 %v2875_v60 }
 0x28b   :  { %2803 = vmatpush3.bf16.msra.mxu0 %v2802_v6  ;;  %2827 = vmatpush3.bf16.msra.mxu1 %v2826_v34  ;;  %v1798_v34 = vld [vmem:[%s4387_s13] ss:$0 sm:$0xff] }
 0x28c   :  { %2804 = vmatprep.subr.bf16.mxu0 %v2875_v60  ;;  %2828 = vmatprep.subr.bf16.mxu1 %v2875_v60 }
 0x28f   :  { %2806 = vmatpush3.bf16.msra.mxu0 %v2805_v10  ;;  %2830 = vmatpush3.bf16.msra.mxu1 %v2829_v39 }
 0x290   :  { %2807 = vmatprep.subr.bf16.mxu0 %v2875_v60  ;;  %2831 = vmatprep.subr.bf16.mxu1 %v2875_v60 }
 0x293   :  { %2809 = vmatpush3.bf16.msra.mxu0 %v2808_v31  ;;  %2833 = vmatpush3.bf16.msra.mxu1 %v2832_v22  ;;  %v2841_v31 = vpack.c.bf16 %v1698_v14, %v1697_v12 }
 0x294   :  { %2810 = vmatprep.subr.bf16.mxu0 %v2875_v60  ;;  %2834 = vmatprep.subr.bf16.mxu1 %v2875_v60 }
 0x297   :  { %2812 = vmatpush3.bf16.msra.mxu0 %v2811_v11  ;;  %2836 = vmatpush3.bf16.msra.mxu1 %v2835_v45  ;;  %v1701_v11 = vld [vmem:[%s4384_s12 + $0x20] sm:$0xff] }
 0x298   :  { %2813 = vmatprep.subr.bf16.mxu0 %v2875_v60  ;;  %2837 = vmatprep.subr.bf16.mxu1 %v2875_v60  ;;  %v2847_v15 = vpack.c.bf16 %v1702_v13, %v1701_v11 }
 0x29b   :  { %2815 = vmatpush3.bf16.msra.mxu0 %v2814_v16  ;;  %v1796_v16 = vld [vmem:[%s4385_s9] ss:$0 sm:$0xff] }
 0x29c   :  { %2840 = vmatprep.subr.bf16.mxu0 %v2875_v60 }
 0x350   :  { %v1402_v25 = vpop.f32.mrb[12].mxu0  ;;  %v1473_v47 = vpop.f32.mrb[12].mxu1 }
 0x351   :  { %v1403_v48 = vadd.f32 %v1402_v25, %v4183_v21  ;;  %v1404_v49 = vpop.f32.mrb[13].mxu0  ;;  %v2278_v50 = vpop.f32.mrb[13].mxu1  ;;  %v1474_v59 = vadd.f32 %v1473_v47, %v4195_v42 }
 0x352   :  { %v1405_v51 = vadd.f32 %v1404_v49, %v4185_v23  ;;  %v1502_v23 = vrot.slane %v4202_v56, 6  ;;  %v1617_v56 = vld [vmem:[%s4382_s10 + $0x70] sm:$0xff] }
 0x353   :  { %v1478_v52 = vrot.slane %v1403_v48, 6  ;;  %v1494_v2 = vrot.slane %v1474_v59, 6 }
 0x354   :  { %v1486_v53 = vrot.slane %v1405_v51, 6 }
 0x355   :  { %v1480_v54 = vadd.f32 %v1478_v52, %v4187_v27 }
 0x356   :  { %v1488_v55 = vadd.f32 %v1486_v53, %v4192_v37 }
 0x357   :  { %v1481_v57 = vmul.f32 0.5, %v1480_v54 }
 0x358   :  { %v1489_v58 = vmul.f32 0.5, %v1488_v55 }
 0x359   :  { %2869 = vtanh.f32 %v1481_v57 }
 0x35a   :  { %2871 = vtanh.f32 %v1489_v58 }
 0x363   :  { %v2870_v61 = vpop.eup %2869 }
 0x364   :  { %v2872_v63 = vpop.eup %2871  ;;  %v1483_v0 = vadd.f32 1.0, %v2870_v61 }
 0x365   :  { %v1491_v21 = vadd.f32 1.0, %v2872_v63 }
 0x366   :  { %v1484_v1 = vmul.f32 0.5, %v1483_v0 }
 0x367   :  { %v1492_v3 = vmul.f32 0.5, %v1491_v21 }
 0x368   :  { %v1496_v4 = vmul.f32 %v1494_v2, %v1484_v1 }
 0x369   :  { %v1504_v5 = vmul.f32 %v1502_v23, %v1492_v3  ;;  %v1499_v37 = vsub.f32 1.0, %v1492_v3 }
 0x36a   :  { %v1497_v27 = vadd.f32 %v1496_v4, %v4198_v46  ;;  %v1618_v46 = vld [vmem:[%s4382_s10 + $0x78] sm:$0xff] }
 0x36b   :  { %v2838_v10 = vpack.c.bf16 %v1618_v46, %v1617_v56 }
 0x36c   :  { %2873 = vtanh.f32 %v1497_v27 }
 0x36d   :  { %2839 = vmatpush3.bf16.msra.mxu1 %v2838_v10 }
 0x376   :  { %v2874_v6 = vpop.eup %2873 }
 0x377   :  { %v1500_v7 = vmul.f32 %v2874_v6, %v1499_v37 }
 0x379   :  { %v1505_v8 = vadd.f32 %v1504_v5, %v1500_v7 }
 0x37b   :  { %1506 = vst [vmem:[#allocation2] sm:$0xc] %v1505_v8  ;;  %1507 = vst [vmem:[%s4383_s15 - $0x2] sm:$0xc] %v1505_v8 }
 0x382   :  { %v1508_v42 = vld [vmem:[#allocation2] sm:$0xf] }
 0x383   :  { %2312 = vmatmul.mubr.f32.vlgmr.msra.gmra.mrb[14].mxu0 %v1508_v42 }
 0x384   :  { %2365 = vmatprep.mubr.msk.f32.mxu0 %vm2877_vm0, %v2876_v32  ;;  %v1699_v32 = vld [vmem:[%s4384_s12 + $0x10] sm:$0xff]  ;;  %2842 = vmatpush3.bf16.msra.mxu0 %v2841_v31 }
 0x385   :  { %v2844_v9 = vpack.c.bf16 %v1700_v30, %v1699_v32  ;;  %2843 = vmatprep.subr.bf16.mxu0 %v2875_v60 }
 0x388   :  { %2845 = vmatpush3.bf16.msra.mxu0 %v2844_v9 }
 0x389   :  { %2846 = vmatprep.subr.bf16.mxu0 %v2875_v60 }
 0x38c   :  { %2848 = vmatpush3.bf16.msra.mxu0 %v2847_v15 }
 0x38d   :  { %2849 = vmatprep.subr.bf16.mxu0 %v2875_v60  ;;  %v1797_v60 = vld [vmem:[%s4386_s11] ss:$0 sm:$0xff] }
 0x390   :  { %2851 = vmatpush3.bf16.msra.mxu0 %v2850_v24 }
 0x456   :  { %v1598_v17 = vpop.f32.mrb[14].mxu0 }
 0x457   :  { %v1599_v36 = vadd.f32 %v1796_v16, %v1598_v17  ;;  %v2313_v18 = vpop.f32.mrb[15].mxu0 }
 0x459   :  { %v1602_v19 = vmax.f32 %v1599_v36, 0.0 }
 0x45b   :  { %2347 = vmatmul.mubr.f32.vlgmr.msra.gmra.mrb[14].mxu1 %v1602_v19 }
 0x52e   :  { %v1692_v26 = vpop.f32.mrb[14].mxu1 }
 0x52f   :  { %v1693_v28 = vadd.f32 %v1797_v60, %v1692_v26  ;;  %v2348_v29 = vpop.f32.mrb[15].mxu1 }
 0x531   :  { %v1696_v33 = vmax.f32 %v1693_v28, 0.0 }
 0x533   :  { %2366 = vmatmul.mubr.msk.f32.vlgmr.msra.gmra.mrb[16].mxu0 %vm1712_vm1, %v1696_v33 }
 0x606   :  { %v1782_v35 = vpop.f32.mrb[16].mxu0 }
 0x607   :  { %v1783_v38 = vadd.f32 %v1798_v34, %v1782_v35  ;;  %v2367_v39 = vpop.f32.mrb[17].mxu0 }
 0x609   :  { %1786 = vst [vmem:[%s4388_s14] sm:$0xf] %v1783_v38 }

// kernel: _lambda_.2
= control target key start
LH: loop header
LB: loop body
LE: loop exit
PB: predicated region body
PF: predicated region fallthrough
CT: control target
= control target key end

     0   :  { %s9374_s27 = smov 0   ;;  %s11350_s0 = inlined_call_operand.vmem [shape: f32[4,192,400], index: 0, kind: input, shape index: {}]   ;;  %s11351_s1 = inlined_call_operand.vmem [shape: f32[16,192], index: 1, kind: input, shape index: {}]   ;;  %s11352_s2 = inlined_call_operand.vmem [shape: f32[16,1], index: 2, kind: input, shape index: {}]   ;;  %s11353_s3 = inlined_call_operand.vmem [shape: f32[16,1], index: 3, kind: input, shape index: {}]   ;;  %s11354_s4 = inlined_call_operand.vmem [shape: f32[16,1], index: 4, kind: input, shape index: {}]   ;;  %s11355_s5 = inlined_call_operand.vmem [shape: f32[16,16], index: 5, kind: input, shape index: {}]   ;;  %s11356_s6 = inlined_call_operand.vmem [shape: f32[400,576], index: 6, kind: input, shape index: {}]   ;;  %s11357_s7 = inlined_call_operand.vmem [shape: f32[256,16], index: 7, kind: input, shape index: {}]   ;;  %s11358_s8 = inlined_call_operand.vmem [shape: f32[16,1], index: 8, kind: input, shape index: {}]   ;;  %s11359_s9 = inlined_call_operand.vmem [shape: f32[16,1], index: 9, kind: input, shape index: {}]   ;;  %s11360_s10 = inlined_call_operand.vmem [shape: f32[16,1], index: 10, kind: input, shape index: {}]   ;;  %s11361_s11 = inlined_call_operand.vmem [shape: f32[16,16], index: 11, kind: input, shape index: {}]   ;;  %s11362_s12 = inlined_call_operand.vmem [shape: f32[288,16], index: 12, kind: input, shape index: {}]   ;;  %s11363_s13 = inlined_call_operand.vmem [shape: f32[32,1], index: 13, kind: input, shape index: {}]   ;;  %s11364_s14 = inlined_call_operand.vmem [shape: f32[32,1], index: 14, kind: input, shape index: {}]   ;;  %s11365_s15 = inlined_call_operand.vmem [shape: f32[32,1], index: 15, kind: input, shape index: {}]   ;;  %s11366_s16 = inlined_call_operand.vmem [shape: f32[32,32], index: 16, kind: input, shape index: {}]   ;;  %s11367_s17 = inlined_call_operand.vmem [shape: f32[288,32], index: 17, kind: input, shape index: {}]   ;;  %s11368_s18 = inlined_call_operand.vmem [shape: f32[32,1], index: 18, kind: input, shape index: {}]   ;;  %s11369_s19 = inlined_call_operand.vmem [shape: f32[32,1], index: 19, kind: input, shape index: {}]   ;;  %s11370_s20 = inlined_call_operand.vmem [shape: f32[32,1], index: 20, kind: input, shape index: {}]   ;;  %s11371_s21 = inlined_call_operand.vmem [shape: f32[32,32], index: 21, kind: input, shape index: {}]   ;;  %s11372_s22 = inlined_call_operand.vmem [shape: f32[1,118], index: 22, kind: input, shape index: {}]   ;;  %s11373_s23 = inlined_call_operand.vmem [shape: f32[1,92], index: 23, kind: input, shape index: {}]   ;;  %s11374_s24 = inlined_call_operand.vmem [shape: f32[118,144], index: 24, kind: input, shape index: {}]   ;;  %s11375_s25 = inlined_call_operand.vmem [shape: f32[92,64], index: 25, kind: input, shape index: {}]   ;;  %s11376_s26 = inlined_call_operand.vmem [shape: f32[4,32,64], index: 26, kind: output, shape index: {}]  }
   0x1   :  { %11405 = sst [smem:[#allocation3_spill]] %s11350_s0 }
   0x2   :  { %11406 = sst [smem:[#allocation4_spill]] %s11351_s1 }
   0x3   :  { %11407 = sst [smem:[#allocation5_spill]] %s11352_s2 }
   0x4   :  { %11408 = sst [smem:[#allocation6_spill]] %s11353_s3 }
   0x5   :  { %11409 = sst [smem:[#allocation7_spill]] %s11354_s4 }
   0x6   :  { %11410 = sst [smem:[#allocation8_spill]] %s11355_s5 }
   0x7   :  { %11411 = sst [smem:[#allocation9_spill]] %s11356_s6 }
   0x8   :  { %11412 = sst [smem:[#allocation10_spill]] %s11357_s7 }
   0x9   :  { %11413 = sst [smem:[#allocation11_spill]] %s11358_s8 }
   0xa   :  { %11414 = sst [smem:[#allocation12_spill]] %s11359_s9 }
   0xb   :  { %11415 = sst [smem:[#allocation13_spill]] %s11360_s10 }
   0xc LB: > { %11416 = sst [smem:[#allocation2_spill]] %s9208_s27  ;;  %s7129_s3 = sadd.s32 4294967295, %s9208_s27   ;;  %s9208_s27 = sphi %s9374_s27, %s36_s27  }
   0xd   : > { %p7133_p0 = scmp.ge.s32.totalorder %s9208_s27, 1  ;;  %p712_p1 = scmp.lt.s32.totalorder %s9208_s27, 5 }
   0xf   : > { %p713_p2 = pnand %p7133_p0, %p712_p1 }
  0x10   : > { %p782_p3 = scmp.lt.s32.totalorder (!%p713_p2), %s7129_s3, 3  ;;  %s11417_s8 = sld [smem:[#allocation4_spill]] (!%p713_p2)  ;;  %vm904_vm0 = vcmask (!%p713_p2), 523264   ;;  %v9210_v2 = vmov (!%p713_p2), 0   ;;  %vm1081_vm1 = vcmask (!%p713_p2), 130048   ;;  %vm2072_vm2 = vcmask (!%p713_p2), 777216  }
  0x11   : > { %716 = sbr.rel (%p713_p2) target bundleno = 6562 (0x19a2), region = 124  ;;  %s11418_s0 = sld [smem:[#allocation5_spill]] (!%p713_p2)  ;;  %8826 = vset.pattern.permute.xlu0 (!%p713_p2), %v9210_v2  ;;  %8827 = vset.pattern.permute.xlu1 (!%p713_p2), %v9210_v2  ;;  %vm2168_vm3 = vcmask (!%p713_p2), 654336   ;;  %vm2264_vm4 = vcmask (!%p713_p2), 646144   ;;  %vm2362_vm5 = vcmask (!%p713_p2), 769024   ;;  %vm2462_vm6 = vcmask (!%p713_p2), 818176  }
  0x12   : > { %s11419_s6 = sld [smem:[#allocation3_spill]] (!%p713_p2)  ;;  %s11420_s10 = sld [smem:[#allocation8_spill]] (!%p713_p2)  ;;  %vm2562_vm7 = vcmask (!%p713_p2), 941056   ;;  %vm2660_vm8 = vcmask (!%p713_p2), 809984   ;;  %vm2758_vm9 = vcmask (!%p713_p2), 932864   ;;  %vm2856_vm10 = vcmask (!%p713_p2), 556032  }
  0x13   : > { %s11421_s4 = sld [smem:[#allocation6_spill]] (!%p713_p2)  ;;  %s11422_s30 = sld [smem:[#allocation9_spill]] (!%p713_p2)  ;;  %vm2954_vm11 = vcmask (!%p713_p2), 678912   ;;  %vm3052_vm12 = vcmask (!%p713_p2), 547840   ;;  %vm3150_vm13 = vcmask (!%p713_p2), 670720   ;;  %vm3248_vm14 = vcmask (!%p713_p2), 719872  }
  0x14   : > { %s9214_s7 = smov (!%p713_p2), 79   ;;  %s9218_s28 = smov (!%p713_p2), 99   ;;  %vm3346_vm15 = vcmask (!%p713_p2), 842752  }
  0x15   : > { %s11396_s27 = smov (!%p713_p2), 114   ;;  %s9220_s29 = smov (!%p713_p2), 68  }
  0x16   : > { %v793_v0 = vld [vmem:[%s11417_s8 + $0x8] sm:$0xff] (!%p713_p2)  ;;  %s9222_s2 = smov (!%p713_p2), 67   ;;  %s9223_s5 = smov (!%p713_p2), 82  }
  0x17   : > { %7137 = vmatprep.mubr.msk.f32.mxu0 (!%p713_p2), %vm904_vm0, %v793_v0  ;;  %7139 = vmatprep.mubr.msk.f32.mxu1 (!%p713_p2), %vm904_vm0, %v793_v0  ;;  %v892_v1 = vld [vmem:[%s11418_s0] sm:$0xff] (!%p713_p2)  ;;  %v893_v3 = vld [vmem:[%s11418_s0 + $0x8] sm:$0xff] (!%p713_p2)  ;;  %s9216_s0 = smov (!%p713_p2), 100  }
  0x18   : > { %s11434_s3 = smov (!%p782_p3, %s7129_s3), 3  ;;  %896 = vperm.xlu0 %8826, %v892_v1  }
  0x19   : > { %s8788_s9 = smul.u32 768, %s11434_s3 }
  0x1b   : > { %s9399_s1 = scalar_lea.vmem %s11419_s6, %s8788_s9  ;;  %s9212_s9 = smov 95  }
  0x1c   : > { %v797_v4 = vld [vmem:[%s9399_s1 + $0x8] sm:$0xff]  ;;  %v799_v6 = vld [vmem:[%s9399_s1 + $0x18] sm:$0xff]  ;;  %901 = vperm.xlu0 %8826, %v893_v3   ;;  %v796_v9 = vld [vmem:[%s9399_s1] sm:$0xff]  ;;  %s11424_s6 = sld [smem:[#allocation10_spill]] }
  0x1d   : > { %v801_v5 = vld [vmem:[%s9399_s1 + $0x28] sm:$0xff]  ;;  %v803_v8 = vld [vmem:[%s9399_s1 + $0x38] sm:$0xff]  ;;  %v800_v10 = vld [vmem:[%s9399_s1 + $0x20] sm:$0xff] }
  0x1e   : > { %v8029_v7 = vpack.c.bf16 %v801_v5, %v797_v4  ;;  %v8077_v11 = vpack.c.bf16 %v803_v8, %v799_v6  ;;  %v8031_v12 = vpack.c.bf16 %v800_v10, %v796_v9  ;;  %v798_v13 = vld [vmem:[%s9399_s1 + $0x10] sm:$0xff]  ;;  %v805_v15 = vld [vmem:[%s9399_s1 + $0x48] sm:$0xff]  ;;  %v807_v18 = vld [vmem:[%s9399_s1 + $0x58] sm:$0xff] }
  0x1f   : > { %v802_v14 = vld [vmem:[%s9399_s1 + $0x30] sm:$0xff]  ;;  %v809_v17 = vld [vmem:[%s9399_s1 + $0x68] sm:$0xff]  ;;  %v811_v19 = vld [vmem:[%s9399_s1 + $0x78] sm:$0xff] }
  0x20   : > { %8030 = vmatprep.subr.bf16.mxu0 %v8029_v7  ;;  %v8079_v16 = vpack.c.bf16 %v802_v14, %v798_v13  ;;  %8078 = vmatprep.subr.bf16.mxu1 %v8077_v11  ;;  %v8033_v20 = vpack.c.bf16 %v809_v17, %v805_v15  ;;  %v8081_v21 = vpack.c.bf16 %v811_v19, %v807_v18  ;;  %v804_v22 = vld [vmem:[%s9399_s1 + $0x40] sm:$0xff]  ;;  %v806_v24 = vld [vmem:[%s9399_s1 + $0x50] sm:$0xff]  ;;  %v813_v27 = vld [vmem:[%s9399_s1 + $0x88] sm:$0xff] }
  0x21   : > { %8032 = vmatpush1.bf16.msra.mxu0 %v8031_v12  ;;  %v808_v23 = vld [vmem:[%s9399_s1 + $0x60] sm:$0xff]  ;;  %v810_v26 = vld [vmem:[%s9399_s1 + $0x70] sm:$0xff]  ;;  %v817_v28 = vld [vmem:[%s9399_s1 + $0xa8] sm:$0xff] }
  0x22   : > { %8080 = vmatpush1.bf16.msra.mxu1 %v8079_v16  ;;  %v8035_v25 = vpack.c.bf16 %v808_v23, %v804_v22  ;;  %8034 = vmatprep.subr.bf16.mxu0 %v8033_v20  ;;  %v8083_v29 = vpack.c.bf16 %v810_v26, %v806_v24  ;;  %v8037_v30 = vpack.c.bf16 %v817_v28, %v813_v27  ;;  %v815_v31 = vld [vmem:[%s9399_s1 + $0x98] sm:$0xff]  ;;  %v812_v33 = vld [vmem:[%s9399_s1 + $0x80] sm:$0xff]  ;;  %v814_v36 = vld [vmem:[%s9399_s1 + $0x90] sm:$0xff] }
  0x23   : > { %8082 = vmatprep.subr.bf16.mxu1 %v8081_v21  ;;  %v819_v32 = vld [vmem:[%s9399_s1 + $0xb8] sm:$0xff]  ;;  %v816_v35 = vld [vmem:[%s9399_s1 + $0xa0] sm:$0xff]  ;;  %v818_v37 = vld [vmem:[%s9399_s1 + $0xb0] sm:$0xff] }
  0x24   : > { %v8085_v34 = vpack.c.bf16 %v819_v32, %v815_v31  ;;  %v8039_v38 = vpack.c.bf16 %v816_v35, %v812_v33  ;;  %v821_v39 = vld [vmem:[%s9399_s1 + $0xc8] sm:$0xff]  ;;  %v823_v41 = vld [vmem:[%s9399_s1 + $0xd8] sm:$0xff]  ;;  %v8087_v42 = vpack.c.bf16 %v818_v37, %v814_v36  ;;  %v820_v45 = vld [vmem:[%s9399_s1 + $0xc0] sm:$0xff] }
  0x25   : > { %8036 = vmatpush1.bf16.msra.mxu0 %v8035_v25  ;;  %v825_v40 = vld [vmem:[%s9399_s1 + $0xe8] sm:$0xff]  ;;  %v827_v44 = vld [vmem:[%s9399_s1 + $0xf8] sm:$0xff]  ;;  %v824_v46 = vld [vmem:[%s9399_s1 + $0xe0] sm:$0xff] }
  0x26   : > { %8084 = vmatpush1.bf16.msra.mxu1 %v8083_v29  ;;  %8038 = vmatprep.subr.bf16.mxu0 %v8037_v30  ;;  %v8041_v43 = vpack.c.bf16 %v825_v40, %v821_v39  ;;  %v8089_v47 = vpack.c.bf16 %v827_v44, %v823_v41  ;;  %v822_v48 = vld [vmem:[%s9399_s1 + $0xd0] sm:$0xff]  ;;  %v829_v50 = vld [vmem:[%s9399_s1 + $0x108] sm:$0xff]  ;;  %v831_v52 = vld [vmem:[%s9399_s1 + $0x118] sm:$0xff]  ;;  %v8043_v54 = vpack.c.bf16 %v824_v46, %v820_v45 }
  0x27   : > { %8086 = vmatprep.subr.bf16.mxu1 %v8085_v34  ;;  %v826_v49 = vld [vmem:[%s9399_s1 + $0xf0] sm:$0xff]  ;;  %v833_v51 = vld [vmem:[%s9399_s1 + $0x128] sm:$0xff]  ;;  %v835_v53 = vld [vmem:[%s9399_s1 + $0x138] sm:$0xff] }
  0x28   : > { %v8091_v55 = vpack.c.bf16 %v826_v49, %v822_v48  ;;  %v8045_v56 = vpack.c.bf16 %v833_v51, %v829_v50  ;;  %v828_v57 = vld [vmem:[%s9399_s1 + $0x100] sm:$0xff]  ;;  %v830_v59 = vld [vmem:[%s9399_s1 + $0x110] sm:$0xff]  ;;  %v8093_v60 = vpack.c.bf16 %v835_v53, %v831_v52  ;;  %v837_v62 = vld [vmem:[%s9399_s1 + $0x148] sm:$0xff] }
  0x29   : > { %8040 = vmatpush1.bf16.msra.mxu0 %v8039_v38  ;;  %v832_v58 = vld [vmem:[%s9399_s1 + $0x120] sm:$0xff]  ;;  %v834_v61 = vld [vmem:[%s9399_s1 + $0x130] sm:$0xff]  ;;  %v841_v63 = vld [vmem:[%s9399_s1 + $0x168] sm:$0xff] }
  0x2a   : > { %8088 = vmatpush1.bf16.msra.mxu1 %v8087_v42  ;;  %8042 = vmatprep.subr.bf16.mxu0 %v8041_v43  ;;  %v839_v0 = vld [vmem:[%s9399_s1 + $0x158] sm:$0xff]  ;;  %v8047_v2 = vpack.c.bf16 %v832_v58, %v828_v57  ;;  %v8095_v3 = vpack.c.bf16 %v834_v61, %v830_v59  ;;  %v8049_v4 = vpack.c.bf16 %v841_v63, %v837_v62  ;;  %v836_v5 = vld [vmem:[%s9399_s1 + $0x140] sm:$0xff]  ;;  %v838_v7 = vld [vmem:[%s9399_s1 + $0x150] sm:$0xff] }
  0x2b   : > { %8090 = vmatprep.subr.bf16.mxu1 %v8089_v47  ;;  %v843_v1 = vld [vmem:[%s9399_s1 + $0x178] sm:$0xff]  ;;  %v840_v6 = vld [vmem:[%s9399_s1 + $0x160] sm:$0xff]  ;;  %v842_v9 = vld [vmem:[%s9399_s1 + $0x170] sm:$0xff] }
  0x2c   : > { %v8097_v8 = vpack.c.bf16 %v843_v1, %v839_v0  ;;  %v845_v10 = vld [vmem:[%s9399_s1 + $0x188] sm:$0xff]  ;;  %v847_v12 = vld [vmem:[%s9399_s1 + $0x198] sm:$0xff]  ;;  %v8051_v14 = vpack.c.bf16 %v840_v6, %v836_v5  ;;  %v8099_v15 = vpack.c.bf16 %v842_v9, %v838_v7  ;;  %v844_v17 = vld [vmem:[%s9399_s1 + $0x180] sm:$0xff] }
  0x2d   : > { %8044 = vmatpush1.bf16.msra.mxu0 %v8043_v54  ;;  %v849_v11 = vld [vmem:[%s9399_s1 + $0x1a8] sm:$0xff]  ;;  %v851_v13 = vld [vmem:[%s9399_s1 + $0x1b8] sm:$0xff]  ;;  %v848_v18 = vld [vmem:[%s9399_s1 + $0x1a0] sm:$0xff] }
  0x2e   : > { %8092 = vmatpush1.bf16.msra.mxu1 %v8091_v55  ;;  %8046 = vmatprep.subr.bf16.mxu0 %v8045_v56  ;;  %v8053_v16 = vpack.c.bf16 %v849_v11, %v845_v10  ;;  %v846_v19 = vld [vmem:[%s9399_s1 + $0x190] sm:$0xff]  ;;  %v8101_v20 = vpack.c.bf16 %v851_v13, %v847_v12  ;;  %v853_v22 = vld [vmem:[%s9399_s1 + $0x1c8] sm:$0xff]  ;;  %v855_v24 = vld [vmem:[%s9399_s1 + $0x1d8] sm:$0xff]  ;;  %v8055_v26 = vpack.c.bf16 %v848_v18, %v844_v17 }
  0x2f   : > { %8094 = vmatprep.subr.bf16.mxu1 %v8093_v60  ;;  %v850_v21 = vld [vmem:[%s9399_s1 + $0x1b0] sm:$0xff]  ;;  %v857_v23 = vld [vmem:[%s9399_s1 + $0x1e8] sm:$0xff]  ;;  %v859_v25 = vld [vmem:[%s9399_s1 + $0x1f8] sm:$0xff] }
  0x30   : > { %v8103_v27 = vpack.c.bf16 %v850_v21, %v846_v19  ;;  %v8057_v28 = vpack.c.bf16 %v857_v23, %v853_v22  ;;  %v852_v29 = vld [vmem:[%s9399_s1 + $0x1c0] sm:$0xff]  ;;  %v854_v31 = vld [vmem:[%s9399_s1 + $0x1d0] sm:$0xff]  ;;  %v8105_v32 = vpack.c.bf16 %v859_v25, %v855_v24  ;;  %v861_v34 = vld [vmem:[%s9399_s1 + $0x208] sm:$0xff] }
  0x31   : > { %8048 = vmatpush1.bf16.msra.mxu0 %v8047_v2  ;;  %v856_v30 = vld [vmem:[%s9399_s1 + $0x1e0] sm:$0xff]  ;;  %v858_v33 = vld [vmem:[%s9399_s1 + $0x1f0] sm:$0xff]  ;;  %v865_v35 = vld [vmem:[%s9399_s1 + $0x228] sm:$0xff] }
  0x32   : > { %8096 = vmatpush1.bf16.msra.mxu1 %v8095_v3  ;;  %8050 = vmatprep.subr.bf16.mxu0 %v8049_v4  ;;  %v863_v36 = vld [vmem:[%s9399_s1 + $0x218] sm:$0xff]  ;;  %v8059_v38 = vpack.c.bf16 %v856_v30, %v852_v29  ;;  %v8107_v39 = vpack.c.bf16 %v858_v33, %v854_v31  ;;  %v8061_v40 = vpack.c.bf16 %v865_v35, %v861_v34  ;;  %v860_v41 = vld [vmem:[%s9399_s1 + $0x200] sm:$0xff]  ;;  %v862_v43 = vld [vmem:[%s9399_s1 + $0x210] sm:$0xff] }
  0x33   : > { %8098 = vmatprep.subr.bf16.mxu1 %v8097_v8  ;;  %v867_v37 = vld [vmem:[%s9399_s1 + $0x238] sm:$0xff]  ;;  %v864_v42 = vld [vmem:[%s9399_s1 + $0x220] sm:$0xff]  ;;  %v866_v45 = vld [vmem:[%s9399_s1 + $0x230] sm:$0xff] }
  0x34   : > { %v8109_v44 = vpack.c.bf16 %v867_v37, %v863_v36  ;;  %v869_v46 = vld [vmem:[%s9399_s1 + $0x248] sm:$0xff]  ;;  %v871_v48 = vld [vmem:[%s9399_s1 + $0x258] sm:$0xff]  ;;  %v8063_v50 = vpack.c.bf16 %v864_v42, %v860_v41  ;;  %v8111_v51 = vpack.c.bf16 %v866_v45, %v862_v43  ;;  %v868_v53 = vld [vmem:[%s9399_s1 + $0x240] sm:$0xff] }
  0x35   : > { %8052 = vmatpush1.bf16.msra.mxu0 %v8051_v14  ;;  %v873_v47 = vld [vmem:[%s9399_s1 + $0x268] sm:$0xff]  ;;  %v875_v49 = vld [vmem:[%s9399_s1 + $0x278] sm:$0xff]  ;;  %v872_v54 = vld [vmem:[%s9399_s1 + $0x260] sm:$0xff] }
  0x36   : > { %8100 = vmatpush1.bf16.msra.mxu1 %v8099_v15  ;;  %8054 = vmatprep.subr.bf16.mxu0 %v8053_v16  ;;  %v8065_v52 = vpack.c.bf16 %v873_v47, %v869_v46  ;;  %v870_v55 = vld [vmem:[%s9399_s1 + $0x250] sm:$0xff]  ;;  %v8113_v56 = vpack.c.bf16 %v875_v49, %v871_v48  ;;  %v877_v58 = vld [vmem:[%s9399_s1 + $0x288] sm:$0xff]  ;;  %v879_v60 = vld [vmem:[%s9399_s1 + $0x298] sm:$0xff]  ;;  %v8067_v62 = vpack.c.bf16 %v872_v54, %v868_v53 }
  0x37   : > { %8102 = vmatprep.subr.bf16.mxu1 %v8101_v20  ;;  %v874_v57 = vld [vmem:[%s9399_s1 + $0x270] sm:$0xff]  ;;  %v881_v59 = vld [vmem:[%s9399_s1 + $0x2a8] sm:$0xff]  ;;  %v883_v61 = vld [vmem:[%s9399_s1 + $0x2b8] sm:$0xff] }
  0x38   : > { %v8115_v63 = vpack.c.bf16 %v874_v57, %v870_v55  ;;  %v8069_v0 = vpack.c.bf16 %v881_v59, %v877_v58  ;;  %v876_v1 = vld [vmem:[%s9399_s1 + $0x280] sm:$0xff]  ;;  %v878_v3 = vld [vmem:[%s9399_s1 + $0x290] sm:$0xff]  ;;  %v8117_v4 = vpack.c.bf16 %v883_v61, %v879_v60  ;;  %v885_v6 = vld [vmem:[%s9399_s1 + $0x2c8] sm:$0xff] }
  0x39   : > { %8056 = vmatpush1.bf16.msra.mxu0 %v8055_v26  ;;  %v880_v2 = vld [vmem:[%s9399_s1 + $0x2a0] sm:$0xff]  ;;  %v882_v5 = vld [vmem:[%s9399_s1 + $0x2b0] sm:$0xff]  ;;  %v889_v7 = vld [vmem:[%s9399_s1 + $0x2e8] sm:$0xff] }
  0x3a   : > { %8104 = vmatpush1.bf16.msra.mxu1 %v8103_v27  ;;  %8058 = vmatprep.subr.bf16.mxu0 %v8057_v28  ;;  %v887_v8 = vld [vmem:[%s9399_s1 + $0x2d8] sm:$0xff]  ;;  %v8071_v10 = vpack.c.bf16 %v880_v2, %v876_v1  ;;  %v8119_v11 = vpack.c.bf16 %v882_v5, %v878_v3  ;;  %v8073_v12 = vpack.c.bf16 %v889_v7, %v885_v6  ;;  %v884_v13 = vld [vmem:[%s9399_s1 + $0x2c0] sm:$0xff]  ;;  %v886_v16 = vld [vmem:[%s9399_s1 + $0x2d0] sm:$0xff] }
  0x3b   : > { %8106 = vmatprep.subr.bf16.mxu1 %v8105_v32  ;;  %v891_v9 = vld [vmem:[%s9399_s1 + $0x2f8] sm:$0xff]  ;;  %v888_v14 = vld [vmem:[%s9399_s1 + $0x2e0] sm:$0xff]  ;;  %v890_v17 = vld [vmem:[%s9399_s1 + $0x2f0] sm:$0xff]  ;;  %s9213_s1 = smov 80  }
  0x3c   : > { %v8121_v15 = vpack.c.bf16 %v891_v9, %v887_v8  ;;  %v8075_v18 = vpack.c.bf16 %v888_v14, %v884_v13  ;;  %v8123_v19 = vpack.c.bf16 %v890_v17, %v886_v16  ;;  %v792_v20 = vld [vmem:[%s11417_s8] sm:$0xff]  ;;  %v795_v21 = vld [vmem:[%s11417_s8 + $0x18] sm:$0xff]  ;;  %v794_v22 = vld [vmem:[%s11417_s8 + $0x10] sm:$0xff]  ;;  %s11423_s8 = sld [smem:[#allocation7_spill]] }
  0x3d   : > { %8060 = vmatpush1.bf16.msra.mxu0 %v8059_v38  ;;  %v1073_v57 = vld [vmem:[%s11420_s10] sm:$0xff]  ;;  %v1074_v61 = vld [vmem:[%s11420_s10 + $0x8] sm:$0xff]  ;;  %s11398_s10 = smov 115  }
  0x3e   : > { %8108 = vmatpush1.bf16.msra.mxu1 %v8107_v39  ;;  %8062 = vmatprep.subr.bf16.mxu0 %v8061_v40 }
  0x3f   : > { %8110 = vmatprep.subr.bf16.mxu1 %v8109_v44 }
  0x41   : > { %8064 = vmatpush1.bf16.msra.mxu0 %v8063_v50 }
  0x42   : > { %8112 = vmatpush1.bf16.msra.mxu1 %v8111_v51  ;;  %8066 = vmatprep.subr.bf16.mxu0 %v8065_v52 }
  0x43   : > { %8114 = vmatprep.subr.bf16.mxu1 %v8113_v56 }
  0x45   : > { %8068 = vmatpush1.bf16.msra.mxu0 %v8067_v62 }
  0x46   : > { %8116 = vmatpush1.bf16.msra.mxu1 %v8115_v63  ;;  %8070 = vmatprep.subr.bf16.mxu0 %v8069_v0 }
  0x47   : > { %8118 = vmatprep.subr.bf16.mxu1 %v8117_v4 }
  0x49   : > { %8072 = vmatpush1.bf16.msra.mxu0 %v8071_v10 }
  0x4a   : > { %8120 = vmatpush1.bf16.msra.mxu1 %v8119_v11  ;;  %8074 = vmatprep.subr.bf16.mxu0 %v8073_v12 }
  0x4b   : > { %8122 = vmatprep.subr.bf16.mxu1 %v8121_v15 }
  0x4d   : > { %8076 = vmatpush1.bf16.msra.mxu0 %v8075_v18 }
  0x4e   : > { %8124 = vmatpush1.bf16.msra.mxu1 %v8123_v19 }
  0x50   : > { %976 = vmatmul.mubr.f32.vlgmr.msra.gmra.mrb[0].mxu0 %v792_v20 }
  0x51   : > { %1053 = vmatmul.mubr.f32.vlgmr.msra.gmra.mrb[0].mxu1 %v792_v20  ;;  %7138 = vmatprep.mubr.msk.f32.mxu0 %vm904_vm0, %v795_v21 }
  0x52   : > { %7140 = vmatprep.mubr.msk.f32.mxu1 %vm904_vm0, %v795_v21 }
  0x54   : > { %982 = vmatmul.mubr.f32.gmra.mrb[2].mxu0 %v794_v22 }
  0x55   : > { %1059 = vmatmul.mubr.f32.gmra.mrb[2].mxu1 %v794_v22  ;;  %7591 = vmatprep.mubr.msk.f32.mxu0 %vm1081_vm1, %v1073_v57 }
  0x97   : > { %v897_v23 = vpop.permute.xlu0 %896 }
  0x9b   : > { %v902_v33 = vpop.permute.xlu0 %901 }
 0x123   : > { %v977_v24 = vpop.f32.mrb[0].mxu0 }
 0x124   : > { %v978_v25 = vadd.f32 %v977_v24, %v897_v23  ;;  %v1054_v26 = vpop.f32.mrb[0].mxu1  ;;  %v979_v27 = vpop.f32.mrb[1].mxu0 }
 0x125   : > { %v1055_v28 = vadd.f32 %v1054_v26, %v897_v23  ;;  %v980_v29 = vadd.f32 %v979_v27, %v897_v23  ;;  %v1056_v30 = vpop.f32.mrb[1].mxu1  ;;  %v1075_v26 = vld [vmem:[%s11421_s4] sm:$0xff] }
 0x126   : > { %v1065_v31 = vmax.f32 %v978_v25, 0.0  ;;  %v1057_v32 = vadd.f32 %v1056_v30, %v897_v23  ;;  %v1343_v30 = vld [vmem:[%s11422_s30 + $0x8] sm:$0xff] }
 0x127   : > { %v1066_v34 = vmax.f32 %v980_v29, 0.0  ;;  %v983_v35 = vpop.f32.mrb[2].mxu0  ;;  %v1067_v40 = vmax.f32 %v1055_v28, 0.0 }
 0x128   : > { %v1068_v36 = vmax.f32 %v1057_v32, 0.0  ;;  %v984_v37 = vadd.f32 %v983_v35, %v902_v33  ;;  %v1060_v38 = vpop.f32.mrb[2].mxu1  ;;  %v985_v39 = vpop.f32.mrb[3].mxu0  ;;  %v1345_v32 = vld [vmem:[%s11422_s30 + $0x18] sm:$0xff]  ;;  %v1342_v35 = vld [vmem:[%s11422_s30] sm:$0xff] }
 0x129   : > { %v1079_v41 = vadd.f32 %v1066_v34, %v1065_v31  ;;  %v1061_v42 = vadd.f32 %v1060_v38, %v902_v33  ;;  %v986_v43 = vadd.f32 %v985_v39, %v902_v33  ;;  %v1062_v44 = vpop.f32.mrb[3].mxu1  ;;  %v1344_v39 = vld [vmem:[%s11422_s30 + $0x10] sm:$0xff] }
 0x12a   : > { %v1069_v45 = vmax.f32 %v984_v37, 0.0  ;;  %v1063_v46 = vadd.f32 %v1062_v44, %v902_v33  ;;  %v1082_v50 = vsel %vm1081_vm1, %v1068_v36, 0.0  ;;  %v1355_v44 = vld [vmem:[%s11422_s30 + $0x68] sm:$0xff] }
 0x12b   : > { %v1070_v47 = vmax.f32 %v986_v43, 0.0  ;;  %v1080_v48 = vadd.f32 %v1079_v41, %v1067_v40  ;;  %v1071_v51 = vmax.f32 %v1061_v42, 0.0  ;;  %v1353_v41 = vld [vmem:[%s11422_s30 + $0x58] sm:$0xff]  ;;  %v1358_v43 = vld [vmem:[%s11422_s30 + $0x80] sm:$0xff] }
 0x12c   : > { %v1072_v49 = vmax.f32 %v1063_v46, 0.0  ;;  %v8137_v46 = vpack.c.bf16 %v1358_v43, %v1353_v41  ;;  %v1394_v41 = vld [vmem:[%s11422_s30 + $0x1a0] sm:$0xff]  ;;  %v1399_v43 = vld [vmem:[%s11422_s30 + $0x1c8] sm:$0xff] }
 0x12d   : > { %v1086_v52 = vadd.f32 %v1070_v47, %v1069_v45  ;;  %v1083_v53 = vadd.f32 %v1082_v50, %v1080_v48  ;;  %v1352_v48 = vld [vmem:[%s11422_s30 + $0x50] sm:$0xff]  ;;  %v1354_v50 = vld [vmem:[%s11422_s30 + $0x60] sm:$0xff] }
 0x12e   : > { %v1088_v55 = vsel %vm1081_vm1, %v1072_v49, 0.0 }
 0x12f   : > { %1084 = vadd.xlane.f32.xlu1 %v1083_v53  ;;  %v1087_v54 = vadd.f32 %v1086_v52, %v1071_v51  ;;  %v1359_v52 = vld [vmem:[%s11422_s30 + $0x88] sm:$0xff] }
 0x130   : > { %v1363_v53 = vld [vmem:[%s11422_s30 + $0xa8] sm:$0xff] }
 0x131   : > { %v1089_v56 = vadd.f32 %v1088_v55, %v1087_v54  ;;  %v1368_v54 = vld [vmem:[%s11422_s30 + $0xd0] sm:$0xff]  ;;  %v8239_v55 = vpack.c.bf16 %v1359_v52, %v1354_v50  ;;  %v1407_v52 = vld [vmem:[%s11422_s30 + $0x208] sm:$0xff] }
 0x133   : > { %1090 = vadd.xlane.f32.xlu1 %v1089_v56  ;;  %v8141_v56 = vpack.c.bf16 %v1368_v54, %v1363_v53  ;;  %v1404_v53 = vld [vmem:[%s11422_s30 + $0x1f0] sm:$0xff] }
 0x1bc   : > { %v1085_v58 = vpop.xlane.xlu1 %1084 }
 0x1c0   : > { %v1091_v59 = vpop.xlane.xlu1 %1090 }
 0x1c1   : > { %v8125_v60 = vpack.c.bf16 %v1091_v59, %v1085_v58  ;;  %v1370_v58 = vld [vmem:[%s11422_s30 + $0xe0] sm:$0xff] }
 0x1c2   : > { %v1362_v59 = vld [vmem:[%s11422_s30 + $0xa0] sm:$0xff] }
 0x1c3   : > { %8126 = vmatprep.subr.bf16.mxu0 %v8125_v60 }
 0x1c4   : > { %8128 = vmatpush3.bf16.msra.mxu0 %v8125_v60 }
 0x1c7   : > { %7592 = vmatmul.mubr.msk.f32.vlgmr.msra.gmra.mrb[4].mxu0 %vm1081_vm1, %v1074_v61 }
 0x1c8   : > { %7598 = vmatprep.mubr.msk.f32.mxu0 %vm1081_vm1, %v1073_v57  ;;  %v1365_v57 = vld [vmem:[%s11422_s30 + $0xb8] sm:$0xff] }
 0x1c9   : > { %v8241_v60 = vpack.c.bf16 %v1370_v58, %v1365_v57  ;;  %v1418_v57 = vld [vmem:[%s11422_s30 + $0x260] sm:$0xff]  ;;  %v1415_v58 = vld [vmem:[%s11422_s30 + $0x248] sm:$0xff] }
 0x29a   : > { %v7593_v62 = vpop.f32.mrb[4].mxu0 }
 0x29b   : > { %1180 = vperm.xlu1 %8827, %v7593_v62   ;;  %v1164_v63 = vpop.f32.mrb[5].mxu0  ;;  %v1364_v62 = vld [vmem:[%s11422_s30 + $0xb0] sm:$0xff] }
 0x29c   : > { %1175 = vperm.xlu0 %8826, %v1164_v63   ;;  %v1369_v63 = vld [vmem:[%s11422_s30 + $0xd8] sm:$0xff] }
 0x31a   : > { %v1181_v0 = vpop.permute.xlu1 %1180 }
 0x31b   : > { %v9519_v1 = vsub.f32 %v1069_v45, %v1181_v0  ;;  %v9521_v2 = vsub.f32 %v1070_v47, %v1181_v0  ;;  %v1176_v3 = vpop.permute.xlu0 %1175  ;;  %v9523_v4 = vsub.f32 %v1071_v51, %v1181_v0  ;;  %v9525_v5 = vsub.f32 %v1072_v49, %v1181_v0  ;;  %v1360_v45 = vld [vmem:[%s11422_s30 + $0x90] sm:$0xff]  ;;  %v1357_v49 = vld [vmem:[%s11422_s30 + $0x78] sm:$0xff] }
 0x31c   : > { %v9527_v6 = vsub.f32 %v1065_v31, %v1176_v3  ;;  %v9529_v7 = vsub.f32 %v1066_v34, %v1176_v3  ;;  %v9531_v8 = vsub.f32 %v1067_v40, %v1176_v3  ;;  %v9533_v9 = vsub.f32 %v1068_v36, %v1176_v3  ;;  %v1348_v31 = vld [vmem:[%s11422_s30 + $0x30] sm:$0xff]  ;;  %v1350_v34 = vld [vmem:[%s11422_s30 + $0x40] sm:$0xff]  ;;  %v1347_v36 = vld [vmem:[%s11422_s30 + $0x28] sm:$0xff] }
 0x31d   : > { %v1195_v10 = vmul.f32 %v9519_v1, %v9519_v1  ;;  %v1196_v11 = vmul.f32 %v9521_v2, %v9521_v2  ;;  %v1198_v12 = vmul.f32 %v9525_v5, %v9525_v5  ;;  %v1197_v15 = vmul.f32 %v9523_v4, %v9523_v4  ;;  %v1349_v40 = vld [vmem:[%s11422_s30 + $0x38] sm:$0xff] }
 0x31e   : > { %v1191_v13 = vmul.f32 %v9527_v6, %v9527_v6  ;;  %v1192_v14 = vmul.f32 %v9529_v7, %v9529_v7  ;;  %v1194_v17 = vmul.f32 %v9533_v9, %v9533_v9  ;;  %v1193_v18 = vmul.f32 %v9531_v8, %v9531_v8  ;;  %v1373_v3 = vld [vmem:[%s11422_s30 + $0xf8] sm:$0xff] }
 0x31f   : > { %v1205_v16 = vadd.f32 %v1196_v11, %v1195_v10  ;;  %v1207_v21 = vsel %vm1081_vm1, %v1198_v12, 0.0  ;;  %v8133_v33 = vpack.c.bf16 %v1348_v31, %v1343_v30  ;;  %v8233_v37 = vpack.c.bf16 %v1350_v34, %v1345_v32  ;;  %v1378_v10 = vld [vmem:[%s11422_s30 + $0x120] sm:$0xff]  ;;  %v1375_v11 = vld [vmem:[%s11422_s30 + $0x108] sm:$0xff]  ;;  %v1389_v31 = vld [vmem:[%s11422_s30 + $0x178] sm:$0xff] }
 0x320   : > { %v1199_v19 = vadd.f32 %v1192_v14, %v1191_v13  ;;  %v1201_v24 = vsel %vm1081_vm1, %v1194_v17, 0.0  ;;  %v8135_v38 = vpack.c.bf16 %v1347_v36, %v1342_v35  ;;  %v8235_v42 = vpack.c.bf16 %v1349_v40, %v1344_v39  ;;  %v1380_v14 = vld [vmem:[%s11422_s30 + $0x130] sm:$0xff]  ;;  %v1393_v32 = vld [vmem:[%s11422_s30 + $0x198] sm:$0xff]  ;;  %v1395_v34 = vld [vmem:[%s11422_s30 + $0x1a8] sm:$0xff] }
 0x321   : > { %v1206_v20 = vadd.f32 %v1205_v16, %v1197_v15  ;;  %8234 = vmatprep.subr.bf16.mxu1 %v8233_v37  ;;  %v8237_v47 = vpack.c.bf16 %v1360_v45, %v1355_v44  ;;  %v8139_v51 = vpack.c.bf16 %v1357_v49, %v1352_v48  ;;  %v8243_v12 = vpack.c.bf16 %v1369_v63, %v1364_v62  ;;  %v1372_v15 = vld [vmem:[%s11422_s30 + $0xf0] sm:$0xff]  ;;  %v1377_v16 = vld [vmem:[%s11422_s30 + $0x118] sm:$0xff]  ;;  %v1403_v44 = vld [vmem:[%s11422_s30 + $0x1e8] sm:$0xff] }
 0x322   : > { %v1200_v22 = vadd.f32 %v1199_v19, %v1193_v18  ;;  %8236 = vmatpush1.bf16.msra.mxu1 %v8235_v42  ;;  %v8145_v13 = vpack.c.bf16 %v1378_v10, %v1373_v3  ;;  %v8245_v17 = vpack.c.bf16 %v1380_v14, %v1375_v11  ;;  %v1374_v18 = vld [vmem:[%s11422_s30 + $0x100] sm:$0xff]  ;;  %v1379_v19 = vld [vmem:[%s11422_s30 + $0x128] sm:$0xff]  ;;  %v1400_v35 = vld [vmem:[%s11422_s30 + $0x1d0] sm:$0xff]  ;;  %v8255_v49 = vpack.c.bf16 %v1399_v43, %v1394_v41 }
 0x323   : > { %v1208_v23 = vadd.f32 %v1207_v21, %v1206_v20  ;;  %8238 = vmatprep.subr.bf16.mxu1 %v8237_v47  ;;  %v1383_v20 = vld [vmem:[%s11422_s30 + $0x148] sm:$0xff]  ;;  %v1388_v21 = vld [vmem:[%s11422_s30 + $0x170] sm:$0xff]  ;;  %v1397_v40 = vld [vmem:[%s11422_s30 + $0x1b8] sm:$0xff]  ;;  %v8253_v42 = vpack.c.bf16 %v1400_v35, %v1395_v34 }
 0x324   : > { %v1202_v25 = vadd.f32 %v1201_v24, %v1200_v22  ;;  %v1385_v22 = vld [vmem:[%s11422_s30 + $0x158] sm:$0xff]  ;;  %v8147_v24 = vpack.c.bf16 %v1377_v16, %v1372_v15  ;;  %v1392_v39 = vld [vmem:[%s11422_s30 + $0x190] sm:$0xff]  ;;  %v1410_v47 = vld [vmem:[%s11422_s30 + $0x220] sm:$0xff] }
 0x325   : > { %1209 = vadd.xlane.f32.xlu1 %v1208_v23  ;;  %v1390_v23 = vld [vmem:[%s11422_s30 + $0x180] sm:$0xff]  ;;  %v1408_v45 = vld [vmem:[%s11422_s30 + $0x210] sm:$0xff]  ;;  %v8155_v48 = vpack.c.bf16 %v1397_v40, %v1392_v39  ;;  %v1419_v11 = vld [vmem:[%s11422_s30 + $0x268] sm:$0xff] }
 0x326   : > { %1203 = vadd.xlane.f32.xlu0 %v1202_v25  ;;  %8240 = vmatpush1.bf16.msra.mxu1 %v8239_v55  ;;  %v8247_v25 = vpack.c.bf16 %v1379_v19, %v1374_v18  ;;  %v8249_v30 = vpack.c.bf16 %v1390_v23, %v1385_v22  ;;  %v8157_v50 = vpack.c.bf16 %v1408_v45, %v1403_v44  ;;  %v1409_v55 = vld [vmem:[%s11422_s30 + $0x218] sm:$0xff]  ;;  %v1412_v63 = vld [vmem:[%s11422_s30 + $0x230] sm:$0xff]  ;;  %v1414_v3 = vld [vmem:[%s11422_s30 + $0x240] sm:$0xff] }
 0x327   : > { %8242 = vmatprep.subr.bf16.mxu1 %v8241_v60  ;;  %v1425_v14 = vld [vmem:[%s11422_s30 + $0x298] sm:$0xff]  ;;  %v1430_v15 = vld [vmem:[%s11422_s30 + $0x2c0] sm:$0xff]  ;;  %v1439_v35 = vld [vmem:[%s11422_s30 + $0x308] sm:$0xff] }
 0x328   : > { %v1422_v19 = vld [vmem:[%s11422_s30 + $0x280] sm:$0xff]  ;;  %v8265_v22 = vpack.c.bf16 %v1430_v15, %v1425_v14  ;;  %v1429_v23 = vld [vmem:[%s11422_s30 + $0x2b8] sm:$0xff]  ;;  %v1447_v44 = vld [vmem:[%s11422_s30 + $0x348] sm:$0xff] }
 0x329   : > { %v1450_v39 = vld [vmem:[%s11422_s30 + $0x360] sm:$0xff]  ;;  %v1444_v45 = vld [vmem:[%s11422_s30 + $0x330] sm:$0xff]  ;;  %v1469_v15 = vld [vmem:[%s11422_s30 + $0x3f8] sm:$0xff] }
 0x32a   : > { %8244 = vmatpush1.bf16.msra.mxu1 %v8243_v12  ;;  %v1423_v12 = vld [vmem:[%s11422_s30 + $0x288] sm:$0xff]  ;;  %v1442_v43 = vld [vmem:[%s11422_s30 + $0x320] sm:$0xff] }
 0x32b   : > { %8246 = vmatprep.subr.bf16.mxu1 %v8245_v17  ;;  %v8263_v17 = vpack.c.bf16 %v1419_v11, %v1414_v3  ;;  %v1462_v11 = vld [vmem:[%s11422_s30 + $0x3c0] sm:$0xff] }
 0x32e   : > { %8248 = vmatpush1.bf16.msra.mxu1 %v8247_v25  ;;  %v1438_v25 = vld [vmem:[%s11422_s30 + $0x300] sm:$0xff] }
 0x32f   : > { %8250 = vmatprep.subr.bf16.mxu1 %v8249_v30 }
 0x336   : > { %1308 = vperm.xlu1 %8827, %v1075_v26   ;;  %v8149_v26 = vpack.c.bf16 %v1388_v21, %v1383_v20  ;;  %v1427_v20 = vld [vmem:[%s11422_s30 + $0x2a8] sm:$0xff]  ;;  %v1424_v21 = vld [vmem:[%s11422_s30 + $0x290] sm:$0xff] }
 0x3b2   : > { %v1210_v27 = vpop.xlane.xlu1 %1209 }
 0x3b3   : > { %v1204_v28 = vpop.xlane.xlu0 %1203 }
 0x3b4   : > { %v8129_v29 = vpack.c.bf16 %v1210_v27, %v1204_v28  ;;  %v1382_v27 = vld [vmem:[%s11422_s30 + $0x140] sm:$0xff]  ;;  %v1387_v28 = vld [vmem:[%s11422_s30 + $0x168] sm:$0xff] }
 0x3b5   : > { %v8151_v36 = vpack.c.bf16 %v1387_v28, %v1382_v27  ;;  %v1440_v27 = vld [vmem:[%s11422_s30 + $0x310] sm:$0xff]  ;;  %v8167_v28 = vpack.c.bf16 %v1427_v20, %v1422_v19 }
 0x3b6   : > { %8130 = vmatprep.subr.bf16.mxu0 %v8129_v29  ;;  %v1480_v19 = vld [vmem:[%s11422_s30 + $0x450] sm:$0xff] }
 0x3b7   : > { %8132 = vmatpush3.bf16.msra.mxu0 %v8129_v29  ;;  %v1384_v29 = vld [vmem:[%s11422_s30 + $0x150] sm:$0xff] }
 0x3b8   : > { %8134 = vmatprep.subr.bf16.mxu0 %v8133_v33  ;;  %v1398_v33 = vld [vmem:[%s11422_s30 + $0x1c0] sm:$0xff]  ;;  %v8251_v37 = vpack.c.bf16 %v1389_v31, %v1384_v29  ;;  %v8267_v29 = vpack.c.bf16 %v1429_v23, %v1424_v21  ;;  %v1432_v31 = vld [vmem:[%s11422_s30 + $0x2d0] sm:$0xff] }
 0x3b9   : > { %v1472_v23 = vld [vmem:[%s11422_s30 + $0x410] sm:$0xff] }
 0x3ba   : > { %7599 = vmatmul.mubr.msk.f32.vlgmr.msra.gmra.mrb[6].mxu0 %vm1081_vm1, %v1074_v61  ;;  %v1367_v61 = vld [vmem:[%s11422_s30 + $0xc8] sm:$0xff]  ;;  %8252 = vmatpush1.bf16.msra.mxu1 %v8251_v37  ;;  %v1448_v37 = vld [vmem:[%s11422_s30 + $0x350] sm:$0xff] }
 0x3bb   : > { %8136 = vmatpush1.bf16.msra.mxu0 %v8135_v38  ;;  %v8143_v0 = vpack.c.bf16 %v1367_v61, %v1362_v59  ;;  %v8153_v38 = vpack.c.bf16 %v1398_v33, %v1393_v32  ;;  %8254 = vmatprep.subr.bf16.mxu1 %v8253_v42  ;;  %v1420_v59 = vld [vmem:[%s11422_s30 + $0x270] sm:$0xff]  ;;  %v8259_v61 = vpack.c.bf16 %v1409_v55, %v1404_v53  ;;  %v1437_v32 = vld [vmem:[%s11422_s30 + $0x2f8] sm:$0xff]  ;;  %v1434_v33 = vld [vmem:[%s11422_s30 + $0x2e0] sm:$0xff] }
 0x3bc   : > { %8138 = vmatprep.subr.bf16.mxu0 %v8137_v46  ;;  %v1405_v46 = vld [vmem:[%s11422_s30 + $0x1f8] sm:$0xff]  ;;  %v8261_v10 = vpack.c.bf16 %v1420_v59, %v1415_v58  ;;  %v8171_v40 = vpack.c.bf16 %v1437_v32, %v1432_v31  ;;  %v8271_v41 = vpack.c.bf16 %v1439_v35, %v1434_v33  ;;  %v1452_v55 = vld [vmem:[%s11422_s30 + $0x370] sm:$0xff]  ;;  %v1459_v59 = vld [vmem:[%s11422_s30 + $0x3a8] sm:$0xff] }
 0x3bd   : > { %v8257_v54 = vpack.c.bf16 %v1410_v47, %v1405_v46  ;;  %v1449_v47 = vld [vmem:[%s11422_s30 + $0x358] sm:$0xff]  ;;  %v1490_v31 = vld [vmem:[%s11422_s30 + $0x4a0] sm:$0xff] }
 0x3be   : > { %8256 = vmatpush1.bf16.msra.mxu1 %v8255_v49  ;;  %v1458_v49 = vld [vmem:[%s11422_s30 + $0x3a0] sm:$0xff]  ;;  %v8275_v53 = vpack.c.bf16 %v1449_v47, %v1444_v45 }
 0x3bf   : > { %8140 = vmatpush1.bf16.msra.mxu0 %v8139_v51  ;;  %v1402_v51 = vld [vmem:[%s11422_s30 + $0x1e0] sm:$0xff]  ;;  %8258 = vmatprep.subr.bf16.mxu1 %v8257_v54 }
 0x3c0   : > { %8142 = vmatprep.subr.bf16.mxu0 %v8141_v56  ;;  %v1413_v56 = vld [vmem:[%s11422_s30 + $0x238] sm:$0xff]  ;;  %v8159_v60 = vpack.c.bf16 %v1407_v52, %v1402_v51  ;;  %v1460_v51 = vld [vmem:[%s11422_s30 + $0x3b0] sm:$0xff]  ;;  %v8175_v52 = vpack.c.bf16 %v1447_v44, %v1442_v43  ;;  %v1482_v35 = vld [vmem:[%s11422_s30 + $0x460] sm:$0xff] }
 0x3c1   : > { %v8161_v62 = vpack.c.bf16 %v1418_v57, %v1413_v56  ;;  %v1457_v56 = vld [vmem:[%s11422_s30 + $0x398] sm:$0xff]  ;;  %v1454_v57 = vld [vmem:[%s11422_s30 + $0x380] sm:$0xff] }
 0x3c2   : > { %8260 = vmatpush1.bf16.msra.mxu1 %v8259_v61  ;;  %v1468_v61 = vld [vmem:[%s11422_s30 + $0x3f0] sm:$0xff]  ;;  %v8279_v3 = vpack.c.bf16 %v1459_v59, %v1454_v57  ;;  %v1077_v47 = vld [vmem:[%s11423_s8] sm:$0xff] }
 0x3c3   : > { %8144 = vmatpush1.bf16.msra.mxu0 %v8143_v0  ;;  %v1417_v0 = vld [vmem:[%s11422_s30 + $0x258] sm:$0xff]  ;;  %8262 = vmatprep.subr.bf16.mxu1 %v8261_v10  ;;  %v1494_v57 = vld [vmem:[%s11422_s30 + $0x4c0] sm:$0xff] }
 0x3c4   : > { %8146 = vmatprep.subr.bf16.mxu0 %v8145_v13  ;;  %v1428_v13 = vld [vmem:[%s11422_s30 + $0x2b0] sm:$0xff]  ;;  %v8163_v16 = vpack.c.bf16 %v1417_v0, %v1412_v63  ;;  %v1470_v63 = vld [vmem:[%s11422_s30 + $0x400] sm:$0xff]  ;;  %v8179_v0 = vpack.c.bf16 %v1457_v56, %v1452_v55 }
 0x3c5   : > { %v8165_v18 = vpack.c.bf16 %v1428_v13, %v1423_v12  ;;  %v1467_v12 = vld [vmem:[%s11422_s30 + $0x3e8] sm:$0xff]  ;;  %v1464_v13 = vld [vmem:[%s11422_s30 + $0x3d0] sm:$0xff] }
 0x3c6   : > { %8264 = vmatpush1.bf16.msra.mxu1 %v8263_v17  ;;  %v1478_v17 = vld [vmem:[%s11422_s30 + $0x440] sm:$0xff]  ;;  %v8183_v20 = vpack.c.bf16 %v1467_v12, %v1462_v11  ;;  %v8283_v21 = vpack.c.bf16 %v1469_v15, %v1464_v13  ;;  %v1076_v11 = vld [vmem:[%s11421_s4 + $0x8] sm:$0xff]  ;;  %s9215_s4 = smov 94  }
 0x3c7   : > { %8148 = vmatpush1.bf16.msra.mxu0 %v8147_v24  ;;  %v1433_v24 = vld [vmem:[%s11422_s30 + $0x2d8] sm:$0xff]  ;;  %8266 = vmatprep.subr.bf16.mxu1 %v8265_v22  ;;  %v1078_v12 = vld [vmem:[%s11423_s8 + $0x8] sm:$0xff] }
 0x3c8   : > { %8150 = vmatprep.subr.bf16.mxu0 %v8149_v26  ;;  %v1435_v26 = vld [vmem:[%s11422_s30 + $0x2e8] sm:$0xff]  ;;  %v8169_v30 = vpack.c.bf16 %v1438_v25, %v1433_v24  ;;  %v1477_v24 = vld [vmem:[%s11422_s30 + $0x438] sm:$0xff]  ;;  %v1474_v25 = vld [vmem:[%s11422_s30 + $0x420] sm:$0xff] }
 0x3c9   : > { %v8269_v34 = vpack.c.bf16 %v1440_v27, %v1435_v26  ;;  %v1479_v27 = vld [vmem:[%s11422_s30 + $0x448] sm:$0xff]  ;;  %v8187_v32 = vpack.c.bf16 %v1477_v24, %v1472_v23  ;;  %v1520_v24 = vld [vmem:[%s11422_s30 + $0x590] sm:$0xff] }
 0x3ca   : > { %8268 = vmatpush1.bf16.msra.mxu1 %v8267_v29  ;;  %v1488_v29 = vld [vmem:[%s11422_s30 + $0x490] sm:$0xff]  ;;  %v8287_v33 = vpack.c.bf16 %v1479_v27, %v1474_v25  ;;  %v1515_v23 = vld [vmem:[%s11422_s30 + $0x568] sm:$0xff] }
 0x3cb   : > { %8152 = vmatpush1.bf16.msra.mxu0 %v8151_v36  ;;  %v1443_v36 = vld [vmem:[%s11422_s30 + $0x328] sm:$0xff]  ;;  %8270 = vmatprep.subr.bf16.mxu1 %v8269_v34 }
 0x3cc   : > { %8154 = vmatprep.subr.bf16.mxu0 %v8153_v38  ;;  %v1445_v38 = vld [vmem:[%s11422_s30 + $0x338] sm:$0xff]  ;;  %v8173_v42 = vpack.c.bf16 %v1448_v37, %v1443_v36  ;;  %v1487_v36 = vld [vmem:[%s11422_s30 + $0x488] sm:$0xff] }
 0x3cd   : > { %v8273_v46 = vpack.c.bf16 %v1450_v39, %v1445_v38  ;;  %v1484_v38 = vld [vmem:[%s11422_s30 + $0x470] sm:$0xff]  ;;  %v1489_v39 = vld [vmem:[%s11422_s30 + $0x498] sm:$0xff] }
 0x3ce   : > { %8272 = vmatpush1.bf16.msra.mxu1 %v8271_v41  ;;  %v8291_v41 = vpack.c.bf16 %v1489_v39, %v1484_v38  ;;  %v1525_v38 = vld [vmem:[%s11422_s30 + $0x5b8] sm:$0xff]  ;;  %v1530_v39 = vld [vmem:[%s11422_s30 + $0x5e0] sm:$0xff] }
 0x3cf   : > { %8156 = vmatpush1.bf16.msra.mxu0 %v8155_v48  ;;  %v1453_v48 = vld [vmem:[%s11422_s30 + $0x378] sm:$0xff]  ;;  %8274 = vmatprep.subr.bf16.mxu1 %v8273_v46 }
 0x3d0   : > { %8158 = vmatprep.subr.bf16.mxu0 %v8157_v50  ;;  %v1455_v50 = vld [vmem:[%s11422_s30 + $0x388] sm:$0xff]  ;;  %v8177_v54 = vpack.c.bf16 %v1458_v49, %v1453_v48  ;;  %v1493_v48 = vld [vmem:[%s11422_s30 + $0x4b8] sm:$0xff]  ;;  %v1498_v49 = vld [vmem:[%s11422_s30 + $0x4e0] sm:$0xff] }
 0x3d1   : > { %v8277_v58 = vpack.c.bf16 %v1460_v51, %v1455_v50  ;;  %v1495_v50 = vld [vmem:[%s11422_s30 + $0x4c8] sm:$0xff]  ;;  %v8193_v51 = vpack.c.bf16 %v1498_v49, %v1493_v48  ;;  %v1529_v48 = vld [vmem:[%s11422_s30 + $0x5d8] sm:$0xff] }
 0x3d2   : > { %8276 = vmatpush1.bf16.msra.mxu1 %v8275_v53  ;;  %v1492_v53 = vld [vmem:[%s11422_s30 + $0x4b0] sm:$0xff]  ;;  %v1533_v49 = vld [vmem:[%s11422_s30 + $0x5f8] sm:$0xff] }
 0x3d3   : > { %8160 = vmatpush1.bf16.msra.mxu0 %v8159_v60  ;;  %v1463_v60 = vld [vmem:[%s11422_s30 + $0x3c8] sm:$0xff]  ;;  %8278 = vmatprep.subr.bf16.mxu1 %v8277_v58 }
 0x3d4   : > { %8162 = vmatprep.subr.bf16.mxu0 %v8161_v62  ;;  %v1465_v62 = vld [vmem:[%s11422_s30 + $0x3d8] sm:$0xff]  ;;  %v8181_v10 = vpack.c.bf16 %v1468_v61, %v1463_v60  ;;  %v1499_v58 = vld [vmem:[%s11422_s30 + $0x4e8] sm:$0xff]  ;;  %v1508_v61 = vld [vmem:[%s11422_s30 + $0x530] sm:$0xff] }
 0x3d5   : > { %v8281_v14 = vpack.c.bf16 %v1470_v63, %v1465_v62  ;;  %v8295_v59 = vpack.c.bf16 %v1499_v58, %v1494_v57  ;;  %v1503_v60 = vld [vmem:[%s11422_s30 + $0x508] sm:$0xff]  ;;  %v1505_v62 = vld [vmem:[%s11422_s30 + $0x518] sm:$0xff] }
 0x3d6   : > { %8280 = vmatpush1.bf16.msra.mxu1 %v8279_v3  ;;  %v8197_v63 = vpack.c.bf16 %v1508_v61, %v1503_v60 }
 0x3d7   : > { %8164 = vmatpush1.bf16.msra.mxu0 %v8163_v16  ;;  %v1473_v16 = vld [vmem:[%s11422_s30 + $0x418] sm:$0xff]  ;;  %8282 = vmatprep.subr.bf16.mxu1 %v8281_v14 }
 0x3d8   : > { %8166 = vmatprep.subr.bf16.mxu0 %v8165_v18  ;;  %v1475_v18 = vld [vmem:[%s11422_s30 + $0x428] sm:$0xff]  ;;  %v8185_v22 = vpack.c.bf16 %v1478_v17, %v1473_v16  ;;  %v1502_v16 = vld [vmem:[%s11422_s30 + $0x500] sm:$0xff] }
 0x3d9   : > { %v8285_v26 = vpack.c.bf16 %v1480_v19, %v1475_v18  ;;  %v1507_v17 = vld [vmem:[%s11422_s30 + $0x528] sm:$0xff]  ;;  %v9974_v18 = vpop.permute.xlu1 %1308  ;;  %v1504_v19 = vld [vmem:[%s11422_s30 + $0x510] sm:$0xff] }
 0x3da   : > { %8284 = vmatpush1.bf16.msra.mxu1 %v8283_v21 }
 0x3db   : > { %8168 = vmatpush1.bf16.msra.mxu0 %v8167_v28  ;;  %v1483_v28 = vld [vmem:[%s11422_s30 + $0x468] sm:$0xff]  ;;  %8286 = vmatprep.subr.bf16.mxu1 %v8285_v26 }
 0x3dc   : > { %8170 = vmatprep.subr.bf16.mxu0 %v8169_v30  ;;  %v1485_v30 = vld [vmem:[%s11422_s30 + $0x478] sm:$0xff]  ;;  %v8189_v34 = vpack.c.bf16 %v1488_v29, %v1483_v28  ;;  %v8199_v28 = vpack.c.bf16 %v1507_v17, %v1502_v16 }
 0x3dd   : > { %v8289_v37 = vpack.c.bf16 %v1490_v31, %v1485_v30  ;;  %v1512_v30 = vld [vmem:[%s11422_s30 + $0x550] sm:$0xff]  ;;  %v1517_v31 = vld [vmem:[%s11422_s30 + $0x578] sm:$0xff] }
 0x3de   : > { %8288 = vmatpush1.bf16.msra.mxu1 %v8287_v33  ;;  %v8301_v33 = vpack.c.bf16 %v1520_v24, %v1515_v23 }
 0x3df   : > { %8172 = vmatpush1.bf16.msra.mxu0 %v8171_v40  ;;  %v8191_v40 = vpack.c.bf16 %v1487_v36, %v1482_v35  ;;  %8290 = vmatprep.subr.bf16.mxu1 %v8289_v37  ;;  %v1519_v35 = vld [vmem:[%s11422_s30 + $0x588] sm:$0xff]  ;;  %v1528_v37 = vld [vmem:[%s11422_s30 + $0x5d0] sm:$0xff] }
 0x3e0   : > { %8174 = vmatprep.subr.bf16.mxu0 %v8173_v42  ;;  %v1523_v36 = vld [vmem:[%s11422_s30 + $0x5a8] sm:$0xff] }
 0x3e2   : > { %8292 = vmatpush1.bf16.msra.mxu1 %v8291_v41  ;;  %v8203_v41 = vpack.c.bf16 %v1517_v31, %v1512_v30  ;;  %v1560_v30 = vld [vmem:[%s11422_s30 + $0x6d0] sm:$0xff] }
 0x3e3   : > { %8176 = vmatpush1.bf16.msra.mxu0 %v8175_v52  ;;  %v1500_v52 = vld [vmem:[%s11422_s30 + $0x4f0] sm:$0xff] }
 0x3e4   : > { %8178 = vmatprep.subr.bf16.mxu0 %v8177_v54  ;;  %v1497_v54 = vld [vmem:[%s11422_s30 + $0x4d8] sm:$0xff]  ;;  %v8293_v55 = vpack.c.bf16 %v1500_v52, %v1495_v50  ;;  %v1538_v50 = vld [vmem:[%s11422_s30 + $0x620] sm:$0xff]  ;;  %v1540_v52 = vld [vmem:[%s11422_s30 + $0x630] sm:$0xff] }
 0x3e5   : > { %v8195_v56 = vpack.c.bf16 %v1497_v54, %v1492_v53  ;;  %v8209_v60 = vpack.c.bf16 %v1538_v50, %v1533_v49 }
 0x3e6   : > { %8294 = vmatprep.subr.bf16.mxu1 %v8293_v55 }
 0x3e7   : > { %8180 = vmatpush1.bf16.msra.mxu0 %v8179_v0  ;;  %8296 = vmatpush1.bf16.msra.mxu1 %v8295_v59  ;;  %v1510_v0 = vld [vmem:[%s11422_s30 + $0x540] sm:$0xff]  ;;  %v1532_v59 = vld [vmem:[%s11422_s30 + $0x5f0] sm:$0xff] }
 0x3e8   : > { %8182 = vmatprep.subr.bf16.mxu0 %v8181_v10  ;;  %v8297_v3 = vpack.c.bf16 %v1510_v0, %v1505_v62  ;;  %v1534_v62 = vld [vmem:[%s11422_s30 + $0x600] sm:$0xff]  ;;  %v1543_v0 = vld [vmem:[%s11422_s30 + $0x648] sm:$0xff] }
 0x3ea   : > { %8298 = vmatprep.subr.bf16.mxu1 %v8297_v3 }
 0x3eb   : > { %8184 = vmatpush1.bf16.msra.mxu0 %v8183_v20 }
 0x3ec   : > { %8186 = vmatprep.subr.bf16.mxu0 %v8185_v22  ;;  %v1518_v22 = vld [vmem:[%s11422_s30 + $0x580] sm:$0xff] }
 0x3ef   : > { %8188 = vmatpush1.bf16.msra.mxu0 %v8187_v32 }
 0x3f0   : > { %8190 = vmatprep.subr.bf16.mxu0 %v8189_v34  ;;  %v1514_v34 = vld [vmem:[%s11422_s30 + $0x560] sm:$0xff] }
 0x3f3   : > { %8192 = vmatpush1.bf16.msra.mxu0 %v8191_v40 }
 0x3f4   : > { %8194 = vmatprep.subr.bf16.mxu0 %v8193_v51  ;;  %v1535_v51 = vld [vmem:[%s11422_s30 + $0x608] sm:$0xff] }
 0x3f5   : > { %v8309_v61 = vpack.c.bf16 %v1540_v52, %v1535_v51  ;;  %v1564_v51 = vld [vmem:[%s11422_s30 + $0x6f0] sm:$0xff]  ;;  %v1569_v52 = vld [vmem:[%s11422_s30 + $0x718] sm:$0xff] }
 0x3f7   : > { %8196 = vmatpush1.bf16.msra.mxu0 %v8195_v56 }
 0x3f8   : > { %8198 = vmatprep.subr.bf16.mxu0 %v8197_v63 }
 0x48d   : > { %v7600_v42 = vpop.f32.mrb[6].mxu0 }
 0x48e   : > { %v1277_v43 = vpop.f32.mrb[7].mxu0  ;;  %v1283_v45 = vadd.f32 1e-05, %v7600_v42  ;;  %v8303_v42 = vpack.c.bf16 %v1519_v35, %v1514_v34  ;;  %v1552_v34 = vld [vmem:[%s11422_s30 + $0x690] sm:$0xff]  ;;  %v1557_v35 = vld [vmem:[%s11422_s30 + $0x6b8] sm:$0xff] }
 0x48f   : > { %v1278_v44 = vadd.f32 1e-05, %v1277_v43  ;;  %v1522_v43 = vld [vmem:[%s11422_s30 + $0x5a0] sm:$0xff] }
 0x491   : > { %9178 = vrsqrt.f32 %v1278_v44  ;;  %v1527_v44 = vld [vmem:[%s11422_s30 + $0x5c8] sm:$0xff] }
 0x492   : > { %9180 = vrsqrt.f32 %v1283_v45  ;;  %v8205_v45 = vpack.c.bf16 %v1528_v37, %v1523_v36  ;;  %v8207_v55 = vpack.c.bf16 %v1527_v44, %v1522_v43  ;;  %v1565_v43 = vld [vmem:[%s11422_s30 + $0x6f8] sm:$0xff]  ;;  %v1570_v44 = vld [vmem:[%s11422_s30 + $0x720] sm:$0xff] }
 0x493   : > { %v8321_v50 = vpack.c.bf16 %v1570_v44, %v1565_v43  ;;  %v1356_v43 = vld [vmem:[%s11422_s30 + $0x70] sm:$0xff] }
 0x49b   : > { %v9179_v46 = vpop.eup %9178 }
 0x49c   : > { %1290 = vperm.xlu0 %8826, %v9179_v46   ;;  %v9181_v10 = vpop.eup %9180  ;;  %v8305_v46 = vpack.c.bf16 %v1530_v39, %v1525_v38  ;;  %v1554_v38 = vld [vmem:[%s11422_s30 + $0x6a0] sm:$0xff]  ;;  %v1559_v39 = vld [vmem:[%s11422_s30 + $0x6c8] sm:$0xff] }
 0x4a0   : > { %1326 = vperm.xlu0 %8826, %v1077_v47   ;;  %v1524_v47 = vld [vmem:[%s11422_s30 + $0x5b0] sm:$0xff] }
 0x4a1   : > { %v8307_v56 = vpack.c.bf16 %v1529_v48, %v1524_v47  ;;  %v1562_v47 = vld [vmem:[%s11422_s30 + $0x6e0] sm:$0xff]  ;;  %v1567_v48 = vld [vmem:[%s11422_s30 + $0x708] sm:$0xff] }
 0x4a4   : > { %1295 = vperm.xlu0 %8826, %v9181_v10  }
 0x4a8   : > { %1313 = vperm.xlu0 %8826, %v1076_v11  }
 0x4ac   : > { %1331 = vperm.xlu0 %8826, %v1078_v12   ;;  %v1548_v12 = vld [vmem:[%s11422_s30 + $0x670] sm:$0xff] }
 0x4ad   : > { %v8213_v23 = vpack.c.bf16 %v1548_v12, %v1543_v0  ;;  %v1588_v0 = vld [vmem:[%s11422_s30 + $0x7b0] sm:$0xff] }
 0x51b   : > { %v9962_v13 = vpop.permute.xlu0 %1290 }
 0x51c   : > { %v1298_v14 = vmul.f32 %v9962_v13, %v9527_v6  ;;  %v1299_v15 = vmul.f32 %v9962_v13, %v9529_v7  ;;  %v1509_v6 = vld [vmem:[%s11422_s30 + $0x538] sm:$0xff]  ;;  %v1301_v53 = vmul.f32 %v9962_v13, %v9533_v9 }
 0x51d   : > { %v1513_v7 = vld [vmem:[%s11422_s30 + $0x558] sm:$0xff]  ;;  %v8299_v29 = vpack.c.bf16 %v1509_v6, %v1504_v19  ;;  %v1542_v6 = vld [vmem:[%s11422_s30 + $0x640] sm:$0xff] }
 0x51e   : > { %v1317_v20 = vmul.f32 %v9974_v18, %v1299_v15  ;;  %v1316_v21 = vmul.f32 %v9974_v18, %v1298_v14  ;;  %v8201_v32 = vpack.c.bf16 %v1518_v22, %v1513_v7  ;;  %v1537_v9 = vld [vmem:[%s11422_s30 + $0x618] sm:$0xff]  ;;  %v1319_v11 = vmul.f32 %v9974_v18, %v1301_v53  ;;  %v1550_v15 = vld [vmem:[%s11422_s30 + $0x680] sm:$0xff]  ;;  %v1547_v7 = vld [vmem:[%s11422_s30 + $0x668] sm:$0xff] }
 0x51f   : > { %v9996_v25 = vpop.permute.xlu0 %1326  ;;  %v8211_v10 = vpack.c.bf16 %v1537_v9, %v1532_v59  ;;  %v1545_v14 = vld [vmem:[%s11422_s30 + $0x658] sm:$0xff]  ;;  %v8323_v59 = vpack.c.bf16 %v1569_v52, %v1564_v51  ;;  %v1572_v9 = vld [vmem:[%s11422_s30 + $0x730] sm:$0xff]  ;;  %v1366_v51 = vld [vmem:[%s11422_s30 + $0xc0] sm:$0xff] }
 0x520   : > { %v9999_v26 = vadd.f32 %v9996_v25, %v1317_v20  ;;  %v10002_v27 = vadd.f32 %v9996_v25, %v1316_v21  ;;  %v1544_v20 = vld [vmem:[%s11422_s30 + $0x650] sm:$0xff]  ;;  %v1549_v21 = vld [vmem:[%s11422_s30 + $0x678] sm:$0xff]  ;;  %v8313_v24 = vpack.c.bf16 %v1550_v15, %v1545_v14  ;;  %v10130_v31 = vadd.f32 %v9996_v25, %v1319_v11  ;;  %v1590_v11 = vld [vmem:[%s11422_s30 + $0x7c0] sm:$0xff] }
 0x521   : > { %v1553_v22 = vld [vmem:[%s11422_s30 + $0x698] sm:$0xff]  ;;  %v1582_v15 = vld [vmem:[%s11422_s30 + $0x780] sm:$0xff] }
 0x522   : > { %1662 = vmatprep.mubr.f32.mxu0 %v9999_v26  ;;  %1816 = vmatprep.mubr.f32.mxu1 %v9999_v26  ;;  %v1573_v53 = vld [vmem:[%s11422_s30 + $0x738] sm:$0xff] }
 0x523   : > { %1663 = vmatmul.mubr.f32.vlgmr.msra.gmra.mrb[8].mxu0 %v10002_v27  ;;  %1817 = vmatmul.mubr.f32.vlgmr.msra.gmra.mrb[4].mxu1 %v10002_v27  ;;  %v10032_v40 = vpop.permute.xlu0 %1295 }
 0x524   : > { %8200 = vmatpush1.bf16.msra.mxu0 %v8199_v28  ;;  %8300 = vmatpush1.bf16.msra.mxu1 %v8299_v29  ;;  %v1303_v57 = vmul.f32 %v10032_v40, %v9521_v2  ;;  %v1302_v58 = vmul.f32 %v10032_v40, %v9519_v1  ;;  %v1539_v1 = vld [vmem:[%s11422_s30 + $0x628] sm:$0xff]  ;;  %v1558_v28 = vld [vmem:[%s11422_s30 + $0x6c0] sm:$0xff] }
 0x525   : > { %8202 = vmatprep.subr.bf16.mxu0 %v8201_v32  ;;  %8302 = vmatprep.subr.bf16.mxu1 %v8301_v33  ;;  %v8311_v19 = vpack.c.bf16 %v1539_v1, %v1534_v62  ;;  %v1555_v29 = vld [vmem:[%s11422_s30 + $0x6a8] sm:$0xff]  ;;  %v8215_v32 = vpack.c.bf16 %v1547_v7, %v1542_v6  ;;  %v8315_v33 = vpack.c.bf16 %v1549_v21, %v1544_v20  ;;  %v1574_v1 = vld [vmem:[%s11422_s30 + $0x740] sm:$0xff]  ;;  %v1584_v21 = vld [vmem:[%s11422_s30 + $0x790] sm:$0xff] }
 0x526   : > { %v8217_v36 = vpack.c.bf16 %v1558_v28, %v1553_v22  ;;  %v8317_v37 = vpack.c.bf16 %v1560_v30, %v1555_v29  ;;  %v1587_v20 = vld [vmem:[%s11422_s30 + $0x7a8] sm:$0xff]  ;;  %v1589_v22 = vld [vmem:[%s11422_s30 + $0x7b8] sm:$0xff]  ;;  %v1346_v30 = vld [vmem:[%s11422_s30 + $0x20] sm:$0xff] }
 0x527   : > { %v10060_v54 = vpop.permute.xlu0 %1313 }
 0x528   : > { %8204 = vmatpush1.bf16.msra.mxu0 %v8203_v41  ;;  %8304 = vmatpush1.bf16.msra.mxu1 %v8303_v42  ;;  %v1321_v2 = vmul.f32 %v10060_v54, %v1303_v57  ;;  %v1320_v63 = vmul.f32 %v10060_v54, %v1302_v58  ;;  %v1563_v41 = vld [vmem:[%s11422_s30 + $0x6e8] sm:$0xff]  ;;  %v1568_v42 = vld [vmem:[%s11422_s30 + $0x710] sm:$0xff]  ;;  %v8223_v58 = vpack.c.bf16 %v1567_v48, %v1562_v47  ;;  %v1446_v47 = vld [vmem:[%s11422_s30 + $0x340] sm:$0xff] }
 0x529   : > { %8206 = vmatprep.subr.bf16.mxu0 %v8205_v45  ;;  %8306 = vmatprep.subr.bf16.mxu1 %v8305_v46  ;;  %v8219_v45 = vpack.c.bf16 %v1557_v35, %v1552_v34  ;;  %v8319_v46 = vpack.c.bf16 %v1559_v39, %v1554_v38  ;;  %v8221_v49 = vpack.c.bf16 %v1568_v42, %v1563_v41  ;;  %v1580_v57 = vld [vmem:[%s11422_s30 + $0x770] sm:$0xff]  ;;  %v1506_v34 = vld [vmem:[%s11422_s30 + $0x520] sm:$0xff]  ;;  %v9211_v39 = vmov 0.0|0.0   ;;  %v1451_v48 = vld [vmem:[%s11422_s30 + $0x368] sm:$0xff] }
 0x52a   : > { %v1436_v35 = vld [vmem:[%s11422_s30 + $0x2f0] sm:$0xff]  ;;  %v1304_v42 = vmul.f32 %v10032_v40, %v9523_v4  ;;  %v1521_v4 = vld [vmem:[%s11422_s30 + $0x598] sm:$0xff]  ;;  %v8341_v52 = vpack.c.bf16 %v1451_v48, %v1446_v47  ;;  %v1591_v47 = vld [vmem:[%s11422_s30 + $0x7c8] sm:$0xff] }
 0x52b   : > { %v10083_v3 = vpop.permute.xlu0 %1331 }
 0x52c   : > { %8208 = vmatpush1.bf16.msra.mxu0 %v8207_v55  ;;  %8308 = vmatpush1.bf16.msra.mxu1 %v8307_v56  ;;  %v10096_v16 = vadd.f32 %v10083_v3, %v1321_v2  ;;  %v10099_v17 = vadd.f32 %v10083_v3, %v1320_v63  ;;  %v1578_v55 = vld [vmem:[%s11422_s30 + $0x760] sm:$0xff]  ;;  %v1575_v56 = vld [vmem:[%s11422_s30 + $0x748] sm:$0xff] }
 0x52d   : > { %8210 = vmatprep.subr.bf16.mxu0 %v8209_v60  ;;  %8310 = vmatprep.subr.bf16.mxu1 %v8309_v61  ;;  %v1577_v60 = vld [vmem:[%s11422_s30 + $0x758] sm:$0xff]  ;;  %v8225_v61 = vpack.c.bf16 %v1578_v55, %v1573_v53  ;;  %v8325_v62 = vpack.c.bf16 %v1580_v57, %v1575_v56  ;;  %v1579_v2 = vld [vmem:[%s11422_s30 + $0x768] sm:$0xff]  ;;  %v1526_v55 = vld [vmem:[%s11422_s30 + $0x5c0] sm:$0xff] }
 0x52e   : > { %1668 = vmatprep.mubr.f32.mxu0 %v10096_v16  ;;  %1822 = vmatprep.mubr.f32.mxu1 %v10096_v16  ;;  %v1583_v63 = vld [vmem:[%s11422_s30 + $0x788] sm:$0xff]  ;;  %v8227_v12 = vpack.c.bf16 %v1577_v60, %v1572_v9  ;;  %v8327_v14 = vpack.c.bf16 %v1579_v2, %v1574_v1  ;;  %v1456_v56 = vld [vmem:[%s11422_s30 + $0x390] sm:$0xff]  ;;  %v1461_v57 = vld [vmem:[%s11422_s30 + $0x3b8] sm:$0xff] }
 0x52f   : > { %1669 = vmatmul.mubr.f32.gmra.mrb[10].mxu0 %v10099_v17  ;;  %1823 = vmatmul.mubr.f32.gmra.mrb[6].mxu1 %v10099_v17  ;;  %v8229_v6 = vpack.c.bf16 %v1588_v0, %v1583_v63  ;;  %v1371_v53 = vld [vmem:[%s11422_s30 + $0xe8] sm:$0xff]  ;;  %v1376_v9 = vld [vmem:[%s11422_s30 + $0x110] sm:$0xff]  ;;  %v8345_v60 = vpack.c.bf16 %v1461_v57, %v1456_v56  ;;  %v1386_v0 = vld [vmem:[%s11422_s30 + $0x160] sm:$0xff] }
 0x530   : > { %8212 = vmatpush1.bf16.msra.mxu0 %v8211_v10  ;;  %8312 = vmatpush1.bf16.msra.mxu1 %v8311_v19  ;;  %v1585_v10 = vld [vmem:[%s11422_s30 + $0x798] sm:$0xff]  ;;  %v1300_v19 = vmul.f32 %v9962_v13, %v9531_v8  ;;  %v1426_v8 = vld [vmem:[%s11422_s30 + $0x2a0] sm:$0xff]  ;;  %v1431_v13 = vld [vmem:[%s11422_s30 + $0x2c8] sm:$0xff] }
 0x531   : > { %7145 = vmatprep.mubr.msk.f32.mxu0 %vm1081_vm1, %v10130_v31  ;;  %7147 = vmatprep.mubr.msk.f32.mxu1 %vm1081_vm1, %v10130_v31  ;;  %v8329_v7 = vpack.c.bf16 %v1590_v11, %v1585_v10  ;;  %v8333_v29 = vpack.c.bf16 %v1431_v13, %v1426_v8  ;;  %v1471_v1 = vld [vmem:[%s11422_s30 + $0x408] sm:$0xff]  ;;  %v1556_v8 = vld [vmem:[%s11422_s30 + $0x6b0] sm:$0xff]  ;;  %v1561_v13 = vld [vmem:[%s11422_s30 + $0x6d8] sm:$0xff] }
 0x532   : > { %8214 = vmatprep.subr.bf16.mxu0 %v8213_v23  ;;  %8314 = vmatprep.subr.bf16.mxu1 %v8313_v24  ;;  %v8231_v23 = vpack.c.bf16 %v1587_v20, %v1582_v15  ;;  %v8331_v24 = vpack.c.bf16 %v1589_v22, %v1584_v21  ;;  %v1318_v28 = vmul.f32 %v9974_v18, %v1300_v19  ;;  %v1511_v18 = vld [vmem:[%s11422_s30 + $0x548] sm:$0xff]  ;;  %v1476_v15 = vld [vmem:[%s11422_s30 + $0x430] sm:$0xff]  ;;  %v1481_v19 = vld [vmem:[%s11422_s30 + $0x458] sm:$0xff] }
 0x533   : > { %v8366_v41 = vpack.c.bf16 %v1511_v18, %v1506_v34  ;;  %v1391_v11 = vld [vmem:[%s11422_s30 + $0x188] sm:$0xff]  ;;  %v1396_v20 = vld [vmem:[%s11422_s30 + $0x1b0] sm:$0xff]  ;;  %v8353_v21 = vpack.c.bf16 %v1481_v19, %v1476_v15  ;;  %v1401_v22 = vld [vmem:[%s11422_s30 + $0x1d8] sm:$0xff] }
 0x534   : > { %8216 = vmatpush1.bf16.msra.mxu0 %v8215_v32  ;;  %8316 = vmatpush1.bf16.msra.mxu1 %v8315_v33  ;;  %v1351_v32 = vld [vmem:[%s11422_s30 + $0x48] sm:$0xff]  ;;  %v1305_v33 = vmul.f32 %v10032_v40, %v9525_v5  ;;  %v10251_v38 = vadd.f32 %v9996_v25, %v1318_v28  ;;  %v1361_v25 = vld [vmem:[%s11422_s30 + $0x98] sm:$0xff]  ;;  %v1322_v40 = vmul.f32 %v10060_v54, %v1304_v42  ;;  %v1566_v34 = vld [vmem:[%s11422_s30 + $0x700] sm:$0xff] }
 0x535   : > { %8218 = vmatprep.subr.bf16.mxu0 %v8217_v36  ;;  %8318 = vmatprep.subr.bf16.mxu1 %v8317_v37  ;;  %v1441_v36 = vld [vmem:[%s11422_s30 + $0x318] sm:$0xff]  ;;  %v8335_v5 = vpack.c.bf16 %v1351_v32, %v1346_v30  ;;  %v8355_v28 = vpack.c.bf16 %v1401_v22, %v1396_v20  ;;  %v1406_v30 = vld [vmem:[%s11422_s30 + $0x200] sm:$0xff]  ;;  %v1571_v18 = vld [vmem:[%s11422_s30 + $0x728] sm:$0xff] }
 0x536   : > { %v1323_v37 = vmul.f32 %v10060_v54, %v1305_v33  ;;  %v8339_v54 = vpack.c.bf16 %v1361_v25, %v1356_v43  ;;  %v1411_v33 = vld [vmem:[%s11422_s30 + $0x228] sm:$0xff]  ;;  %v1421_v43 = vld [vmem:[%s11422_s30 + $0x278] sm:$0xff]  ;;  %v2058_v57 = vld [vmem:[%s11424_s6 + $0x10] sm:$0xff] }
 0x537   : > { %v1581_v25 = vld [vmem:[%s11422_s30 + $0x778] sm:$0xff] }
 0x538   : > { %8220 = vmatpush1.bf16.msra.mxu0 %v8219_v45  ;;  %8320 = vmatpush1.bf16.msra.mxu1 %v8319_v46  ;;  %v10260_v44 = vadd.f32 %v10083_v3, %v1323_v37  ;;  %v8337_v45 = vpack.c.bf16 %v1441_v36, %v1436_v35  ;;  %v1516_v46 = vld [vmem:[%s11422_s30 + $0x570] sm:$0xff]  ;;  %v1501_v36 = vld [vmem:[%s11422_s30 + $0x4f8] sm:$0xff]  ;;  %v8359_v37 = vpack.c.bf16 %v1411_v33, %v1406_v30 }
 0x539   : > { %8222 = vmatprep.subr.bf16.mxu0 %v8221_v49  ;;  %8322 = vmatprep.subr.bf16.mxu1 %v8321_v50  ;;  %v10285_v49 = vadd.f32 %v10083_v3, %v1322_v40  ;;  %v8369_v50 = vpack.c.bf16 %v1521_v4, %v1516_v46  ;;  %v1531_v3 = vld [vmem:[%s11422_s30 + $0x5e8] sm:$0xff]  ;;  %v1496_v35 = vld [vmem:[%s11422_s30 + $0x4d0] sm:$0xff]  ;;  %v1586_v40 = vld [vmem:[%s11422_s30 + $0x7a0] sm:$0xff] }
 0x53a   : > { %v8361_v42 = vpack.c.bf16 %v1501_v36, %v1496_v35  ;;  %v8390_v48 = vpack.c.bf16 %v1591_v47, %v1586_v40 }
 0x53c   : > { %8224 = vmatpush1.bf16.msra.mxu0 %v8223_v58  ;;  %8324 = vmatpush1.bf16.msra.mxu1 %v8323_v59  ;;  %v8343_v58 = vpack.c.bf16 %v1371_v53, %v1366_v51  ;;  %v8372_v59 = vpack.c.bf16 %v1531_v3, %v1526_v55 }
 0x53d   : > { %8226 = vmatprep.subr.bf16.mxu0 %v8225_v61  ;;  %8326 = vmatprep.subr.bf16.mxu1 %v8325_v62  ;;  %v1381_v61 = vld [vmem:[%s11422_s30 + $0x138] sm:$0xff]  ;;  %v1466_v62 = vld [vmem:[%s11422_s30 + $0x3e0] sm:$0xff] }
 0x53e   : > { %v8347_v2 = vpack.c.bf16 %v1381_v61, %v1376_v9  ;;  %v8349_v10 = vpack.c.bf16 %v1471_v1, %v1466_v62 }
 0x540   : > { %8228 = vmatpush1.bf16.msra.mxu0 %v8227_v12  ;;  %8328 = vmatpush1.bf16.msra.mxu1 %v8327_v14  ;;  %v1546_v12 = vld [vmem:[%s11422_s30 + $0x660] sm:$0xff]  ;;  %v1551_v14 = vld [vmem:[%s11422_s30 + $0x688] sm:$0xff] }
 0x541   : > { %8230 = vmatprep.subr.bf16.mxu0 %v8229_v6  ;;  %8330 = vmatprep.subr.bf16.mxu1 %v8329_v7  ;;  %v8351_v6 = vpack.c.bf16 %v1391_v11, %v1386_v0  ;;  %v8378_v7 = vpack.c.bf16 %v1551_v14, %v1546_v12 }
 0x544   : > { %8232 = vmatpush1.bf16.msra.mxu0 %v8231_v23  ;;  %8332 = vmatpush1.bf16.msra.mxu1 %v8331_v24  ;;  %v1486_v23 = vld [vmem:[%s11422_s30 + $0x480] sm:$0xff]  ;;  %v1491_v24 = vld [vmem:[%s11422_s30 + $0x4a8] sm:$0xff] }
 0x545   : > { %8334 = vmatprep.subr.bf16.mxu0 %v8333_v29  ;;  %8365 = vmatprep.subr.bf16.mxu1 %v9211_v39  ;;  %v8381_v29 = vpack.c.bf16 %v1561_v13, %v1556_v8  ;;  %v8357_v32 = vpack.c.bf16 %v1491_v24, %v1486_v23  ;;  %v2059_v13 = vld [vmem:[%s11424_s6 + $0x18] sm:$0xff]  ;;  %v2056_v23 = vld [vmem:[%s11424_s6] sm:$0xff] }
 0x547   : > { %1740 = vmatmul.mubr.f32.vlgmr.msra.gmra.mrb[8].mxu0 %v10251_v38  ;;  %1894 = vmatmul.mubr.f32.vlgmr.msra.gmra.mrb[4].mxu1 %v10251_v38 }
 0x548   : > { %7146 = vmatprep.mubr.msk.f32.mxu0 %vm1081_vm1, %v10260_v44  ;;  %7148 = vmatprep.mubr.msk.f32.mxu1 %vm1081_vm1, %v10260_v44 }
 0x549   : > { %8336 = vmatpush3.bf16.msra.mxu0 %v8335_v5  ;;  %8367 = vmatpush1.bf16.msra.mxu1 %v8366_v41  ;;  %v8384_v5 = vpack.c.bf16 %v1571_v18, %v1566_v34  ;;  %v1416_v41 = vld [vmem:[%s11422_s30 + $0x250] sm:$0xff] }
 0x54a   : > { %8338 = vmatprep.subr.bf16.mxu0 %v8337_v45  ;;  %8368 = vmatprep.subr.bf16.mxu1 %v9211_v39  ;;  %v1576_v45 = vld [vmem:[%s11422_s30 + $0x750] sm:$0xff]  ;;  %v8363_v46 = vpack.c.bf16 %v1421_v43, %v1416_v41 }
 0x54b   : > { %1746 = vmatmul.mubr.f32.gmra.mrb[10].mxu0 %v10285_v49  ;;  %1900 = vmatmul.mubr.f32.gmra.mrb[6].mxu1 %v10285_v49  ;;  %v8387_v4 = vpack.c.bf16 %v1581_v25, %v1576_v45 }
 0x54c   : > { %1970 = vmatprep.mubr.f32.mxu0 %v9999_v26  ;;  %7149 = vmatprep.mubr.msk.f32.mxu1 %vm1081_vm1, %v10130_v31  ;;  %v1536_v26 = vld [vmem:[%s11422_s30 + $0x610] sm:$0xff]  ;;  %v1541_v31 = vld [vmem:[%s11422_s30 + $0x638] sm:$0xff] }
 0x54d   : > { %8340 = vmatpush3.bf16.msra.mxu0 %v8339_v54  ;;  %8370 = vmatpush1.bf16.msra.mxu1 %v8369_v50  ;;  %v8375_v63 = vpack.c.bf16 %v1541_v31, %v1536_v26 }
 0x54e   : > { %8342 = vmatprep.subr.bf16.mxu0 %v8341_v52  ;;  %8371 = vmatprep.subr.bf16.mxu1 %v9211_v39 }
 0x551   : > { %8344 = vmatpush3.bf16.msra.mxu0 %v8343_v58  ;;  %8373 = vmatpush1.bf16.msra.mxu1 %v8372_v59 }
 0x552   : > { %8346 = vmatprep.subr.bf16.mxu0 %v8345_v60  ;;  %8374 = vmatprep.subr.bf16.mxu1 %v9211_v39 }
 0x555   : > { %8348 = vmatpush3.bf16.msra.mxu0 %v8347_v2  ;;  %8376 = vmatpush1.bf16.msra.mxu1 %v8375_v63 }
 0x556   : > { %8350 = vmatprep.subr.bf16.mxu0 %v8349_v10  ;;  %8377 = vmatprep.subr.bf16.mxu1 %v9211_v39 }
 0x559   : > { %8352 = vmatpush3.bf16.msra.mxu0 %v8351_v6  ;;  %8379 = vmatpush1.bf16.msra.mxu1 %v8378_v7 }
 0x55a   : > { %8354 = vmatprep.subr.bf16.mxu0 %v8353_v21  ;;  %8380 = vmatprep.subr.bf16.mxu1 %v9211_v39 }
 0x55d   : > { %8356 = vmatpush3.bf16.msra.mxu0 %v8355_v28  ;;  %8382 = vmatpush1.bf16.msra.mxu1 %v8381_v29 }
 0x55e   : > { %8358 = vmatprep.subr.bf16.mxu0 %v8357_v32  ;;  %8383 = vmatprep.subr.bf16.mxu1 %v9211_v39 }
 0x561   : > { %8360 = vmatpush3.bf16.msra.mxu0 %v8359_v37  ;;  %8385 = vmatpush1.bf16.msra.mxu1 %v8384_v5 }
 0x562   : > { %8362 = vmatprep.subr.bf16.mxu0 %v8361_v42  ;;  %8386 = vmatprep.subr.bf16.mxu1 %v9211_v39 }
 0x565   : > { %8364 = vmatpush3.bf16.msra.mxu0 %v8363_v46  ;;  %8388 = vmatpush1.bf16.msra.mxu1 %v8387_v4  ;;  %v2057_v4 = vld [vmem:[%s11424_s6 + $0x8] sm:$0xff] }
 0x566   : > { %8389 = vmatprep.subr.bf16.mxu1 %v9211_v39 }
 0x568   : > { %1971 = vmatmul.mubr.f32.vlgmr.msra.gmra.mrb[12].mxu0 %v10002_v27 }
 0x569   : > { %1975 = vmatprep.mubr.f32.mxu0 %v10096_v16  ;;  %8391 = vmatpush1.bf16.msra.mxu1 %v8390_v48 }
 0x56c   : > { %1976 = vmatmul.mubr.f32.gmra.mrb[14].mxu0 %v10099_v17  ;;  %2046 = vmatmul.mubr.f32.vlgmr.msra.gmra.mrb[8].mxu1 %v10251_v38 }
 0x56d   : > { %7150 = vmatprep.mubr.msk.f32.mxu1 %vm1081_vm1, %v10260_v44  ;;  %7605 = vmatprep.mubr.msk.f32.mxu0 %vm1081_vm1, %v2058_v57 }
 0x570   : > { %2051 = vmatmul.mubr.f32.gmra.mrb[10].mxu1 %v10285_v49 }
 0x61a   : > { %v1741_v54 = vpop.f32.mrb[8].mxu0  ;;  %v1895_v50 = vpop.f32.mrb[4].mxu1 }
 0x61b   : > { %v1743_v51 = vpop.f32.mrb[9].mxu0  ;;  %v1897_v52 = vpop.f32.mrb[5].mxu1 }
 0x61c   : > { %v8828_v53 = vpack.i.bf16 %v1897_v52, %v1895_v50  ;;  %v10415_v39 = vpack.i.bf16 %v1895_v50, %v1743_v51  ;;  %v10417_v27 = vpack.i.bf16 %v1743_v51, %v1741_v54  ;;  %v2254_v51 = vld [vmem:[%s11424_s6 + $0x20] sm:$0xff] }
 0x61e   : > { %8829 = vrot.lane.b32.xlu1 %v8828_v53, %s9212_s9  ;;  %v1747_v16 = vpop.f32.mrb[10].mxu0  ;;  %v1901_v17 = vpop.f32.mrb[6].mxu1 }
 0x61f   : > { %v1749_v55 = vpop.f32.mrb[11].mxu0  ;;  %v1903_v38 = vpop.f32.mrb[7].mxu1 }
 0x620   : > { %v8833_v3 = vpack.i.bf16 %v1903_v38, %v1901_v17  ;;  %v8873_v56 = vpack.i.bf16 %v1901_v17, %v1749_v55  ;;  %v8883_v44 = vpack.i.bf16 %v1749_v55, %v1747_v16 }
 0x622   : > { %8834 = vrot.lane.b32.xlu0 %v8833_v3, %s9212_s9  ;;  %s9221_s9 = smov 83  }
 0x63b   : > { %v7335_v49 = vpop.f32.mrb[12].mxu0 }
 0x63c   : > { %v7336_v58 = vpop.f32.mrb[13].mxu0 }
 0x63d   : > { %v7337_v59 = vadd.f32 %v7336_v58, %v7335_v49 }
 0x63f   : > { %v7338_v9 = vpop.f32.mrb[14].mxu0  ;;  %v2047_v60 = vpop.f32.mrb[8].mxu1 }
 0x640   : > { %v2048_v61 = vadd.f32 %v7337_v59, %v2047_v60  ;;  %v7339_v26 = vpop.f32.mrb[15].mxu0  ;;  %v2049_v31 = vpop.f32.mrb[9].mxu1 }
 0x641   : > { %v7340_v62 = vadd.f32 %v7339_v26, %v7338_v9  ;;  %v2352_v9 = vld [vmem:[%s11424_s6 + $0x30] sm:$0xff] }
 0x642   : > { %v8838_v1 = vpack.i.bf16 %v2048_v61, %v1897_v52 }
 0x643   : > { %v2052_v2 = vpop.f32.mrb[10].mxu1 }
 0x644   : > { %v2053_v63 = vadd.f32 %v7340_v62, %v2052_v2  ;;  %v2054_v0 = vpop.f32.mrb[11].mxu1  ;;  %8839 = vrot.lane.b32.xlu1 %v8838_v1, %s9213_s1 }
 0x645   : > { %v2450_v0 = vld [vmem:[%s11424_s6 + $0x40] sm:$0xff] }
 0x646   : > { %v8843_v10 = vpack.i.bf16 %v2053_v63, %v1903_v38 }
 0x648   : > { %8844 = vrot.lane.b32.xlu0 %v8843_v10, %s9213_s1  ;;  %8849 = vrot.lane.b32.xlu1 %v8838_v1, %s9214_s7  ;;  %s9224_s1 = smov 88  }
 0x64c   : > { %8854 = vrot.lane.b32.xlu0 %v8843_v10, %s9214_s7  ;;  %8859 = vrot.lane.b32.xlu1 %v8828_v53, %s9215_s4  ;;  %s11394_s7 = smov 103  }
 0x650   : > { %8864 = vrot.lane.b32.xlu0 %v8833_v3, %s9215_s4  ;;  %8869 = vrot.lane.b32.xlu1 %v10415_v39, %s9216_s0  ;;  %s9226_s4 = smov 87  }
 0x654   : > { %8874 = vrot.lane.b32.xlu0 %v8873_v56, %s9216_s0  ;;  %8879 = vrot.lane.b32.xlu1 %v10417_v27, %s11398_s10  ;;  %s11392_s0 = smov 102  }
 0x658   : > { %8884 = vrot.lane.b32.xlu0 %v8883_v44, %s11398_s10  ;;  %8889 = vrot.lane.b32.xlu1 %v10415_v39, %s9218_s28  ;;  %s9229_s10 = smov 116  }
 0x65c   : > { %8894 = vrot.lane.b32.xlu0 %v8873_v56, %s9218_s28  ;;  %8899 = vrot.lane.b32.xlu1 %v10417_v27, %s11396_s27 }
 0x660   : > { %8904 = vrot.lane.b32.xlu0 %v8883_v44, %s11396_s27  ;;  %8909 = vrot.lane.b32.xlu1 %v8838_v1, %s9220_s29  ;;  %s11428_s27 = smov 115  }
 0x664   : > { %8914 = vrot.lane.b32.xlu0 %v8843_v10, %s9220_s29  ;;  %8919 = vrot.lane.b32.xlu1 %v8828_v53, %s9221_s9  ;;  %s11429_s29 = smov 114  }
 0x668   : > { %8924 = vrot.lane.b32.xlu0 %v8833_v3, %s9221_s9  ;;  %8929 = vrot.lane.b32.xlu1 %v8838_v1, %s9222_s2  ;;  %s11425_s9 = sld [smem:[#allocation11_spill]]  ;;  %v2353_v1 = vld [vmem:[%s11424_s6 + $0x38] sm:$0xff] }
 0x66c   : > { %8934 = vrot.lane.b32.xlu0 %v8843_v10, %s9222_s2  ;;  %8939 = vrot.lane.b32.xlu1 %v8828_v53, %s9223_s5  ;;  %s11426_s2 = sld [smem:[#allocation12_spill]] }
 0x66e   : > { %v3630_v11 = vld [vmem:[%s11425_s9] sm:$0xff]  ;;  %v3631_v12 = vld [vmem:[%s11425_s9 + $0x8] sm:$0xff] }
 0x670   : > { %8944 = vrot.lane.b32.xlu0 %v8833_v3, %s9223_s5  ;;  %8949 = vrot.lane.b32.xlu1 %v10415_v39, %s9224_s1  ;;  %s11427_s5 = sld [smem:[#allocation13_spill]] }
 0x674   : > { %8954 = vrot.lane.b32.xlu0 %v8873_v56, %s9224_s1  ;;  %8959 = vrot.lane.b32.xlu1 %v10417_v27, %s11394_s7  ;;  %s9230_s1 = smov 126  }
 0x678   : > { %8964 = vrot.lane.b32.xlu0 %v8883_v44, %s11394_s7  ;;  %8969 = vrot.lane.b32.xlu1 %v10415_v39, %s9226_s4  ;;  %s9231_s7 = smov 104  }
 0x67c   : > { %8974 = vrot.lane.b32.xlu0 %v8873_v56, %s9226_s4  ;;  %8979 = vrot.lane.b32.xlu1 %v10417_v27, %s11392_s0  ;;  %s9232_s4 = smov 127  }
 0x680   : > { %8984 = vrot.lane.b32.xlu0 %v8883_v44, %s11392_s0  ;;  %3634 = vperm.xlu1 %8827, %v3630_v11   ;;  %v2255_v44 = vld [vmem:[%s11424_s6 + $0x28] sm:$0xff]  ;;  %s11431_s0 = smov 102  }
 0x684   : > { %3639 = vperm.xlu0 %8826, %v3631_v12  }
 0x690   : > { %v8830_v14 = vpop.permute.xlu1 %8829 }
 0x691   : > { %v8832_v15 = vunpack.i.h.bf16 %v8830_v14  ;;  %v8831_v19 = vunpack.i.l.bf16 %v8830_v14 }
 0x693   : > { %v2073_v21 = vsel %vm2072_vm2, %v8831_v19, %v8832_v15 }
 0x694   : > { %v8835_v6 = vpop.permute.xlu0 %8834 }
 0x695   : > { %v8837_v7 = vunpack.i.h.bf16 %v8835_v6  ;;  %v8836_v20 = vunpack.i.l.bf16 %v8835_v6 }
 0x697   : > { %v2074_v22 = vsel %vm2072_vm2, %v8836_v20, %v8837_v7  ;;  %v2451_v7 = vld [vmem:[%s11424_s6 + $0x48] sm:$0xff]  ;;  %vm3444_vm2 = vcmask 711680  }
 0x698   : > { %v8392_v8 = vpack.c.bf16 %v2074_v22, %v2073_v21  ;;  %v2550_v22 = vld [vmem:[%s11424_s6 + $0x50] sm:$0xff] }
 0x69a   : > { %8393 = vmatprep.subr.bf16.mxu0 %v8392_v8 }
 0x69b   : > { %8395 = vmatpush3.bf16.msra.mxu0 %v8392_v8 }
 0x69e   : > { %7606 = vmatmul.mubr.msk.f32.vlgmr.msra.gmra.mrb[16].mxu0 %vm1081_vm1, %v2059_v13 }
 0x69f   : > { %7612 = vmatprep.mubr.msk.f32.mxu0 %vm1081_vm1, %v2056_v23 }
 0x6b6   : > { %v8840_v24 = vpop.permute.xlu1 %8839 }
 0x6b7   : > { %v8842_v28 = vunpack.i.h.bf16 %v8840_v24  ;;  %v8841_v29 = vunpack.i.l.bf16 %v8840_v24 }
 0x6b9   : > { %v2169_v36 = vsel %vm2168_vm3, %v8841_v29, %v8842_v28 }
 0x6ba   : > { %v8845_v30 = vpop.permute.xlu0 %8844  ;;  %v8850_v32 = vpop.permute.xlu1 %8849 }
 0x6bb   : > { %v8847_v33 = vunpack.i.h.bf16 %v8845_v30  ;;  %v8846_v34 = vunpack.i.l.bf16 %v8845_v30  ;;  %v8852_v18 = vunpack.i.h.bf16 %v8850_v32  ;;  %v8851_v35 = vunpack.i.l.bf16 %v8850_v32  ;;  %v2551_v32 = vld [vmem:[%s11424_s6 + $0x58] sm:$0xff] }
 0x6bd   : > { %v2170_v37 = vsel %vm2168_vm3, %v8846_v34, %v8847_v33  ;;  %v2265_v40 = vsel %vm2264_vm4, %v8851_v35, %v8852_v18  ;;  %v2650_v18 = vld [vmem:[%s11424_s6 + $0x60] sm:$0xff]  ;;  %vm3542_vm3 = vcmask 834560  }
 0x6be   : > { %v8855_v5 = vpop.permute.xlu0 %8854  ;;  %v8860_v41 = vpop.permute.xlu1 %8859  ;;  %v8396_v42 = vpack.c.bf16 %v2170_v37, %v2169_v36 }
 0x6bf   : > { %v8857_v43 = vunpack.i.h.bf16 %v8855_v5  ;;  %v8856_v45 = vunpack.i.l.bf16 %v8855_v5  ;;  %v8862_v25 = vunpack.i.h.bf16 %v8860_v41  ;;  %v8861_v46 = vunpack.i.l.bf16 %v8860_v41 }
 0x6c0   : > { %8397 = vmatprep.subr.bf16.mxu0 %v8396_v42 }
 0x6c1   : > { %8399 = vmatpush3.bf16.msra.mxu0 %v8396_v42  ;;  %v2266_v47 = vsel %vm2264_vm4, %v8856_v45, %v8857_v43  ;;  %v2363_v16 = vsel %vm2362_vm5, %v8861_v46, %v8862_v25  ;;  %v2651_v45 = vld [vmem:[%s11424_s6 + $0x68] sm:$0xff]  ;;  %vm3661_vm4 = vcmask 965632  }
 0x6c2   : > { %v8865_v48 = vpop.permute.xlu0 %8864  ;;  %v8870_v54 = vpop.permute.xlu1 %8869  ;;  %v8400_v50 = vpack.c.bf16 %v2266_v47, %v2265_v40 }
 0x6c3   : > { %v8867_v52 = vunpack.i.h.bf16 %v8865_v48  ;;  %v8866_v53 = vunpack.i.l.bf16 %v8865_v48  ;;  %v8872_v39 = vunpack.i.h.bf16 %v8870_v54  ;;  %v8871_v27 = vunpack.i.l.bf16 %v8870_v54 }
 0x6c4   : > { %7613 = vmatmul.mubr.msk.f32.vlgmr.msra.gmra.mrb[16].mxu0 %vm1081_vm1, %v2057_v4  ;;  %8401 = vmatprep.subr.bf16.mxu0 %v8400_v50  ;;  %v2748_v4 = vld [vmem:[%s11424_s6 + $0x70] sm:$0xff] }
 0x6c5   : > { %8403 = vmatpush3.bf16.msra.mxu0 %v8400_v50  ;;  %v2364_v17 = vsel %vm2362_vm5, %v8866_v53, %v8867_v52  ;;  %7619 = vmatprep.mubr.msk.f32.mxu0 %vm1081_vm1, %v2254_v51  ;;  %v2463_v49 = vsel %vm2462_vm6, %v8871_v27, %v8872_v39  ;;  %v2749_v53 = vld [vmem:[%s11424_s6 + $0x78] sm:$0xff]  ;;  %vm3920_vm5 = vcmask 1045504  }
 0x6c6   : > { %v8875_v55 = vpop.permute.xlu0 %8874  ;;  %v8404_v38 = vpack.c.bf16 %v2364_v17, %v2363_v16  ;;  %v8880_v60 = vpop.permute.xlu1 %8879  ;;  %v2846_v16 = vld [vmem:[%s11424_s6 + $0x80] sm:$0xff] }
 0x6c7   : > { %v8877_v3 = vunpack.i.h.bf16 %v8875_v55  ;;  %v8876_v56 = vunpack.i.l.bf16 %v8875_v55  ;;  %v8882_v31 = vunpack.i.h.bf16 %v8880_v60  ;;  %v8881_v62 = vunpack.i.l.bf16 %v8880_v60 }
 0x6c8   : > { %8405 = vmatprep.subr.bf16.mxu0 %v8404_v38 }
 0x6c9   : > { %v2464_v57 = vsel %vm2462_vm6, %v8876_v56, %v8877_v3  ;;  %v2563_v10 = vsel %vm2562_vm7, %v8881_v62, %v8882_v31  ;;  %vm4339_vm6 = vcmask 949248  }
 0x6ca   : > { %v8885_v58 = vpop.permute.xlu0 %8884  ;;  %v8408_v59 = vpack.c.bf16 %v2464_v57, %v2463_v49  ;;  %v8890_v11 = vpop.permute.xlu1 %8889  ;;  %v2847_v57 = vld [vmem:[%s11424_s6 + $0x88] sm:$0xff] }
 0x6cb   : > { %v8887_v61 = vunpack.i.h.bf16 %v8885_v58  ;;  %v8886_v26 = vunpack.i.l.bf16 %v8885_v58  ;;  %v8892_v19 = vunpack.i.h.bf16 %v8890_v11  ;;  %v8891_v6 = vunpack.i.l.bf16 %v8890_v11  ;;  %v3042_v11 = vld [vmem:[%s11424_s6 + $0xa0] sm:$0xff] }
 0x6cc   : > { %7620 = vmatmul.mubr.msk.f32.vlgmr.msra.gmra.mrb[16].mxu0 %vm1081_vm1, %v2255_v44 }
 0x6cd   : > { %8407 = vmatpush3.bf16.msra.mxu0 %v8404_v38  ;;  %7626 = vmatprep.mubr.msk.f32.mxu0 %vm1081_vm1, %v2352_v9  ;;  %v2564_v2 = vsel %vm2562_vm7, %v8886_v26, %v8887_v61  ;;  %v2661_v8 = vsel %vm2660_vm8, %v8891_v6, %v8892_v19  ;;  %v2944_v9 = vld [vmem:[%s11424_s6 + $0x90] sm:$0xff] }
 0x6ce   : > { %8409 = vmatprep.subr.bf16.mxu0 %v8408_v59  ;;  %v8895_v63 = vpop.permute.xlu0 %8894  ;;  %v8412_v12 = vpack.c.bf16 %v2564_v2, %v2563_v10  ;;  %v8900_v13 = vpop.permute.xlu1 %8899 }
 0x6cf   : > { %v8897_v14 = vunpack.i.h.bf16 %v8895_v63  ;;  %v8896_v15 = vunpack.i.l.bf16 %v8895_v63  ;;  %v8902_v29 = vunpack.i.h.bf16 %v8900_v13  ;;  %v8901_v30 = vunpack.i.l.bf16 %v8900_v13  ;;  %v2945_v63 = vld [vmem:[%s11424_s6 + $0x98] sm:$0xff]  ;;  %v3140_v13 = vld [vmem:[%s11424_s6 + $0xb0] sm:$0xff] }
 0x6d1   : > { %v2662_v20 = vsel %vm2660_vm8, %v8896_v15, %v8897_v14  ;;  %v2759_v35 = vsel %vm2758_vm9, %v8901_v30, %v8902_v29  ;;  %vm6217_vm8 = vcmask 744448  }
 0x6d2   : > { %v8905_v21 = vpop.permute.xlu0 %8904  ;;  %v8416_v23 = vpack.c.bf16 %v2662_v20, %v2661_v8  ;;  %v8910_v36 = vpop.permute.xlu1 %8909 }
 0x6d3   : > { %v8907_v24 = vunpack.i.h.bf16 %v8905_v21  ;;  %v8906_v28 = vunpack.i.l.bf16 %v8905_v21  ;;  %v8912_v42 = vunpack.i.h.bf16 %v8910_v36  ;;  %v8911_v43 = vunpack.i.l.bf16 %v8910_v36  ;;  %v3043_v21 = vld [vmem:[%s11424_s6 + $0xa8] sm:$0xff]  ;;  %v3238_v36 = vld [vmem:[%s11424_s6 + $0xc0] sm:$0xff] }
 0x6d4   : > { %7627 = vmatmul.mubr.msk.f32.vlgmr.msra.gmra.mrb[16].mxu0 %vm1081_vm1, %v2353_v1 }
 0x6d5   : > { %8411 = vmatpush3.bf16.msra.mxu0 %v8408_v59  ;;  %7633 = vmatprep.mubr.msk.f32.mxu0 %vm1081_vm1, %v2450_v0  ;;  %v2760_v33 = vsel %vm2758_vm9, %v8906_v28, %v8907_v24  ;;  %v2857_v40 = vsel %vm2856_vm10, %v8911_v43, %v8912_v42 }
 0x6d6   : > { %8413 = vmatprep.subr.bf16.mxu0 %v8412_v12  ;;  %v8915_v34 = vpop.permute.xlu0 %8914  ;;  %v8420_v37 = vpack.c.bf16 %v2760_v33, %v2759_v35  ;;  %v8920_v47 = vpop.permute.xlu1 %8919 }
 0x6d7   : > { %v8917_v5 = vunpack.i.h.bf16 %v8915_v34  ;;  %v8916_v41 = vunpack.i.l.bf16 %v8915_v34  ;;  %v8922_v51 = vunpack.i.h.bf16 %v8920_v47  ;;  %v8921_v52 = vunpack.i.l.bf16 %v8920_v47  ;;  %v3141_v34 = vld [vmem:[%s11424_s6 + $0xb8] sm:$0xff]  ;;  %v3336_v47 = vld [vmem:[%s11424_s6 + $0xd0] sm:$0xff] }
 0x6d9   : > { %v2858_v25 = vsel %vm2856_vm10, %v8916_v41, %v8917_v5  ;;  %v2955_v17 = vsel %vm2954_vm11, %v8921_v52, %v8922_v51  ;;  %vm6477_vm10 = vcmask 728064  }
 0x6da   : > { %v8925_v46 = vpop.permute.xlu0 %8924  ;;  %v8424_v48 = vpack.c.bf16 %v2858_v25, %v2857_v40  ;;  %v8930_v55 = vpop.permute.xlu1 %8929 }
 0x6db   : > { %v8927_v54 = vunpack.i.h.bf16 %v8925_v46  ;;  %v8926_v50 = vunpack.i.l.bf16 %v8925_v46  ;;  %v8932_v44 = vunpack.i.h.bf16 %v8930_v55  ;;  %v8931_v49 = vunpack.i.l.bf16 %v8930_v55  ;;  %v3239_v46 = vld [vmem:[%s11424_s6 + $0xc8] sm:$0xff] }
 0x6dc   : > { %7634 = vmatmul.mubr.msk.f32.vlgmr.msra.gmra.mrb[16].mxu0 %vm1081_vm1, %v2451_v7 }
 0x6dd   : > { %8415 = vmatpush3.bf16.msra.mxu0 %v8412_v12  ;;  %7640 = vmatprep.mubr.msk.f32.mxu0 %vm1081_vm1, %v2550_v22  ;;  %v2956_v39 = vsel %vm2954_vm11, %v8926_v50, %v8927_v54  ;;  %v3053_v60 = vsel %vm3052_vm12, %v8931_v49, %v8932_v44  ;;  %v3533_v44 = vld [vmem:[%s11424_s6 + $0xf8] sm:$0xff]  ;;  %vm6642_vm11 = vcmask 752640  }
 0x6de   : > { %8417 = vmatprep.subr.bf16.mxu0 %v8416_v23  ;;  %v8935_v27 = vpop.permute.xlu0 %8934  ;;  %v8428_v38 = vpack.c.bf16 %v2956_v39, %v2955_v17  ;;  %v8940_v61 = vpop.permute.xlu1 %8939  ;;  %v3434_v17 = vld [vmem:[%s11424_s6 + $0xe0] sm:$0xff] }
 0x6df   : > { %v8937_v3 = vunpack.i.h.bf16 %v8935_v27  ;;  %v8936_v56 = vunpack.i.l.bf16 %v8935_v27  ;;  %v8942_v1 = vunpack.i.h.bf16 %v8940_v61  ;;  %v8941_v2 = vunpack.i.l.bf16 %v8940_v61  ;;  %v3337_v27 = vld [vmem:[%s11424_s6 + $0xd8] sm:$0xff]  ;;  %v10580_v61 = vld [vmem:[%s11372_s22] ss:$0 sm:$0xff] }
 0x6e1   : > { %v3054_v58 = vsel %vm3052_vm12, %v8936_v56, %v8937_v3  ;;  %v3151_v12 = vsel %vm3150_vm13, %v8941_v2, %v8942_v1  ;;  %v3435_v3 = vld [vmem:[%s11424_s6 + $0xe8] sm:$0xff]  ;;  %v3532_v56 = vld [vmem:[%s11424_s6 + $0xf0] sm:$0xff]  ;;  %vm6981_vm12 = vcmask 1043456  }
 0x6e2   : > { %v8945_v59 = vpop.permute.xlu0 %8944  ;;  %v8432_v26 = vpack.c.bf16 %v3054_v58, %v3053_v60  ;;  %v8950_v14 = vpop.permute.xlu1 %8949 }
 0x6e3   : > { %v8947_v31 = vunpack.i.h.bf16 %v8945_v59  ;;  %v8946_v62 = vunpack.i.l.bf16 %v8945_v59  ;;  %v8952_v7 = vunpack.i.h.bf16 %v8950_v14  ;;  %v8951_v20 = vunpack.i.l.bf16 %v8950_v14  ;;  %v3648_v14 = vld [vmem:[%s11361_s11 + $0x8] sm:$0xff] }
 0x6e4   : > { %7641 = vmatmul.mubr.msk.f32.vlgmr.msra.gmra.mrb[16].mxu0 %vm1081_vm1, %v2551_v32 }
 0x6e5   : > { %8419 = vmatpush3.bf16.msra.mxu0 %v8416_v23  ;;  %7647 = vmatprep.mubr.msk.f32.mxu0 %vm1081_vm1, %v2650_v18  ;;  %v3152_v0 = vsel %vm3150_vm13, %v8946_v62, %v8947_v31  ;;  %v3249_v23 = vsel %vm3248_vm14, %v8951_v20, %v8952_v7  ;;  %vm9238_vm13 = vmmov 1  }
 0x6e6   : > { %8421 = vmatprep.subr.bf16.mxu0 %v8420_v37  ;;  %v8955_v10 = vpop.permute.xlu0 %8954  ;;  %v8436_v15 = vpack.c.bf16 %v3152_v0, %v3151_v12  ;;  %v8960_v24 = vpop.permute.xlu1 %8959  ;;  %v3647_v0 = vld [vmem:[%s11361_s11] sm:$0xff] }
 0x6e7   : > { %v8957_v19 = vunpack.i.h.bf16 %v8955_v10  ;;  %v8956_v6 = vunpack.i.l.bf16 %v8955_v10  ;;  %v8962_v32 = vunpack.i.h.bf16 %v8960_v24  ;;  %v8961_v33 = vunpack.i.l.bf16 %v8960_v24  ;;  %7717 = vmatprep.mubr.msk.f32.mxu1 %vm1081_vm1, %v3647_v0 }
 0x6e9   : > { %v3250_v22 = vsel %vm3248_vm14, %v8956_v6, %v8957_v19  ;;  %vm8681_vm14 = vmpackc.low %vm6981_vm12, %vm9238_vm13 }
 0x6ea   : > { %v8965_v8 = vpop.permute.xlu0 %8964  ;;  %v8440_v28 = vpack.c.bf16 %v3250_v22, %v3249_v23  ;;  %v8970_v5 = vpop.permute.xlu1 %8969 }
 0x6eb   : > { %v8967_v29 = vunpack.i.h.bf16 %v8965_v8  ;;  %v8966_v30 = vunpack.i.l.bf16 %v8965_v8  ;;  %v8971_v25 = vunpack.i.l.bf16 %v8970_v5 }
 0x6ec   : > { %7648 = vmatmul.mubr.msk.f32.vlgmr.msra.gmra.mrb[16].mxu0 %vm1081_vm1, %v2651_v45  ;;  %v8972_v45 = vunpack.i.h.bf16 %v8970_v5  ;;  %v3889_v5 = vld [vmem:[%s11374_s24 + $0x28] sm:$0xff] }
 0x6ed   : > { %8423 = vmatpush3.bf16.msra.mxu0 %v8420_v37  ;;  %7654 = vmatprep.mubr.msk.f32.mxu0 %vm1081_vm1, %v2748_v4  ;;  %v3348_v18 = vsel %vm3346_vm15, %v8966_v30, %v8967_v29  ;;  %v3347_v37 = vsel %vm3346_vm15, %v8961_v33, %v8962_v32  ;;  %v3649_v29 = vld [vmem:[%s11426_s2] sm:$0xff] }
 0x6ee   : > { %8425 = vmatprep.subr.bf16.mxu0 %v8424_v48  ;;  %v8975_v35 = vpop.permute.xlu0 %8974  ;;  %v8444_v41 = vpack.c.bf16 %v3348_v18, %v3347_v37  ;;  %v8980_v54 = vpop.permute.xlu1 %8979  ;;  %v3887_v18 = vld [vmem:[%s11374_s24 + $0x18] sm:$0xff]  ;;  %v3886_v37 = vld [vmem:[%s11374_s24 + $0x10] sm:$0xff] }
 0x6ef   : > { %v8977_v42 = vunpack.i.h.bf16 %v8975_v35  ;;  %v8976_v43 = vunpack.i.l.bf16 %v8975_v35  ;;  %v8981_v39 = vunpack.i.l.bf16 %v8980_v54  ;;  %v3884_v35 = vld [vmem:[%s11374_s24] sm:$0xff] }
 0x6f1   : > { %v3446_v4 = vsel %vm3444_vm2, %v8976_v43, %v8977_v42  ;;  %v10629_v42 = vpack.c.bf16 %v3886_v37, %v3884_v35 }
 0x6f2   : > { %v8985_v40 = vpop.permute.xlu0 %8984 }
 0x6f3   : > { %v8987_v51 = vunpack.i.h.bf16 %v8985_v40  ;;  %v8986_v52 = vunpack.i.l.bf16 %v8985_v40 }
 0x6f4   : > { %7655 = vmatmul.mubr.msk.f32.vlgmr.msra.gmra.mrb[16].mxu0 %vm1081_vm1, %v2749_v53  ;;  %v8982_v53 = vunpack.i.h.bf16 %v8980_v54  ;;  %v3894_v54 = vld [vmem:[%s11374_s24 + $0x50] sm:$0xff] }
 0x6f5   : > { %8427 = vmatpush3.bf16.msra.mxu0 %v8424_v48  ;;  %7661 = vmatprep.mubr.msk.f32.mxu0 %vm1081_vm1, %v2846_v16  ;;  %v3445_v48 = vsel %vm3444_vm2, %v8971_v25, %v8972_v45  ;;  %v3544_v16 = vsel %vm3542_vm3, %v8986_v52, %v8987_v51  ;;  %v3888_v45 = vld [vmem:[%s11374_s24 + $0x20] sm:$0xff]  ;;  %v3890_v25 = vld [vmem:[%s11374_s24 + $0x30] sm:$0xff]  ;;  %v3899_v51 = vld [vmem:[%s11374_s24 + $0x78] sm:$0xff] }
 0x6f6   : > { %8429 = vmatprep.subr.bf16.mxu0 %v8428_v38  ;;  %v8448_v50 = vpack.c.bf16 %v3446_v4, %v3445_v48  ;;  %v3543_v55 = vsel %vm3542_vm3, %v8981_v39, %v8982_v53  ;;  %v3895_v4 = vld [vmem:[%s11374_s24 + $0x58] sm:$0xff]  ;;  %v10647_v40 = vpack.c.bf16 %v3890_v25, %v3888_v45  ;;  %v3892_v48 = vld [vmem:[%s11374_s24 + $0x40] sm:$0xff] }
 0x6f7   : > { %v10665_v52 = vpack.c.bf16 %v3894_v54, %v3892_v48  ;;  %v3896_v39 = vld [vmem:[%s11374_s24 + $0x60] sm:$0xff] }
 0x6fc   : > { %7662 = vmatmul.mubr.msk.f32.vlgmr.msra.gmra.mrb[16].mxu0 %vm1081_vm1, %v2847_v57 }
 0x6fd   : > { %8431 = vmatpush3.bf16.msra.mxu0 %v8428_v38  ;;  %7668 = vmatprep.mubr.msk.f32.mxu0 %vm1081_vm1, %v2944_v9  ;;  %v8452_v38 = vpack.c.bf16 %v3544_v16, %v3543_v55  ;;  %v3901_v16 = vld [vmem:[%s11374_s24 + $0x88] sm:$0xff] }
 0x6fe   : > { %8433 = vmatprep.subr.bf16.mxu0 %v8432_v26 }
 0x6ff   : > { %v3635_v58 = vpop.permute.xlu1 %3634 }
 0x703   : > { %v3640_v49 = vpop.permute.xlu0 %3639 }
 0x704   : > { %7669 = vmatmul.mubr.msk.f32.vlgmr.msra.gmra.mrb[16].mxu0 %vm1081_vm1, %v2945_v63 }
 0x705   : > { %8435 = vmatpush3.bf16.msra.mxu0 %v8432_v26  ;;  %7675 = vmatprep.mubr.msk.f32.mxu0 %vm1081_vm1, %v3042_v11 }
 0x706   : > { %8437 = vmatprep.subr.bf16.mxu0 %v8436_v15 }
 0x70c   : > { %7676 = vmatmul.mubr.msk.f32.vlgmr.msra.gmra.mrb[16].mxu0 %vm1081_vm1, %v3043_v21 }
 0x70d   : > { %8439 = vmatpush3.bf16.msra.mxu0 %v8436_v15  ;;  %7682 = vmatprep.mubr.msk.f32.mxu0 %vm1081_vm1, %v3140_v13 }
 0x70e   : > { %8441 = vmatprep.subr.bf16.mxu0 %v8440_v28 }
 0x714   : > { %7683 = vmatmul.mubr.msk.f32.vlgmr.msra.gmra.mrb[16].mxu0 %vm1081_vm1, %v3141_v34  ;;  %v3885_v34 = vld [vmem:[%s11374_s24 + $0x8] sm:$0xff] }
 0x715   : > { %8443 = vmatpush3.bf16.msra.mxu0 %v8440_v28  ;;  %7689 = vmatprep.mubr.msk.f32.mxu0 %vm1081_vm1, %v3238_v36  ;;  %v10618_v36 = vpack.c.bf16 %v3887_v18, %v3885_v34 }
 0x716   : > { %8445 = vmatprep.subr.bf16.mxu0 %v8444_v41 }
 0x71c   : > { %7690 = vmatmul.mubr.msk.f32.vlgmr.msra.gmra.mrb[16].mxu0 %vm1081_vm1, %v3239_v46  ;;  %v3893_v46 = vld [vmem:[%s11374_s24 + $0x48] sm:$0xff] }
 0x71d   : > { %8447 = vmatpush3.bf16.msra.mxu0 %v8444_v41  ;;  %7696 = vmatprep.mubr.msk.f32.mxu0 %vm1081_vm1, %v3336_v47  ;;  %v3891_v41 = vld [vmem:[%s11374_s24 + $0x38] sm:$0xff]  ;;  %v10650_v47 = vpack.c.bf16 %v3895_v4, %v3893_v46 }
 0x71e   : > { %8449 = vmatprep.subr.bf16.mxu0 %v8448_v50  ;;  %v10631_v43 = vpack.c.bf16 %v3891_v41, %v3889_v5  ;;  %v4004_v41 = vld [vmem:[%s11362_s12] sm:$0xff] }
 0x724   : > { %7697 = vmatmul.mubr.msk.f32.vlgmr.msra.gmra.mrb[16].mxu0 %vm1081_vm1, %v3337_v27  ;;  %v3898_v27 = vld [vmem:[%s11374_s24 + $0x70] sm:$0xff] }
 0x725   : > { %8451 = vmatpush3.bf16.msra.mxu0 %v8448_v50  ;;  %7703 = vmatprep.mubr.msk.f32.mxu0 %vm1081_vm1, %v3434_v17  ;;  %v3897_v50 = vld [vmem:[%s11374_s24 + $0x68] sm:$0xff]  ;;  %v3903_v17 = vld [vmem:[%s11374_s24 + $0x98] sm:$0xff]  ;;  %v10683_v55 = vpack.c.bf16 %v3898_v27, %v3896_v39  ;;  %v4214_v27 = vld [vmem:[%s11362_s12 + $0x40] sm:$0xff] }
 0x726   : > { %8453 = vmatprep.subr.bf16.mxu0 %v8452_v38  ;;  %v10668_v53 = vpack.c.bf16 %v3899_v51, %v3897_v50  ;;  %v4005_v50 = vld [vmem:[%s11362_s12 + $0x8] sm:$0xff]  ;;  %v4006_v51 = vld [vmem:[%s11362_s12 + $0x10] sm:$0xff]  ;;  %v4007_v39 = vld [vmem:[%s11362_s12 + $0x18] sm:$0xff] }
 0x72c   : > { %7704 = vmatmul.mubr.msk.f32.vlgmr.msra.gmra.mrb[16].mxu0 %vm1081_vm1, %v3435_v3  ;;  %v3900_v3 = vld [vmem:[%s11374_s24 + $0x80] sm:$0xff] }
 0x72d   : > { %8455 = vmatpush3.bf16.msra.mxu0 %v8452_v38  ;;  %7710 = vmatprep.mubr.msk.f32.mxu0 %vm1081_vm1, %v3532_v56  ;;  %v10686_v38 = vpack.c.bf16 %v3903_v17, %v3901_v16  ;;  %v3902_v56 = vld [vmem:[%s11374_s24 + $0x90] sm:$0xff]  ;;  %v5032_v16 = vld [vmem:[%s11363_s13 + $0x8] sm:$0xff]  ;;  %v5031_v17 = vld [vmem:[%s11363_s13] sm:$0xff] }
 0x734   : > { %7711 = vmatmul.mubr.msk.f32.vlgmr.msra.gmra.mrb[16].mxu0 %vm1081_vm1, %v3533_v44  ;;  %v3905_v44 = vld [vmem:[%s11374_s24 + $0xa8] sm:$0xff] }
 0x807   : > { %v7712_v57 = vpop.f32.mrb[16].mxu0 }
 0x808   : > { %v3643_v59 = vadd.f32 %v7712_v57, %v3640_v49  ;;  %v3619_v9 = vpop.f32.mrb[17].mxu0  ;;  %v3907_v49 = vld [vmem:[%s11374_s24 + $0xb8] sm:$0xff]  ;;  %v10701_v57 = vpack.c.bf16 %v3902_v56, %v3900_v3  ;;  %v5033_v56 = vld [vmem:[%s11363_s13 + $0x10] sm:$0xff] }
 0x809   : > { %v3642_v60 = vadd.f32 %v3635_v58, %v3619_v9  ;;  %v10704_v58 = vpack.c.bf16 %v3907_v49, %v3905_v44  ;;  %v3906_v9 = vld [vmem:[%s11374_s24 + $0xb0] sm:$0xff]  ;;  %v5034_v3 = vld [vmem:[%s11363_s13 + $0x18] sm:$0xff]  ;;  %v4008_v44 = vld [vmem:[%s11362_s12 + $0x20] sm:$0xff] }
 0x80a   : > { %v3645_v26 = vmax.f32 %v3643_v59, 0.0  ;;  %v3904_v59 = vld [vmem:[%s11374_s24 + $0xa0] sm:$0xff]  ;;  %7731 = vmatprep.mubr.msk.f32.mxu0 %vm1081_vm1, %v4008_v44 }
 0x80b   : > { %v3644_v31 = vmax.f32 %v3642_v60, 0.0  ;;  %v10713_v60 = vpack.c.bf16 %v3906_v9, %v3904_v59 }
 0x80c   : > { %v3660_v62 = vmul.f32 %v10580_v61, %v3645_v26 }
 0x80d   : > { %v3659_v1 = vmul.f32 %v10580_v61, %v3644_v31 }
 0x80e   : > { %v3665_v2 = vsel %vm3661_vm4, %v3660_v62, 0.0 }
 0x80f   : > { %3666 = vadd.xlane.f32.xlu0 %v3665_v2  ;;  %v3662_v63 = vsel %vm3661_vm4, %v3659_v1, 0.0 }
 0x810   : > { %3663 = vadd.xlane.f32.xlu1 %v3662_v63  ;;  %v3909_v63 = vld [vmem:[%s11374_s24 + $0xc8] sm:$0xff] }
 0x89c   : > { %v3667_v10 = vpop.xlane.xlu0 %3666 }
 0x89d   : > { %v3664_v11 = vpop.xlane.xlu1 %3663 }
 0x89e   : > { %v8456_v12 = vpack.c.bf16 %v3667_v10, %v3664_v11 }
 0x8a0   : > { %8457 = vmatprep.subr.bf16.mxu1 %v8456_v12 }
 0x8a1   : > { %8459 = vmatpush3.bf16.msra.mxu1 %v8456_v12  ;;  %v3908_v12 = vld [vmem:[%s11374_s24 + $0xc0] sm:$0xff] }
 0x8a4   : > { %7718 = vmatmul.mubr.msk.f32.vlgmr.msra.gmra.mrb[12].mxu1 %vm1081_vm1, %v3648_v14 }
 0x8a5   : > { %7724 = vmatprep.mubr.msk.f32.mxu1 %vm1081_vm1, %v3647_v0  ;;  %v3911_v0 = vld [vmem:[%s11374_s24 + $0xd8] sm:$0xff] }
 0x8a6   : > { %v10723_v11 = vpack.c.bf16 %v3911_v0, %v3909_v63 }
 0x977   : > { %v7719_v15 = vpop.f32.mrb[12].mxu1 }
 0x978   : > { %3756 = vperm.xlu1 %8827, %v7719_v15   ;;  %v3740_v19 = vpop.f32.mrb[13].mxu1  ;;  %v3650_v15 = vld [vmem:[%s11426_s2 + $0x8] sm:$0xff]  ;;  %s9236_s2 = smov 90  }
 0x979   : > { %3751 = vperm.xlu0 %8826, %v3740_v19  }
 0x9f7   : > { %v3757_v6 = vpop.permute.xlu1 %3756 }
 0x9f8   : > { %v10595_v7 = vsub.f32 %v3645_v26, %v3757_v6  ;;  %v3752_v20 = vpop.permute.xlu0 %3751  ;;  %v3651_v6 = vld [vmem:[%s11427_s5] sm:$0xff] }
 0x9f9   : > { %v10597_v21 = vsub.f32 %v3644_v31, %v3752_v20  ;;  %v10744_v20 = vld [vmem:[%s11374_s24 + $0xe8] sm:$0x3f] }
 0x9fa   : > { %v3762_v22 = vmul.f32 %v10580_v61, %v10595_v7 }
 0x9fb   : > { %v3761_v8 = vmul.f32 %v10580_v61, %v10597_v21 }
 0x9fc   : > { %v3764_v13 = vmul.f32 %v3762_v22, %v3762_v22  ;;  %v10749_v22 = vld [vmem:[%s11374_s24 + $0xe0] sm:$0x3f] }
 0x9fd   : > { %v3763_v23 = vmul.f32 %v3761_v8, %v3761_v8  ;;  %v3652_v8 = vld [vmem:[%s11427_s5 + $0x8] sm:$0xff] }
 0x9fe   : > { %v3768_v24 = vsel %vm3661_vm4, %v3764_v13, 0.0  ;;  %v9228_v13 = vmov 0.0  }
 0x9ff   : > { %3769 = vadd.xlane.f32.xlu0 %v3768_v24  ;;  %v3765_v28 = vsel %vm3661_vm4, %v3763_v23, 0.0 }
 0xa00   : > { %3766 = vadd.xlane.f32.xlu1 %v3765_v28 }
 0xa11   : > { %3862 = vperm.xlu1 %8827, %v3649_v29  }
 0xa8c   : > { %v3770_v30 = vpop.xlane.xlu0 %3769 }
 0xa8d   : > { %v3767_v32 = vpop.xlane.xlu1 %3766 }
 0xa8e   : > { %v8460_v33 = vpack.c.bf16 %v3770_v30, %v3767_v32 }
 0xa90   : > { %8461 = vmatprep.subr.bf16.mxu1 %v8460_v33 }
 0xa91   : > { %8463 = vmatpush3.bf16.msra.mxu1 %v8460_v33  ;;  %v3863_v23 = vpop.permute.xlu1 %3862 }
 0xa92   : > { %8465 = vmatprep.subr.bf16.mxu1 %v10618_v36 }
 0xa94   : > { %7725 = vmatmul.mubr.msk.f32.vlgmr.msra.gmra.mrb[14].mxu1 %vm1081_vm1, %v3648_v14  ;;  %v3910_v14 = vld [vmem:[%s11374_s24 + $0xd0] sm:$0xff] }
 0xa95   : > { %8467 = vmatpush1.bf16.msra.mxu1 %v10629_v42  ;;  %v10734_v19 = vpack.c.bf16 %v3910_v14, %v3908_v12  ;;  %3991 = vmatprep.mubr.f32.mxu1 %v9228_v13  ;;  %v4215_v14 = vld [vmem:[%s11362_s12 + $0x48] sm:$0xff] }
 0xa96   : > { %8469 = vmatprep.subr.bf16.mxu1 %v10631_v43 }
 0xa99   : > { %8471 = vmatpush1.bf16.msra.mxu1 %v10647_v40 }
 0xa9a   : > { %8473 = vmatprep.subr.bf16.mxu1 %v10650_v47 }
 0xa9d   : > { %8475 = vmatpush1.bf16.msra.mxu1 %v10665_v52 }
 0xa9e   : > { %8477 = vmatprep.subr.bf16.mxu1 %v10668_v53 }
 0xaa1   : > { %8479 = vmatpush1.bf16.msra.mxu1 %v10683_v55 }
 0xaa2   : > { %8481 = vmatprep.subr.bf16.mxu1 %v10686_v38 }
 0xaa5   : > { %8483 = vmatpush1.bf16.msra.mxu1 %v10701_v57 }
 0xaa6   : > { %8485 = vmatprep.subr.bf16.mxu1 %v10704_v58 }
 0xaa9   : > { %8487 = vmatpush1.bf16.msra.mxu1 %v10713_v60 }
 0xaaa   : > { %8489 = vmatprep.subr.bf16.mxu1 %v10723_v11 }
 0xaad   : > { %8491 = vmatpush1.bf16.msra.mxu1 %v10734_v19 }
 0xaae   : > { %7188 = vmatprep.subr.msk.mxu1 %vm3920_vm5, %v10744_v20 }
 0xab1   : > { %7189 = vmatpush1.msk.msra.mxu1 %vm3920_vm5, %v10749_v22 }
 0xb67   : > { %v7726_v26 = vpop.f32.mrb[14].mxu1 }
 0xb68   : > { %v3843_v31 = vadd.f32 1e-05, %v7726_v26  ;;  %v3837_v62 = vpop.f32.mrb[15].mxu1 }
 0xb69   : > { %v3838_v1 = vadd.f32 1e-05, %v3837_v62 }
 0xb6a   : > { %9182 = vrsqrt.f32 %v3843_v31 }
 0xb6b   : > { %9184 = vrsqrt.f32 %v3838_v1 }
 0xb74   : > { %v9183_v2 = vpop.eup %9182 }
 0xb75   : > { %v9185_v10 = vpop.eup %9184  ;;  %3855 = vperm.xlu1 %8827, %v9183_v2  }
 0xb76   : > { %3850 = vperm.xlu0 %8826, %v9185_v10  }
 0xb79   : > { %3867 = vperm.xlu1 %8827, %v3650_v15  }
 0xb7a   : > { %3874 = vperm.xlu0 %8826, %v3651_v6  }
 0xb7e   : > { %3879 = vperm.xlu0 %8826, %v3652_v8  }
 0xbf4   : > { %v3856_v24 = vpop.permute.xlu1 %3855 }
 0xbf5   : > { %v3851_v28 = vpop.permute.xlu0 %3850  ;;  %v3859_v34 = vmul.f32 %v3856_v24, %v10595_v7  ;;  %v4216_v24 = vld [vmem:[%s11362_s12 + $0x50] sm:$0xff] }
 0xbf6   : > { %v3858_v29 = vmul.f32 %v3851_v28, %v10597_v21 }
 0xbf8   : > { %v3870_v30 = vmul.f32 %v3863_v23, %v3858_v29  ;;  %v3868_v32 = vpop.permute.xlu1 %3867 }
 0xbf9   : > { %v3875_v33 = vpop.permute.xlu0 %3874  ;;  %v3871_v35 = vmul.f32 %v3868_v32, %v3859_v34  ;;  %v4217_v34 = vld [vmem:[%s11362_s12 + $0x58] sm:$0xff] }
 0xbfa   : > { %v3882_v18 = vadd.f32 %v3875_v33, %v3870_v30 }
 0xbfc   : > { %7190 = vmatmul.mubr.msk.f32.vlgmr.msra.gmra.mrb[16].mxu1 %vm3661_vm4, %v3882_v18 }
 0xbfd   : > { %v3880_v37 = vpop.permute.xlu0 %3879  ;;  %3997 = vmatprep.mubr.f32.mxu1 %v9228_v13 }
 0xbfe   : > { %v3883_v5 = vadd.f32 %v3880_v37, %v3871_v35 }
 0xc00   : > { %7191 = vmatmul.mubr.msk.f32.gmra.mrb[18].mxu1 %vm3661_vm4, %v3883_v5 }
 0xc01   : > { %7741 = vmatprep.mubr.msk.f32.mxu1 %vm1081_vm1, %v4004_v41  ;;  %v4325_v41 = vld [vmem:[%s11362_s12 + $0x60] sm:$0xff] }
 0xccf   : > { %v3993_v21 = vpop.f32.mrb[16].mxu1 }
 0xcd0   : > { %v3995_v45 = vpop.f32.mrb[17].mxu1 }
 0xcd1   : > { %v8993_v25 = vpack.i.bf16 %v3995_v45, %v3993_v21 }
 0xcd3   : > { %8994 = vrot.lane.b32.xlu0 %v8993_v25, %s9229_s10  ;;  %v3999_v7 = vpop.f32.mrb[18].mxu1 }
 0xcd4   : > { %v4001_v46 = vpop.f32.mrb[19].mxu1  ;;  %v8988_v4 = vpack.i.bf16 %v3999_v7, %v3993_v21  ;;  %v8496_v48 = vpack.c.bf16 %v3999_v7, %v3993_v21 }
 0xcd5   : > { %v8998_v54 = vpack.i.bf16 %v4001_v46, %v3999_v7 }
 0xcd6   : > { %8989 = vrot.lane.b32.xlu1 %v8988_v4, %s9230_s1  ;;  %8497 = vmatprep.subr.bf16.mxu1 %v8496_v48  ;;  %s9233_s1 = smov 113  }
 0xcd7   : > { %9004 = vrot.lane.b32.xlu0 %v8993_v25, %s11428_s27  ;;  %8499 = vmatpush3.bf16.msra.mxu1 %v8496_v48 }
 0xcda   : > { %8999 = vrot.lane.b32.xlu1 %v8998_v54, %s9229_s10  ;;  %7742 = vmatmul.mubr.msk.f32.vlgmr.msra.gmra.mrb[20].mxu1 %vm1081_vm1, %v4005_v50  ;;  %s11430_s10 = smov 103   ;;  %v4327_v50 = vld [vmem:[%s11362_s12 + $0x70] sm:$0xff] }
 0xcdb   : > { %9014 = vrot.lane.b32.xlu0 %v8993_v25, %s11429_s29  ;;  %7744 = vmatprep.mubr.msk.f32.mxu1 %vm1081_vm1, %v4006_v51 }
 0xcde   : > { %9009 = vrot.lane.b32.xlu1 %v8998_v54, %s11428_s27  ;;  %7745 = vmatmul.mubr.msk.f32.gmra.mrb[22].mxu1 %vm1081_vm1, %v4007_v39 }
 0xcdf   : > { %9024 = vrot.lane.b32.xlu0 %v8993_v25, %s9231_s7  ;;  %7751 = vmatprep.mubr.msk.f32.mxu1 %vm1081_vm1, %v4214_v27 }
 0xce2   : > { %9019 = vrot.lane.b32.xlu1 %v8998_v54, %s11429_s29 }
 0xce3   : > { %9034 = vrot.lane.b32.xlu0 %v8993_v25, %s11430_s10 }
 0xce6   : > { %9029 = vrot.lane.b32.xlu1 %v8998_v54, %s9231_s7  ;;  %s9234_s7 = smov 101  }
 0xce7   : > { %9044 = vrot.lane.b32.xlu0 %v8993_v25, %s11431_s0 }
 0xcea   : > { %9039 = vrot.lane.b32.xlu1 %v8998_v54, %s11430_s10 }
 0xceb   : > { %9054 = vrot.lane.b32.xlu0 %v8988_v4, %s9232_s4  ;;  %v4326_v4 = vld [vmem:[%s11362_s12 + $0x68] sm:$0xff]  ;;  %s9235_s4 = smov 91  }
 0xcee   : > { %9049 = vrot.lane.b32.xlu1 %v8998_v54, %s11431_s0 }
 0xcef   : > { %5042 = vperm.xlu0 %8826, %v5032_v16  }
 0xcf2   : > { %5037 = vperm.xlu1 %8827, %v5031_v17  }
 0xcf3   : > { %5052 = vperm.xlu0 %8826, %v5034_v3   ;;  %v4328_v3 = vld [vmem:[%s11362_s12 + $0x78] sm:$0xff] }
 0xcf6   : > { %5047 = vperm.xlu1 %8827, %v5033_v56   ;;  %v4445_v56 = vld [vmem:[%s11362_s12 + $0x80] sm:$0xff] }
 0xd45   : > { %v8995_v49 = vpop.permute.xlu0 %8994 }
 0xd46   : > { %v8997_v62 = vunpack.i.h.bf16 %v8995_v49  ;;  %v8996_v1 = vunpack.i.l.bf16 %v8995_v49 }
 0xd48   : > { %v8990_v59 = vpop.permute.xlu1 %8989  ;;  %v4340_v8 = vsel %vm4339_vm6, %v8996_v1, %v8997_v62 }
 0xd49   : > { %v8992_v9 = vunpack.i.h.bf16 %v8990_v59  ;;  %v8991_v26 = vunpack.i.l.bf16 %v8990_v59  ;;  %v9005_v31 = vpop.permute.xlu0 %9004 }
 0xd4a   : > { %v9007_v15 = vunpack.i.h.bf16 %v9005_v31  ;;  %v9006_v6 = vunpack.i.l.bf16 %v9005_v31  ;;  %v4446_v31 = vld [vmem:[%s11362_s12 + $0x88] sm:$0xff] }
 0xd4b   : > { %v8500_v2 = vpack.c.bf16 %v8992_v9, %v8991_v26 }
 0xd4c   : > { %v9000_v63 = vpop.permute.xlu1 %8999  ;;  %v4457_v37 = vsel %vm2562_vm7, %v9006_v6, %v9007_v15  ;;  %v4448_v15 = vld [vmem:[%s11362_s12 + $0x98] sm:$0xff]  ;;  %v4562_v6 = vld [vmem:[%s11362_s12 + $0xa0] sm:$0xff] }
 0xd4d   : > { %v9002_v0 = vunpack.i.h.bf16 %v9000_v63  ;;  %v9001_v10 = vunpack.i.l.bf16 %v9000_v63  ;;  %8501 = vmatprep.subr.bf16.mxu1 %v8500_v2  ;;  %v9015_v12 = vpop.permute.xlu0 %9014 }
 0xd4e   : > { %8503 = vmatpush3.bf16.msra.mxu1 %v8500_v2  ;;  %v9017_v18 = vunpack.i.h.bf16 %v9015_v12  ;;  %v9016_v35 = vunpack.i.l.bf16 %v9015_v12 }
 0xd4f   : > { %v4341_v23 = vsel %vm4339_vm6, %v9001_v10, %v9002_v0  ;;  %v4447_v10 = vld [vmem:[%s11362_s12 + $0x90] sm:$0xff] }
 0xd50   : > { %v9010_v28 = vpop.permute.xlu1 %9009  ;;  %v8504_v29 = vpack.c.bf16 %v4341_v23, %v4340_v8  ;;  %v4574_v48 = vsel %vm2758_vm9, %v9016_v35, %v9017_v18  ;;  %v4009_v8 = vld [vmem:[%s11362_s12 + $0x28] sm:$0xff]  ;;  %v4011_v18 = vld [vmem:[%s11362_s12 + $0x38] sm:$0xff] }
 0xd51   : > { %v9012_v30 = vunpack.i.h.bf16 %v9010_v28  ;;  %v9011_v32 = vunpack.i.l.bf16 %v9010_v28  ;;  %7752 = vmatmul.mubr.msk.f32.vlgmr.msra.gmra.mrb[20].mxu1 %vm1081_vm1, %v4215_v14  ;;  %v9025_v33 = vpop.permute.xlu0 %9024  ;;  %v4010_v28 = vld [vmem:[%s11362_s12 + $0x30] sm:$0xff] }
 0xd52   : > { %8505 = vmatprep.subr.bf16.mxu1 %v8504_v29  ;;  %7754 = vmatprep.mubr.msk.f32.mxu1 %vm1081_vm1, %v4216_v24  ;;  %v9027_v44 = vunpack.i.h.bf16 %v9025_v33  ;;  %v9026_v49 = vunpack.i.l.bf16 %v9025_v33  ;;  %v4564_v33 = vld [vmem:[%s11362_s12 + $0xb0] sm:$0xff] }
 0xd53   : > { %8507 = vmatpush3.bf16.msra.mxu1 %v8504_v29  ;;  %v4458_v5 = vsel %vm2562_vm7, %v9011_v32, %v9012_v30  ;;  %vm4691_vm7 = vcmask 850944   ;;  %v4563_v29 = vld [vmem:[%s11362_s12 + $0xa8] sm:$0xff] }
 0xd54   : > { %v9020_v21 = vpop.permute.xlu1 %9019  ;;  %v8508_v45 = vpack.c.bf16 %v4458_v5, %v4457_v37  ;;  %v4692_v63 = vsel %vm4691_vm7, %v9026_v49, %v9027_v44  ;;  %v4917_v44 = vld [vmem:[%s11362_s12 + $0x118] sm:$0xff] }
 0xd55   : > { %v9022_v25 = vunpack.i.h.bf16 %v9020_v21  ;;  %v9021_v7 = vunpack.i.l.bf16 %v9020_v21  ;;  %7755 = vmatmul.mubr.msk.f32.gmra.mrb[22].mxu1 %vm1081_vm1, %v4217_v34  ;;  %v9035_v46 = vpop.permute.xlu0 %9034  ;;  %v4679_v21 = vld [vmem:[%s11362_s12 + $0xc0] sm:$0xff] }
 0xd56   : > { %8509 = vmatprep.subr.bf16.mxu1 %v8508_v45  ;;  %7761 = vmatprep.mubr.msk.f32.mxu1 %vm1081_vm1, %v4325_v41  ;;  %v9037_v23 = vunpack.i.h.bf16 %v9035_v46  ;;  %v9036_v24 = vunpack.i.l.bf16 %v9035_v46  ;;  %v4565_v41 = vld [vmem:[%s11362_s12 + $0xb8] sm:$0xff] }
 0xd57   : > { %v4575_v54 = vsel %vm2758_vm9, %v9021_v7, %v9022_v25  ;;  %v4680_v7 = vld [vmem:[%s11362_s12 + $0xc8] sm:$0xff]  ;;  %vm6347_vm9 = vcmask 736256  }
 0xd58   : > { %v9030_v51 = vpop.permute.xlu1 %9029  ;;  %v8512_v39 = vpack.c.bf16 %v4575_v54, %v4574_v48  ;;  %v4809_v34 = vsel %vm3346_vm15, %v9036_v24, %v9037_v23 }
 0xd59   : > { %v10834_v27 = vpop.permute.xlu0 %9044  ;;  %7762 = vmatmul.mubr.msk.f32.vlgmr.msra.gmra.mrb[20].mxu1 %vm1081_vm1, %v4326_v4  ;;  %v9032_v16 = vunpack.i.h.bf16 %v9030_v51  ;;  %v9031_v17 = vunpack.i.l.bf16 %v9030_v51  ;;  %v4681_v4 = vld [vmem:[%s11362_s12 + $0xd0] sm:$0xff]  ;;  %v4797_v51 = vld [vmem:[%s11362_s12 + $0xe0] sm:$0xff] }
 0xd5a   : > { %8511 = vmatpush3.bf16.msra.mxu1 %v8508_v45  ;;  %7764 = vmatprep.mubr.msk.f32.mxu1 %vm1081_vm1, %v4327_v50  ;;  %v9047_v45 = vunpack.i.h.bf16 %v10834_v27  ;;  %v9046_v25 = vunpack.i.l.bf16 %v10834_v27  ;;  %v4682_v50 = vld [vmem:[%s11362_s12 + $0xd8] sm:$0xff]  ;;  %v4799_v27 = vld [vmem:[%s11362_s12 + $0xf0] sm:$0xff] }
 0xd5b   : > { %8513 = vmatprep.subr.bf16.mxu1 %v8512_v39  ;;  %v4693_v62 = vsel %vm4691_vm7, %v9031_v17, %v9032_v16  ;;  %v4800_v16 = vld [vmem:[%s11362_s12 + $0xf8] sm:$0xff]  ;;  %v4914_v17 = vld [vmem:[%s11362_s12 + $0x100] sm:$0xff] }
 0xd5c   : > { %v9040_v1 = vpop.permute.xlu1 %9039  ;;  %v8516_v0 = vpack.c.bf16 %v4693_v62, %v4692_v63  ;;  %v4926_v48 = vsel %vm3542_vm3, %v9046_v25, %v9047_v45 }
 0xd5d   : > { %v9055_v59 = vpop.permute.xlu0 %9054  ;;  %7765 = vmatmul.mubr.msk.f32.gmra.mrb[22].mxu1 %vm1081_vm1, %v4328_v3  ;;  %v9042_v12 = vunpack.i.h.bf16 %v9040_v1  ;;  %v9041_v14 = vunpack.i.l.bf16 %v9040_v1  ;;  %v4915_v3 = vld [vmem:[%s11362_s12 + $0x108] sm:$0xff] }
 0xd5e   : > { %v9057_v9 = vunpack.i.h.bf16 %v9055_v59  ;;  %v9056_v26 = vunpack.i.l.bf16 %v9055_v59  ;;  %7771 = vmatprep.mubr.msk.f32.mxu1 %vm1081_vm1, %v4445_v56  ;;  %v4916_v56 = vld [vmem:[%s11362_s12 + $0x110] sm:$0xff] }
 0xd5f   : > { %v4810_v30 = vsel %vm3346_vm15, %v9041_v14, %v9042_v12 }
 0xd60   : > { %v8492_v2 = vpack.c.bf16 %v9057_v9, %v9056_v26  ;;  %v9050_v32 = vpop.permute.xlu1 %9049  ;;  %v8520_v35 = vpack.c.bf16 %v4810_v30, %v4809_v34 }
 0xd61   : > { %7772 = vmatmul.mubr.msk.f32.vlgmr.msra.gmra.mrb[20].mxu1 %vm1081_vm1, %v4446_v31  ;;  %v9052_v37 = vunpack.i.h.bf16 %v9050_v32  ;;  %v9051_v5 = vunpack.i.l.bf16 %v9050_v32 }
 0xd62   : > { %8515 = vmatpush3.bf16.msra.mxu1 %v8512_v39  ;;  %8493 = vmatprep.subr.bf16.mxu0 %v8492_v2  ;;  %v4798_v39 = vld [vmem:[%s11362_s12 + $0xe8] sm:$0xff] }
 0xd63   : > { %8517 = vmatprep.subr.bf16.mxu1 %v8516_v0  ;;  %8495 = vmatpush3.bf16.msra.mxu0 %v8492_v2  ;;  %v4927_v46 = vsel %vm3542_vm3, %v9051_v5, %v9052_v37 }
 0xd64   : > { %7774 = vmatprep.mubr.msk.f32.mxu1 %vm1081_vm1, %v4447_v10  ;;  %v8524_v54 = vpack.c.bf16 %v4927_v46, %v4926_v48 }
 0xd65   : > { %7775 = vmatmul.mubr.msk.f32.gmra.mrb[22].mxu1 %vm1081_vm1, %v4448_v15 }
 0xd66   : > { %7781 = vmatprep.mubr.msk.f32.mxu1 %vm1081_vm1, %v4562_v6  ;;  %7732 = vmatmul.mubr.msk.f32.vlgmr.msra.gmra.mrb[18].mxu0 %vm1081_vm1, %v4009_v8 }
 0xd67   : > { %7734 = vmatprep.mubr.msk.f32.mxu0 %vm1081_vm1, %v4010_v28 }
 0xd69   : > { %7782 = vmatmul.mubr.msk.f32.vlgmr.msra.gmra.mrb[20].mxu1 %vm1081_vm1, %v4563_v29 }
 0xd6a   : > { %8519 = vmatpush3.bf16.msra.mxu1 %v8516_v0  ;;  %7784 = vmatprep.mubr.msk.f32.mxu1 %vm1081_vm1, %v4564_v33 }
 0xd6b   : > { %8521 = vmatprep.subr.bf16.mxu1 %v8520_v35  ;;  %7735 = vmatmul.mubr.msk.f32.gmra.mrb[20].mxu0 %vm1081_vm1, %v4011_v18 }
 0xd6d   : > { %7785 = vmatmul.mubr.msk.f32.gmra.mrb[22].mxu1 %vm1081_vm1, %v4565_v41 }
 0xd6e   : > { %7791 = vmatprep.mubr.msk.f32.mxu1 %vm1081_vm1, %v4679_v21  ;;  %v5043_v31 = vpop.permute.xlu0 %5042 }
 0xd71   : > { %7792 = vmatmul.mubr.msk.f32.vlgmr.msra.gmra.mrb[20].mxu1 %vm1081_vm1, %v4680_v7  ;;  %v5038_v1 = vpop.permute.xlu1 %5037  ;;  %v5063_v7 = vld [vmem:[%s11366_s16] sm:$0xff] }
 0xd72   : > { %8523 = vmatpush3.bf16.msra.mxu1 %v8520_v35  ;;  %7794 = vmatprep.mubr.msk.f32.mxu1 %vm1081_vm1, %v4681_v4  ;;  %v5053_v23 = vpop.permute.xlu0 %5052 }
 0xd73   : > { %8525 = vmatprep.subr.bf16.mxu1 %v8524_v54 }
 0xd75   : > { %7795 = vmatmul.mubr.msk.f32.gmra.mrb[22].mxu1 %vm1081_vm1, %v4682_v50  ;;  %v5048_v29 = vpop.permute.xlu1 %5047 }
 0xd76   : > { %7801 = vmatprep.mubr.msk.f32.mxu1 %vm1081_vm1, %v4797_v51 }
 0xd79   : > { %7802 = vmatmul.mubr.msk.f32.vlgmr.msra.gmra.mrb[20].mxu1 %vm1081_vm1, %v4798_v39  ;;  %v5064_v39 = vld [vmem:[%s11366_s16 + $0x8] sm:$0xff] }
 0xd7a   : > { %8527 = vmatpush3.bf16.msra.mxu1 %v8524_v54  ;;  %7804 = vmatprep.mubr.msk.f32.mxu1 %vm1081_vm1, %v4799_v27  ;;  %v5065_v27 = vld [vmem:[%s11366_s16 + $0x10] sm:$0xff] }
 0xd7d   : > { %7805 = vmatmul.mubr.msk.f32.gmra.mrb[22].mxu1 %vm1081_vm1, %v4800_v16  ;;  %v5066_v16 = vld [vmem:[%s11366_s16 + $0x18] sm:$0xff] }
 0xd7e   : > { %7811 = vmatprep.mubr.msk.f32.mxu1 %vm1081_vm1, %v4914_v17 }
 0xd81   : > { %7812 = vmatmul.mubr.msk.f32.vlgmr.msra.gmra.mrb[20].mxu1 %vm1081_vm1, %v4915_v3 }
 0xd82   : > { %7814 = vmatprep.mubr.msk.f32.mxu1 %vm1081_vm1, %v4916_v56 }
 0xd85   : > { %7815 = vmatmul.mubr.msk.f32.gmra.mrb[22].mxu1 %vm1081_vm1, %v4917_v44  ;;  %vm5091_vm1 = vcmask 261120  }
 0xd86   : > { %7825 = vmatprep.mubr.msk.f32.mxu0 %vm5091_vm1, %v5063_v7 }
 0xe39   : > { %v7733_v49 = vpop.f32.mrb[18].mxu0 }
 0xe3a   : > { %v4098_v59 = vpop.f32.mrb[19].mxu0 }
 0xe3e   : > { %v7736_v9 = vpop.f32.mrb[20].mxu0 }
 0xe3f   : > { %v4108_v26 = vpop.f32.mrb[21].mxu0 }
 0xe54   : > { %v7813_v62 = vpop.f32.mrb[20].mxu1 }
 0xe55   : > { %v8686_v2 = vadd.f32 %v7813_v62, %v7733_v49  ;;  %v5008_v63 = vpop.f32.mrb[21].mxu1 }
 0xe56   : > { %v8687_v0 = vadd.f32 %v5008_v63, %v4098_v59 }
 0xe57   : > { %v5056_v10 = vadd.f32 %v8686_v2, %v5043_v31 }
 0xe58   : > { %v5055_v12 = vadd.f32 %v8687_v0, %v5038_v1  ;;  %v7816_v14 = vpop.f32.mrb[22].mxu1 }
 0xe59   : > { %v5060_v15 = vmax.f32 %v5056_v10, 0.0  ;;  %v8688_v6 = vadd.f32 %v7816_v14, %v7736_v9  ;;  %v5018_v8 = vpop.f32.mrb[23].mxu1 }
 0xe5a   : > { %v5059_v24 = vmax.f32 %v5055_v12, 0.0  ;;  %v8689_v28 = vadd.f32 %v5018_v8, %v4108_v26 }
 0xe5b   : > { %v5058_v30 = vadd.f32 %v8688_v6, %v5053_v23  ;;  %v5076_v32 = vmul.f32 %v10580_v61, %v5060_v15 }
 0xe5c   : > { %v5057_v33 = vadd.f32 %v8689_v28, %v5048_v29  ;;  %v5075_v34 = vmul.f32 %v10580_v61, %v5059_v24 }
 0xe5d   : > { %v5062_v18 = vmax.f32 %v5058_v30, 0.0  ;;  %v5082_v35 = vsel %vm3661_vm4, %v5076_v32, 0.0  ;;  %v5067_v30 = vld [vmem:[%s11364_s14] sm:$0xff] }
 0xe5e   : > { %v5061_v37 = vmax.f32 %v5057_v33, 0.0  ;;  %5083 = vadd.xlane.f32.xlu0 %v5082_v35  ;;  %v5079_v5 = vsel %vm3661_vm4, %v5075_v34, 0.0  ;;  %v5071_v32 = vld [vmem:[%s11365_s15] sm:$0xff] }
 0xe5f   : > { %5080 = vadd.xlane.f32.xlu1 %v5079_v5  ;;  %v5078_v41 = vmul.f32 %v10580_v61, %v5062_v18 }
 0xe60   : > { %v5077_v21 = vmul.f32 %v10580_v61, %v5061_v37 }
 0xe61   : > { %v5088_v45 = vsel %vm3661_vm4, %v5078_v41, 0.0  ;;  %v5074_v41 = vld [vmem:[%s11365_s15 + $0x18] sm:$0xff] }
 0xe62   : > { %v5085_v25 = vsel %vm3661_vm4, %v5077_v21, 0.0 }
 0xe63   : > { %5089 = vadd.xlane.f32.xlu1 %v5088_v45  ;;  %5086 = vadd.xlane.f32.xlu0 %v5085_v25 }
 0xeeb   : > { %v5084_v46 = vpop.xlane.xlu0 %5083 }
 0xeec   : > { %v5081_v4 = vpop.xlane.xlu1 %5080 }
 0xeed   : > { %v8528_v48 = vpack.c.bf16 %v5084_v46, %v5081_v4 }
 0xeef   : > { %8529 = vmatprep.subr.bf16.mxu0 %v8528_v48 }
 0xef0   : > { %8531 = vmatpush3.bf16.msra.mxu0 %v8528_v48  ;;  %v5090_v54 = vpop.xlane.xlu1 %5089  ;;  %v5087_v50 = vpop.xlane.xlu0 %5086 }
 0xef1   : > { %v8532_v51 = vpack.c.bf16 %v5090_v54, %v5087_v50 }
 0xef3   : > { %8533 = vmatprep.subr.bf16.mxu0 %v8532_v51 }
 0xef4   : > { %8535 = vmatpush3.bf16.msra.mxu0 %v8532_v51 }
 0xef7   : > { %7826 = vmatmul.mubr.msk.f32.vlgmr.msra.gmra.mrb[22].mxu0 %vm5091_vm1, %v5064_v39 }
 0xef8   : > { %7828 = vmatprep.mubr.msk.f32.mxu0 %vm5091_vm1, %v5065_v27 }
 0xefb   : > { %7829 = vmatmul.mubr.msk.f32.gmra.mrb[24].mxu0 %vm5091_vm1, %v5066_v16 }
 0xefc   : > { %7839 = vmatprep.mubr.msk.f32.mxu0 %vm5091_vm1, %v5063_v7 }
 0xfca   : > { %v7827_v17 = vpop.f32.mrb[22].mxu0 }
 0xfcb   : > { %5196 = vperm.xlu1 %8827, %v7827_v17   ;;  %v5170_v3 = vpop.f32.mrb[23].mxu0 }
 0xfcc   : > { %5191 = vperm.xlu0 %8826, %v5170_v3  }
 0xfce   : > { %v7830_v56 = vpop.f32.mrb[24].mxu0 }
 0xfcf   : > { %v5180_v44 = vpop.f32.mrb[25].mxu0 }
 0xfd0   : > { %5206 = vperm.xlu0 %8826, %v7830_v56   ;;  %5201 = vperm.xlu1 %8827, %v5180_v44  }
0x104a   : > { %v5197_v49 = vpop.permute.xlu1 %5196 }
0x104b   : > { %v10965_v59 = vsub.f32 %v5060_v15, %v5197_v49  ;;  %v5192_v9 = vpop.permute.xlu0 %5191 }
0x104c   : > { %v10967_v26 = vsub.f32 %v5059_v24, %v5192_v9 }
0x104d   : > { %v5214_v31 = vmul.f32 %v10580_v61, %v10965_v59 }
0x104e   : > { %v5213_v62 = vmul.f32 %v10580_v61, %v10967_v26 }
0x104f   : > { %v5207_v1 = vpop.permute.xlu0 %5206  ;;  %v5202_v2 = vpop.permute.xlu1 %5201  ;;  %v5218_v63 = vmul.f32 %v5214_v31, %v5214_v31 }
0x1050   : > { %v10973_v0 = vsub.f32 %v5062_v18, %v5207_v1  ;;  %v10975_v10 = vsub.f32 %v5061_v37, %v5202_v2  ;;  %v5217_v12 = vmul.f32 %v5213_v62, %v5213_v62 }
0x1051   : > { %v5224_v14 = vsel %vm3661_vm4, %v5218_v63, 0.0 }
0x1052   : > { %v5216_v15 = vmul.f32 %v10580_v61, %v10973_v0  ;;  %v5215_v6 = vmul.f32 %v10580_v61, %v10975_v10  ;;  %5225 = vadd.xlane.f32.xlu0 %v5224_v14  ;;  %v5221_v8 = vsel %vm3661_vm4, %v5217_v12, 0.0  ;;  %v5068_v61 = vld [vmem:[%s11364_s14 + $0x8] sm:$0xff] }
0x1053   : > { %5222 = vadd.xlane.f32.xlu1 %v5221_v8  ;;  %v5499_v8 = vld [vmem:[%s11367_s17 + $0x20] sm:$0xff] }
0x1054   : > { %v5220_v23 = vmul.f32 %v5216_v15, %v5216_v15  ;;  %v5219_v24 = vmul.f32 %v5215_v6, %v5215_v6  ;;  %7853 = vmatprep.mubr.msk.f32.mxu1 %vm5091_vm1, %v5499_v8 }
0x1056   : > { %v5230_v28 = vsel %vm3661_vm4, %v5220_v23, 0.0  ;;  %v5227_v29 = vsel %vm3661_vm4, %v5219_v24, 0.0 }
0x1057   : > { %5231 = vadd.xlane.f32.xlu1 %v5230_v28  ;;  %5228 = vadd.xlane.f32.xlu0 %v5227_v29 }
0x1068   : > { %5348 = vperm.xlu1 %8827, %v5067_v30  }
0x106c   : > { %5353 = vperm.xlu1 %8827, %v5068_v61   ;;  %v6587_v61 = vld [vmem:[%s11368_s18] sm:$0xff] }
0x106d   : > { %5372 = vperm.xlu0 %8826, %v5071_v32   ;;  %v6589_v32 = vld [vmem:[%s11368_s18 + $0x10] sm:$0xff] }
0x10df   : > { %v5226_v33 = vpop.xlane.xlu0 %5225 }
0x10e0   : > { %v5223_v34 = vpop.xlane.xlu1 %5222 }
0x10e1   : > { %v8536_v18 = vpack.c.bf16 %v5226_v33, %v5223_v34  ;;  %v6588_v33 = vld [vmem:[%s11368_s18 + $0x8] sm:$0xff]  ;;  %v6590_v34 = vld [vmem:[%s11368_s18 + $0x18] sm:$0xff] }
0x10e3   : > { %8537 = vmatprep.subr.bf16.mxu0 %v8536_v18 }
0x10e4   : > { %v5229_v35 = vpop.xlane.xlu0 %5228  ;;  %8539 = vmatpush3.bf16.msra.mxu0 %v8536_v18  ;;  %v5232_v37 = vpop.xlane.xlu1 %5231 }
0x10e5   : > { %v8540_v5 = vpack.c.bf16 %v5232_v37, %v5229_v35 }
0x10e7   : > { %8541 = vmatprep.subr.bf16.mxu0 %v8540_v5 }
0x10e8   : > { %8543 = vmatpush3.bf16.msra.mxu0 %v8540_v5  ;;  %v5349_v21 = vpop.permute.xlu1 %5348 }
0x10e9   : > { %8545 = vmatprep.subr.bf16.mxu0 %v10618_v36 }
0x10eb   : > { %7840 = vmatmul.mubr.msk.f32.vlgmr.msra.gmra.mrb[26].mxu0 %vm5091_vm1, %v5064_v39 }
0x10ec   : > { %7842 = vmatprep.mubr.msk.f32.mxu0 %vm5091_vm1, %v5065_v27  ;;  %8547 = vmatpush1.bf16.msra.mxu0 %v10629_v42  ;;  %v5354_v45 = vpop.permute.xlu1 %5353  ;;  %v5373_v25 = vpop.permute.xlu0 %5372 }
0x10ed   : > { %8549 = vmatprep.subr.bf16.mxu0 %v10631_v43 }
0x10ef   : > { %7843 = vmatmul.mubr.msk.f32.gmra.mrb[28].mxu0 %vm5091_vm1, %v5066_v16 }
0x10f0   : > { %8551 = vmatpush1.bf16.msra.mxu0 %v10647_v40  ;;  %5470 = vmatprep.mubr.f32.mxu0 %v9228_v13 }
0x10f1   : > { %8553 = vmatprep.subr.bf16.mxu0 %v10650_v47 }
0x10f4   : > { %8555 = vmatpush1.bf16.msra.mxu0 %v10665_v52 }
0x10f5   : > { %8557 = vmatprep.subr.bf16.mxu0 %v10668_v53 }
0x10f8   : > { %8559 = vmatpush1.bf16.msra.mxu0 %v10683_v55 }
0x10f9   : > { %8561 = vmatprep.subr.bf16.mxu0 %v10686_v38 }
0x10fc   : > { %8563 = vmatpush1.bf16.msra.mxu0 %v10701_v57 }
0x10fd   : > { %8565 = vmatprep.subr.bf16.mxu0 %v10704_v58  ;;  %v5072_v58 = vld [vmem:[%s11365_s15 + $0x8] sm:$0xff] }
0x1100   : > { %8567 = vmatpush1.bf16.msra.mxu0 %v10713_v60  ;;  %v5069_v60 = vld [vmem:[%s11364_s14 + $0x10] sm:$0xff] }
0x1101   : > { %8569 = vmatprep.subr.bf16.mxu0 %v10723_v11 }
0x1104   : > { %8571 = vmatpush1.bf16.msra.mxu0 %v10734_v19 }
0x1105   : > { %7236 = vmatprep.subr.msk.mxu0 %vm3920_vm5, %v10744_v20  ;;  %v5070_v20 = vld [vmem:[%s11364_s14 + $0x18] sm:$0xff] }
0x1108   : > { %7237 = vmatpush1.msk.msra.mxu0 %vm3920_vm5, %v10749_v22  ;;  %v5073_v22 = vld [vmem:[%s11365_s15 + $0x10] sm:$0xff] }
0x11be   : > { %v7841_v36 = vpop.f32.mrb[26].mxu0 }
0x11bf   : > { %v5305_v42 = vadd.f32 1e-05, %v7841_v36  ;;  %v5299_v43 = vpop.f32.mrb[27].mxu0 }
0x11c0   : > { %v5300_v40 = vadd.f32 1e-05, %v5299_v43 }
0x11c1   : > { %9186 = vrsqrt.f32 %v5305_v42 }
0x11c2   : > { %9188 = vrsqrt.f32 %v5300_v40  ;;  %v7844_v47 = vpop.f32.mrb[28].mxu0 }
0x11c3   : > { %v5315_v52 = vadd.f32 1e-05, %v7844_v47  ;;  %v5309_v53 = vpop.f32.mrb[29].mxu0 }
0x11c4   : > { %v5310_v55 = vadd.f32 1e-05, %v5309_v53 }
0x11c5   : > { %9190 = vrsqrt.f32 %v5315_v52 }
0x11c6   : > { %9192 = vrsqrt.f32 %v5310_v55 }
0x11cb   : > { %v9187_v38 = vpop.eup %9186 }
0x11cc   : > { %v9189_v57 = vpop.eup %9188  ;;  %5329 = vperm.xlu1 %8827, %v9187_v38  }
0x11cd   : > { %5324 = vperm.xlu0 %8826, %v9189_v57  }
0x11cf   : > { %v9191_v11 = vpop.eup %9190 }
0x11d0   : > { %5377 = vperm.xlu1 %8827, %v5072_v58   ;;  %v9193_v19 = vpop.eup %9192 }
0x11d1   : > { %5358 = vperm.xlu0 %8826, %v5069_v60  }
0x11d4   : > { %5339 = vperm.xlu1 %8827, %v9191_v11   ;;  %v5500_v11 = vld [vmem:[%s11367_s17 + $0x28] sm:$0xff] }
0x11d5   : > { %5334 = vperm.xlu0 %8826, %v9193_v19   ;;  %v5501_v19 = vld [vmem:[%s11367_s17 + $0x30] sm:$0xff] }
0x11d8   : > { %5363 = vperm.xlu1 %8827, %v5070_v20  }
0x11d9   : > { %5382 = vperm.xlu0 %8826, %v5073_v22  }
0x11dd   : > { %5387 = vperm.xlu0 %8826, %v5074_v41  }
0x124b   : > { %v5330_v7 = vpop.permute.xlu1 %5329 }
0x124c   : > { %v5325_v46 = vpop.permute.xlu0 %5324  ;;  %v5343_v4 = vmul.f32 %v5330_v7, %v10965_v59  ;;  %v5495_v7 = vld [vmem:[%s11367_s17] sm:$0xff] }
0x124d   : > { %v5342_v48 = vmul.f32 %v5325_v46, %v10967_v26 }
0x124e   : > { %v5367_v27 = vmul.f32 %v5354_v45, %v5343_v4 }
0x124f   : > { %v5366_v54 = vmul.f32 %v5349_v21, %v5342_v48  ;;  %v5378_v50 = vpop.permute.xlu1 %5377 }
0x1250   : > { %v5359_v51 = vpop.permute.xlu0 %5358  ;;  %v5391_v3 = vadd.f32 %v5378_v50, %v5367_v27  ;;  %v5496_v50 = vld [vmem:[%s11367_s17 + $0x8] sm:$0xff] }
0x1251   : > { %v5390_v39 = vadd.f32 %v5373_v25, %v5366_v54  ;;  %v5502_v25 = vld [vmem:[%s11367_s17 + $0x38] sm:$0xff] }
0x1253   : > { %7238 = vmatmul.mubr.msk.f32.vlgmr.msra.gmra.mrb[30].mxu0 %vm3661_vm4, %v5390_v39  ;;  %v5340_v16 = vpop.permute.xlu1 %5339  ;;  %v5497_v39 = vld [vmem:[%s11367_s17 + $0x10] sm:$0xff] }
0x1254   : > { %v5335_v17 = vpop.permute.xlu0 %5334  ;;  %5476 = vmatprep.mubr.f32.mxu0 %v9228_v13  ;;  %v5345_v9 = vmul.f32 %v5340_v16, %v10973_v0 }
0x1255   : > { %v5344_v56 = vmul.f32 %v5335_v17, %v10975_v10 }
0x1257   : > { %7239 = vmatmul.mubr.msk.f32.gmra.mrb[32].mxu0 %vm3661_vm4, %v5391_v3  ;;  %v5368_v44 = vmul.f32 %v5359_v51, %v5344_v56  ;;  %v5364_v49 = vpop.permute.xlu1 %5363  ;;  %v5498_v56 = vld [vmem:[%s11367_s17 + $0x18] sm:$0xff] }
0x1258   : > { %v5383_v59 = vpop.permute.xlu0 %5382  ;;  %5482 = vmatprep.mubr.f32.mxu0 %v9228_v13  ;;  %v5369_v31 = vmul.f32 %v5364_v49, %v5345_v9 }
0x1259   : > { %v5392_v26 = vadd.f32 %v5383_v59, %v5368_v44  ;;  %v5725_v44 = vld [vmem:[%s11367_s17 + $0x40] sm:$0xff] }
0x125b   : > { %7240 = vmatmul.mubr.msk.f32.gmra.mrb[34].mxu0 %vm3661_vm4, %v5392_v26 }
0x125c   : > { %v5388_v62 = vpop.permute.xlu0 %5387  ;;  %5488 = vmatprep.mubr.f32.mxu0 %v9228_v13 }
0x125d   : > { %v5393_v1 = vadd.f32 %v5388_v62, %v5369_v31  ;;  %v5726_v62 = vld [vmem:[%s11367_s17 + $0x48] sm:$0xff] }
0x125f   : > { %7241 = vmatmul.mubr.msk.f32.gmra.mrb[36].mxu0 %vm3661_vm4, %v5393_v1  ;;  %v5727_v1 = vld [vmem:[%s11367_s17 + $0x50] sm:$0xff] }
0x1326   : > { %v5472_v2 = vpop.f32.mrb[30].mxu0 }
0x1327   : > { %v5474_v63 = vpop.f32.mrb[31].mxu0 }
0x1328   : > { %v9153_v10 = vpack.i.bf16 %v5474_v63, %v5472_v2 }
0x132a   : > { %v5478_v12 = vpop.f32.mrb[32].mxu0 }
0x132b   : > { %v5480_v14 = vpop.f32.mrb[33].mxu0  ;;  %v9058_v15 = vpack.i.bf16 %v5478_v12, %v5472_v2 }
0x132c   : > { %v9163_v6 = vpack.i.bf16 %v5480_v14, %v5478_v12  ;;  %v5728_v14 = vld [vmem:[%s11367_s17 + $0x58] sm:$0xff] }
0x132d   : > { %9059 = vrot.lane.b32.xlu1 %v9058_v15, %s11429_s29 }
0x132e   : > { %v5484_v0 = vpop.f32.mrb[34].mxu0 }
0x132f   : > { %v5486_v23 = vpop.f32.mrb[35].mxu0 }
0x1330   : > { %v9168_v13 = vpack.i.bf16 %v5486_v23, %v5484_v0 }
0x1331   : > { %9069 = vrot.lane.b32.xlu1 %v9058_v15, %s11428_s27 }
0x1332   : > { %v5490_v24 = vpop.f32.mrb[36].mxu0 }
0x1333   : > { %v5492_v28 = vpop.f32.mrb[37].mxu0  ;;  %v9063_v29 = vpack.i.bf16 %v5490_v24, %v5484_v0 }
0x1334   : > { %v9173_v30 = vpack.i.bf16 %v5492_v28, %v5490_v24  ;;  %v5844_v28 = vld [vmem:[%s11367_s17 + $0x70] sm:$0xff] }
0x1335   : > { %9079 = vrot.lane.b32.xlu1 %v9058_v15, %s9233_s1  ;;  %9064 = vrot.lane.b32.xlu0 %v9063_v29, %s11429_s29  ;;  %s9237_s29 = smov 89  }
0x1339   : > { %9089 = vrot.lane.b32.xlu1 %v9058_v15, %s11430_s10  ;;  %9074 = vrot.lane.b32.xlu0 %v9063_v29, %s11428_s27 }
0x133d   : > { %9099 = vrot.lane.b32.xlu1 %v9058_v15, %s11431_s0  ;;  %9084 = vrot.lane.b32.xlu0 %v9063_v29, %s9233_s1 }
0x1341   : > { %9109 = vrot.lane.b32.xlu1 %v9058_v15, %s9234_s7  ;;  %9094 = vrot.lane.b32.xlu0 %v9063_v29, %s11430_s10 }
0x1345   : > { %9114 = vrot.lane.b32.xlu1 %v9153_v10, %s9235_s4  ;;  %9104 = vrot.lane.b32.xlu0 %v9063_v29, %s11431_s0 }
0x1349   : > { %9129 = vrot.lane.b32.xlu1 %v9168_v13, %s9235_s4  ;;  %9119 = vrot.lane.b32.xlu0 %v9063_v29, %s9234_s7 }
0x134d   : > { %9134 = vrot.lane.b32.xlu1 %v9153_v10, %s9236_s2  ;;  %9124 = vrot.lane.b32.xlu0 %v9163_v6, %s9235_s4 }
0x1351   : > { %9149 = vrot.lane.b32.xlu1 %v9168_v13, %s9236_s2  ;;  %9139 = vrot.lane.b32.xlu0 %v9173_v30, %s9235_s4 }
0x1355   : > { %9154 = vrot.lane.b32.xlu1 %v9153_v10, %s9237_s29  ;;  %9144 = vrot.lane.b32.xlu0 %v9163_v6, %s9236_s2 }
0x1359   : > { %9169 = vrot.lane.b32.xlu1 %v9168_v13, %s9237_s29  ;;  %9159 = vrot.lane.b32.xlu0 %v9173_v30, %s9236_s2  ;;  %v5843_v13 = vld [vmem:[%s11367_s17 + $0x68] sm:$0xff]  ;;  %s7294_s2 = sshll.u32 %s11434_s3, 5 }
0x135a   : > { %s791_s8 = scalar_lea.vmem %s11376_s26, %s7294_s2 }
0x135d   : > { %6593 = vperm.xlu1 %8827, %v6587_v61   ;;  %9164 = vrot.lane.b32.xlu0 %v9163_v6, %s9237_s29  ;;  %v5842_v6 = vld [vmem:[%s11367_s17 + $0x60] sm:$0xff] }
0x1361   : > { %6603 = vperm.xlu1 %8827, %v6589_v32   ;;  %9174 = vrot.lane.b32.xlu0 %v9173_v30, %s9237_s29 }
0x1365   : > { %6598 = vperm.xlu0 %8826, %v6588_v33   ;;  %v5845_v33 = vld [vmem:[%s11367_s17 + $0x78] sm:$0xff] }
0x1369   : > { %6608 = vperm.xlu0 %8826, %v6590_v34   ;;  %v5959_v34 = vld [vmem:[%s11367_s17 + $0x80] sm:$0xff] }
0x139f   : > { %v9060_v18 = vpop.permute.xlu1 %9059 }
0x13a0   : > { %v9062_v35 = vunpack.i.h.bf16 %v9060_v18  ;;  %v9061_v37 = vunpack.i.l.bf16 %v9060_v18 }
0x13a2   : > { %v8572_v5 = vpack.c.bf16 %v9062_v35, %v9061_v37 }
0x13a3   : > { %v9070_v36 = vpop.permute.xlu1 %9069 }
0x13a4   : > { %8573 = vmatprep.subr.bf16.mxu1 %v8572_v5  ;;  %v9072_v43 = vunpack.i.h.bf16 %v9070_v36  ;;  %v9071_v40 = vunpack.i.l.bf16 %v9070_v36 }
0x13a5   : > { %8575 = vmatpush3.bf16.msra.mxu1 %v8572_v5 }
0x13a6   : > { %v8580_v57 = vpack.c.bf16 %v9072_v43, %v9071_v40  ;;  %v5960_v43 = vld [vmem:[%s11367_s17 + $0x88] sm:$0xff] }
0x13a7   : > { %v9065_v42 = vpop.permute.xlu0 %9064  ;;  %v9080_v55 = vpop.permute.xlu1 %9079 }
0x13a8   : > { %v9067_v47 = vunpack.i.h.bf16 %v9065_v42  ;;  %v9066_v52 = vunpack.i.l.bf16 %v9065_v42  ;;  %v9082_v22 = vunpack.i.h.bf16 %v9080_v55  ;;  %v9081_v41 = vunpack.i.l.bf16 %v9080_v55 }
0x13aa   : > { %v8576_v53 = vpack.c.bf16 %v9067_v47, %v9066_v52  ;;  %v8588_v4 = vpack.c.bf16 %v9082_v22, %v9081_v41  ;;  %v5961_v47 = vld [vmem:[%s11367_s17 + $0x90] sm:$0xff] }
0x13ab   : > { %v9075_v38 = vpop.permute.xlu0 %9074  ;;  %v9090_v45 = vpop.permute.xlu1 %9089 }
0x13ac   : > { %v9077_v58 = vunpack.i.h.bf16 %v9075_v38  ;;  %v9076_v60 = vunpack.i.l.bf16 %v9075_v38  ;;  %8577 = vmatprep.subr.bf16.mxu1 %v8576_v53  ;;  %v9092_v16 = vunpack.i.h.bf16 %v9090_v45  ;;  %v9091_v17 = vunpack.i.l.bf16 %v9090_v45 }
0x13ad   : > { %8579 = vmatpush3.bf16.msra.mxu1 %v8576_v53 }
0x13ae   : > { %8581 = vmatprep.subr.bf16.mxu1 %v8580_v57  ;;  %v8584_v21 = vpack.c.bf16 %v9077_v58, %v9076_v60  ;;  %v8596_v59 = vpack.c.bf16 %v9092_v16, %v9091_v17  ;;  %v5962_v58 = vld [vmem:[%s11367_s17 + $0x98] sm:$0xff] }
0x13af   : > { %v9085_v20 = vpop.permute.xlu0 %9084  ;;  %v9100_v51 = vpop.permute.xlu1 %9099 }
0x13b0   : > { %7854 = vmatmul.mubr.msk.f32.vlgmr.msra.gmra.mrb[24].mxu1 %vm5091_vm1, %v5500_v11  ;;  %v9087_v48 = vunpack.i.h.bf16 %v9085_v20  ;;  %v9086_v54 = vunpack.i.l.bf16 %v9085_v20  ;;  %v9102_v2 = vunpack.i.h.bf16 %v9100_v51  ;;  %v9101_v63 = vunpack.i.l.bf16 %v9100_v51 }
0x13b1   : > { %8583 = vmatpush3.bf16.msra.mxu1 %v8580_v57  ;;  %7856 = vmatprep.mubr.msk.f32.mxu1 %vm5091_vm1, %v5501_v19  ;;  %v6076_v19 = vld [vmem:[%s11367_s17 + $0xa0] sm:$0xff] }
0x13b2   : > { %8585 = vmatprep.subr.bf16.mxu1 %v8584_v21  ;;  %v8592_v3 = vpack.c.bf16 %v9087_v48, %v9086_v54  ;;  %v8604_v0 = vpack.c.bf16 %v9102_v2, %v9101_v63  ;;  %v6078_v48 = vld [vmem:[%s11367_s17 + $0xb0] sm:$0xff]  ;;  %v6194_v2 = vld [vmem:[%s11367_s17 + $0xc8] sm:$0xff] }
0x13b3   : > { %v9095_v46 = vpop.permute.xlu0 %9094  ;;  %v9110_v31 = vpop.permute.xlu1 %9109 }
0x13b4   : > { %7857 = vmatmul.mubr.msk.f32.gmra.mrb[26].mxu1 %vm5091_vm1, %v5502_v25  ;;  %v9097_v9 = vunpack.i.h.bf16 %v9095_v46  ;;  %v9096_v26 = vunpack.i.l.bf16 %v9095_v46  ;;  %v9112_v29 = vunpack.i.h.bf16 %v9110_v31  ;;  %v9111_v30 = vunpack.i.l.bf16 %v9110_v31  ;;  %v6077_v46 = vld [vmem:[%s11367_s17 + $0xa8] sm:$0xff] }
0x13b5   : > { %8587 = vmatpush3.bf16.msra.mxu1 %v8584_v21  ;;  %7867 = vmatprep.mubr.msk.f32.mxu1 %vm5091_vm1, %v5495_v7 }
0x13b6   : > { %8589 = vmatprep.subr.bf16.mxu1 %v8588_v4  ;;  %v8600_v10 = vpack.c.bf16 %v9097_v9, %v9096_v26  ;;  %v8612_v18 = vpack.c.bf16 %v9112_v29, %v9111_v30  ;;  %v6327_v29 = vld [vmem:[%s11367_s17 + $0xe0] sm:$0xff] }
0x13b7   : > { %v9105_v27 = vpop.permute.xlu0 %9104  ;;  %v9115_v15 = vpop.permute.xlu1 %9114 }
0x13b8   : > { %7868 = vmatmul.mubr.msk.f32.vlgmr.msra.gmra.mrb[24].mxu1 %vm5091_vm1, %v5496_v50  ;;  %v9107_v8 = vunpack.i.h.bf16 %v9105_v27  ;;  %v9106_v23 = vunpack.i.l.bf16 %v9105_v27  ;;  %v9117_v52 = vunpack.i.h.bf16 %v9115_v15  ;;  %v9116_v53 = vunpack.i.l.bf16 %v9115_v15 }
0x13b9   : > { %8591 = vmatpush3.bf16.msra.mxu1 %v8588_v4  ;;  %7870 = vmatprep.mubr.msk.f32.mxu1 %vm5091_vm1, %v5497_v39 }
0x13ba   : > { %8593 = vmatprep.subr.bf16.mxu1 %v8592_v3  ;;  %v8608_v61 = vpack.c.bf16 %v9107_v8, %v9106_v23  ;;  %v6218_v41 = vsel %vm6217_vm8, %v9116_v53, %v9117_v52 }
0x13bb   : > { %v9120_v49 = vpop.permute.xlu0 %9119  ;;  %v9130_v32 = vpop.permute.xlu1 %9129 }
0x13bc   : > { %7871 = vmatmul.mubr.msk.f32.gmra.mrb[26].mxu1 %vm5091_vm1, %v5498_v56  ;;  %v9122_v35 = vunpack.i.h.bf16 %v9120_v49  ;;  %v9121_v37 = vunpack.i.l.bf16 %v9120_v49  ;;  %v9132_v20 = vunpack.i.h.bf16 %v9130_v32  ;;  %v9131_v22 = vunpack.i.l.bf16 %v9130_v32  ;;  %v6193_v49 = vld [vmem:[%s11367_s17 + $0xc0] sm:$0xff] }
0x13bd   : > { %8595 = vmatpush3.bf16.msra.mxu1 %v8592_v3  ;;  %7881 = vmatprep.mubr.msk.f32.mxu1 %vm5091_vm1, %v5725_v44  ;;  %v6079_v3 = vld [vmem:[%s11367_s17 + $0xb8] sm:$0xff] }
0x13be   : > { %8597 = vmatprep.subr.bf16.mxu1 %v8596_v59  ;;  %v8616_v55 = vpack.c.bf16 %v9122_v35, %v9121_v37  ;;  %v6220_v51 = vsel %vm6217_vm8, %v9131_v22, %v9132_v20  ;;  %v6329_v35 = vld [vmem:[%s11367_s17 + $0xf0] sm:$0xff] }
0x13bf   : > { %v9125_v12 = vpop.permute.xlu0 %9124  ;;  %v9135_v40 = vpop.permute.xlu1 %9134 }
0x13c0   : > { %7882 = vmatmul.mubr.msk.f32.vlgmr.msra.gmra.mrb[24].mxu1 %vm5091_vm1, %v5726_v62  ;;  %v9127_v36 = vunpack.i.h.bf16 %v9125_v12  ;;  %v9126_v42 = vunpack.i.l.bf16 %v9125_v12  ;;  %v9137_v54 = vunpack.i.h.bf16 %v9135_v40  ;;  %v9136_v50 = vunpack.i.l.bf16 %v9135_v40  ;;  %v6195_v12 = vld [vmem:[%s11367_s17 + $0xd0] sm:$0xff] }
0x13c1   : > { %8599 = vmatpush3.bf16.msra.mxu1 %v8596_v59  ;;  %7884 = vmatprep.mubr.msk.f32.mxu1 %vm5091_vm1, %v5727_v1  ;;  %v6459_v40 = vld [vmem:[%s11367_s17 + $0x110] sm:$0xff] }
0x13c2   : > { %8601 = vmatprep.subr.bf16.mxu1 %v8600_v10  ;;  %v6219_v60 = vsel %vm6217_vm8, %v9126_v42, %v9127_v36  ;;  %v6348_v26 = vsel %vm6347_vm9, %v9136_v50, %v9137_v54  ;;  %v6330_v36 = vld [vmem:[%s11367_s17 + $0xf8] sm:$0xff]  ;;  %v6457_v42 = vld [vmem:[%s11367_s17 + $0x100] sm:$0xff] }
0x13c3   : > { %v9140_v24 = vpop.permute.xlu0 %9139  ;;  %v9150_v21 = vpop.permute.xlu1 %9149  ;;  %v8620_v45 = vpack.c.bf16 %v6219_v60, %v6218_v41 }
0x13c4   : > { %7885 = vmatmul.mubr.msk.f32.gmra.mrb[26].mxu1 %vm5091_vm1, %v5728_v14  ;;  %v9142_v38 = vunpack.i.h.bf16 %v9140_v24  ;;  %v9141_v57 = vunpack.i.l.bf16 %v9140_v24  ;;  %v9152_v59 = vunpack.i.h.bf16 %v9150_v21  ;;  %v9151_v9 = vunpack.i.l.bf16 %v9150_v21  ;;  %v6196_v24 = vld [vmem:[%s11367_s17 + $0xd8] sm:$0xff] }
0x13c5   : > { %8603 = vmatpush3.bf16.msra.mxu1 %v8600_v10  ;;  %7895 = vmatprep.mubr.msk.f32.mxu1 %vm5091_vm1, %v5842_v6 }
0x13c6   : > { %8605 = vmatprep.subr.bf16.mxu1 %v8604_v0  ;;  %v6221_v4 = vsel %vm6217_vm8, %v9141_v57, %v9142_v38  ;;  %v6350_v6 = vsel %vm6347_vm9, %v9151_v9, %v9152_v59 }
0x13c7   : > { %v9145_v5 = vpop.permute.xlu0 %9144  ;;  %v8624_v27 = vpack.c.bf16 %v6221_v4, %v6220_v51  ;;  %v9155_v44 = vpop.permute.xlu1 %9154 }
0x13c8   : > { %7896 = vmatmul.mubr.msk.f32.vlgmr.msra.gmra.mrb[24].mxu1 %vm5091_vm1, %v5843_v13  ;;  %v9147_v25 = vunpack.i.h.bf16 %v9145_v5  ;;  %v9146_v7 = vunpack.i.l.bf16 %v9145_v5  ;;  %v9157_v14 = vunpack.i.h.bf16 %v9155_v44  ;;  %v9156_v15 = vunpack.i.l.bf16 %v9155_v44 }
0x13c9   : > { %8607 = vmatpush3.bf16.msra.mxu1 %v8604_v0  ;;  %7898 = vmatprep.mubr.msk.f32.mxu1 %vm5091_vm1, %v5844_v28 }
0x13ca   : > { %8609 = vmatprep.subr.bf16.mxu1 %v8608_v61  ;;  %v6349_v56 = vsel %vm6347_vm9, %v9146_v7, %v9147_v25  ;;  %v6478_v32 = vsel %vm6477_vm10, %v9156_v15, %v9157_v14 }
0x13cb   : > { %v9160_v11 = vpop.permute.xlu0 %9159  ;;  %v8628_v31 = vpack.c.bf16 %v6349_v56, %v6348_v26  ;;  %v9170_v0 = vpop.permute.xlu1 %9169  ;;  %v6620_v26 = vld [vmem:[%s11371_s21 + $0x8] sm:$0xff] }
0x13cc   : > { %7899 = vmatmul.mubr.msk.f32.gmra.mrb[26].mxu1 %vm5091_vm1, %v5845_v33  ;;  %v9162_v16 = vunpack.i.h.bf16 %v9160_v11  ;;  %v9161_v17 = vunpack.i.l.bf16 %v9160_v11  ;;  %v9172_v30 = vunpack.i.h.bf16 %v9170_v0 }
0x13cd   : > { %8611 = vmatpush3.bf16.msra.mxu1 %v8608_v61  ;;  %7909 = vmatprep.mubr.msk.f32.mxu1 %vm5091_vm1, %v5959_v34  ;;  %v9171_v61 = vunpack.i.l.bf16 %v9170_v0  ;;  %v6328_v34 = vld [vmem:[%s11367_s17 + $0xe8] sm:$0xff] }
0x13ce   : > { %8613 = vmatprep.subr.bf16.mxu1 %v8612_v18  ;;  %v6351_v63 = vsel %vm6347_vm9, %v9161_v17, %v9162_v16  ;;  %v6619_v17 = vld [vmem:[%s11371_s21] sm:$0xff] }
0x13cf   : > { %v9165_v39 = vpop.permute.xlu0 %9164  ;;  %v8632_v8 = vpack.c.bf16 %v6351_v63, %v6350_v6  ;;  %v6480_v37 = vsel %vm6477_vm10, %v9171_v61, %v9172_v30  ;;  %7979 = vmatprep.mubr.msk.f32.mxu0 %vm5091_vm1, %v6619_v17 }
0x13d0   : > { %7910 = vmatmul.mubr.msk.f32.vlgmr.msra.gmra.mrb[24].mxu1 %vm5091_vm1, %v5960_v43  ;;  %v9167_v62 = vunpack.i.h.bf16 %v9165_v39  ;;  %v9166_v1 = vunpack.i.l.bf16 %v9165_v39  ;;  %v6458_v43 = vld [vmem:[%s11367_s17 + $0x108] sm:$0xff] }
0x13d1   : > { %8615 = vmatpush3.bf16.msra.mxu1 %v8612_v18  ;;  %7912 = vmatprep.mubr.msk.f32.mxu1 %vm5091_vm1, %v5961_v47  ;;  %v6460_v47 = vld [vmem:[%s11367_s17 + $0x118] sm:$0xff] }
0x13d2   : > { %8617 = vmatprep.subr.bf16.mxu1 %v8616_v55  ;;  %v6479_v28 = vsel %vm6477_vm10, %v9166_v1, %v9167_v62  ;;  %v6622_v62 = vld [vmem:[%s11371_s21 + $0x18] sm:$0xff] }
0x13d3   : > { %v9175_v10 = vpop.permute.xlu0 %9174  ;;  %v8636_v33 = vpack.c.bf16 %v6479_v28, %v6478_v32 }
0x13d4   : > { %7913 = vmatmul.mubr.msk.f32.gmra.mrb[26].mxu1 %vm5091_vm1, %v5962_v58  ;;  %v9177_v23 = vunpack.i.h.bf16 %v9175_v10  ;;  %v9176_v13 = vunpack.i.l.bf16 %v9175_v10  ;;  %v11221_v58 = vld [vmem:[%s11373_s23] ss:$0 sm:$0xff] }
0x13d5   : > { %8619 = vmatpush3.bf16.msra.mxu1 %v8616_v55  ;;  %7923 = vmatprep.mubr.msk.f32.mxu1 %vm5091_vm1, %v6076_v19 }
0x13d6   : > { %8621 = vmatprep.subr.bf16.mxu1 %v8620_v45  ;;  %v6481_v18 = vsel %vm6477_vm10, %v9176_v13, %v9177_v23 }
0x13d7   : > { %v8640_v5 = vpack.c.bf16 %v6481_v18, %v6480_v37 }
0x13d8   : > { %7924 = vmatmul.mubr.msk.f32.vlgmr.msra.gmra.mrb[24].mxu1 %vm5091_vm1, %v6077_v46 }
0x13d9   : > { %8623 = vmatpush3.bf16.msra.mxu1 %v8620_v45  ;;  %7926 = vmatprep.mubr.msk.f32.mxu1 %vm5091_vm1, %v6078_v48 }
0x13da   : > { %8625 = vmatprep.subr.bf16.mxu1 %v8624_v27 }
0x13dc   : > { %7927 = vmatmul.mubr.msk.f32.gmra.mrb[26].mxu1 %vm5091_vm1, %v6079_v3  ;;  %v6594_v53 = vpop.permute.xlu1 %6593 }
0x13dd   : > { %8627 = vmatpush3.bf16.msra.mxu1 %v8624_v27  ;;  %7937 = vmatprep.mubr.msk.f32.mxu1 %vm5091_vm1, %v6193_v49 }
0x13de   : > { %8629 = vmatprep.subr.bf16.mxu1 %v8628_v31 }
0x13e0   : > { %7938 = vmatmul.mubr.msk.f32.vlgmr.msra.gmra.mrb[24].mxu1 %vm5091_vm1, %v6194_v2  ;;  %v6604_v41 = vpop.permute.xlu1 %6603 }
0x13e1   : > { %8631 = vmatpush3.bf16.msra.mxu1 %v8628_v31  ;;  %7940 = vmatprep.mubr.msk.f32.mxu1 %vm5091_vm1, %v6195_v12  ;;  %v6621_v31 = vld [vmem:[%s11371_s21 + $0x10] sm:$0xff] }
0x13e2   : > { %8633 = vmatprep.subr.bf16.mxu1 %v8632_v8 }
0x13e4   : > { %7941 = vmatmul.mubr.msk.f32.gmra.mrb[26].mxu1 %vm5091_vm1, %v6196_v24  ;;  %v6599_v52 = vpop.permute.xlu0 %6598 }
0x13e5   : > { %8635 = vmatpush3.bf16.msra.mxu1 %v8632_v8  ;;  %7951 = vmatprep.mubr.msk.f32.mxu1 %vm5091_vm1, %v6327_v29 }
0x13e6   : > { %8637 = vmatprep.subr.bf16.mxu1 %v8636_v33 }
0x13e8   : > { %7952 = vmatmul.mubr.msk.f32.vlgmr.msra.gmra.mrb[24].mxu1 %vm5091_vm1, %v6328_v34  ;;  %v6609_v19 = vpop.permute.xlu0 %6608 }
0x13e9   : > { %8639 = vmatpush3.bf16.msra.mxu1 %v8636_v33  ;;  %7954 = vmatprep.mubr.msk.f32.mxu1 %vm5091_vm1, %v6329_v35 }
0x13ea   : > { %8641 = vmatprep.subr.bf16.mxu1 %v8640_v5 }
0x13ec   : > { %7955 = vmatmul.mubr.msk.f32.gmra.mrb[26].mxu1 %vm5091_vm1, %v6330_v36  ;;  %v6623_v36 = vld [vmem:[%s11369_s19] sm:$0xff] }
0x13ed   : > { %8643 = vmatpush3.bf16.msra.mxu1 %v8640_v5  ;;  %7965 = vmatprep.mubr.msk.f32.mxu1 %vm5091_vm1, %v6457_v42  ;;  %v6624_v42 = vld [vmem:[%s11369_s19 + $0x8] sm:$0xff] }
0x13f0   : > { %7966 = vmatmul.mubr.msk.f32.vlgmr.msra.gmra.mrb[24].mxu1 %vm5091_vm1, %v6458_v43  ;;  %v6627_v43 = vld [vmem:[%s11370_s20] sm:$0xff] }
0x13f1   : > { %7968 = vmatprep.mubr.msk.f32.mxu1 %vm5091_vm1, %v6459_v40 }
0x13f4   : > { %7969 = vmatmul.mubr.msk.f32.gmra.mrb[26].mxu1 %vm5091_vm1, %v6460_v47 }
0x14c3   : > { %v7967_v55 = vpop.f32.mrb[24].mxu1 }
0x14c4   : > { %v6612_v38 = vadd.f32 %v7967_v55, %v6599_v52  ;;  %v6564_v57 = vpop.f32.mrb[25].mxu1 }
0x14c5   : > { %v6611_v60 = vadd.f32 %v6594_v53, %v6564_v57  ;;  %v6957_v57 = vld [vmem:[%s11375_s25] sm:$0xff] }
0x14c6   : > { %v6616_v11 = vmax.f32 %v6612_v38, 0.0 }
0x14c7   : > { %v6615_v20 = vmax.f32 %v6611_v60, 0.0  ;;  %v7970_v22 = vpop.f32.mrb[26].mxu1  ;;  %v6959_v60 = vld [vmem:[%s11375_s25 + $0x10] sm:$0xff] }
0x14c8   : > { %v6639_v21 = vmul.f32 %v11221_v58, %v6616_v11  ;;  %v6614_v45 = vadd.f32 %v7970_v22, %v6609_v19  ;;  %v6574_v25 = vpop.f32.mrb[27].mxu1  ;;  %v6960_v19 = vld [vmem:[%s11375_s25 + $0x18] sm:$0xff]  ;;  %v6961_v22 = vld [vmem:[%s11375_s25 + $0x20] sm:$0xff] }
0x14c9   : > { %v6638_v7 = vmul.f32 %v11221_v58, %v6615_v20  ;;  %v6613_v46 = vadd.f32 %v6604_v41, %v6574_v25  ;;  %v6962_v41 = vld [vmem:[%s11375_s25 + $0x28] sm:$0xff]  ;;  %v6964_v25 = vld [vmem:[%s11375_s25 + $0x38] sm:$0xff] }
0x14ca   : > { %v6618_v4 = vmax.f32 %v6614_v45, 0.0  ;;  %v6646_v48 = vsel %vm6642_vm11, %v6639_v21, 0.0  ;;  %v8668_v21 = vpack.c.bf16 %v6962_v41, %v6961_v22  ;;  %v6963_v45 = vld [vmem:[%s11375_s25 + $0x30] sm:$0xff] }
0x14cb   : > { %v6617_v54 = vmax.f32 %v6613_v46, 0.0  ;;  %6647 = vadd.xlane.f32.xlu0 %v6646_v48  ;;  %v6643_v50 = vsel %vm6642_vm11, %v6638_v7, 0.0  ;;  %v8672_v7 = vpack.c.bf16 %v6964_v25, %v6963_v45 }
0x14cc   : > { %v6641_v51 = vmul.f32 %v11221_v58, %v6618_v4  ;;  %6644 = vadd.xlane.f32.xlu1 %v6643_v50 }
0x14cd   : > { %v6640_v39 = vmul.f32 %v11221_v58, %v6617_v54 }
0x14ce   : > { %v6652_v27 = vsel %vm6642_vm11, %v6641_v51, 0.0 }
0x14cf   : > { %v6649_v16 = vsel %vm6642_vm11, %v6640_v39, 0.0 }
0x14d0   : > { %6653 = vadd.xlane.f32.xlu1 %v6652_v27  ;;  %6650 = vadd.xlane.f32.xlu0 %v6649_v16 }
0x1558   : > { %v6648_v3 = vpop.xlane.xlu0 %6647 }
0x1559   : > { %v6645_v56 = vpop.xlane.xlu1 %6644 }
0x155a   : > { %v8644_v44 = vpack.c.bf16 %v6648_v3, %v6645_v56  ;;  %v6966_v3 = vld [vmem:[%s11375_s25 + $0x48] sm:$0xff] }
0x155c   : > { %8645 = vmatprep.subr.bf16.mxu0 %v8644_v44 }
0x155d   : > { %8647 = vmatpush3.bf16.msra.mxu0 %v8644_v44  ;;  %v6654_v49 = vpop.xlane.xlu1 %6653  ;;  %v6651_v59 = vpop.xlane.xlu0 %6650 }
0x155e   : > { %v8648_v9 = vpack.c.bf16 %v6654_v49, %v6651_v59  ;;  %v6625_v49 = vld [vmem:[%s11369_s19 + $0x10] sm:$0xff]  ;;  %v6628_v59 = vld [vmem:[%s11370_s20 + $0x8] sm:$0xff] }
0x1560   : > { %8649 = vmatprep.subr.bf16.mxu0 %v8648_v9 }
0x1561   : > { %8651 = vmatpush3.bf16.msra.mxu0 %v8648_v9  ;;  %v6967_v9 = vld [vmem:[%s11375_s25 + $0x50] sm:$0xff] }
0x1564   : > { %7980 = vmatmul.mubr.msk.f32.vlgmr.msra.gmra.mrb[38].mxu0 %vm5091_vm1, %v6620_v26 }
0x1565   : > { %7982 = vmatprep.mubr.msk.f32.mxu0 %vm5091_vm1, %v6621_v31 }
0x1568   : > { %7983 = vmatmul.mubr.msk.f32.gmra.mrb[40].mxu0 %vm5091_vm1, %v6622_v62 }
0x1569   : > { %7993 = vmatprep.mubr.msk.f32.mxu0 %vm5091_vm1, %v6619_v17  ;;  %v6965_v17 = vld [vmem:[%s11375_s25 + $0x40] sm:$0xff] }
0x156a   : > { %v8676_v44 = vpack.c.bf16 %v6966_v3, %v6965_v17 }
0x1637   : > { %v7981_v1 = vpop.f32.mrb[38].mxu0 }
0x1638   : > { %6759 = vperm.xlu1 %8827, %v7981_v1   ;;  %v6733_v2 = vpop.f32.mrb[39].mxu0  ;;  %v6626_v1 = vld [vmem:[%s11369_s19 + $0x18] sm:$0xff] }
0x1639   : > { %6754 = vperm.xlu0 %8826, %v6733_v2   ;;  %v6630_v2 = vld [vmem:[%s11370_s20 + $0x18] sm:$0xff] }
0x163b   : > { %v7984_v63 = vpop.f32.mrb[40].mxu0 }
0x163c   : > { %v6743_v10 = vpop.f32.mrb[41].mxu0 }
0x163d   : > { %6769 = vperm.xlu0 %8826, %v7984_v63   ;;  %6764 = vperm.xlu1 %8827, %v6743_v10   ;;  %v6629_v10 = vld [vmem:[%s11370_s20 + $0x10] sm:$0xff] }
0x16b7   : > { %v6760_v12 = vpop.permute.xlu1 %6759 }
0x16b8   : > { %v11248_v14 = vsub.f32 %v6616_v11, %v6760_v12  ;;  %v6755_v15 = vpop.permute.xlu0 %6754 }
0x16b9   : > { %v11250_v6 = vsub.f32 %v6615_v20, %v6755_v15  ;;  %v8664_v20 = vpack.c.bf16 %v6960_v19, %v6959_v60 }
0x16ba   : > { %v6777_v0 = vmul.f32 %v11221_v58, %v11248_v14 }
0x16bb   : > { %v6776_v8 = vmul.f32 %v11221_v58, %v11250_v6 }
0x16bc   : > { %v6781_v23 = vmul.f32 %v6777_v0, %v6777_v0  ;;  %v6770_v13 = vpop.permute.xlu0 %6769  ;;  %v6765_v24 = vpop.permute.xlu1 %6764 }
0x16bd   : > { %v6780_v28 = vmul.f32 %v6776_v8, %v6776_v8  ;;  %v11256_v29 = vsub.f32 %v6618_v4, %v6770_v13  ;;  %v11258_v30 = vsub.f32 %v6617_v54, %v6765_v24 }
0x16be   : > { %v6787_v61 = vsel %vm6642_vm11, %v6781_v23, 0.0 }
0x16bf   : > { %v6779_v32 = vmul.f32 %v11221_v58, %v11256_v29  ;;  %v6778_v33 = vmul.f32 %v11221_v58, %v11258_v30  ;;  %6788 = vadd.xlane.f32.xlu0 %v6787_v61  ;;  %v6784_v34 = vsel %vm6642_vm11, %v6780_v28, 0.0  ;;  %v6958_v58 = vld [vmem:[%s11375_s25 + $0x8] sm:$0xff] }
0x16c0   : > { %6785 = vadd.xlane.f32.xlu1 %v6784_v34  ;;  %v8660_v11 = vpack.c.bf16 %v6958_v58, %v6957_v57 }
0x16c1   : > { %v6783_v18 = vmul.f32 %v6779_v32, %v6779_v32  ;;  %v6782_v35 = vmul.f32 %v6778_v33, %v6778_v33 }
0x16c3   : > { %v6793_v37 = vsel %vm6642_vm11, %v6783_v18, 0.0  ;;  %v6790_v5 = vsel %vm6642_vm11, %v6782_v35, 0.0 }
0x16c4   : > { %6794 = vadd.xlane.f32.xlu1 %v6793_v37  ;;  %6791 = vadd.xlane.f32.xlu0 %v6790_v5 }
0x16d5   : > { %6911 = vperm.xlu1 %8827, %v6623_v36  }
0x16da   : > { %6916 = vperm.xlu0 %8826, %v6624_v42  }
0x16de   : > { %6935 = vperm.xlu0 %8826, %v6627_v43  }
0x174c   : > { %v6789_v40 = vpop.xlane.xlu0 %6788 }
0x174d   : > { %v6786_v47 = vpop.xlane.xlu1 %6785 }
0x174e   : > { %v8652_v52 = vpack.c.bf16 %v6789_v40, %v6786_v47 }
0x1750   : > { %8653 = vmatprep.subr.bf16.mxu0 %v8652_v52 }
0x1751   : > { %v6792_v53 = vpop.xlane.xlu0 %6791  ;;  %8655 = vmatpush3.bf16.msra.mxu0 %v8652_v52  ;;  %v6795_v55 = vpop.xlane.xlu1 %6794 }
0x1752   : > { %v8656_v38 = vpack.c.bf16 %v6795_v55, %v6792_v53 }
0x1754   : > { %8657 = vmatprep.subr.bf16.mxu0 %v8656_v38 }
0x1755   : > { %8659 = vmatpush3.bf16.msra.mxu0 %v8656_v38  ;;  %v6912_v15 = vpop.permute.xlu1 %6911 }
0x1756   : > { %8661 = vmatprep.subr.bf16.mxu0 %v8660_v11 }
0x1758   : > { %7994 = vmatmul.mubr.msk.f32.vlgmr.msra.gmra.mrb[42].mxu0 %vm5091_vm1, %v6620_v26  ;;  %v6968_v26 = vld [vmem:[%s11375_s25 + $0x58] sm:$0xf] }
0x1759   : > { %7996 = vmatprep.mubr.msk.f32.mxu0 %vm5091_vm1, %v6621_v31  ;;  %8663 = vmatpush3.bf16.msra.mxu0 %v8660_v11  ;;  %v8680_v31 = vpack.c.bf16 %v6968_v26, %v6967_v9  ;;  %v6917_v12 = vpop.permute.xlu0 %6916 }
0x175a   : > { %8665 = vmatprep.subr.bf16.mxu0 %v8664_v20 }
0x175c   : > { %7997 = vmatmul.mubr.msk.f32.gmra.mrb[44].mxu0 %vm5091_vm1, %v6622_v62 }
0x175d   : > { %8667 = vmatpush3.bf16.msra.mxu0 %v8664_v20  ;;  %v6936_v0 = vpop.permute.xlu0 %6935 }
0x175e   : > { %8669 = vmatprep.subr.bf16.mxu0 %v8668_v21 }
0x1761   : > { %8671 = vmatpush3.bf16.msra.mxu0 %v8668_v21 }
0x1762   : > { %8673 = vmatprep.subr.bf16.mxu0 %v8672_v7 }
0x1765   : > { %8675 = vmatpush3.bf16.msra.mxu0 %v8672_v7 }
0x1766   : > { %8677 = vmatprep.subr.bf16.mxu0 %v8676_v44 }
0x1769   : > { %8679 = vmatpush3.bf16.msra.mxu0 %v8676_v44 }
0x176a   : > { %8682 = vmatprep.subr.msk.bf16.mxu0 %vm8681_vm14, %v8680_v31 }
0x176d   : > { %8685 = vmatpush3.bf16.msk.msra.mxu0 %vm8681_vm14, %v8680_v31 }
0x182b   : > { %v7995_v46 = vpop.f32.mrb[42].mxu0 }
0x182c   : > { %v6868_v4 = vadd.f32 1e-05, %v7995_v46  ;;  %v6862_v48 = vpop.f32.mrb[43].mxu0 }
0x182d   : > { %v6863_v54 = vadd.f32 1e-05, %v6862_v48 }
0x182e   : > { %9194 = vrsqrt.f32 %v6868_v4 }
0x182f   : > { %9196 = vrsqrt.f32 %v6863_v54  ;;  %v7998_v50 = vpop.f32.mrb[44].mxu0 }
0x1830   : > { %v6878_v51 = vadd.f32 1e-05, %v7998_v50  ;;  %v6872_v39 = vpop.f32.mrb[45].mxu0 }
0x1831   : > { %v6873_v27 = vadd.f32 1e-05, %v6872_v39 }
0x1832   : > { %9198 = vrsqrt.f32 %v6878_v51 }
0x1833   : > { %9200 = vrsqrt.f32 %v6873_v27 }
0x1838   : > { %v9195_v16 = vpop.eup %9194 }
0x1839   : > { %v9197_v56 = vpop.eup %9196  ;;  %6892 = vperm.xlu1 %8827, %v9195_v16  }
0x183a   : > { %6887 = vperm.xlu0 %8826, %v9197_v56  }
0x183c   : > { %v9199_v62 = vpop.eup %9198 }
0x183d   : > { %6921 = vperm.xlu1 %8827, %v6625_v49   ;;  %v9201_v63 = vpop.eup %9200 }
0x183e   : > { %6940 = vperm.xlu0 %8826, %v6628_v59  }
0x1841   : > { %6902 = vperm.xlu1 %8827, %v9199_v62  }
0x1842   : > { %6926 = vperm.xlu0 %8826, %v6626_v1  }
0x1845   : > { %6897 = vperm.xlu1 %8827, %v9201_v63  }
0x1846   : > { %6950 = vperm.xlu0 %8826, %v6630_v2  }
0x1849   : > { %6945 = vperm.xlu1 %8827, %v6629_v10  }
0x18b8   : > { %v6893_v8 = vpop.permute.xlu1 %6892 }
0x18b9   : > { %v6906_v23 = vmul.f32 %v6893_v8, %v11248_v14  ;;  %v6888_v13 = vpop.permute.xlu0 %6887 }
0x18ba   : > { %v6905_v24 = vmul.f32 %v6888_v13, %v11250_v6 }
0x18bb   : > { %v6930_v28 = vmul.f32 %v6917_v12, %v6906_v23 }
0x18bc   : > { %v6929_v61 = vmul.f32 %v6912_v15, %v6905_v24  ;;  %v6922_v32 = vpop.permute.xlu1 %6921 }
0x18bd   : > { %v6941_v33 = vpop.permute.xlu0 %6940 }
0x18be   : > { %v6953_v34 = vadd.f32 %v6936_v0, %v6929_v61  ;;  %v6954_v18 = vadd.f32 %v6941_v33, %v6930_v28 }
0x18c0   : > { %8023 = vmatprep.mubr.msk.f32.mxu0 %vm6642_vm11, %v6953_v34  ;;  %v6903_v35 = vpop.permute.xlu1 %6902 }
0x18c1   : > { %v6927_v37 = vpop.permute.xlu0 %6926  ;;  %8024 = vmatmul.mubr.msk.f32.vlgmr.msra.gmra.mrb[46].mxu0 %vm6642_vm11, %v6954_v18  ;;  %v6908_v5 = vmul.f32 %v6903_v35, %v11256_v29 }
0x18c3   : > { %v6932_v42 = vmul.f32 %v6927_v37, %v6908_v5 }
0x18c4   : > { %v6898_v36 = vpop.permute.xlu1 %6897 }
0x18c5   : > { %v6907_v14 = vmul.f32 %v6898_v36, %v11258_v30  ;;  %v6951_v6 = vpop.permute.xlu0 %6950 }
0x18c6   : > { %v6956_v52 = vadd.f32 %v6951_v6, %v6932_v42 }
0x18c7   : > { %v6931_v43 = vmul.f32 %v6922_v32, %v6907_v14 }
0x18c8   : > { %v6946_v40 = vpop.permute.xlu1 %6945 }
0x18c9   : > { %v6955_v47 = vadd.f32 %v6946_v40, %v6931_v43 }
0x18cb   : > { %8026 = vmatprep.mubr.msk.f32.mxu0 %vm6642_vm11, %v6955_v47 }
0x18cc   : > { %8027 = vmatmul.mubr.msk.f32.gmra.mrb[48].mxu0 %vm6642_vm11, %v6956_v52 }
0x1994   : > { %v8025_v53 = vpop.f32.mrb[46].mxu0 }
0x1995   : > { %7071 = vst.msk [vmem:[%s791_s8 + $0x8] sm:$0xff] %vm904_vm0, %v8025_v53  ;;  %v7051_v29 = vpop.f32.mrb[47].mxu0 }
0x1996   : > { %7070 = vst.msk [vmem:[%s791_s8] sm:$0xff] %vm904_vm0, %v7051_v29 }
0x199f   : > { %v8028_v30 = vpop.f32.mrb[48].mxu0 }
0x19a0   : > { %7073 = vst.msk [vmem:[%s791_s8 + $0x18] sm:$0xff] %vm904_vm0, %v8028_v30  ;;  %v7061_v55 = vpop.f32.mrb[49].mxu0 }
0x19a1   : > { %7072 = vst.msk [vmem:[%s791_s8 + $0x10] sm:$0xff] %vm904_vm0, %v7061_v55 }
0x19a2 PF: > { %s11432_s10 = sld [smem:[#allocation2_spill]] }
0x19a8   : > { %s36_s27 = sadd.s32 1, %s11432_s10  }
0x19a9   : > { %p33_p4 = scmp.ge.s32.totalorder %s36_s27, 6  }
0x19ab   :  { %35 = sbr.rel (!%p33_p4) target bundleno = 12 (0xc), region = 154 }

</bundles_post_ra>
